<compile_context>
chip_gen: v5e
topology: v5e:2x2
jax: 0.10.0
libtpu: 0.0.40
codegen_flags: <defaults>
</compile_context>

<pallas_src>
import functools

import jax
import jax.numpy as jnp
from jax.experimental import pallas as pl
from jax.experimental.pallas import tpu as pltpu


# ----------------------------- shared helpers --------------------------------

def _ln(x, g, b, eps=1e-12):
    # f32 layernorm (VPU); rsqrt goes to the EUP slot.
    mu = jnp.mean(x, axis=-1, keepdims=True)
    var = jnp.mean(jnp.square(x - mu), axis=-1, keepdims=True)
    return (x - mu) * jax.lax.rsqrt(var + eps) * g + b


# ----------------------------- fused per-layer kernel -------------------------

def _bert_layer_kernel(x_ref, acc_ref, wqkv_ref, vec_ref, wo_ref, w1_ref, w2_ref,
                       xo_ref, acco_ref, *, n_heads, acc_scale):
    """One full encoder layer for one batch element, fully fused."""
    bf16 = jnp.bfloat16
    f32 = jnp.float32

    x = x_ref[0]                                    # (S, H) f32
    S, H = x.shape
    dH = H // n_heads
    I = w1_ref.shape[1]

    # Packed small vectors: one (8, VD) f32 operand, static slices inside.
    vec = vec_ref[...]
    bqkv = vec[0, :3 * H]
    bo = vec[1, :H]
    g1 = vec[2, :H]
    be1 = vec[3, :H]
    b1 = vec[4, :I]
    b2 = vec[5, :H]
    g2 = vec[6, :H]
    be2 = vec[7, :H]

    # --- fused Q|K|V projection: bf16 MXU operands, f32 accumulation ---------
    # 1/sqrt(dH) is already folded into the Q third of wqkv/bqkv at init time.
    qkv = jnp.dot(x.astype(bf16), wqkv_ref[...],
                  preferred_element_type=f32) + bqkv              # (S, 3H)

    # --- multi-head attention -------------------------------------------------
    # Heads are unrolled statically; per-head contexts are written into lane
    # slices of a single (S, H) bf16 buffer so the output projection is ONE
    # K=H matmul (fills the MXU contraction depth) instead of n_heads K=dH.
    ctx_parts = []
    for h in range(n_heads):
        lo = h * dH
        qh = qkv[:, lo:lo + dH].astype(bf16)
        kh = qkv[:, H + lo:H + lo + dH].astype(bf16)
        vh = qkv[:, 2 * H + lo:2 * H + lo + dH].astype(bf16)
        # scores without materializing K^T: contract the head dim of both.
        s = jax.lax.dot_general(qh, kh, (((1,), (1,)), ((), ())),
                                preferred_element_type=f32)       # (S, S)
        s = s - jnp.max(s, axis=-1, keepdims=True)
        p = jnp.exp(s)
        # reciprocal on the EUP slot instead of a VALU divide.
        p = p * pl.reciprocal(jnp.sum(p, axis=-1, keepdims=True), approx=True)
        ctx_parts.append(
            jnp.dot(p.astype(bf16), vh, preferred_element_type=f32).astype(bf16))
    ctx = jnp.concatenate(ctx_parts, axis=-1)                     # (S, H) bf16
    attn = jnp.dot(ctx, wo_ref[...], preferred_element_type=f32) + bo

    # --- residual + LayerNorm1 (fused epilogue) ------------------------------
    h1 = _ln(attn + x, g1, be1)

    # --- FFN: gelu(h1 @ W1 + b1) @ W2 + b2, residual + LayerNorm2 ------------
    ff = jnp.dot(h1.astype(bf16), w1_ref[...],
                 preferred_element_type=f32) + b1
    ff = jax.nn.gelu(ff)                            # f32 elementwise (v5e-safe)
    ff = jnp.dot(ff.astype(bf16), w2_ref[...],
                 preferred_element_type=f32) + b2
    out = _ln(ff + h1, g2, be2)

    xo_ref[0] = out
    # Running sum of hidden states, updated IN PLACE (aliased). On the last
    # layer acc_scale = 1/(n_layers+1), so the layer-mean needs no extra kernel.
    acc_new = acc_ref[0] + out
    if acc_scale != 1.0:                            # trace-time constant branch
        acc_new = acc_new * acc_scale
    acco_ref[0] = acc_new


def bert_layer_pallas(x, acc, p, n_heads, acc_scale, single_buffer_weights):
    """x, acc: [B, S, H] -> (layer_out, updated acc), one fused pallas_call."""
    B, S, H = x.shape
    I = p["w1"].shape[1]
    VD = p["vecs"].shape[1]

    row3 = lambda b: (b, 0, 0)
    rep2 = lambda b: (0, 0)

    def wspec(shape):
        # Constant-index weight blocks: fetched once, single-buffered to halve
        # their VMEM footprint (matters at BERT-base on v7x's 64 MiB VMEM).
        if single_buffer_weights:
            return pl.BlockSpec(shape, rep2, pipeline_mode=pl.Buffered(1))
        return pl.BlockSpec(shape, rep2)

    kernel = functools.partial(_bert_layer_kernel,
                               n_heads=n_heads, acc_scale=acc_scale)

    return pl.pallas_call(
        kernel,
        out_shape=(jax.ShapeDtypeStruct((B, S, H), jnp.float32),
                   jax.ShapeDtypeStruct((B, S, H), jnp.float32)),
        grid=(B,),
        in_specs=[
            pl.BlockSpec((1, S, H), row3),       # x (lane-dense: H % 128 == 0)
            pl.BlockSpec((1, S, H), row3),       # running hidden-state sum
            wspec((H, 3 * H)),                   # fused Wq|Wk|Wv (bf16)
            wspec((8, VD)),                      # packed biases + LN vectors
            wspec((H, H)),                       # Wo (bf16)
            wspec((H, I)),                       # W1 (bf16)
            wspec((I, H)),                       # W2 (bf16)
        ],
        out_specs=(pl.BlockSpec((1, S, H), row3),
                   pl.BlockSpec((1, S, H), row3)),
        # acc is updated in place: no extra HBM buffer / copy per layer.
        input_output_aliases={1: 1},
        compiler_params=pltpu.CompilerParams(
            dimension_semantics=("parallel",),
            # Sized with headroom for v7x's 64 MiB physical VMEM; v5e/v6e
            # (128 MiB) could go higher for bigger tiles at real shapes.
            vmem_limit_bytes=48 * 1024 * 1024),
    )(x, acc, p["wqkv"], p["vecs"], p["wo"], p["w1"], p["w2"])


# ------------------------- BERT-style encoder (glue) --------------------------

def init_params(key, vocab, max_seq, H, n_layers, n_heads, I):
    def nrm(k, shape):
        return 0.02 * jax.random.normal(k, shape, dtype=jnp.float32)

    scale = 1.0 / float((H // n_heads) ** 0.5)
    VD = max(3 * H, I)

    def pad_row(v):
        return jnp.pad(v, (0, VD - v.shape[0]))

    keys = jax.random.split(key, 2 + n_layers)
    params = {
        "word_emb": nrm(keys[0], (vocab, H)),
        "pos_emb": nrm(keys[1], (max_seq, H)),
        "emb_ln_g": jnp.ones((H,), jnp.float32),
        "emb_ln_b": jnp.zeros((H,), jnp.float32),
        "layers": [],
    }
    for li in range(n_layers):
        lk = jax.random.split(keys[2 + li], 6)
        wq, wk, wv = nrm(lk[0], (H, H)), nrm(lk[1], (H, H)), nrm(lk[2], (H, H))
        # 1/sqrt(dH) folded into the Q third of the fused weight (and its bias).
        wqkv = jnp.concatenate([wq * scale, wk, wv], axis=1)
        bq = bk = bv = jnp.zeros((H,), jnp.float32)
        bqkv = jnp.concatenate([bq * scale, bk, bv])
        # All small vectors packed into one (8, VD) operand (single DMA).
        vecs = jnp.stack([
            pad_row(bqkv),                          # 0: fused qkv bias (3H)
            pad_row(jnp.zeros((H,), jnp.float32)),  # 1: bo
            pad_row(jnp.ones((H,), jnp.float32)),   # 2: ln1 gamma
            pad_row(jnp.zeros((H,), jnp.float32)),  # 3: ln1 beta
            pad_row(jnp.zeros((I,), jnp.float32)),  # 4: b1
            pad_row(jnp.zeros((H,), jnp.float32)),  # 5: b2
            pad_row(jnp.ones((H,), jnp.float32)),   # 6: ln2 gamma
            pad_row(jnp.zeros((H,), jnp.float32)),  # 7: ln2 beta
        ])
        params["layers"].append({
            "wqkv": wqkv.astype(jnp.bfloat16),      # [H, 3H]
            "wo": nrm(lk[3], (H, H)).astype(jnp.bfloat16),
            "w1": nrm(lk[4], (H, I)).astype(jnp.bfloat16),
            "w2": nrm(lk[5], (I, H)).astype(jnp.bfloat16),
            "vecs": vecs,                           # [8, VD] f32
        })
    return params


def compressor_forward(params, sent, *, max_len, n_heads,
                       single_buffer_weights=True):
    """Equivalent of Compressor.forward: encoder, mean over hidden_states, flatten."""
    B, S = sent.shape
    # The torch reshape((-1, 768*max_len)) assumes S == max_len; enforce it.
    assert S == max_len, (S, max_len)

    # Token-id gather (data-dependent row lookup) + embedding LayerNorm stay in
    # plain JAX; XLA fuses the LN into the gather, so a standalone Pallas pass
    # would only add an extra HBM round-trip.
    emb = params["word_emb"][sent] + params["pos_emb"][:S][None, :, :]
    x = _ln(emb, params["emb_ln_g"], params["emb_ln_b"])

    n_states = len(params["layers"]) + 1      # embeddings + each layer output
    acc = x                                   # hidden_states[0] = embedding output
    for li, lp in enumerate(params["layers"]):
        last = li == len(params["layers"]) - 1
        acc_scale = (1.0 / float(n_states)) if last else 1.0
        x, acc = bert_layer_pallas(x, acc, lp, n_heads, acc_scale,
                                   single_buffer_weights)

    # Mean over hidden states already applied via acc_scale on the last layer;
    # the (B,S,H)->(B,S*H) flatten is a free metadata reshape on a contiguous
    # array (seq-major then hidden = torch order).
    return acc.reshape(B, -1)                 # [B, H * max_len]


if __name__ == "__main__":
    key = jax.random.PRNGKey(0)
    # H=128 keeps every activation/output block lane-dense (last dim % 128 == 0).
    B, max_len = 2, 16
    H, n_heads, n_layers, I, vocab = 128, 4, 2, 512, 50

    pkey, ikey = jax.random.split(key)
    params = init_params(pkey, vocab, max_len, H, n_layers, n_heads, I)
    sent = jax.random.randint(ikey, (B, max_len), 0, vocab, dtype=jnp.int32)

    def run(single_buffer_weights):
        fwd = jax.jit(functools.partial(
            compressor_forward, max_len=max_len, n_heads=n_heads,
            single_buffer_weights=single_buffer_weights))
        return jax.block_until_ready(fwd(params, sent))

    try:
        out = run(True)
    except Exception:
        # pl.Buffered(1) single-buffering of constant-index weight blocks is a
        # newer pipeline knob; fall back to default double-buffering if this
        # JAX / libtpu build rejects it (functionally identical).
        out = run(False)

    assert out.shape == (B, H * max_len), out.shape
    assert out.dtype == jnp.float32
    print("KERNEL_OK")
</pallas_src>

<mosaic_0001>
module attributes {stable_mosaic.version = 11 : i64} {
  func.func @_bert_layer_kernel(%arg0: i32, %arg1: memref<1x16x128xf32, #tpu.memory_space<vmem>>, %arg2: memref<1x16x128xf32, #tpu.memory_space<vmem>>, %arg3: memref<128x384xbf16, #tpu.memory_space<vmem>>, %arg4: memref<8x512xf32, #tpu.memory_space<vmem>>, %arg5: memref<128x128xbf16, #tpu.memory_space<vmem>>, %arg6: memref<128x512xbf16, #tpu.memory_space<vmem>>, %arg7: memref<512x128xbf16, #tpu.memory_space<vmem>>, %arg8: memref<1x16x128xf32, #tpu.memory_space<vmem>>, %arg9: memref<1x16x128xf32, #tpu.memory_space<vmem>>) attributes {dimension_semantics = [#tpu.dimension_semantics<parallel>], iteration_bounds = array<i64: 2>, scalar_prefetch = 0 : i64, scratch_operands = 0 : i64, tpu.core_type = #tpu.core_type<tc>, window_params = [{transform_indices = @transform_0, window_bounds = array<i64: 1, 16, 128>}, {transform_indices = @transform_1, window_bounds = array<i64: 1, 16, 128>}, {pipeline_mode = #tpu.pipeline_mode<synchronous>, transform_indices = @transform_2, window_bounds = array<i64: 128, 384>}, {pipeline_mode = #tpu.pipeline_mode<synchronous>, transform_indices = @transform_3, window_bounds = array<i64: 8, 512>}, {pipeline_mode = #tpu.pipeline_mode<synchronous>, transform_indices = @transform_4, window_bounds = array<i64: 128, 128>}, {pipeline_mode = #tpu.pipeline_mode<synchronous>, transform_indices = @transform_5, window_bounds = array<i64: 128, 512>}, {pipeline_mode = #tpu.pipeline_mode<synchronous>, transform_indices = @transform_6, window_bounds = array<i64: 512, 128>}, {transform_indices = @transform_7, window_bounds = array<i64: 1, 16, 128>}, {transform_indices = @transform_8, window_bounds = array<i64: 1, 16, 128>}]} {
    %c0 = arith.constant 0 : index
    %c0_0 = arith.constant 0 : index
    %c0_1 = arith.constant 0 : index
    %0 = vector.load %arg1[%c0, %c0_0, %c0_1] : memref<1x16x128xf32, #tpu.memory_space<vmem>>, vector<1x16x128xf32>
    %1 = vector.shape_cast %0 : vector<1x16x128xf32> to vector<16x128xf32>
    %c0_2 = arith.constant 0 : index
    %c0_3 = arith.constant 0 : index
    %2 = vector.load %arg4[%c0_2, %c0_3] : memref<8x512xf32, #tpu.memory_space<vmem>>, vector<8x512xf32>
    %3 = vector.extract_strided_slice %2 {offsets = [0, 0], sizes = [1, 384], strides = [1, 1]} : vector<8x512xf32> to vector<1x384xf32>
    %4 = vector.shape_cast %3 : vector<1x384xf32> to vector<384xf32>
    %5 = vector.extract_strided_slice %2 {offsets = [1, 0], sizes = [1, 128], strides = [1, 1]} : vector<8x512xf32> to vector<1x128xf32>
    %6 = vector.shape_cast %5 : vector<1x128xf32> to vector<128xf32>
    %7 = vector.extract_strided_slice %2 {offsets = [2, 0], sizes = [1, 128], strides = [1, 1]} : vector<8x512xf32> to vector<1x128xf32>
    %8 = vector.shape_cast %7 : vector<1x128xf32> to vector<128xf32>
    %9 = vector.extract_strided_slice %2 {offsets = [3, 0], sizes = [1, 128], strides = [1, 1]} : vector<8x512xf32> to vector<1x128xf32>
    %10 = vector.shape_cast %9 : vector<1x128xf32> to vector<128xf32>
    %11 = vector.extract_strided_slice %2 {offsets = [4, 0], sizes = [1, 512], strides = [1, 1]} : vector<8x512xf32> to vector<1x512xf32>
    %12 = vector.shape_cast %11 : vector<1x512xf32> to vector<512xf32>
    %13 = vector.extract_strided_slice %2 {offsets = [5, 0], sizes = [1, 128], strides = [1, 1]} : vector<8x512xf32> to vector<1x128xf32>
    %14 = vector.shape_cast %13 : vector<1x128xf32> to vector<128xf32>
    %15 = vector.extract_strided_slice %2 {offsets = [6, 0], sizes = [1, 128], strides = [1, 1]} : vector<8x512xf32> to vector<1x128xf32>
    %16 = vector.shape_cast %15 : vector<1x128xf32> to vector<128xf32>
    %17 = vector.extract_strided_slice %2 {offsets = [7, 0], sizes = [1, 128], strides = [1, 1]} : vector<8x512xf32> to vector<1x128xf32>
    %18 = vector.shape_cast %17 : vector<1x128xf32> to vector<128xf32>
    %19 = arith.truncf %1 : vector<16x128xf32> to vector<16x128xbf16>
    %c0_4 = arith.constant 0 : index
    %c0_5 = arith.constant 0 : index
    %20 = vector.load %arg3[%c0_4, %c0_5] : memref<128x384xbf16, #tpu.memory_space<vmem>>, vector<128x384xbf16>
    %cst = arith.constant dense<0.000000e+00> : vector<16x384xf32>
    %21 = tpu.matmul %19, %20, %cst {dimension_numbers = #tpu.dot_dimension_numbers<[1], [0], [0], [1], [0, 0, 1, 1], [], []>} : vector<16x128xbf16>, vector<128x384xbf16>, vector<16x384xf32> -> vector<16x384xf32>
    %22 = vector.shape_cast %4 : vector<384xf32> to vector<1x384xf32>
    %23 = vector.broadcast %22 : vector<1x384xf32> to vector<16x384xf32>
    %24 = arith.addf %21, %23 : vector<16x384xf32>
    %25 = vector.extract_strided_slice %24 {offsets = [0, 0], sizes = [16, 32], strides = [1, 1]} : vector<16x384xf32> to vector<16x32xf32>
    %26 = arith.truncf %25 : vector<16x32xf32> to vector<16x32xbf16>
    %27 = vector.extract_strided_slice %24 {offsets = [0, 128], sizes = [16, 32], strides = [1, 1]} : vector<16x384xf32> to vector<16x32xf32>
    %28 = arith.truncf %27 : vector<16x32xf32> to vector<16x32xbf16>
    %29 = vector.extract_strided_slice %24 {offsets = [0, 256], sizes = [16, 32], strides = [1, 1]} : vector<16x384xf32> to vector<16x32xf32>
    %30 = arith.truncf %29 : vector<16x32xf32> to vector<16x32xbf16>
    %cst_6 = arith.constant dense<0.000000e+00> : vector<16x16xf32>
    %31 = tpu.matmul %26, %28, %cst_6 {dimension_numbers = #tpu.dot_dimension_numbers<[1], [1], [0], [0], [0, 0, 1, 0], [], []>} : vector<16x32xbf16>, vector<16x32xbf16>, vector<16x16xf32> -> vector<16x16xf32>
    %cst_7 = arith.constant dense<0xFF800000> : vector<16xf32>
    %32 = vector.multi_reduction <maximumf>, %31, %cst_7 [1] : vector<16x16xf32> to vector<16xf32>
    %33 = vector.shape_cast %32 : vector<16xf32> to vector<16x1xf32>
    %34 = vector.broadcast %33 : vector<16x1xf32> to vector<16x16xf32>
    %35 = arith.subf %31, %34 : vector<16x16xf32>
    %36 = math.exp %35 : vector<16x16xf32>
    %cst_8 = arith.constant dense<0.000000e+00> : vector<16xf32>
    %37 = vector.multi_reduction <add>, %36, %cst_8 [1] : vector<16x16xf32> to vector<16xf32>
    %38 = vector.shape_cast %37 : vector<16xf32> to vector<16x1xf32>
    %39 = tpu.reciprocal %38 {approx = true} : vector<16x1xf32> -> vector<16x1xf32>
    %40 = vector.broadcast %39 : vector<16x1xf32> to vector<16x16xf32>
    %41 = arith.mulf %36, %40 : vector<16x16xf32>
    %42 = arith.truncf %41 : vector<16x16xf32> to vector<16x16xbf16>
    %cst_9 = arith.constant dense<0.000000e+00> : vector<16x32xf32>
    %43 = tpu.matmul %42, %30, %cst_9 {dimension_numbers = #tpu.dot_dimension_numbers<[1], [0], [0], [1], [0, 0, 1, 1], [], []>} : vector<16x16xbf16>, vector<16x32xbf16>, vector<16x32xf32> -> vector<16x32xf32>
    %44 = arith.truncf %43 : vector<16x32xf32> to vector<16x32xbf16>
    %45 = vector.extract_strided_slice %24 {offsets = [0, 32], sizes = [16, 32], strides = [1, 1]} : vector<16x384xf32> to vector<16x32xf32>
    %46 = arith.truncf %45 : vector<16x32xf32> to vector<16x32xbf16>
    %47 = vector.extract_strided_slice %24 {offsets = [0, 160], sizes = [16, 32], strides = [1, 1]} : vector<16x384xf32> to vector<16x32xf32>
    %48 = arith.truncf %47 : vector<16x32xf32> to vector<16x32xbf16>
    %49 = vector.extract_strided_slice %24 {offsets = [0, 288], sizes = [16, 32], strides = [1, 1]} : vector<16x384xf32> to vector<16x32xf32>
    %50 = arith.truncf %49 : vector<16x32xf32> to vector<16x32xbf16>
    %cst_10 = arith.constant dense<0.000000e+00> : vector<16x16xf32>
    %51 = tpu.matmul %46, %48, %cst_10 {dimension_numbers = #tpu.dot_dimension_numbers<[1], [1], [0], [0], [0, 0, 1, 0], [], []>} : vector<16x32xbf16>, vector<16x32xbf16>, vector<16x16xf32> -> vector<16x16xf32>
    %cst_11 = arith.constant dense<0xFF800000> : vector<16xf32>
    %52 = vector.multi_reduction <maximumf>, %51, %cst_11 [1] : vector<16x16xf32> to vector<16xf32>
    %53 = vector.shape_cast %52 : vector<16xf32> to vector<16x1xf32>
    %54 = vector.broadcast %53 : vector<16x1xf32> to vector<16x16xf32>
    %55 = arith.subf %51, %54 : vector<16x16xf32>
    %56 = math.exp %55 : vector<16x16xf32>
    %cst_12 = arith.constant dense<0.000000e+00> : vector<16xf32>
    %57 = vector.multi_reduction <add>, %56, %cst_12 [1] : vector<16x16xf32> to vector<16xf32>
    %58 = vector.shape_cast %57 : vector<16xf32> to vector<16x1xf32>
    %59 = tpu.reciprocal %58 {approx = true} : vector<16x1xf32> -> vector<16x1xf32>
    %60 = vector.broadcast %59 : vector<16x1xf32> to vector<16x16xf32>
    %61 = arith.mulf %56, %60 : vector<16x16xf32>
    %62 = arith.truncf %61 : vector<16x16xf32> to vector<16x16xbf16>
    %cst_13 = arith.constant dense<0.000000e+00> : vector<16x32xf32>
    %63 = tpu.matmul %62, %50, %cst_13 {dimension_numbers = #tpu.dot_dimension_numbers<[1], [0], [0], [1], [0, 0, 1, 1], [], []>} : vector<16x16xbf16>, vector<16x32xbf16>, vector<16x32xf32> -> vector<16x32xf32>
    %64 = arith.truncf %63 : vector<16x32xf32> to vector<16x32xbf16>
    %65 = vector.extract_strided_slice %24 {offsets = [0, 64], sizes = [16, 32], strides = [1, 1]} : vector<16x384xf32> to vector<16x32xf32>
    %66 = arith.truncf %65 : vector<16x32xf32> to vector<16x32xbf16>
    %67 = vector.extract_strided_slice %24 {offsets = [0, 192], sizes = [16, 32], strides = [1, 1]} : vector<16x384xf32> to vector<16x32xf32>
    %68 = arith.truncf %67 : vector<16x32xf32> to vector<16x32xbf16>
    %69 = vector.extract_strided_slice %24 {offsets = [0, 320], sizes = [16, 32], strides = [1, 1]} : vector<16x384xf32> to vector<16x32xf32>
    %70 = arith.truncf %69 : vector<16x32xf32> to vector<16x32xbf16>
    %cst_14 = arith.constant dense<0.000000e+00> : vector<16x16xf32>
    %71 = tpu.matmul %66, %68, %cst_14 {dimension_numbers = #tpu.dot_dimension_numbers<[1], [1], [0], [0], [0, 0, 1, 0], [], []>} : vector<16x32xbf16>, vector<16x32xbf16>, vector<16x16xf32> -> vector<16x16xf32>
    %cst_15 = arith.constant dense<0xFF800000> : vector<16xf32>
    %72 = vector.multi_reduction <maximumf>, %71, %cst_15 [1] : vector<16x16xf32> to vector<16xf32>
    %73 = vector.shape_cast %72 : vector<16xf32> to vector<16x1xf32>
    %74 = vector.broadcast %73 : vector<16x1xf32> to vector<16x16xf32>
    %75 = arith.subf %71, %74 : vector<16x16xf32>
    %76 = math.exp %75 : vector<16x16xf32>
    %cst_16 = arith.constant dense<0.000000e+00> : vector<16xf32>
    %77 = vector.multi_reduction <add>, %76, %cst_16 [1] : vector<16x16xf32> to vector<16xf32>
    %78 = vector.shape_cast %77 : vector<16xf32> to vector<16x1xf32>
    %79 = tpu.reciprocal %78 {approx = true} : vector<16x1xf32> -> vector<16x1xf32>
    %80 = vector.broadcast %79 : vector<16x1xf32> to vector<16x16xf32>
    %81 = arith.mulf %76, %80 : vector<16x16xf32>
    %82 = arith.truncf %81 : vector<16x16xf32> to vector<16x16xbf16>
    %cst_17 = arith.constant dense<0.000000e+00> : vector<16x32xf32>
    %83 = tpu.matmul %82, %70, %cst_17 {dimension_numbers = #tpu.dot_dimension_numbers<[1], [0], [0], [1], [0, 0, 1, 1], [], []>} : vector<16x16xbf16>, vector<16x32xbf16>, vector<16x32xf32> -> vector<16x32xf32>
    %84 = arith.truncf %83 : vector<16x32xf32> to vector<16x32xbf16>
    %85 = vector.extract_strided_slice %24 {offsets = [0, 96], sizes = [16, 32], strides = [1, 1]} : vector<16x384xf32> to vector<16x32xf32>
    %86 = arith.truncf %85 : vector<16x32xf32> to vector<16x32xbf16>
    %87 = vector.extract_strided_slice %24 {offsets = [0, 224], sizes = [16, 32], strides = [1, 1]} : vector<16x384xf32> to vector<16x32xf32>
    %88 = arith.truncf %87 : vector<16x32xf32> to vector<16x32xbf16>
    %89 = vector.extract_strided_slice %24 {offsets = [0, 352], sizes = [16, 32], strides = [1, 1]} : vector<16x384xf32> to vector<16x32xf32>
    %90 = arith.truncf %89 : vector<16x32xf32> to vector<16x32xbf16>
    %cst_18 = arith.constant dense<0.000000e+00> : vector<16x16xf32>
    %91 = tpu.matmul %86, %88, %cst_18 {dimension_numbers = #tpu.dot_dimension_numbers<[1], [1], [0], [0], [0, 0, 1, 0], [], []>} : vector<16x32xbf16>, vector<16x32xbf16>, vector<16x16xf32> -> vector<16x16xf32>
    %cst_19 = arith.constant dense<0xFF800000> : vector<16xf32>
    %92 = vector.multi_reduction <maximumf>, %91, %cst_19 [1] : vector<16x16xf32> to vector<16xf32>
    %93 = vector.shape_cast %92 : vector<16xf32> to vector<16x1xf32>
    %94 = vector.broadcast %93 : vector<16x1xf32> to vector<16x16xf32>
    %95 = arith.subf %91, %94 : vector<16x16xf32>
    %96 = math.exp %95 : vector<16x16xf32>
    %cst_20 = arith.constant dense<0.000000e+00> : vector<16xf32>
    %97 = vector.multi_reduction <add>, %96, %cst_20 [1] : vector<16x16xf32> to vector<16xf32>
    %98 = vector.shape_cast %97 : vector<16xf32> to vector<16x1xf32>
    %99 = tpu.reciprocal %98 {approx = true} : vector<16x1xf32> -> vector<16x1xf32>
    %100 = vector.broadcast %99 : vector<16x1xf32> to vector<16x16xf32>
    %101 = arith.mulf %96, %100 : vector<16x16xf32>
    %102 = arith.truncf %101 : vector<16x16xf32> to vector<16x16xbf16>
    %cst_21 = arith.constant dense<0.000000e+00> : vector<16x32xf32>
    %103 = tpu.matmul %102, %90, %cst_21 {dimension_numbers = #tpu.dot_dimension_numbers<[1], [0], [0], [1], [0, 0, 1, 1], [], []>} : vector<16x16xbf16>, vector<16x32xbf16>, vector<16x32xf32> -> vector<16x32xf32>
    %104 = arith.truncf %103 : vector<16x32xf32> to vector<16x32xbf16>
    %105 = tpu.concatenate %44, %64, %84, %104 in 1 : vector<16x32xbf16>, vector<16x32xbf16>, vector<16x32xbf16>, vector<16x32xbf16> -> vector<16x128xbf16>
    %c0_22 = arith.constant 0 : index
    %c0_23 = arith.constant 0 : index
    %106 = vector.load %arg5[%c0_22, %c0_23] : memref<128x128xbf16, #tpu.memory_space<vmem>>, vector<128x128xbf16>
    %cst_24 = arith.constant dense<0.000000e+00> : vector<16x128xf32>
    %107 = tpu.matmul %105, %106, %cst_24 {dimension_numbers = #tpu.dot_dimension_numbers<[1], [0], [0], [1], [0, 0, 1, 1], [], []>} : vector<16x128xbf16>, vector<128x128xbf16>, vector<16x128xf32> -> vector<16x128xf32>
    %108 = vector.shape_cast %6 : vector<128xf32> to vector<1x128xf32>
    %109 = vector.broadcast %108 : vector<1x128xf32> to vector<16x128xf32>
    %110 = arith.addf %107, %109 : vector<16x128xf32>
    %111 = arith.addf %110, %1 : vector<16x128xf32>
    %cst_25 = arith.constant dense<0.000000e+00> : vector<16xf32>
    %112 = vector.multi_reduction <add>, %111, %cst_25 [1] : vector<16x128xf32> to vector<16xf32>
    %113 = vector.shape_cast %112 : vector<16xf32> to vector<16x1xf32>
    %cst_26 = arith.constant 1.280000e+02 : f32
    %114 = vector.broadcast %cst_26 : f32 to vector<16x1xf32>
    %115 = arith.divf %113, %114 : vector<16x1xf32>
    %116 = vector.broadcast %115 : vector<16x1xf32> to vector<16x128xf32>
    %117 = arith.subf %111, %116 : vector<16x128xf32>
    %118 = arith.mulf %117, %117 : vector<16x128xf32>
    %cst_27 = arith.constant dense<0.000000e+00> : vector<16xf32>
    %119 = vector.multi_reduction <add>, %118, %cst_27 [1] : vector<16x128xf32> to vector<16xf32>
    %120 = vector.shape_cast %119 : vector<16xf32> to vector<16x1xf32>
    %cst_28 = arith.constant 1.280000e+02 : f32
    %121 = vector.broadcast %cst_28 : f32 to vector<16x1xf32>
    %122 = arith.divf %120, %121 : vector<16x1xf32>
    %123 = vector.broadcast %115 : vector<16x1xf32> to vector<16x128xf32>
    %124 = arith.subf %111, %123 : vector<16x128xf32>
    %cst_29 = arith.constant 9.99999996E-13 : f32
    %125 = vector.broadcast %cst_29 : f32 to vector<16x1xf32>
    %126 = arith.addf %122, %125 : vector<16x1xf32>
    %127 = math.rsqrt %126 : vector<16x1xf32>
    %128 = vector.broadcast %127 : vector<16x1xf32> to vector<16x128xf32>
    %129 = arith.mulf %124, %128 : vector<16x128xf32>
    %130 = vector.shape_cast %8 : vector<128xf32> to vector<1x128xf32>
    %131 = vector.broadcast %130 : vector<1x128xf32> to vector<16x128xf32>
    %132 = arith.mulf %129, %131 : vector<16x128xf32>
    %133 = vector.shape_cast %10 : vector<128xf32> to vector<1x128xf32>
    %134 = vector.broadcast %133 : vector<1x128xf32> to vector<16x128xf32>
    %135 = arith.addf %132, %134 : vector<16x128xf32>
    %136 = arith.truncf %135 : vector<16x128xf32> to vector<16x128xbf16>
    %c0_30 = arith.constant 0 : index
    %c0_31 = arith.constant 0 : index
    %137 = vector.load %arg6[%c0_30, %c0_31] : memref<128x512xbf16, #tpu.memory_space<vmem>>, vector<128x512xbf16>
    %cst_32 = arith.constant dense<0.000000e+00> : vector<16x512xf32>
    %138 = tpu.matmul %136, %137, %cst_32 {dimension_numbers = #tpu.dot_dimension_numbers<[1], [0], [0], [1], [0, 0, 1, 1], [], []>} : vector<16x128xbf16>, vector<128x512xbf16>, vector<16x512xf32> -> vector<16x512xf32>
    %139 = vector.shape_cast %12 : vector<512xf32> to vector<1x512xf32>
    %140 = vector.broadcast %139 : vector<1x512xf32> to vector<16x512xf32>
    %141 = arith.addf %138, %140 : vector<16x512xf32>
    %142 = arith.mulf %141, %141 : vector<16x512xf32>
    %143 = arith.mulf %141, %142 : vector<16x512xf32>
    %cst_33 = arith.constant 4.471500e-02 : f32
    %144 = vector.broadcast %cst_33 : f32 to vector<16x512xf32>
    %145 = arith.mulf %144, %143 : vector<16x512xf32>
    %146 = arith.addf %141, %145 : vector<16x512xf32>
    %cst_34 = arith.constant 0.797884583 : f32
    %147 = vector.broadcast %cst_34 : f32 to vector<16x512xf32>
    %148 = arith.mulf %147, %146 : vector<16x512xf32>
    %149 = math.tanh %148 : vector<16x512xf32>
    %cst_35 = arith.constant 1.000000e+00 : f32
    %150 = vector.broadcast %cst_35 : f32 to vector<16x512xf32>
    %151 = arith.addf %150, %149 : vector<16x512xf32>
    %cst_36 = arith.constant 5.000000e-01 : f32
    %152 = vector.broadcast %cst_36 : f32 to vector<16x512xf32>
    %153 = arith.mulf %152, %151 : vector<16x512xf32>
    %154 = arith.mulf %141, %153 : vector<16x512xf32>
    %155 = arith.truncf %154 : vector<16x512xf32> to vector<16x512xbf16>
    %c0_37 = arith.constant 0 : index
    %c0_38 = arith.constant 0 : index
    %156 = vector.load %arg7[%c0_37, %c0_38] : memref<512x128xbf16, #tpu.memory_space<vmem>>, vector<512x128xbf16>
    %cst_39 = arith.constant dense<0.000000e+00> : vector<16x128xf32>
    %157 = tpu.matmul %155, %156, %cst_39 {dimension_numbers = #tpu.dot_dimension_numbers<[1], [0], [0], [1], [0, 0, 1, 1], [], []>} : vector<16x512xbf16>, vector<512x128xbf16>, vector<16x128xf32> -> vector<16x128xf32>
    %158 = vector.shape_cast %14 : vector<128xf32> to vector<1x128xf32>
    %159 = vector.broadcast %158 : vector<1x128xf32> to vector<16x128xf32>
    %160 = arith.addf %157, %159 : vector<16x128xf32>
    %161 = arith.addf %160, %135 : vector<16x128xf32>
    %cst_40 = arith.constant dense<0.000000e+00> : vector<16xf32>
    %162 = vector.multi_reduction <add>, %161, %cst_40 [1] : vector<16x128xf32> to vector<16xf32>
    %163 = vector.shape_cast %162 : vector<16xf32> to vector<16x1xf32>
    %cst_41 = arith.constant 1.280000e+02 : f32
    %164 = vector.broadcast %cst_41 : f32 to vector<16x1xf32>
    %165 = arith.divf %163, %164 : vector<16x1xf32>
    %166 = vector.broadcast %165 : vector<16x1xf32> to vector<16x128xf32>
    %167 = arith.subf %161, %166 : vector<16x128xf32>
    %168 = arith.mulf %167, %167 : vector<16x128xf32>
    %cst_42 = arith.constant dense<0.000000e+00> : vector<16xf32>
    %169 = vector.multi_reduction <add>, %168, %cst_42 [1] : vector<16x128xf32> to vector<16xf32>
    %170 = vector.shape_cast %169 : vector<16xf32> to vector<16x1xf32>
    %cst_43 = arith.constant 1.280000e+02 : f32
    %171 = vector.broadcast %cst_43 : f32 to vector<16x1xf32>
    %172 = arith.divf %170, %171 : vector<16x1xf32>
    %173 = vector.broadcast %165 : vector<16x1xf32> to vector<16x128xf32>
    %174 = arith.subf %161, %173 : vector<16x128xf32>
    %cst_44 = arith.constant 9.99999996E-13 : f32
    %175 = vector.broadcast %cst_44 : f32 to vector<16x1xf32>
    %176 = arith.addf %172, %175 : vector<16x1xf32>
    %177 = math.rsqrt %176 : vector<16x1xf32>
    %178 = vector.broadcast %177 : vector<16x1xf32> to vector<16x128xf32>
    %179 = arith.mulf %174, %178 : vector<16x128xf32>
    %180 = vector.shape_cast %16 : vector<128xf32> to vector<1x128xf32>
    %181 = vector.broadcast %180 : vector<1x128xf32> to vector<16x128xf32>
    %182 = arith.mulf %179, %181 : vector<16x128xf32>
    %183 = vector.shape_cast %18 : vector<128xf32> to vector<1x128xf32>
    %184 = vector.broadcast %183 : vector<1x128xf32> to vector<16x128xf32>
    %185 = arith.addf %182, %184 : vector<16x128xf32>
    %c0_45 = arith.constant 0 : index
    %c0_46 = arith.constant 0 : index
    %c0_47 = arith.constant 0 : index
    %186 = vector.load %arg8[%c0_45, %c0_46, %c0_47] : memref<1x16x128xf32, #tpu.memory_space<vmem>>, vector<1x16x128xf32>
    %187 = vector.shape_cast %186 : vector<1x16x128xf32> to vector<16x128xf32>
    %188 = vector.shape_cast %185 : vector<16x128xf32> to vector<1x16x128xf32>
    tpu.vector_store %arg8[%c0_45, %c0_46, %c0_47], %188 {strides = array<i32>} : memref<1x16x128xf32, #tpu.memory_space<vmem>>, vector<1x16x128xf32>,
    %c0_48 = arith.constant 0 : index
    %c0_49 = arith.constant 0 : index
    %c0_50 = arith.constant 0 : index
    %189 = vector.load %arg2[%c0_48, %c0_49, %c0_50] : memref<1x16x128xf32, #tpu.memory_space<vmem>>, vector<1x16x128xf32>
    %190 = vector.shape_cast %189 : vector<1x16x128xf32> to vector<16x128xf32>
    %191 = arith.addf %190, %185 : vector<16x128xf32>
    %c0_51 = arith.constant 0 : index
    %c0_52 = arith.constant 0 : index
    %c0_53 = arith.constant 0 : index
    %192 = vector.load %arg9[%c0_51, %c0_52, %c0_53] : memref<1x16x128xf32, #tpu.memory_space<vmem>>, vector<1x16x128xf32>
    %193 = vector.shape_cast %192 : vector<1x16x128xf32> to vector<16x128xf32>
    %194 = vector.shape_cast %191 : vector<16x128xf32> to vector<1x16x128xf32>
    tpu.vector_store %arg9[%c0_51, %c0_52, %c0_53], %194 {strides = array<i32>} : memref<1x16x128xf32, #tpu.memory_space<vmem>>, vector<1x16x128xf32>,
    return
  }
  func.func @transform_0(%arg0: i32) -> (i32, i32, i32) {
    %c0_i32 = arith.constant 0 : i32
    %c0_i32_0 = arith.constant 0 : i32
    %c0_i32_1 = arith.constant 0 : i32
    return %arg0, %c0_i32, %c0_i32_0 : i32, i32, i32
  }
  func.func @transform_1(%arg0: i32) -> (i32, i32, i32) {
    %c0_i32 = arith.constant 0 : i32
    %c0_i32_0 = arith.constant 0 : i32
    %c0_i32_1 = arith.constant 0 : i32
    return %arg0, %c0_i32, %c0_i32_0 : i32, i32, i32
  }
  func.func @transform_2(%arg0: i32) -> (i32, i32) {
    %c0_i32 = arith.constant 0 : i32
    %c0_i32_0 = arith.constant 0 : i32
    %c0_i32_1 = arith.constant 0 : i32
    return %c0_i32, %c0_i32_0 : i32, i32
  }
  func.func @transform_3(%arg0: i32) -> (i32, i32) {
    %c0_i32 = arith.constant 0 : i32
    %c0_i32_0 = arith.constant 0 : i32
    %c0_i32_1 = arith.constant 0 : i32
    return %c0_i32, %c0_i32_0 : i32, i32
  }
  func.func @transform_4(%arg0: i32) -> (i32, i32) {
    %c0_i32 = arith.constant 0 : i32
    %c0_i32_0 = arith.constant 0 : i32
    %c0_i32_1 = arith.constant 0 : i32
    return %c0_i32, %c0_i32_0 : i32, i32
  }
  func.func @transform_5(%arg0: i32) -> (i32, i32) {
    %c0_i32 = arith.constant 0 : i32
    %c0_i32_0 = arith.constant 0 : i32
    %c0_i32_1 = arith.constant 0 : i32
    return %c0_i32, %c0_i32_0 : i32, i32
  }
  func.func @transform_6(%arg0: i32) -> (i32, i32) {
    %c0_i32 = arith.constant 0 : i32
    %c0_i32_0 = arith.constant 0 : i32
    %c0_i32_1 = arith.constant 0 : i32
    return %c0_i32, %c0_i32_0 : i32, i32
  }
  func.func @transform_7(%arg0: i32) -> (i32, i32, i32) {
    %c0_i32 = arith.constant 0 : i32
    %c0_i32_0 = arith.constant 0 : i32
    %c0_i32_1 = arith.constant 0 : i32
    return %arg0, %c0_i32, %c0_i32_0 : i32, i32, i32
  }
  func.func @transform_8(%arg0: i32) -> (i32, i32, i32) {
    %c0_i32 = arith.constant 0 : i32
    %c0_i32_0 = arith.constant 0 : i32
    %c0_i32_1 = arith.constant 0 : i32
    return %arg0, %c0_i32, %c0_i32_0 : i32, i32, i32
  }
}

module attributes {stable_mosaic.version = 11 : i64} {
  func.func @_bert_layer_kernel(%arg0: i32, %arg1: memref<1x16x128xf32, #tpu.memory_space<vmem>>, %arg2: memref<1x16x128xf32, #tpu.memory_space<vmem>>, %arg3: memref<128x384xbf16, #tpu.memory_space<vmem>>, %arg4: memref<8x512xf32, #tpu.memory_space<vmem>>, %arg5: memref<128x128xbf16, #tpu.memory_space<vmem>>, %arg6: memref<128x512xbf16, #tpu.memory_space<vmem>>, %arg7: memref<512x128xbf16, #tpu.memory_space<vmem>>, %arg8: memref<1x16x128xf32, #tpu.memory_space<vmem>>, %arg9: memref<1x16x128xf32, #tpu.memory_space<vmem>>) attributes {dimension_semantics = [#tpu.dimension_semantics<parallel>], iteration_bounds = array<i64: 2>, scalar_prefetch = 0 : i64, scratch_operands = 0 : i64, tpu.core_type = #tpu.core_type<tc>, window_params = [{transform_indices = @transform_0, window_bounds = array<i64: 1, 16, 128>}, {transform_indices = @transform_1, window_bounds = array<i64: 1, 16, 128>}, {pipeline_mode = #tpu.pipeline_mode<synchronous>, transform_indices = @transform_2, window_bounds = array<i64: 128, 384>}, {pipeline_mode = #tpu.pipeline_mode<synchronous>, transform_indices = @transform_3, window_bounds = array<i64: 8, 512>}, {pipeline_mode = #tpu.pipeline_mode<synchronous>, transform_indices = @transform_4, window_bounds = array<i64: 128, 128>}, {pipeline_mode = #tpu.pipeline_mode<synchronous>, transform_indices = @transform_5, window_bounds = array<i64: 128, 512>}, {pipeline_mode = #tpu.pipeline_mode<synchronous>, transform_indices = @transform_6, window_bounds = array<i64: 512, 128>}, {transform_indices = @transform_7, window_bounds = array<i64: 1, 16, 128>}, {transform_indices = @transform_8, window_bounds = array<i64: 1, 16, 128>}]} {
    %c0 = arith.constant 0 : index
    %c0_0 = arith.constant 0 : index
    %c0_1 = arith.constant 0 : index
    %0 = vector.load %arg1[%c0, %c0_0, %c0_1] : memref<1x16x128xf32, #tpu.memory_space<vmem>>, vector<1x16x128xf32>
    %1 = vector.shape_cast %0 : vector<1x16x128xf32> to vector<16x128xf32>
    %c0_2 = arith.constant 0 : index
    %c0_3 = arith.constant 0 : index
    %2 = vector.load %arg4[%c0_2, %c0_3] : memref<8x512xf32, #tpu.memory_space<vmem>>, vector<8x512xf32>
    %3 = vector.extract_strided_slice %2 {offsets = [0, 0], sizes = [1, 384], strides = [1, 1]} : vector<8x512xf32> to vector<1x384xf32>
    %4 = vector.shape_cast %3 : vector<1x384xf32> to vector<384xf32>
    %5 = vector.extract_strided_slice %2 {offsets = [1, 0], sizes = [1, 128], strides = [1, 1]} : vector<8x512xf32> to vector<1x128xf32>
    %6 = vector.shape_cast %5 : vector<1x128xf32> to vector<128xf32>
    %7 = vector.extract_strided_slice %2 {offsets = [2, 0], sizes = [1, 128], strides = [1, 1]} : vector<8x512xf32> to vector<1x128xf32>
    %8 = vector.shape_cast %7 : vector<1x128xf32> to vector<128xf32>
    %9 = vector.extract_strided_slice %2 {offsets = [3, 0], sizes = [1, 128], strides = [1, 1]} : vector<8x512xf32> to vector<1x128xf32>
    %10 = vector.shape_cast %9 : vector<1x128xf32> to vector<128xf32>
    %11 = vector.extract_strided_slice %2 {offsets = [4, 0], sizes = [1, 512], strides = [1, 1]} : vector<8x512xf32> to vector<1x512xf32>
    %12 = vector.shape_cast %11 : vector<1x512xf32> to vector<512xf32>
    %13 = vector.extract_strided_slice %2 {offsets = [5, 0], sizes = [1, 128], strides = [1, 1]} : vector<8x512xf32> to vector<1x128xf32>
    %14 = vector.shape_cast %13 : vector<1x128xf32> to vector<128xf32>
    %15 = vector.extract_strided_slice %2 {offsets = [6, 0], sizes = [1, 128], strides = [1, 1]} : vector<8x512xf32> to vector<1x128xf32>
    %16 = vector.shape_cast %15 : vector<1x128xf32> to vector<128xf32>
    %17 = vector.extract_strided_slice %2 {offsets = [7, 0], sizes = [1, 128], strides = [1, 1]} : vector<8x512xf32> to vector<1x128xf32>
    %18 = vector.shape_cast %17 : vector<1x128xf32> to vector<128xf32>
    %19 = arith.truncf %1 : vector<16x128xf32> to vector<16x128xbf16>
    %c0_4 = arith.constant 0 : index
    %c0_5 = arith.constant 0 : index
    %20 = vector.load %arg3[%c0_4, %c0_5] : memref<128x384xbf16, #tpu.memory_space<vmem>>, vector<128x384xbf16>
    %cst = arith.constant dense<0.000000e+00> : vector<16x384xf32>
    %21 = tpu.matmul %19, %20, %cst {dimension_numbers = #tpu.dot_dimension_numbers<[1], [0], [0], [1], [0, 0, 1, 1], [], []>} : vector<16x128xbf16>, vector<128x384xbf16>, vector<16x384xf32> -> vector<16x384xf32>
    %22 = vector.shape_cast %4 : vector<384xf32> to vector<1x384xf32>
    %23 = vector.broadcast %22 : vector<1x384xf32> to vector<16x384xf32>
    %24 = arith.addf %21, %23 : vector<16x384xf32>
    %25 = vector.extract_strided_slice %24 {offsets = [0, 0], sizes = [16, 32], strides = [1, 1]} : vector<16x384xf32> to vector<16x32xf32>
    %26 = arith.truncf %25 : vector<16x32xf32> to vector<16x32xbf16>
    %27 = vector.extract_strided_slice %24 {offsets = [0, 128], sizes = [16, 32], strides = [1, 1]} : vector<16x384xf32> to vector<16x32xf32>
    %28 = arith.truncf %27 : vector<16x32xf32> to vector<16x32xbf16>
    %29 = vector.extract_strided_slice %24 {offsets = [0, 256], sizes = [16, 32], strides = [1, 1]} : vector<16x384xf32> to vector<16x32xf32>
    %30 = arith.truncf %29 : vector<16x32xf32> to vector<16x32xbf16>
    %cst_6 = arith.constant dense<0.000000e+00> : vector<16x16xf32>
    %31 = tpu.matmul %26, %28, %cst_6 {dimension_numbers = #tpu.dot_dimension_numbers<[1], [1], [0], [0], [0, 0, 1, 0], [], []>} : vector<16x32xbf16>, vector<16x32xbf16>, vector<16x16xf32> -> vector<16x16xf32>
    %cst_7 = arith.constant dense<0xFF800000> : vector<16xf32>
    %32 = vector.multi_reduction <maximumf>, %31, %cst_7 [1] : vector<16x16xf32> to vector<16xf32>
    %33 = vector.shape_cast %32 : vector<16xf32> to vector<16x1xf32>
    %34 = vector.broadcast %33 : vector<16x1xf32> to vector<16x16xf32>
    %35 = arith.subf %31, %34 : vector<16x16xf32>
    %36 = math.exp %35 : vector<16x16xf32>
    %cst_8 = arith.constant dense<0.000000e+00> : vector<16xf32>
    %37 = vector.multi_reduction <add>, %36, %cst_8 [1] : vector<16x16xf32> to vector<16xf32>
    %38 = vector.shape_cast %37 : vector<16xf32> to vector<16x1xf32>
    %39 = tpu.reciprocal %38 {approx = true} : vector<16x1xf32> -> vector<16x1xf32>
    %40 = vector.broadcast %39 : vector<16x1xf32> to vector<16x16xf32>
    %41 = arith.mulf %36, %40 : vector<16x16xf32>
    %42 = arith.truncf %41 : vector<16x16xf32> to vector<16x16xbf16>
    %cst_9 = arith.constant dense<0.000000e+00> : vector<16x32xf32>
    %43 = tpu.matmul %42, %30, %cst_9 {dimension_numbers = #tpu.dot_dimension_numbers<[1], [0], [0], [1], [0, 0, 1, 1], [], []>} : vector<16x16xbf16>, vector<16x32xbf16>, vector<16x32xf32> -> vector<16x32xf32>
    %44 = arith.truncf %43 : vector<16x32xf32> to vector<16x32xbf16>
    %45 = vector.extract_strided_slice %24 {offsets = [0, 32], sizes = [16, 32], strides = [1, 1]} : vector<16x384xf32> to vector<16x32xf32>
    %46 = arith.truncf %45 : vector<16x32xf32> to vector<16x32xbf16>
    %47 = vector.extract_strided_slice %24 {offsets = [0, 160], sizes = [16, 32], strides = [1, 1]} : vector<16x384xf32> to vector<16x32xf32>
    %48 = arith.truncf %47 : vector<16x32xf32> to vector<16x32xbf16>
    %49 = vector.extract_strided_slice %24 {offsets = [0, 288], sizes = [16, 32], strides = [1, 1]} : vector<16x384xf32> to vector<16x32xf32>
    %50 = arith.truncf %49 : vector<16x32xf32> to vector<16x32xbf16>
    %cst_10 = arith.constant dense<0.000000e+00> : vector<16x16xf32>
    %51 = tpu.matmul %46, %48, %cst_10 {dimension_numbers = #tpu.dot_dimension_numbers<[1], [1], [0], [0], [0, 0, 1, 0], [], []>} : vector<16x32xbf16>, vector<16x32xbf16>, vector<16x16xf32> -> vector<16x16xf32>
    %cst_11 = arith.constant dense<0xFF800000> : vector<16xf32>
    %52 = vector.multi_reduction <maximumf>, %51, %cst_11 [1] : vector<16x16xf32> to vector<16xf32>
    %53 = vector.shape_cast %52 : vector<16xf32> to vector<16x1xf32>
    %54 = vector.broadcast %53 : vector<16x1xf32> to vector<16x16xf32>
    %55 = arith.subf %51, %54 : vector<16x16xf32>
    %56 = math.exp %55 : vector<16x16xf32>
    %cst_12 = arith.constant dense<0.000000e+00> : vector<16xf32>
    %57 = vector.multi_reduction <add>, %56, %cst_12 [1] : vector<16x16xf32> to vector<16xf32>
    %58 = vector.shape_cast %57 : vector<16xf32> to vector<16x1xf32>
    %59 = tpu.reciprocal %58 {approx = true} : vector<16x1xf32> -> vector<16x1xf32>
    %60 = vector.broadcast %59 : vector<16x1xf32> to vector<16x16xf32>
    %61 = arith.mulf %56, %60 : vector<16x16xf32>
    %62 = arith.truncf %61 : vector<16x16xf32> to vector<16x16xbf16>
    %cst_13 = arith.constant dense<0.000000e+00> : vector<16x32xf32>
    %63 = tpu.matmul %62, %50, %cst_13 {dimension_numbers = #tpu.dot_dimension_numbers<[1], [0], [0], [1], [0, 0, 1, 1], [], []>} : vector<16x16xbf16>, vector<16x32xbf16>, vector<16x32xf32> -> vector<16x32xf32>
    %64 = arith.truncf %63 : vector<16x32xf32> to vector<16x32xbf16>
    %65 = vector.extract_strided_slice %24 {offsets = [0, 64], sizes = [16, 32], strides = [1, 1]} : vector<16x384xf32> to vector<16x32xf32>
    %66 = arith.truncf %65 : vector<16x32xf32> to vector<16x32xbf16>
    %67 = vector.extract_strided_slice %24 {offsets = [0, 192], sizes = [16, 32], strides = [1, 1]} : vector<16x384xf32> to vector<16x32xf32>
    %68 = arith.truncf %67 : vector<16x32xf32> to vector<16x32xbf16>
    %69 = vector.extract_strided_slice %24 {offsets = [0, 320], sizes = [16, 32], strides = [1, 1]} : vector<16x384xf32> to vector<16x32xf32>
    %70 = arith.truncf %69 : vector<16x32xf32> to vector<16x32xbf16>
    %cst_14 = arith.constant dense<0.000000e+00> : vector<16x16xf32>
    %71 = tpu.matmul %66, %68, %cst_14 {dimension_numbers = #tpu.dot_dimension_numbers<[1], [1], [0], [0], [0, 0, 1, 0], [], []>} : vector<16x32xbf16>, vector<16x32xbf16>, vector<16x16xf32> -> vector<16x16xf32>
    %cst_15 = arith.constant dense<0xFF800000> : vector<16xf32>
    %72 = vector.multi_reduction <maximumf>, %71, %cst_15 [1] : vector<16x16xf32> to vector<16xf32>
    %73 = vector.shape_cast %72 : vector<16xf32> to vector<16x1xf32>
    %74 = vector.broadcast %73 : vector<16x1xf32> to vector<16x16xf32>
    %75 = arith.subf %71, %74 : vector<16x16xf32>
    %76 = math.exp %75 : vector<16x16xf32>
    %cst_16 = arith.constant dense<0.000000e+00> : vector<16xf32>
    %77 = vector.multi_reduction <add>, %76, %cst_16 [1] : vector<16x16xf32> to vector<16xf32>
    %78 = vector.shape_cast %77 : vector<16xf32> to vector<16x1xf32>
    %79 = tpu.reciprocal %78 {approx = true} : vector<16x1xf32> -> vector<16x1xf32>
    %80 = vector.broadcast %79 : vector<16x1xf32> to vector<16x16xf32>
    %81 = arith.mulf %76, %80 : vector<16x16xf32>
    %82 = arith.truncf %81 : vector<16x16xf32> to vector<16x16xbf16>
    %cst_17 = arith.constant dense<0.000000e+00> : vector<16x32xf32>
    %83 = tpu.matmul %82, %70, %cst_17 {dimension_numbers = #tpu.dot_dimension_numbers<[1], [0], [0], [1], [0, 0, 1, 1], [], []>} : vector<16x16xbf16>, vector<16x32xbf16>, vector<16x32xf32> -> vector<16x32xf32>
    %84 = arith.truncf %83 : vector<16x32xf32> to vector<16x32xbf16>
    %85 = vector.extract_strided_slice %24 {offsets = [0, 96], sizes = [16, 32], strides = [1, 1]} : vector<16x384xf32> to vector<16x32xf32>
    %86 = arith.truncf %85 : vector<16x32xf32> to vector<16x32xbf16>
    %87 = vector.extract_strided_slice %24 {offsets = [0, 224], sizes = [16, 32], strides = [1, 1]} : vector<16x384xf32> to vector<16x32xf32>
    %88 = arith.truncf %87 : vector<16x32xf32> to vector<16x32xbf16>
    %89 = vector.extract_strided_slice %24 {offsets = [0, 352], sizes = [16, 32], strides = [1, 1]} : vector<16x384xf32> to vector<16x32xf32>
    %90 = arith.truncf %89 : vector<16x32xf32> to vector<16x32xbf16>
    %cst_18 = arith.constant dense<0.000000e+00> : vector<16x16xf32>
    %91 = tpu.matmul %86, %88, %cst_18 {dimension_numbers = #tpu.dot_dimension_numbers<[1], [1], [0], [0], [0, 0, 1, 0], [], []>} : vector<16x32xbf16>, vector<16x32xbf16>, vector<16x16xf32> -> vector<16x16xf32>
    %cst_19 = arith.constant dense<0xFF800000> : vector<16xf32>
    %92 = vector.multi_reduction <maximumf>, %91, %cst_19 [1] : vector<16x16xf32> to vector<16xf32>
    %93 = vector.shape_cast %92 : vector<16xf32> to vector<16x1xf32>
    %94 = vector.broadcast %93 : vector<16x1xf32> to vector<16x16xf32>
    %95 = arith.subf %91, %94 : vector<16x16xf32>
    %96 = math.exp %95 : vector<16x16xf32>
    %cst_20 = arith.constant dense<0.000000e+00> : vector<16xf32>
    %97 = vector.multi_reduction <add>, %96, %cst_20 [1] : vector<16x16xf32> to vector<16xf32>
    %98 = vector.shape_cast %97 : vector<16xf32> to vector<16x1xf32>
    %99 = tpu.reciprocal %98 {approx = true} : vector<16x1xf32> -> vector<16x1xf32>
    %100 = vector.broadcast %99 : vector<16x1xf32> to vector<16x16xf32>
    %101 = arith.mulf %96, %100 : vector<16x16xf32>
    %102 = arith.truncf %101 : vector<16x16xf32> to vector<16x16xbf16>
    %cst_21 = arith.constant dense<0.000000e+00> : vector<16x32xf32>
    %103 = tpu.matmul %102, %90, %cst_21 {dimension_numbers = #tpu.dot_dimension_numbers<[1], [0], [0], [1], [0, 0, 1, 1], [], []>} : vector<16x16xbf16>, vector<16x32xbf16>, vector<16x32xf32> -> vector<16x32xf32>
    %104 = arith.truncf %103 : vector<16x32xf32> to vector<16x32xbf16>
    %105 = tpu.concatenate %44, %64, %84, %104 in 1 : vector<16x32xbf16>, vector<16x32xbf16>, vector<16x32xbf16>, vector<16x32xbf16> -> vector<16x128xbf16>
    %c0_22 = arith.constant 0 : index
    %c0_23 = arith.constant 0 : index
    %106 = vector.load %arg5[%c0_22, %c0_23] : memref<128x128xbf16, #tpu.memory_space<vmem>>, vector<128x128xbf16>
    %cst_24 = arith.constant dense<0.000000e+00> : vector<16x128xf32>
    %107 = tpu.matmul %105, %106, %cst_24 {dimension_numbers = #tpu.dot_dimension_numbers<[1], [0], [0], [1], [0, 0, 1, 1], [], []>} : vector<16x128xbf16>, vector<128x128xbf16>, vector<16x128xf32> -> vector<16x128xf32>
    %108 = vector.shape_cast %6 : vector<128xf32> to vector<1x128xf32>
    %109 = vector.broadcast %108 : vector<1x128xf32> to vector<16x128xf32>
    %110 = arith.addf %107, %109 : vector<16x128xf32>
    %111 = arith.addf %110, %1 : vector<16x128xf32>
    %cst_25 = arith.constant dense<0.000000e+00> : vector<16xf32>
    %112 = vector.multi_reduction <add>, %111, %cst_25 [1] : vector<16x128xf32> to vector<16xf32>
    %113 = vector.shape_cast %112 : vector<16xf32> to vector<16x1xf32>
    %cst_26 = arith.constant 1.280000e+02 : f32
    %114 = vector.broadcast %cst_26 : f32 to vector<16x1xf32>
    %115 = arith.divf %113, %114 : vector<16x1xf32>
    %116 = vector.broadcast %115 : vector<16x1xf32> to vector<16x128xf32>
    %117 = arith.subf %111, %116 : vector<16x128xf32>
    %118 = arith.mulf %117, %117 : vector<16x128xf32>
    %cst_27 = arith.constant dense<0.000000e+00> : vector<16xf32>
    %119 = vector.multi_reduction <add>, %118, %cst_27 [1] : vector<16x128xf32> to vector<16xf32>
    %120 = vector.shape_cast %119 : vector<16xf32> to vector<16x1xf32>
    %cst_28 = arith.constant 1.280000e+02 : f32
    %121 = vector.broadcast %cst_28 : f32 to vector<16x1xf32>
    %122 = arith.divf %120, %121 : vector<16x1xf32>
    %123 = vector.broadcast %115 : vector<16x1xf32> to vector<16x128xf32>
    %124 = arith.subf %111, %123 : vector<16x128xf32>
    %cst_29 = arith.constant 9.99999996E-13 : f32
    %125 = vector.broadcast %cst_29 : f32 to vector<16x1xf32>
    %126 = arith.addf %122, %125 : vector<16x1xf32>
    %127 = math.rsqrt %126 : vector<16x1xf32>
    %128 = vector.broadcast %127 : vector<16x1xf32> to vector<16x128xf32>
    %129 = arith.mulf %124, %128 : vector<16x128xf32>
    %130 = vector.shape_cast %8 : vector<128xf32> to vector<1x128xf32>
    %131 = vector.broadcast %130 : vector<1x128xf32> to vector<16x128xf32>
    %132 = arith.mulf %129, %131 : vector<16x128xf32>
    %133 = vector.shape_cast %10 : vector<128xf32> to vector<1x128xf32>
    %134 = vector.broadcast %133 : vector<1x128xf32> to vector<16x128xf32>
    %135 = arith.addf %132, %134 : vector<16x128xf32>
    %136 = arith.truncf %135 : vector<16x128xf32> to vector<16x128xbf16>
    %c0_30 = arith.constant 0 : index
    %c0_31 = arith.constant 0 : index
    %137 = vector.load %arg6[%c0_30, %c0_31] : memref<128x512xbf16, #tpu.memory_space<vmem>>, vector<128x512xbf16>
    %cst_32 = arith.constant dense<0.000000e+00> : vector<16x512xf32>
    %138 = tpu.matmul %136, %137, %cst_32 {dimension_numbers = #tpu.dot_dimension_numbers<[1], [0], [0], [1], [0, 0, 1, 1], [], []>} : vector<16x128xbf16>, vector<128x512xbf16>, vector<16x512xf32> -> vector<16x512xf32>
    %139 = vector.shape_cast %12 : vector<512xf32> to vector<1x512xf32>
    %140 = vector.broadcast %139 : vector<1x512xf32> to vector<16x512xf32>
    %141 = arith.addf %138, %140 : vector<16x512xf32>
    %142 = arith.mulf %141, %141 : vector<16x512xf32>
    %143 = arith.mulf %141, %142 : vector<16x512xf32>
    %cst_33 = arith.constant 4.471500e-02 : f32
    %144 = vector.broadcast %cst_33 : f32 to vector<16x512xf32>
    %145 = arith.mulf %144, %143 : vector<16x512xf32>
    %146 = arith.addf %141, %145 : vector<16x512xf32>
    %cst_34 = arith.constant 0.797884583 : f32
    %147 = vector.broadcast %cst_34 : f32 to vector<16x512xf32>
    %148 = arith.mulf %147, %146 : vector<16x512xf32>
    %149 = math.tanh %148 : vector<16x512xf32>
    %cst_35 = arith.constant 1.000000e+00 : f32
    %150 = vector.broadcast %cst_35 : f32 to vector<16x512xf32>
    %151 = arith.addf %150, %149 : vector<16x512xf32>
    %cst_36 = arith.constant 5.000000e-01 : f32
    %152 = vector.broadcast %cst_36 : f32 to vector<16x512xf32>
    %153 = arith.mulf %152, %151 : vector<16x512xf32>
    %154 = arith.mulf %141, %153 : vector<16x512xf32>
    %155 = arith.truncf %154 : vector<16x512xf32> to vector<16x512xbf16>
    %c0_37 = arith.constant 0 : index
    %c0_38 = arith.constant 0 : index
    %156 = vector.load %arg7[%c0_37, %c0_38] : memref<512x128xbf16, #tpu.memory_space<vmem>>, vector<512x128xbf16>
    %cst_39 = arith.constant dense<0.000000e+00> : vector<16x128xf32>
    %157 = tpu.matmul %155, %156, %cst_39 {dimension_numbers = #tpu.dot_dimension_numbers<[1], [0], [0], [1], [0, 0, 1, 1], [], []>} : vector<16x512xbf16>, vector<512x128xbf16>, vector<16x128xf32> -> vector<16x128xf32>
    %158 = vector.shape_cast %14 : vector<128xf32> to vector<1x128xf32>
    %159 = vector.broadcast %158 : vector<1x128xf32> to vector<16x128xf32>
    %160 = arith.addf %157, %159 : vector<16x128xf32>
    %161 = arith.addf %160, %135 : vector<16x128xf32>
    %cst_40 = arith.constant dense<0.000000e+00> : vector<16xf32>
    %162 = vector.multi_reduction <add>, %161, %cst_40 [1] : vector<16x128xf32> to vector<16xf32>
    %163 = vector.shape_cast %162 : vector<16xf32> to vector<16x1xf32>
    %cst_41 = arith.constant 1.280000e+02 : f32
    %164 = vector.broadcast %cst_41 : f32 to vector<16x1xf32>
    %165 = arith.divf %163, %164 : vector<16x1xf32>
    %166 = vector.broadcast %165 : vector<16x1xf32> to vector<16x128xf32>
    %167 = arith.subf %161, %166 : vector<16x128xf32>
    %168 = arith.mulf %167, %167 : vector<16x128xf32>
    %cst_42 = arith.constant dense<0.000000e+00> : vector<16xf32>
    %169 = vector.multi_reduction <add>, %168, %cst_42 [1] : vector<16x128xf32> to vector<16xf32>
    %170 = vector.shape_cast %169 : vector<16xf32> to vector<16x1xf32>
    %cst_43 = arith.constant 1.280000e+02 : f32
    %171 = vector.broadcast %cst_43 : f32 to vector<16x1xf32>
    %172 = arith.divf %170, %171 : vector<16x1xf32>
    %173 = vector.broadcast %165 : vector<16x1xf32> to vector<16x128xf32>
    %174 = arith.subf %161, %173 : vector<16x128xf32>
    %cst_44 = arith.constant 9.99999996E-13 : f32
    %175 = vector.broadcast %cst_44 : f32 to vector<16x1xf32>
    %176 = arith.addf %172, %175 : vector<16x1xf32>
    %177 = math.rsqrt %176 : vector<16x1xf32>
    %178 = vector.broadcast %177 : vector<16x1xf32> to vector<16x128xf32>
    %179 = arith.mulf %174, %178 : vector<16x128xf32>
    %180 = vector.shape_cast %16 : vector<128xf32> to vector<1x128xf32>
    %181 = vector.broadcast %180 : vector<1x128xf32> to vector<16x128xf32>
    %182 = arith.mulf %179, %181 : vector<16x128xf32>
    %183 = vector.shape_cast %18 : vector<128xf32> to vector<1x128xf32>
    %184 = vector.broadcast %183 : vector<1x128xf32> to vector<16x128xf32>
    %185 = arith.addf %182, %184 : vector<16x128xf32>
    %c0_45 = arith.constant 0 : index
    %c0_46 = arith.constant 0 : index
    %c0_47 = arith.constant 0 : index
    %186 = vector.load %arg8[%c0_45, %c0_46, %c0_47] : memref<1x16x128xf32, #tpu.memory_space<vmem>>, vector<1x16x128xf32>
    %187 = vector.shape_cast %186 : vector<1x16x128xf32> to vector<16x128xf32>
    %188 = vector.shape_cast %185 : vector<16x128xf32> to vector<1x16x128xf32>
    tpu.vector_store %arg8[%c0_45, %c0_46, %c0_47], %188 {strides = array<i32>} : memref<1x16x128xf32, #tpu.memory_space<vmem>>, vector<1x16x128xf32>,
    %c0_48 = arith.constant 0 : index
    %c0_49 = arith.constant 0 : index
    %c0_50 = arith.constant 0 : index
    %189 = vector.load %arg2[%c0_48, %c0_49, %c0_50] : memref<1x16x128xf32, #tpu.memory_space<vmem>>, vector<1x16x128xf32>
    %190 = vector.shape_cast %189 : vector<1x16x128xf32> to vector<16x128xf32>
    %191 = arith.addf %190, %185 : vector<16x128xf32>
    %cst_51 = arith.constant 0.333333343 : f32
    %192 = vector.broadcast %cst_51 : f32 to vector<16x128xf32>
    %193 = arith.mulf %191, %192 : vector<16x128xf32>
    %c0_52 = arith.constant 0 : index
    %c0_53 = arith.constant 0 : index
    %c0_54 = arith.constant 0 : index
    %194 = vector.load %arg9[%c0_52, %c0_53, %c0_54] : memref<1x16x128xf32, #tpu.memory_space<vmem>>, vector<1x16x128xf32>
    %195 = vector.shape_cast %194 : vector<1x16x128xf32> to vector<16x128xf32>
    %196 = vector.shape_cast %193 : vector<16x128xf32> to vector<1x16x128xf32>
    tpu.vector_store %arg9[%c0_52, %c0_53, %c0_54], %196 {strides = array<i32>} : memref<1x16x128xf32, #tpu.memory_space<vmem>>, vector<1x16x128xf32>,
    return
  }
  func.func @transform_0(%arg0: i32) -> (i32, i32, i32) {
    %c0_i32 = arith.constant 0 : i32
    %c0_i32_0 = arith.constant 0 : i32
    %c0_i32_1 = arith.constant 0 : i32
    return %arg0, %c0_i32, %c0_i32_0 : i32, i32, i32
  }
  func.func @transform_1(%arg0: i32) -> (i32, i32, i32) {
    %c0_i32 = arith.constant 0 : i32
    %c0_i32_0 = arith.constant 0 : i32
    %c0_i32_1 = arith.constant 0 : i32
    return %arg0, %c0_i32, %c0_i32_0 : i32, i32, i32
  }
  func.func @transform_2(%arg0: i32) -> (i32, i32) {
    %c0_i32 = arith.constant 0 : i32
    %c0_i32_0 = arith.constant 0 : i32
    %c0_i32_1 = arith.constant 0 : i32
    return %c0_i32, %c0_i32_0 : i32, i32
  }
  func.func @transform_3(%arg0: i32) -> (i32, i32) {
    %c0_i32 = arith.constant 0 : i32
    %c0_i32_0 = arith.constant 0 : i32
    %c0_i32_1 = arith.constant 0 : i32
    return %c0_i32, %c0_i32_0 : i32, i32
  }
  func.func @transform_4(%arg0: i32) -> (i32, i32) {
    %c0_i32 = arith.constant 0 : i32
    %c0_i32_0 = arith.constant 0 : i32
    %c0_i32_1 = arith.constant 0 : i32
    return %c0_i32, %c0_i32_0 : i32, i32
  }
  func.func @transform_5(%arg0: i32) -> (i32, i32) {
    %c0_i32 = arith.constant 0 : i32
    %c0_i32_0 = arith.constant 0 : i32
    %c0_i32_1 = arith.constant 0 : i32
    return %c0_i32, %c0_i32_0 : i32, i32
  }
  func.func @transform_6(%arg0: i32) -> (i32, i32) {
    %c0_i32 = arith.constant 0 : i32
    %c0_i32_0 = arith.constant 0 : i32
    %c0_i32_1 = arith.constant 0 : i32
    return %c0_i32, %c0_i32_0 : i32, i32
  }
  func.func @transform_7(%arg0: i32) -> (i32, i32, i32) {
    %c0_i32 = arith.constant 0 : i32
    %c0_i32_0 = arith.constant 0 : i32
    %c0_i32_1 = arith.constant 0 : i32
    return %arg0, %c0_i32, %c0_i32_0 : i32, i32, i32
  }
  func.func @transform_8(%arg0: i32) -> (i32, i32, i32) {
    %c0_i32 = arith.constant 0 : i32
    %c0_i32_0 = arith.constant 0 : i32
    %c0_i32_1 = arith.constant 0 : i32
    return %arg0, %c0_i32, %c0_i32_0 : i32, i32, i32
  }
}

module attributes {stable_mosaic.version = 11 : i64} {
  func.func @_bert_layer_kernel(%arg0: i32, %arg1: memref<1x16x128xf32, #tpu.memory_space<vmem>>, %arg2: memref<1x16x128xf32, #tpu.memory_space<vmem>>, %arg3: memref<128x384xbf16, #tpu.memory_space<vmem>>, %arg4: memref<8x512xf32, #tpu.memory_space<vmem>>, %arg5: memref<128x128xbf16, #tpu.memory_space<vmem>>, %arg6: memref<128x512xbf16, #tpu.memory_space<vmem>>, %arg7: memref<512x128xbf16, #tpu.memory_space<vmem>>, %arg8: memref<1x16x128xf32, #tpu.memory_space<vmem>>, %arg9: memref<1x16x128xf32, #tpu.memory_space<vmem>>) attributes {dimension_semantics = [#tpu.dimension_semantics<parallel>], iteration_bounds = array<i64: 2>, scalar_prefetch = 0 : i64, scratch_operands = 0 : i64, tpu.core_type = #tpu.core_type<tc>, window_params = [{transform_indices = @transform_0, window_bounds = array<i64: 1, 16, 128>}, {transform_indices = @transform_1, window_bounds = array<i64: 1, 16, 128>}, {pipeline_mode = #tpu.pipeline_mode<synchronous>, transform_indices = @transform_2, window_bounds = array<i64: 128, 384>}, {pipeline_mode = #tpu.pipeline_mode<synchronous>, transform_indices = @transform_3, window_bounds = array<i64: 8, 512>}, {pipeline_mode = #tpu.pipeline_mode<synchronous>, transform_indices = @transform_4, window_bounds = array<i64: 128, 128>}, {pipeline_mode = #tpu.pipeline_mode<synchronous>, transform_indices = @transform_5, window_bounds = array<i64: 128, 512>}, {pipeline_mode = #tpu.pipeline_mode<synchronous>, transform_indices = @transform_6, window_bounds = array<i64: 512, 128>}, {transform_indices = @transform_7, window_bounds = array<i64: 1, 16, 128>}, {transform_indices = @transform_8, window_bounds = array<i64: 1, 16, 128>}]} {
    %c0 = arith.constant 0 : index
    %c0_0 = arith.constant 0 : index
    %c0_1 = arith.constant 0 : index
    %0 = vector.load %arg1[%c0, %c0_0, %c0_1] : memref<1x16x128xf32, #tpu.memory_space<vmem>>, vector<1x16x128xf32>
    %1 = vector.shape_cast %0 : vector<1x16x128xf32> to vector<16x128xf32>
    %c0_2 = arith.constant 0 : index
    %c0_3 = arith.constant 0 : index
    %2 = vector.load %arg4[%c0_2, %c0_3] : memref<8x512xf32, #tpu.memory_space<vmem>>, vector<8x512xf32>
    %3 = vector.extract_strided_slice %2 {offsets = [0, 0], sizes = [1, 384], strides = [1, 1]} : vector<8x512xf32> to vector<1x384xf32>
    %4 = vector.shape_cast %3 : vector<1x384xf32> to vector<384xf32>
    %5 = vector.extract_strided_slice %2 {offsets = [1, 0], sizes = [1, 128], strides = [1, 1]} : vector<8x512xf32> to vector<1x128xf32>
    %6 = vector.shape_cast %5 : vector<1x128xf32> to vector<128xf32>
    %7 = vector.extract_strided_slice %2 {offsets = [2, 0], sizes = [1, 128], strides = [1, 1]} : vector<8x512xf32> to vector<1x128xf32>
    %8 = vector.shape_cast %7 : vector<1x128xf32> to vector<128xf32>
    %9 = vector.extract_strided_slice %2 {offsets = [3, 0], sizes = [1, 128], strides = [1, 1]} : vector<8x512xf32> to vector<1x128xf32>
    %10 = vector.shape_cast %9 : vector<1x128xf32> to vector<128xf32>
    %11 = vector.extract_strided_slice %2 {offsets = [4, 0], sizes = [1, 512], strides = [1, 1]} : vector<8x512xf32> to vector<1x512xf32>
    %12 = vector.shape_cast %11 : vector<1x512xf32> to vector<512xf32>
    %13 = vector.extract_strided_slice %2 {offsets = [5, 0], sizes = [1, 128], strides = [1, 1]} : vector<8x512xf32> to vector<1x128xf32>
    %14 = vector.shape_cast %13 : vector<1x128xf32> to vector<128xf32>
    %15 = vector.extract_strided_slice %2 {offsets = [6, 0], sizes = [1, 128], strides = [1, 1]} : vector<8x512xf32> to vector<1x128xf32>
    %16 = vector.shape_cast %15 : vector<1x128xf32> to vector<128xf32>
    %17 = vector.extract_strided_slice %2 {offsets = [7, 0], sizes = [1, 128], strides = [1, 1]} : vector<8x512xf32> to vector<1x128xf32>
    %18 = vector.shape_cast %17 : vector<1x128xf32> to vector<128xf32>
    %19 = arith.truncf %1 : vector<16x128xf32> to vector<16x128xbf16>
    %c0_4 = arith.constant 0 : index
    %c0_5 = arith.constant 0 : index
    %20 = vector.load %arg3[%c0_4, %c0_5] : memref<128x384xbf16, #tpu.memory_space<vmem>>, vector<128x384xbf16>
    %cst = arith.constant dense<0.000000e+00> : vector<16x384xf32>
    %21 = tpu.matmul %19, %20, %cst {dimension_numbers = #tpu.dot_dimension_numbers<[1], [0], [0], [1], [0, 0, 1, 1], [], []>} : vector<16x128xbf16>, vector<128x384xbf16>, vector<16x384xf32> -> vector<16x384xf32>
    %22 = vector.shape_cast %4 : vector<384xf32> to vector<1x384xf32>
    %23 = vector.broadcast %22 : vector<1x384xf32> to vector<16x384xf32>
    %24 = arith.addf %21, %23 : vector<16x384xf32>
    %25 = vector.extract_strided_slice %24 {offsets = [0, 0], sizes = [16, 32], strides = [1, 1]} : vector<16x384xf32> to vector<16x32xf32>
    %26 = arith.truncf %25 : vector<16x32xf32> to vector<16x32xbf16>
    %27 = vector.extract_strided_slice %24 {offsets = [0, 128], sizes = [16, 32], strides = [1, 1]} : vector<16x384xf32> to vector<16x32xf32>
    %28 = arith.truncf %27 : vector<16x32xf32> to vector<16x32xbf16>
    %29 = vector.extract_strided_slice %24 {offsets = [0, 256], sizes = [16, 32], strides = [1, 1]} : vector<16x384xf32> to vector<16x32xf32>
    %30 = arith.truncf %29 : vector<16x32xf32> to vector<16x32xbf16>
    %cst_6 = arith.constant dense<0.000000e+00> : vector<16x16xf32>
    %31 = tpu.matmul %26, %28, %cst_6 {dimension_numbers = #tpu.dot_dimension_numbers<[1], [1], [0], [0], [0, 0, 1, 0], [], []>} : vector<16x32xbf16>, vector<16x32xbf16>, vector<16x16xf32> -> vector<16x16xf32>
    %cst_7 = arith.constant dense<0xFF800000> : vector<16xf32>
    %32 = vector.multi_reduction <maximumf>, %31, %cst_7 [1] : vector<16x16xf32> to vector<16xf32>
    %33 = vector.shape_cast %32 : vector<16xf32> to vector<16x1xf32>
    %34 = vector.broadcast %33 : vector<16x1xf32> to vector<16x16xf32>
    %35 = arith.subf %31, %34 : vector<16x16xf32>
    %36 = math.exp %35 : vector<16x16xf32>
    %cst_8 = arith.constant dense<0.000000e+00> : vector<16xf32>
    %37 = vector.multi_reduction <add>, %36, %cst_8 [1] : vector<16x16xf32> to vector<16xf32>
    %38 = vector.shape_cast %37 : vector<16xf32> to vector<16x1xf32>
    %39 = tpu.reciprocal %38 {approx = true} : vector<16x1xf32> -> vector<16x1xf32>
    %40 = vector.broadcast %39 : vector<16x1xf32> to vector<16x16xf32>
    %41 = arith.mulf %36, %40 : vector<16x16xf32>
    %42 = arith.truncf %41 : vector<16x16xf32> to vector<16x16xbf16>
    %cst_9 = arith.constant dense<0.000000e+00> : vector<16x32xf32>
    %43 = tpu.matmul %42, %30, %cst_9 {dimension_numbers = #tpu.dot_dimension_numbers<[1], [0], [0], [1], [0, 0, 1, 1], [], []>} : vector<16x16xbf16>, vector<16x32xbf16>, vector<16x32xf32> -> vector<16x32xf32>
    %44 = arith.truncf %43 : vector<16x32xf32> to vector<16x32xbf16>
    %45 = vector.extract_strided_slice %24 {offsets = [0, 32], sizes = [16, 32], strides = [1, 1]} : vector<16x384xf32> to vector<16x32xf32>
    %46 = arith.truncf %45 : vector<16x32xf32> to vector<16x32xbf16>
    %47 = vector.extract_strided_slice %24 {offsets = [0, 160], sizes = [16, 32], strides = [1, 1]} : vector<16x384xf32> to vector<16x32xf32>
    %48 = arith.truncf %47 : vector<16x32xf32> to vector<16x32xbf16>
    %49 = vector.extract_strided_slice %24 {offsets = [0, 288], sizes = [16, 32], strides = [1, 1]} : vector<16x384xf32> to vector<16x32xf32>
    %50 = arith.truncf %49 : vector<16x32xf32> to vector<16x32xbf16>
    %cst_10 = arith.constant dense<0.000000e+00> : vector<16x16xf32>
    %51 = tpu.matmul %46, %48, %cst_10 {dimension_numbers = #tpu.dot_dimension_numbers<[1], [1], [0], [0], [0, 0, 1, 0], [], []>} : vector<16x32xbf16>, vector<16x32xbf16>, vector<16x16xf32> -> vector<16x16xf32>
    %cst_11 = arith.constant dense<0xFF800000> : vector<16xf32>
    %52 = vector.multi_reduction <maximumf>, %51, %cst_11 [1] : vector<16x16xf32> to vector<16xf32>
    %53 = vector.shape_cast %52 : vector<16xf32> to vector<16x1xf32>
    %54 = vector.broadcast %53 : vector<16x1xf32> to vector<16x16xf32>
    %55 = arith.subf %51, %54 : vector<16x16xf32>
    %56 = math.exp %55 : vector<16x16xf32>
    %cst_12 = arith.constant dense<0.000000e+00> : vector<16xf32>
    %57 = vector.multi_reduction <add>, %56, %cst_12 [1] : vector<16x16xf32> to vector<16xf32>
    %58 = vector.shape_cast %57 : vector<16xf32> to vector<16x1xf32>
    %59 = tpu.reciprocal %58 {approx = true} : vector<16x1xf32> -> vector<16x1xf32>
    %60 = vector.broadcast %59 : vector<16x1xf32> to vector<16x16xf32>
    %61 = arith.mulf %56, %60 : vector<16x16xf32>
    %62 = arith.truncf %61 : vector<16x16xf32> to vector<16x16xbf16>
    %cst_13 = arith.constant dense<0.000000e+00> : vector<16x32xf32>
    %63 = tpu.matmul %62, %50, %cst_13 {dimension_numbers = #tpu.dot_dimension_numbers<[1], [0], [0], [1], [0, 0, 1, 1], [], []>} : vector<16x16xbf16>, vector<16x32xbf16>, vector<16x32xf32> -> vector<16x32xf32>
    %64 = arith.truncf %63 : vector<16x32xf32> to vector<16x32xbf16>
    %65 = vector.extract_strided_slice %24 {offsets = [0, 64], sizes = [16, 32], strides = [1, 1]} : vector<16x384xf32> to vector<16x32xf32>
    %66 = arith.truncf %65 : vector<16x32xf32> to vector<16x32xbf16>
    %67 = vector.extract_strided_slice %24 {offsets = [0, 192], sizes = [16, 32], strides = [1, 1]} : vector<16x384xf32> to vector<16x32xf32>
    %68 = arith.truncf %67 : vector<16x32xf32> to vector<16x32xbf16>
    %69 = vector.extract_strided_slice %24 {offsets = [0, 320], sizes = [16, 32], strides = [1, 1]} : vector<16x384xf32> to vector<16x32xf32>
    %70 = arith.truncf %69 : vector<16x32xf32> to vector<16x32xbf16>
    %cst_14 = arith.constant dense<0.000000e+00> : vector<16x16xf32>
    %71 = tpu.matmul %66, %68, %cst_14 {dimension_numbers = #tpu.dot_dimension_numbers<[1], [1], [0], [0], [0, 0, 1, 0], [], []>} : vector<16x32xbf16>, vector<16x32xbf16>, vector<16x16xf32> -> vector<16x16xf32>
    %cst_15 = arith.constant dense<0xFF800000> : vector<16xf32>
    %72 = vector.multi_reduction <maximumf>, %71, %cst_15 [1] : vector<16x16xf32> to vector<16xf32>
    %73 = vector.shape_cast %72 : vector<16xf32> to vector<16x1xf32>
    %74 = vector.broadcast %73 : vector<16x1xf32> to vector<16x16xf32>
    %75 = arith.subf %71, %74 : vector<16x16xf32>
    %76 = math.exp %75 : vector<16x16xf32>
    %cst_16 = arith.constant dense<0.000000e+00> : vector<16xf32>
    %77 = vector.multi_reduction <add>, %76, %cst_16 [1] : vector<16x16xf32> to vector<16xf32>
    %78 = vector.shape_cast %77 : vector<16xf32> to vector<16x1xf32>
    %79 = tpu.reciprocal %78 {approx = true} : vector<16x1xf32> -> vector<16x1xf32>
    %80 = vector.broadcast %79 : vector<16x1xf32> to vector<16x16xf32>
    %81 = arith.mulf %76, %80 : vector<16x16xf32>
    %82 = arith.truncf %81 : vector<16x16xf32> to vector<16x16xbf16>
    %cst_17 = arith.constant dense<0.000000e+00> : vector<16x32xf32>
    %83 = tpu.matmul %82, %70, %cst_17 {dimension_numbers = #tpu.dot_dimension_numbers<[1], [0], [0], [1], [0, 0, 1, 1], [], []>} : vector<16x16xbf16>, vector<16x32xbf16>, vector<16x32xf32> -> vector<16x32xf32>
    %84 = arith.truncf %83 : vector<16x32xf32> to vector<16x32xbf16>
    %85 = vector.extract_strided_slice %24 {offsets = [0, 96], sizes = [16, 32], strides = [1, 1]} : vector<16x384xf32> to vector<16x32xf32>
    %86 = arith.truncf %85 : vector<16x32xf32> to vector<16x32xbf16>
    %87 = vector.extract_strided_slice %24 {offsets = [0, 224], sizes = [16, 32], strides = [1, 1]} : vector<16x384xf32> to vector<16x32xf32>
    %88 = arith.truncf %87 : vector<16x32xf32> to vector<16x32xbf16>
    %89 = vector.extract_strided_slice %24 {offsets = [0, 352], sizes = [16, 32], strides = [1, 1]} : vector<16x384xf32> to vector<16x32xf32>
    %90 = arith.truncf %89 : vector<16x32xf32> to vector<16x32xbf16>
    %cst_18 = arith.constant dense<0.000000e+00> : vector<16x16xf32>
    %91 = tpu.matmul %86, %88, %cst_18 {dimension_numbers = #tpu.dot_dimension_numbers<[1], [1], [0], [0], [0, 0, 1, 0], [], []>} : vector<16x32xbf16>, vector<16x32xbf16>, vector<16x16xf32> -> vector<16x16xf32>
    %cst_19 = arith.constant dense<0xFF800000> : vector<16xf32>
    %92 = vector.multi_reduction <maximumf>, %91, %cst_19 [1] : vector<16x16xf32> to vector<16xf32>
    %93 = vector.shape_cast %92 : vector<16xf32> to vector<16x1xf32>
    %94 = vector.broadcast %93 : vector<16x1xf32> to vector<16x16xf32>
    %95 = arith.subf %91, %94 : vector<16x16xf32>
    %96 = math.exp %95 : vector<16x16xf32>
    %cst_20 = arith.constant dense<0.000000e+00> : vector<16xf32>
    %97 = vector.multi_reduction <add>, %96, %cst_20 [1] : vector<16x16xf32> to vector<16xf32>
    %98 = vector.shape_cast %97 : vector<16xf32> to vector<16x1xf32>
    %99 = tpu.reciprocal %98 {approx = true} : vector<16x1xf32> -> vector<16x1xf32>
    %100 = vector.broadcast %99 : vector<16x1xf32> to vector<16x16xf32>
    %101 = arith.mulf %96, %100 : vector<16x16xf32>
    %102 = arith.truncf %101 : vector<16x16xf32> to vector<16x16xbf16>
    %cst_21 = arith.constant dense<0.000000e+00> : vector<16x32xf32>
    %103 = tpu.matmul %102, %90, %cst_21 {dimension_numbers = #tpu.dot_dimension_numbers<[1], [0], [0], [1], [0, 0, 1, 1], [], []>} : vector<16x16xbf16>, vector<16x32xbf16>, vector<16x32xf32> -> vector<16x32xf32>
    %104 = arith.truncf %103 : vector<16x32xf32> to vector<16x32xbf16>
    %105 = tpu.concatenate %44, %64, %84, %104 in 1 : vector<16x32xbf16>, vector<16x32xbf16>, vector<16x32xbf16>, vector<16x32xbf16> -> vector<16x128xbf16>
    %c0_22 = arith.constant 0 : index
    %c0_23 = arith.constant 0 : index
    %106 = vector.load %arg5[%c0_22, %c0_23] : memref<128x128xbf16, #tpu.memory_space<vmem>>, vector<128x128xbf16>
    %cst_24 = arith.constant dense<0.000000e+00> : vector<16x128xf32>
    %107 = tpu.matmul %105, %106, %cst_24 {dimension_numbers = #tpu.dot_dimension_numbers<[1], [0], [0], [1], [0, 0, 1, 1], [], []>} : vector<16x128xbf16>, vector<128x128xbf16>, vector<16x128xf32> -> vector<16x128xf32>
    %108 = vector.shape_cast %6 : vector<128xf32> to vector<1x128xf32>
    %109 = vector.broadcast %108 : vector<1x128xf32> to vector<16x128xf32>
    %110 = arith.addf %107, %109 : vector<16x128xf32>
    %111 = arith.addf %110, %1 : vector<16x128xf32>
    %cst_25 = arith.constant dense<0.000000e+00> : vector<16xf32>
    %112 = vector.multi_reduction <add>, %111, %cst_25 [1] : vector<16x128xf32> to vector<16xf32>
    %113 = vector.shape_cast %112 : vector<16xf32> to vector<16x1xf32>
    %cst_26 = arith.constant 1.280000e+02 : f32
    %114 = vector.broadcast %cst_26 : f32 to vector<16x1xf32>
    %115 = arith.divf %113, %114 : vector<16x1xf32>
    %116 = vector.broadcast %115 : vector<16x1xf32> to vector<16x128xf32>
    %117 = arith.subf %111, %116 : vector<16x128xf32>
    %118 = arith.mulf %117, %117 : vector<16x128xf32>
    %cst_27 = arith.constant dense<0.000000e+00> : vector<16xf32>
    %119 = vector.multi_reduction <add>, %118, %cst_27 [1] : vector<16x128xf32> to vector<16xf32>
    %120 = vector.shape_cast %119 : vector<16xf32> to vector<16x1xf32>
    %cst_28 = arith.constant 1.280000e+02 : f32
    %121 = vector.broadcast %cst_28 : f32 to vector<16x1xf32>
    %122 = arith.divf %120, %121 : vector<16x1xf32>
    %123 = vector.broadcast %115 : vector<16x1xf32> to vector<16x128xf32>
    %124 = arith.subf %111, %123 : vector<16x128xf32>
    %cst_29 = arith.constant 9.99999996E-13 : f32
    %125 = vector.broadcast %cst_29 : f32 to vector<16x1xf32>
    %126 = arith.addf %122, %125 : vector<16x1xf32>
    %127 = math.rsqrt %126 : vector<16x1xf32>
    %128 = vector.broadcast %127 : vector<16x1xf32> to vector<16x128xf32>
    %129 = arith.mulf %124, %128 : vector<16x128xf32>
    %130 = vector.shape_cast %8 : vector<128xf32> to vector<1x128xf32>
    %131 = vector.broadcast %130 : vector<1x128xf32> to vector<16x128xf32>
    %132 = arith.mulf %129, %131 : vector<16x128xf32>
    %133 = vector.shape_cast %10 : vector<128xf32> to vector<1x128xf32>
    %134 = vector.broadcast %133 : vector<1x128xf32> to vector<16x128xf32>
    %135 = arith.addf %132, %134 : vector<16x128xf32>
    %136 = arith.truncf %135 : vector<16x128xf32> to vector<16x128xbf16>
    %c0_30 = arith.constant 0 : index
    %c0_31 = arith.constant 0 : index
    %137 = vector.load %arg6[%c0_30, %c0_31] : memref<128x512xbf16, #tpu.memory_space<vmem>>, vector<128x512xbf16>
    %cst_32 = arith.constant dense<0.000000e+00> : vector<16x512xf32>
    %138 = tpu.matmul %136, %137, %cst_32 {dimension_numbers = #tpu.dot_dimension_numbers<[1], [0], [0], [1], [0, 0, 1, 1], [], []>} : vector<16x128xbf16>, vector<128x512xbf16>, vector<16x512xf32> -> vector<16x512xf32>
    %139 = vector.shape_cast %12 : vector<512xf32> to vector<1x512xf32>
    %140 = vector.broadcast %139 : vector<1x512xf32> to vector<16x512xf32>
    %141 = arith.addf %138, %140 : vector<16x512xf32>
    %142 = arith.mulf %141, %141 : vector<16x512xf32>
    %143 = arith.mulf %141, %142 : vector<16x512xf32>
    %cst_33 = arith.constant 4.471500e-02 : f32
    %144 = vector.broadcast %cst_33 : f32 to vector<16x512xf32>
    %145 = arith.mulf %144, %143 : vector<16x512xf32>
    %146 = arith.addf %141, %145 : vector<16x512xf32>
    %cst_34 = arith.constant 0.797884583 : f32
    %147 = vector.broadcast %cst_34 : f32 to vector<16x512xf32>
    %148 = arith.mulf %147, %146 : vector<16x512xf32>
    %149 = math.tanh %148 : vector<16x512xf32>
    %cst_35 = arith.constant 1.000000e+00 : f32
    %150 = vector.broadcast %cst_35 : f32 to vector<16x512xf32>
    %151 = arith.addf %150, %149 : vector<16x512xf32>
    %cst_36 = arith.constant 5.000000e-01 : f32
    %152 = vector.broadcast %cst_36 : f32 to vector<16x512xf32>
    %153 = arith.mulf %152, %151 : vector<16x512xf32>
    %154 = arith.mulf %141, %153 : vector<16x512xf32>
    %155 = arith.truncf %154 : vector<16x512xf32> to vector<16x512xbf16>
    %c0_37 = arith.constant 0 : index
    %c0_38 = arith.constant 0 : index
    %156 = vector.load %arg7[%c0_37, %c0_38] : memref<512x128xbf16, #tpu.memory_space<vmem>>, vector<512x128xbf16>
    %cst_39 = arith.constant dense<0.000000e+00> : vector<16x128xf32>
    %157 = tpu.matmul %155, %156, %cst_39 {dimension_numbers = #tpu.dot_dimension_numbers<[1], [0], [0], [1], [0, 0, 1, 1], [], []>} : vector<16x512xbf16>, vector<512x128xbf16>, vector<16x128xf32> -> vector<16x128xf32>
    %158 = vector.shape_cast %14 : vector<128xf32> to vector<1x128xf32>
    %159 = vector.broadcast %158 : vector<1x128xf32> to vector<16x128xf32>
    %160 = arith.addf %157, %159 : vector<16x128xf32>
    %161 = arith.addf %160, %135 : vector<16x128xf32>
    %cst_40 = arith.constant dense<0.000000e+00> : vector<16xf32>
    %162 = vector.multi_reduction <add>, %161, %cst_40 [1] : vector<16x128xf32> to vector<16xf32>
    %163 = vector.shape_cast %162 : vector<16xf32> to vector<16x1xf32>
    %cst_41 = arith.constant 1.280000e+02 : f32
    %164 = vector.broadcast %cst_41 : f32 to vector<16x1xf32>
    %165 = arith.divf %163, %164 : vector<16x1xf32>
    %166 = vector.broadcast %165 : vector<16x1xf32> to vector<16x128xf32>
    %167 = arith.subf %161, %166 : vector<16x128xf32>
    %168 = arith.mulf %167, %167 : vector<16x128xf32>
    %cst_42 = arith.constant dense<0.000000e+00> : vector<16xf32>
    %169 = vector.multi_reduction <add>, %168, %cst_42 [1] : vector<16x128xf32> to vector<16xf32>
    %170 = vector.shape_cast %169 : vector<16xf32> to vector<16x1xf32>
    %cst_43 = arith.constant 1.280000e+02 : f32
    %171 = vector.broadcast %cst_43 : f32 to vector<16x1xf32>
    %172 = arith.divf %170, %171 : vector<16x1xf32>
    %173 = vector.broadcast %165 : vector<16x1xf32> to vector<16x128xf32>
    %174 = arith.subf %161, %173 : vector<16x128xf32>
    %cst_44 = arith.constant 9.99999996E-13 : f32
    %175 = vector.broadcast %cst_44 : f32 to vector<16x1xf32>
    %176 = arith.addf %172, %175 : vector<16x1xf32>
    %177 = math.rsqrt %176 : vector<16x1xf32>
    %178 = vector.broadcast %177 : vector<16x1xf32> to vector<16x128xf32>
    %179 = arith.mulf %174, %178 : vector<16x128xf32>
    %180 = vector.shape_cast %16 : vector<128xf32> to vector<1x128xf32>
    %181 = vector.broadcast %180 : vector<1x128xf32> to vector<16x128xf32>
    %182 = arith.mulf %179, %181 : vector<16x128xf32>
    %183 = vector.shape_cast %18 : vector<128xf32> to vector<1x128xf32>
    %184 = vector.broadcast %183 : vector<1x128xf32> to vector<16x128xf32>
    %185 = arith.addf %182, %184 : vector<16x128xf32>
    %c0_45 = arith.constant 0 : index
    %c0_46 = arith.constant 0 : index
    %c0_47 = arith.constant 0 : index
    %186 = vector.load %arg8[%c0_45, %c0_46, %c0_47] : memref<1x16x128xf32, #tpu.memory_space<vmem>>, vector<1x16x128xf32>
    %187 = vector.shape_cast %186 : vector<1x16x128xf32> to vector<16x128xf32>
    %188 = vector.shape_cast %185 : vector<16x128xf32> to vector<1x16x128xf32>
    tpu.vector_store %arg8[%c0_45, %c0_46, %c0_47], %188 {strides = array<i32>} : memref<1x16x128xf32, #tpu.memory_space<vmem>>, vector<1x16x128xf32>,
    %c0_48 = arith.constant 0 : index
    %c0_49 = arith.constant 0 : index
    %c0_50 = arith.constant 0 : index
    %189 = vector.load %arg2[%c0_48, %c0_49, %c0_50] : memref<1x16x128xf32, #tpu.memory_space<vmem>>, vector<1x16x128xf32>
    %190 = vector.shape_cast %189 : vector<1x16x128xf32> to vector<16x128xf32>
    %191 = arith.addf %190, %185 : vector<16x128xf32>
    %c0_51 = arith.constant 0 : index
    %c0_52 = arith.constant 0 : index
    %c0_53 = arith.constant 0 : index
    %192 = vector.load %arg9[%c0_51, %c0_52, %c0_53] : memref<1x16x128xf32, #tpu.memory_space<vmem>>, vector<1x16x128xf32>
    %193 = vector.shape_cast %192 : vector<1x16x128xf32> to vector<16x128xf32>
    %194 = vector.shape_cast %191 : vector<16x128xf32> to vector<1x16x128xf32>
    tpu.vector_store %arg9[%c0_51, %c0_52, %c0_53], %194 {strides = array<i32>} : memref<1x16x128xf32, #tpu.memory_space<vmem>>, vector<1x16x128xf32>,
    return
  }
  func.func @transform_0(%arg0: i32) -> (i32, i32, i32) {
    %c0_i32 = arith.constant 0 : i32
    %c0_i32_0 = arith.constant 0 : i32
    %c0_i32_1 = arith.constant 0 : i32
    return %arg0, %c0_i32, %c0_i32_0 : i32, i32, i32
  }
  func.func @transform_1(%arg0: i32) -> (i32, i32, i32) {
    %c0_i32 = arith.constant 0 : i32
    %c0_i32_0 = arith.constant 0 : i32
    %c0_i32_1 = arith.constant 0 : i32
    return %arg0, %c0_i32, %c0_i32_0 : i32, i32, i32
  }
  func.func @transform_2(%arg0: i32) -> (i32, i32) {
    %c0_i32 = arith.constant 0 : i32
    %c0_i32_0 = arith.constant 0 : i32
    %c0_i32_1 = arith.constant 0 : i32
    return %c0_i32, %c0_i32_0 : i32, i32
  }
  func.func @transform_3(%arg0: i32) -> (i32, i32) {
    %c0_i32 = arith.constant 0 : i32
    %c0_i32_0 = arith.constant 0 : i32
    %c0_i32_1 = arith.constant 0 : i32
    return %c0_i32, %c0_i32_0 : i32, i32
  }
  func.func @transform_4(%arg0: i32) -> (i32, i32) {
    %c0_i32 = arith.constant 0 : i32
    %c0_i32_0 = arith.constant 0 : i32
    %c0_i32_1 = arith.constant 0 : i32
    return %c0_i32, %c0_i32_0 : i32, i32
  }
  func.func @transform_5(%arg0: i32) -> (i32, i32) {
    %c0_i32 = arith.constant 0 : i32
    %c0_i32_0 = arith.constant 0 : i32
    %c0_i32_1 = arith.constant 0 : i32
    return %c0_i32, %c0_i32_0 : i32, i32
  }
  func.func @transform_6(%arg0: i32) -> (i32, i32) {
    %c0_i32 = arith.constant 0 : i32
    %c0_i32_0 = arith.constant 0 : i32
    %c0_i32_1 = arith.constant 0 : i32
    return %c0_i32, %c0_i32_0 : i32, i32
  }
  func.func @transform_7(%arg0: i32) -> (i32, i32, i32) {
    %c0_i32 = arith.constant 0 : i32
    %c0_i32_0 = arith.constant 0 : i32
    %c0_i32_1 = arith.constant 0 : i32
    return %arg0, %c0_i32, %c0_i32_0 : i32, i32, i32
  }
  func.func @transform_8(%arg0: i32) -> (i32, i32, i32) {
    %c0_i32 = arith.constant 0 : i32
    %c0_i32_0 = arith.constant 0 : i32
    %c0_i32_1 = arith.constant 0 : i32
    return %arg0, %c0_i32, %c0_i32_0 : i32, i32, i32
  }
}

module attributes {stable_mosaic.version = 11 : i64} {
  func.func @_bert_layer_kernel(%arg0: i32, %arg1: memref<1x16x128xf32, #tpu.memory_space<vmem>>, %arg2: memref<1x16x128xf32, #tpu.memory_space<vmem>>, %arg3: memref<128x384xbf16, #tpu.memory_space<vmem>>, %arg4: memref<8x512xf32, #tpu.memory_space<vmem>>, %arg5: memref<128x128xbf16, #tpu.memory_space<vmem>>, %arg6: memref<128x512xbf16, #tpu.memory_space<vmem>>, %arg7: memref<512x128xbf16, #tpu.memory_space<vmem>>, %arg8: memref<1x16x128xf32, #tpu.memory_space<vmem>>, %arg9: memref<1x16x128xf32, #tpu.memory_space<vmem>>) attributes {dimension_semantics = [#tpu.dimension_semantics<parallel>], iteration_bounds = array<i64: 2>, scalar_prefetch = 0 : i64, scratch_operands = 0 : i64, tpu.core_type = #tpu.core_type<tc>, window_params = [{transform_indices = @transform_0, window_bounds = array<i64: 1, 16, 128>}, {transform_indices = @transform_1, window_bounds = array<i64: 1, 16, 128>}, {pipeline_mode = #tpu.pipeline_mode<synchronous>, transform_indices = @transform_2, window_bounds = array<i64: 128, 384>}, {pipeline_mode = #tpu.pipeline_mode<synchronous>, transform_indices = @transform_3, window_bounds = array<i64: 8, 512>}, {pipeline_mode = #tpu.pipeline_mode<synchronous>, transform_indices = @transform_4, window_bounds = array<i64: 128, 128>}, {pipeline_mode = #tpu.pipeline_mode<synchronous>, transform_indices = @transform_5, window_bounds = array<i64: 128, 512>}, {pipeline_mode = #tpu.pipeline_mode<synchronous>, transform_indices = @transform_6, window_bounds = array<i64: 512, 128>}, {transform_indices = @transform_7, window_bounds = array<i64: 1, 16, 128>}, {transform_indices = @transform_8, window_bounds = array<i64: 1, 16, 128>}]} {
    %c0 = arith.constant 0 : index
    %c0_0 = arith.constant 0 : index
    %c0_1 = arith.constant 0 : index
    %0 = vector.load %arg1[%c0, %c0_0, %c0_1] : memref<1x16x128xf32, #tpu.memory_space<vmem>>, vector<1x16x128xf32>
    %1 = vector.shape_cast %0 : vector<1x16x128xf32> to vector<16x128xf32>
    %c0_2 = arith.constant 0 : index
    %c0_3 = arith.constant 0 : index
    %2 = vector.load %arg4[%c0_2, %c0_3] : memref<8x512xf32, #tpu.memory_space<vmem>>, vector<8x512xf32>
    %3 = vector.extract_strided_slice %2 {offsets = [0, 0], sizes = [1, 384], strides = [1, 1]} : vector<8x512xf32> to vector<1x384xf32>
    %4 = vector.shape_cast %3 : vector<1x384xf32> to vector<384xf32>
    %5 = vector.extract_strided_slice %2 {offsets = [1, 0], sizes = [1, 128], strides = [1, 1]} : vector<8x512xf32> to vector<1x128xf32>
    %6 = vector.shape_cast %5 : vector<1x128xf32> to vector<128xf32>
    %7 = vector.extract_strided_slice %2 {offsets = [2, 0], sizes = [1, 128], strides = [1, 1]} : vector<8x512xf32> to vector<1x128xf32>
    %8 = vector.shape_cast %7 : vector<1x128xf32> to vector<128xf32>
    %9 = vector.extract_strided_slice %2 {offsets = [3, 0], sizes = [1, 128], strides = [1, 1]} : vector<8x512xf32> to vector<1x128xf32>
    %10 = vector.shape_cast %9 : vector<1x128xf32> to vector<128xf32>
    %11 = vector.extract_strided_slice %2 {offsets = [4, 0], sizes = [1, 512], strides = [1, 1]} : vector<8x512xf32> to vector<1x512xf32>
    %12 = vector.shape_cast %11 : vector<1x512xf32> to vector<512xf32>
    %13 = vector.extract_strided_slice %2 {offsets = [5, 0], sizes = [1, 128], strides = [1, 1]} : vector<8x512xf32> to vector<1x128xf32>
    %14 = vector.shape_cast %13 : vector<1x128xf32> to vector<128xf32>
    %15 = vector.extract_strided_slice %2 {offsets = [6, 0], sizes = [1, 128], strides = [1, 1]} : vector<8x512xf32> to vector<1x128xf32>
    %16 = vector.shape_cast %15 : vector<1x128xf32> to vector<128xf32>
    %17 = vector.extract_strided_slice %2 {offsets = [7, 0], sizes = [1, 128], strides = [1, 1]} : vector<8x512xf32> to vector<1x128xf32>
    %18 = vector.shape_cast %17 : vector<1x128xf32> to vector<128xf32>
    %19 = arith.truncf %1 : vector<16x128xf32> to vector<16x128xbf16>
    %c0_4 = arith.constant 0 : index
    %c0_5 = arith.constant 0 : index
    %20 = vector.load %arg3[%c0_4, %c0_5] : memref<128x384xbf16, #tpu.memory_space<vmem>>, vector<128x384xbf16>
    %cst = arith.constant dense<0.000000e+00> : vector<16x384xf32>
    %21 = tpu.matmul %19, %20, %cst {dimension_numbers = #tpu.dot_dimension_numbers<[1], [0], [0], [1], [0, 0, 1, 1], [], []>} : vector<16x128xbf16>, vector<128x384xbf16>, vector<16x384xf32> -> vector<16x384xf32>
    %22 = vector.shape_cast %4 : vector<384xf32> to vector<1x384xf32>
    %23 = vector.broadcast %22 : vector<1x384xf32> to vector<16x384xf32>
    %24 = arith.addf %21, %23 : vector<16x384xf32>
    %25 = vector.extract_strided_slice %24 {offsets = [0, 0], sizes = [16, 32], strides = [1, 1]} : vector<16x384xf32> to vector<16x32xf32>
    %26 = arith.truncf %25 : vector<16x32xf32> to vector<16x32xbf16>
    %27 = vector.extract_strided_slice %24 {offsets = [0, 128], sizes = [16, 32], strides = [1, 1]} : vector<16x384xf32> to vector<16x32xf32>
    %28 = arith.truncf %27 : vector<16x32xf32> to vector<16x32xbf16>
    %29 = vector.extract_strided_slice %24 {offsets = [0, 256], sizes = [16, 32], strides = [1, 1]} : vector<16x384xf32> to vector<16x32xf32>
    %30 = arith.truncf %29 : vector<16x32xf32> to vector<16x32xbf16>
    %cst_6 = arith.constant dense<0.000000e+00> : vector<16x16xf32>
    %31 = tpu.matmul %26, %28, %cst_6 {dimension_numbers = #tpu.dot_dimension_numbers<[1], [1], [0], [0], [0, 0, 1, 0], [], []>} : vector<16x32xbf16>, vector<16x32xbf16>, vector<16x16xf32> -> vector<16x16xf32>
    %cst_7 = arith.constant dense<0xFF800000> : vector<16xf32>
    %32 = vector.multi_reduction <maximumf>, %31, %cst_7 [1] : vector<16x16xf32> to vector<16xf32>
    %33 = vector.shape_cast %32 : vector<16xf32> to vector<16x1xf32>
    %34 = vector.broadcast %33 : vector<16x1xf32> to vector<16x16xf32>
    %35 = arith.subf %31, %34 : vector<16x16xf32>
    %36 = math.exp %35 : vector<16x16xf32>
    %cst_8 = arith.constant dense<0.000000e+00> : vector<16xf32>
    %37 = vector.multi_reduction <add>, %36, %cst_8 [1] : vector<16x16xf32> to vector<16xf32>
    %38 = vector.shape_cast %37 : vector<16xf32> to vector<16x1xf32>
    %39 = tpu.reciprocal %38 {approx = true} : vector<16x1xf32> -> vector<16x1xf32>
    %40 = vector.broadcast %39 : vector<16x1xf32> to vector<16x16xf32>
    %41 = arith.mulf %36, %40 : vector<16x16xf32>
    %42 = arith.truncf %41 : vector<16x16xf32> to vector<16x16xbf16>
    %cst_9 = arith.constant dense<0.000000e+00> : vector<16x32xf32>
    %43 = tpu.matmul %42, %30, %cst_9 {dimension_numbers = #tpu.dot_dimension_numbers<[1], [0], [0], [1], [0, 0, 1, 1], [], []>} : vector<16x16xbf16>, vector<16x32xbf16>, vector<16x32xf32> -> vector<16x32xf32>
    %44 = arith.truncf %43 : vector<16x32xf32> to vector<16x32xbf16>
    %45 = vector.extract_strided_slice %24 {offsets = [0, 32], sizes = [16, 32], strides = [1, 1]} : vector<16x384xf32> to vector<16x32xf32>
    %46 = arith.truncf %45 : vector<16x32xf32> to vector<16x32xbf16>
    %47 = vector.extract_strided_slice %24 {offsets = [0, 160], sizes = [16, 32], strides = [1, 1]} : vector<16x384xf32> to vector<16x32xf32>
    %48 = arith.truncf %47 : vector<16x32xf32> to vector<16x32xbf16>
    %49 = vector.extract_strided_slice %24 {offsets = [0, 288], sizes = [16, 32], strides = [1, 1]} : vector<16x384xf32> to vector<16x32xf32>
    %50 = arith.truncf %49 : vector<16x32xf32> to vector<16x32xbf16>
    %cst_10 = arith.constant dense<0.000000e+00> : vector<16x16xf32>
    %51 = tpu.matmul %46, %48, %cst_10 {dimension_numbers = #tpu.dot_dimension_numbers<[1], [1], [0], [0], [0, 0, 1, 0], [], []>} : vector<16x32xbf16>, vector<16x32xbf16>, vector<16x16xf32> -> vector<16x16xf32>
    %cst_11 = arith.constant dense<0xFF800000> : vector<16xf32>
    %52 = vector.multi_reduction <maximumf>, %51, %cst_11 [1] : vector<16x16xf32> to vector<16xf32>
    %53 = vector.shape_cast %52 : vector<16xf32> to vector<16x1xf32>
    %54 = vector.broadcast %53 : vector<16x1xf32> to vector<16x16xf32>
    %55 = arith.subf %51, %54 : vector<16x16xf32>
    %56 = math.exp %55 : vector<16x16xf32>
    %cst_12 = arith.constant dense<0.000000e+00> : vector<16xf32>
    %57 = vector.multi_reduction <add>, %56, %cst_12 [1] : vector<16x16xf32> to vector<16xf32>
    %58 = vector.shape_cast %57 : vector<16xf32> to vector<16x1xf32>
    %59 = tpu.reciprocal %58 {approx = true} : vector<16x1xf32> -> vector<16x1xf32>
    %60 = vector.broadcast %59 : vector<16x1xf32> to vector<16x16xf32>
    %61 = arith.mulf %56, %60 : vector<16x16xf32>
    %62 = arith.truncf %61 : vector<16x16xf32> to vector<16x16xbf16>
    %cst_13 = arith.constant dense<0.000000e+00> : vector<16x32xf32>
    %63 = tpu.matmul %62, %50, %cst_13 {dimension_numbers = #tpu.dot_dimension_numbers<[1], [0], [0], [1], [0, 0, 1, 1], [], []>} : vector<16x16xbf16>, vector<16x32xbf16>, vector<16x32xf32> -> vector<16x32xf32>
    %64 = arith.truncf %63 : vector<16x32xf32> to vector<16x32xbf16>
    %65 = vector.extract_strided_slice %24 {offsets = [0, 64], sizes = [16, 32], strides = [1, 1]} : vector<16x384xf32> to vector<16x32xf32>
    %66 = arith.truncf %65 : vector<16x32xf32> to vector<16x32xbf16>
    %67 = vector.extract_strided_slice %24 {offsets = [0, 192], sizes = [16, 32], strides = [1, 1]} : vector<16x384xf32> to vector<16x32xf32>
    %68 = arith.truncf %67 : vector<16x32xf32> to vector<16x32xbf16>
    %69 = vector.extract_strided_slice %24 {offsets = [0, 320], sizes = [16, 32], strides = [1, 1]} : vector<16x384xf32> to vector<16x32xf32>
    %70 = arith.truncf %69 : vector<16x32xf32> to vector<16x32xbf16>
    %cst_14 = arith.constant dense<0.000000e+00> : vector<16x16xf32>
    %71 = tpu.matmul %66, %68, %cst_14 {dimension_numbers = #tpu.dot_dimension_numbers<[1], [1], [0], [0], [0, 0, 1, 0], [], []>} : vector<16x32xbf16>, vector<16x32xbf16>, vector<16x16xf32> -> vector<16x16xf32>
    %cst_15 = arith.constant dense<0xFF800000> : vector<16xf32>
    %72 = vector.multi_reduction <maximumf>, %71, %cst_15 [1] : vector<16x16xf32> to vector<16xf32>
    %73 = vector.shape_cast %72 : vector<16xf32> to vector<16x1xf32>
    %74 = vector.broadcast %73 : vector<16x1xf32> to vector<16x16xf32>
    %75 = arith.subf %71, %74 : vector<16x16xf32>
    %76 = math.exp %75 : vector<16x16xf32>
    %cst_16 = arith.constant dense<0.000000e+00> : vector<16xf32>
    %77 = vector.multi_reduction <add>, %76, %cst_16 [1] : vector<16x16xf32> to vector<16xf32>
    %78 = vector.shape_cast %77 : vector<16xf32> to vector<16x1xf32>
    %79 = tpu.reciprocal %78 {approx = true} : vector<16x1xf32> -> vector<16x1xf32>
    %80 = vector.broadcast %79 : vector<16x1xf32> to vector<16x16xf32>
    %81 = arith.mulf %76, %80 : vector<16x16xf32>
    %82 = arith.truncf %81 : vector<16x16xf32> to vector<16x16xbf16>
    %cst_17 = arith.constant dense<0.000000e+00> : vector<16x32xf32>
    %83 = tpu.matmul %82, %70, %cst_17 {dimension_numbers = #tpu.dot_dimension_numbers<[1], [0], [0], [1], [0, 0, 1, 1], [], []>} : vector<16x16xbf16>, vector<16x32xbf16>, vector<16x32xf32> -> vector<16x32xf32>
    %84 = arith.truncf %83 : vector<16x32xf32> to vector<16x32xbf16>
    %85 = vector.extract_strided_slice %24 {offsets = [0, 96], sizes = [16, 32], strides = [1, 1]} : vector<16x384xf32> to vector<16x32xf32>
    %86 = arith.truncf %85 : vector<16x32xf32> to vector<16x32xbf16>
    %87 = vector.extract_strided_slice %24 {offsets = [0, 224], sizes = [16, 32], strides = [1, 1]} : vector<16x384xf32> to vector<16x32xf32>
    %88 = arith.truncf %87 : vector<16x32xf32> to vector<16x32xbf16>
    %89 = vector.extract_strided_slice %24 {offsets = [0, 352], sizes = [16, 32], strides = [1, 1]} : vector<16x384xf32> to vector<16x32xf32>
    %90 = arith.truncf %89 : vector<16x32xf32> to vector<16x32xbf16>
    %cst_18 = arith.constant dense<0.000000e+00> : vector<16x16xf32>
    %91 = tpu.matmul %86, %88, %cst_18 {dimension_numbers = #tpu.dot_dimension_numbers<[1], [1], [0], [0], [0, 0, 1, 0], [], []>} : vector<16x32xbf16>, vector<16x32xbf16>, vector<16x16xf32> -> vector<16x16xf32>
    %cst_19 = arith.constant dense<0xFF800000> : vector<16xf32>
    %92 = vector.multi_reduction <maximumf>, %91, %cst_19 [1] : vector<16x16xf32> to vector<16xf32>
    %93 = vector.shape_cast %92 : vector<16xf32> to vector<16x1xf32>
    %94 = vector.broadcast %93 : vector<16x1xf32> to vector<16x16xf32>
    %95 = arith.subf %91, %94 : vector<16x16xf32>
    %96 = math.exp %95 : vector<16x16xf32>
    %cst_20 = arith.constant dense<0.000000e+00> : vector<16xf32>
    %97 = vector.multi_reduction <add>, %96, %cst_20 [1] : vector<16x16xf32> to vector<16xf32>
    %98 = vector.shape_cast %97 : vector<16xf32> to vector<16x1xf32>
    %99 = tpu.reciprocal %98 {approx = true} : vector<16x1xf32> -> vector<16x1xf32>
    %100 = vector.broadcast %99 : vector<16x1xf32> to vector<16x16xf32>
    %101 = arith.mulf %96, %100 : vector<16x16xf32>
    %102 = arith.truncf %101 : vector<16x16xf32> to vector<16x16xbf16>
    %cst_21 = arith.constant dense<0.000000e+00> : vector<16x32xf32>
    %103 = tpu.matmul %102, %90, %cst_21 {dimension_numbers = #tpu.dot_dimension_numbers<[1], [0], [0], [1], [0, 0, 1, 1], [], []>} : vector<16x16xbf16>, vector<16x32xbf16>, vector<16x32xf32> -> vector<16x32xf32>
    %104 = arith.truncf %103 : vector<16x32xf32> to vector<16x32xbf16>
    %105 = tpu.concatenate %44, %64, %84, %104 in 1 : vector<16x32xbf16>, vector<16x32xbf16>, vector<16x32xbf16>, vector<16x32xbf16> -> vector<16x128xbf16>
    %c0_22 = arith.constant 0 : index
    %c0_23 = arith.constant 0 : index
    %106 = vector.load %arg5[%c0_22, %c0_23] : memref<128x128xbf16, #tpu.memory_space<vmem>>, vector<128x128xbf16>
    %cst_24 = arith.constant dense<0.000000e+00> : vector<16x128xf32>
    %107 = tpu.matmul %105, %106, %cst_24 {dimension_numbers = #tpu.dot_dimension_numbers<[1], [0], [0], [1], [0, 0, 1, 1], [], []>} : vector<16x128xbf16>, vector<128x128xbf16>, vector<16x128xf32> -> vector<16x128xf32>
    %108 = vector.shape_cast %6 : vector<128xf32> to vector<1x128xf32>
    %109 = vector.broadcast %108 : vector<1x128xf32> to vector<16x128xf32>
    %110 = arith.addf %107, %109 : vector<16x128xf32>
    %111 = arith.addf %110, %1 : vector<16x128xf32>
    %cst_25 = arith.constant dense<0.000000e+00> : vector<16xf32>
    %112 = vector.multi_reduction <add>, %111, %cst_25 [1] : vector<16x128xf32> to vector<16xf32>
    %113 = vector.shape_cast %112 : vector<16xf32> to vector<16x1xf32>
    %cst_26 = arith.constant 1.280000e+02 : f32
    %114 = vector.broadcast %cst_26 : f32 to vector<16x1xf32>
    %115 = arith.divf %113, %114 : vector<16x1xf32>
    %116 = vector.broadcast %115 : vector<16x1xf32> to vector<16x128xf32>
    %117 = arith.subf %111, %116 : vector<16x128xf32>
    %118 = arith.mulf %117, %117 : vector<16x128xf32>
    %cst_27 = arith.constant dense<0.000000e+00> : vector<16xf32>
    %119 = vector.multi_reduction <add>, %118, %cst_27 [1] : vector<16x128xf32> to vector<16xf32>
    %120 = vector.shape_cast %119 : vector<16xf32> to vector<16x1xf32>
    %cst_28 = arith.constant 1.280000e+02 : f32
    %121 = vector.broadcast %cst_28 : f32 to vector<16x1xf32>
    %122 = arith.divf %120, %121 : vector<16x1xf32>
    %123 = vector.broadcast %115 : vector<16x1xf32> to vector<16x128xf32>
    %124 = arith.subf %111, %123 : vector<16x128xf32>
    %cst_29 = arith.constant 9.99999996E-13 : f32
    %125 = vector.broadcast %cst_29 : f32 to vector<16x1xf32>
    %126 = arith.addf %122, %125 : vector<16x1xf32>
    %127 = math.rsqrt %126 : vector<16x1xf32>
    %128 = vector.broadcast %127 : vector<16x1xf32> to vector<16x128xf32>
    %129 = arith.mulf %124, %128 : vector<16x128xf32>
    %130 = vector.shape_cast %8 : vector<128xf32> to vector<1x128xf32>
    %131 = vector.broadcast %130 : vector<1x128xf32> to vector<16x128xf32>
    %132 = arith.mulf %129, %131 : vector<16x128xf32>
    %133 = vector.shape_cast %10 : vector<128xf32> to vector<1x128xf32>
    %134 = vector.broadcast %133 : vector<1x128xf32> to vector<16x128xf32>
    %135 = arith.addf %132, %134 : vector<16x128xf32>
    %136 = arith.truncf %135 : vector<16x128xf32> to vector<16x128xbf16>
    %c0_30 = arith.constant 0 : index
    %c0_31 = arith.constant 0 : index
    %137 = vector.load %arg6[%c0_30, %c0_31] : memref<128x512xbf16, #tpu.memory_space<vmem>>, vector<128x512xbf16>
    %cst_32 = arith.constant dense<0.000000e+00> : vector<16x512xf32>
    %138 = tpu.matmul %136, %137, %cst_32 {dimension_numbers = #tpu.dot_dimension_numbers<[1], [0], [0], [1], [0, 0, 1, 1], [], []>} : vector<16x128xbf16>, vector<128x512xbf16>, vector<16x512xf32> -> vector<16x512xf32>
    %139 = vector.shape_cast %12 : vector<512xf32> to vector<1x512xf32>
    %140 = vector.broadcast %139 : vector<1x512xf32> to vector<16x512xf32>
    %141 = arith.addf %138, %140 : vector<16x512xf32>
    %142 = arith.mulf %141, %141 : vector<16x512xf32>
    %143 = arith.mulf %141, %142 : vector<16x512xf32>
    %cst_33 = arith.constant 4.471500e-02 : f32
    %144 = vector.broadcast %cst_33 : f32 to vector<16x512xf32>
    %145 = arith.mulf %144, %143 : vector<16x512xf32>
    %146 = arith.addf %141, %145 : vector<16x512xf32>
    %cst_34 = arith.constant 0.797884583 : f32
    %147 = vector.broadcast %cst_34 : f32 to vector<16x512xf32>
    %148 = arith.mulf %147, %146 : vector<16x512xf32>
    %149 = math.tanh %148 : vector<16x512xf32>
    %cst_35 = arith.constant 1.000000e+00 : f32
    %150 = vector.broadcast %cst_35 : f32 to vector<16x512xf32>
    %151 = arith.addf %150, %149 : vector<16x512xf32>
    %cst_36 = arith.constant 5.000000e-01 : f32
    %152 = vector.broadcast %cst_36 : f32 to vector<16x512xf32>
    %153 = arith.mulf %152, %151 : vector<16x512xf32>
    %154 = arith.mulf %141, %153 : vector<16x512xf32>
    %155 = arith.truncf %154 : vector<16x512xf32> to vector<16x512xbf16>
    %c0_37 = arith.constant 0 : index
    %c0_38 = arith.constant 0 : index
    %156 = vector.load %arg7[%c0_37, %c0_38] : memref<512x128xbf16, #tpu.memory_space<vmem>>, vector<512x128xbf16>
    %cst_39 = arith.constant dense<0.000000e+00> : vector<16x128xf32>
    %157 = tpu.matmul %155, %156, %cst_39 {dimension_numbers = #tpu.dot_dimension_numbers<[1], [0], [0], [1], [0, 0, 1, 1], [], []>} : vector<16x512xbf16>, vector<512x128xbf16>, vector<16x128xf32> -> vector<16x128xf32>
    %158 = vector.shape_cast %14 : vector<128xf32> to vector<1x128xf32>
    %159 = vector.broadcast %158 : vector<1x128xf32> to vector<16x128xf32>
    %160 = arith.addf %157, %159 : vector<16x128xf32>
    %161 = arith.addf %160, %135 : vector<16x128xf32>
    %cst_40 = arith.constant dense<0.000000e+00> : vector<16xf32>
    %162 = vector.multi_reduction <add>, %161, %cst_40 [1] : vector<16x128xf32> to vector<16xf32>
    %163 = vector.shape_cast %162 : vector<16xf32> to vector<16x1xf32>
    %cst_41 = arith.constant 1.280000e+02 : f32
    %164 = vector.broadcast %cst_41 : f32 to vector<16x1xf32>
    %165 = arith.divf %163, %164 : vector<16x1xf32>
    %166 = vector.broadcast %165 : vector<16x1xf32> to vector<16x128xf32>
    %167 = arith.subf %161, %166 : vector<16x128xf32>
    %168 = arith.mulf %167, %167 : vector<16x128xf32>
    %cst_42 = arith.constant dense<0.000000e+00> : vector<16xf32>
    %169 = vector.multi_reduction <add>, %168, %cst_42 [1] : vector<16x128xf32> to vector<16xf32>
    %170 = vector.shape_cast %169 : vector<16xf32> to vector<16x1xf32>
    %cst_43 = arith.constant 1.280000e+02 : f32
    %171 = vector.broadcast %cst_43 : f32 to vector<16x1xf32>
    %172 = arith.divf %170, %171 : vector<16x1xf32>
    %173 = vector.broadcast %165 : vector<16x1xf32> to vector<16x128xf32>
    %174 = arith.subf %161, %173 : vector<16x128xf32>
    %cst_44 = arith.constant 9.99999996E-13 : f32
    %175 = vector.broadcast %cst_44 : f32 to vector<16x1xf32>
    %176 = arith.addf %172, %175 : vector<16x1xf32>
    %177 = math.rsqrt %176 : vector<16x1xf32>
    %178 = vector.broadcast %177 : vector<16x1xf32> to vector<16x128xf32>
    %179 = arith.mulf %174, %178 : vector<16x128xf32>
    %180 = vector.shape_cast %16 : vector<128xf32> to vector<1x128xf32>
    %181 = vector.broadcast %180 : vector<1x128xf32> to vector<16x128xf32>
    %182 = arith.mulf %179, %181 : vector<16x128xf32>
    %183 = vector.shape_cast %18 : vector<128xf32> to vector<1x128xf32>
    %184 = vector.broadcast %183 : vector<1x128xf32> to vector<16x128xf32>
    %185 = arith.addf %182, %184 : vector<16x128xf32>
    %c0_45 = arith.constant 0 : index
    %c0_46 = arith.constant 0 : index
    %c0_47 = arith.constant 0 : index
    %186 = vector.load %arg8[%c0_45, %c0_46, %c0_47] : memref<1x16x128xf32, #tpu.memory_space<vmem>>, vector<1x16x128xf32>
    %187 = vector.shape_cast %186 : vector<1x16x128xf32> to vector<16x128xf32>
    %188 = vector.shape_cast %185 : vector<16x128xf32> to vector<1x16x128xf32>
    tpu.vector_store %arg8[%c0_45, %c0_46, %c0_47], %188 {strides = array<i32>} : memref<1x16x128xf32, #tpu.memory_space<vmem>>, vector<1x16x128xf32>,
    %c0_48 = arith.constant 0 : index
    %c0_49 = arith.constant 0 : index
    %c0_50 = arith.constant 0 : index
    %189 = vector.load %arg2[%c0_48, %c0_49, %c0_50] : memref<1x16x128xf32, #tpu.memory_space<vmem>>, vector<1x16x128xf32>
    %190 = vector.shape_cast %189 : vector<1x16x128xf32> to vector<16x128xf32>
    %191 = arith.addf %190, %185 : vector<16x128xf32>
    %cst_51 = arith.constant 0.333333343 : f32
    %192 = vector.broadcast %cst_51 : f32 to vector<16x128xf32>
    %193 = arith.mulf %191, %192 : vector<16x128xf32>
    %c0_52 = arith.constant 0 : index
    %c0_53 = arith.constant 0 : index
    %c0_54 = arith.constant 0 : index
    %194 = vector.load %arg9[%c0_52, %c0_53, %c0_54] : memref<1x16x128xf32, #tpu.memory_space<vmem>>, vector<1x16x128xf32>
    %195 = vector.shape_cast %194 : vector<1x16x128xf32> to vector<16x128xf32>
    %196 = vector.shape_cast %193 : vector<16x128xf32> to vector<1x16x128xf32>
    tpu.vector_store %arg9[%c0_52, %c0_53, %c0_54], %196 {strides = array<i32>} : memref<1x16x128xf32, #tpu.memory_space<vmem>>, vector<1x16x128xf32>,
    return
  }
  func.func @transform_0(%arg0: i32) -> (i32, i32, i32) {
    %c0_i32 = arith.constant 0 : i32
    %c0_i32_0 = arith.constant 0 : i32
    %c0_i32_1 = arith.constant 0 : i32
    return %arg0, %c0_i32, %c0_i32_0 : i32, i32, i32
  }
  func.func @transform_1(%arg0: i32) -> (i32, i32, i32) {
    %c0_i32 = arith.constant 0 : i32
    %c0_i32_0 = arith.constant 0 : i32
    %c0_i32_1 = arith.constant 0 : i32
    return %arg0, %c0_i32, %c0_i32_0 : i32, i32, i32
  }
  func.func @transform_2(%arg0: i32) -> (i32, i32) {
    %c0_i32 = arith.constant 0 : i32
    %c0_i32_0 = arith.constant 0 : i32
    %c0_i32_1 = arith.constant 0 : i32
    return %c0_i32, %c0_i32_0 : i32, i32
  }
  func.func @transform_3(%arg0: i32) -> (i32, i32) {
    %c0_i32 = arith.constant 0 : i32
    %c0_i32_0 = arith.constant 0 : i32
    %c0_i32_1 = arith.constant 0 : i32
    return %c0_i32, %c0_i32_0 : i32, i32
  }
  func.func @transform_4(%arg0: i32) -> (i32, i32) {
    %c0_i32 = arith.constant 0 : i32
    %c0_i32_0 = arith.constant 0 : i32
    %c0_i32_1 = arith.constant 0 : i32
    return %c0_i32, %c0_i32_0 : i32, i32
  }
  func.func @transform_5(%arg0: i32) -> (i32, i32) {
    %c0_i32 = arith.constant 0 : i32
    %c0_i32_0 = arith.constant 0 : i32
    %c0_i32_1 = arith.constant 0 : i32
    return %c0_i32, %c0_i32_0 : i32, i32
  }
  func.func @transform_6(%arg0: i32) -> (i32, i32) {
    %c0_i32 = arith.constant 0 : i32
    %c0_i32_0 = arith.constant 0 : i32
    %c0_i32_1 = arith.constant 0 : i32
    return %c0_i32, %c0_i32_0 : i32, i32
  }
  func.func @transform_7(%arg0: i32) -> (i32, i32, i32) {
    %c0_i32 = arith.constant 0 : i32
    %c0_i32_0 = arith.constant 0 : i32
    %c0_i32_1 = arith.constant 0 : i32
    return %arg0, %c0_i32, %c0_i32_0 : i32, i32, i32
  }
  func.func @transform_8(%arg0: i32) -> (i32, i32, i32) {
    %c0_i32 = arith.constant 0 : i32
    %c0_i32_0 = arith.constant 0 : i32
    %c0_i32_1 = arith.constant 0 : i32
    return %arg0, %c0_i32, %c0_i32_0 : i32, i32, i32
  }
}

</mosaic_0001>

<bundles_post_ra>
// kernel: compressor_forward.3
= control target key start
LH: loop header
LB: loop body
LE: loop exit
PB: predicated region body
PF: predicated region fallthrough
CT: control target
= control target key end

     0   :  { %s3112_s0 = inlined_call_operand.vmem [shape: f32[2,16,128], index: 0, kind: input, shape index: {}]   ;;  %s3113_s1 = inlined_call_operand.vmem [shape: f32[2,16,128], index: 1, kind: input, shape index: {}, may-alias: {1,8}]   ;;  %s3114_s2 = inlined_call_operand.hbm [shape: bf16[128,384], index: 2, kind: input, shape index: {}]   ;;  %s3115_s3 = inlined_call_operand.vmem [shape: f32[8,512], index: 3, kind: input, shape index: {}]   ;;  %s3116_s4 = inlined_call_operand.vmem [shape: bf16[128,128], index: 4, kind: input, shape index: {}]   ;;  %s3117_s5 = inlined_call_operand.hbm [shape: bf16[128,512], index: 5, kind: input, shape index: {}]   ;;  %s3118_s6 = inlined_call_operand.hbm [shape: bf16[512,128], index: 6, kind: input, shape index: {}]   ;;  %s3119_s7 = inlined_call_operand.hbm [shape: f32[2,16,128], index: 7, kind: output, shape index: {0}]   ;;  %s3120_s8 = inlined_call_operand.vmem [shape: f32[2,16,128], index: 8, kind: output, shape index: {1}, may-alias: {1,8}]  }
   0x1   :  { %3124 = sst [smem:[#allocation15_spill]] %s3114_s2 }
   0x2   :  { %3125 = sst [smem:[#allocation16_spill]] %s3117_s5 }
   0x3   :  { %14 = vsyncpa [#allocation3], 0 }
   0x4   :  { %15 = vsyncpa [#allocation6], 0 }
   0x5   :  { %16 = vsyncpa [#allocation4], 0 }
   0x6   :  { %18 = vsyncpa [#allocation4 + $0x1], 0  ;;  %s2778_s27 = smov 0   ;;  %s2780_s28 = smov 0  }
   0x7   :  { %s2782_s29 = smov 0   ;;  %s2784_s30 = smov 0  }
   0x8 LB: > { %3126 = sst [smem:[#allocation12_spill]] %s2712_s29  ;;  %s2799_s9 = sadd.s32 4294967295, %s2716_s30   ;;  %s2716_s30 = sphi %s2784_s30, %s3135_s30   ;;  %s2712_s29 = sphi %s2782_s29, %s3137_s29   ;;  %s2708_s28 = sphi %s2780_s28, %s3139_s28   ;;  %s2704_s27 = sphi %s2778_s27, %s3138_s27  }
   0x9   : > { %s1901_s10 = sadd.s32 4294967294, %s2716_s30   ;;  %s2803_s11 = sadd.s32 1, %s2716_s30  }
   0xa   : > { %3127 = sst [smem:[#allocation13_spill]] %s2803_s11  ;;  %s188_s12 = sadd.s32 1, %s2712_s29 }
   0xb   : > { %s185_s13 = ssub.s32 %s2716_s30, %s2803_s11  ;;  %p198_p0 = scmp.ne.s32.totalorder %s2712_s29, %s2708_s28 }
   0xc   : > { %p186_p1 = scmp.eq.s32.totalorder %s185_s13, 0  ;;  %p199_p2 = scmp.eq.s32.totalorder %s2799_s9, 1 }
   0xd   : > { %p204_p3 = scmp.ne.s32.totalorder %s2708_s28, %s2704_s27  ;;  %p205_p4 = scmp.eq.s32.totalorder %s1901_s10, 1 }
   0xe   : > { %s2814_s14 = scalar_select %p186_p1, %s2712_s29, %s188_s12  }
   0xf   : > { %p2816_p5 = por %p199_p2, %p198_p0  ;;  %p2820_p6 = por %p205_p4, %p204_p3 }
  0x10   : > { %3128 = sst [smem:[#allocation14_spill]] %s2814_s14  ;;  %p1902_p7 = scmp.ge.s32.totalorder %s2716_s30, 1 }
  0x11   : > { %p238_p8 = scmp.lt.s32.totalorder %s2716_s30, 3  ;;  %p2443_p9 = scmp.eq.s32.totalorder %s2799_s9, 0 }
  0x12   : > { %s3132_s5 = sld [smem:[#allocation16_spill]]  ;;  %s2718_s21 = smov [#allocation5]  }
  0x13   : > { %p2827_p10 = pnand %p1902_p7, %p238_p8  ;;  %s271_s22 = sshll.u32 %s2718_s21, 4  ;;  %s272_s22 = int_to_ptr.vmem [resolvable:$true] %s271_s22 }
  0x14   : > { %s3134_s2 = sld [smem:[#allocation15_spill]]  ;;  %s2719_s10 = smov 256  }
  0x15   : > { %p2429_p11 = pneg %p2827_p10  ;;  %s2720_s12 = smov 16  }
  0x16   : > { %s2721_s13 = smov [#allocation2]   ;;  %s2722_s19 = smov 192  }
  0x17   : > { %p2838_p12 = pnand %p2443_p9, %p2429_p11  ;;  %s251_s18 = sshll.u32 %s2721_s13, 4  ;;  %s252_s18 = int_to_ptr.vmem [resolvable:$true] %s251_s18 }
  0x18   : > { %s269_s20 = sshll.u32 %s3132_s5, 4  ;;  %s2723_s21 = smov 12   ;;  %s270_s20 = int_to_ptr.hbm [resolvable:$true] %s269_s20 }
  0x19   : > { %2435 = dma.hbm_to_vmem [thread:$0]  (!%p2838_p12), %s270_s20, 4096, %s272_s22, [#allocation6], %s2719_s10, %s2719_s10, %s2720_s12  }
  0x1a   : > { %s249_s26 = sshll.u32 %s3134_s2, 4  ;;  %s283_s24 = sshll.u32 %s3118_s6, 4  ;;  %s250_s26 = int_to_ptr.hbm [resolvable:$true] %s249_s26  ;;  %s284_s24 = int_to_ptr.hbm [resolvable:$true] %s283_s24 }
  0x1b   : > { %2432 = dma.hbm_to_vmem [thread:$0]  (!%p2838_p12), %s250_s26, 3072, %s252_s18, [#allocation3], %s2722_s19, %s2722_s19, %s2723_s21  }
  0x1c   : > { %s2724_s25 = smov [#allocation7]   ;;  %s2725_s29 = smov 64  }
  0x1d   : > { %s285_s2 = sshll.u32 %s2724_s25, 4  ;;  %s2726_s11 = smov 4   ;;  %s286_s2 = int_to_ptr.vmem [resolvable:$true] %s285_s2 }
  0x1e   : > { %2438 = dma.hbm_to_vmem [thread:$0]  (!%p2838_p12), %s284_s24, 4096, %s286_s2, [#allocation6], %s2725_s29, %s2725_s29, %s2726_s11  }
  0x1f   : > { %317 = sbr.rel (%p2827_p10) target bundleno = 2300 (0x8fc), region = 48 }
  0x24   : > { %2691 = dma.done.wait (%p2443_p9), [#allocation3], 3072  }
  0x25   : > { %2693 = vsyncadd (%p2443_p9), [#allocation3], 4294964224 }
  0x26   : > { %2695 = dma.done.wait (%p2443_p9), [#allocation6], 8192  }
  0x27   : > { %2697 = vsyncadd (%p2443_p9), [#allocation6], 4294959104  ;;  %v2004_v0 = vld [vmem:[#allocation2 + $0xa8] sm:$0xf]  ;;  %v2340_v1 = vld [vmem:[#allocation2 + $0xb0] sm:$0xf0] }
  0x28   : > { %v2339_v2 = vld [vmem:[#allocation2 + $0xac] sm:$0xf]  ;;  %v2005_v3 = vor.u32 %v2340_v1, %v2004_v0  ;;  %v2006_v4 = vld [vmem:[#allocation2 + $0xb4] sm:$0xf0]  ;;  %v1992_v5 = vld [vmem:[#allocation2 + $0x90] sm:$0xf] }
  0x29   : > { %v2337_v6 = vld [vmem:[#allocation2 + $0x98] sm:$0xf0]  ;;  %v2009_v7 = vor.u32 %v2339_v2, %v2006_v4  ;;  %v2336_v8 = vld [vmem:[#allocation2 + $0x94] sm:$0xf]  ;;  %v1994_v9 = vld [vmem:[#allocation2 + $0x9c] sm:$0xf0] }
  0x2a   : > { %558 = vmatpush.bf16.msra.mxu0 %v2005_v3  ;;  %v1993_v10 = vor.u32 %v2337_v6, %v1992_v5  ;;  %v1997_v11 = vor.u32 %v2336_v8, %v1994_v9  ;;  %v1980_v12 = vld [vmem:[#allocation2 + $0x78] sm:$0xf]  ;;  %v2334_v13 = vld [vmem:[#allocation2 + $0x80] sm:$0xf0]  ;;  %v2333_v14 = vld [vmem:[#allocation2 + $0x7c] sm:$0xf] }
  0x2b   : > { %572 = vmatpush.bf16.msra.mxu1 %v2009_v7  ;;  %v1982_v15 = vld [vmem:[#allocation2 + $0x84] sm:$0xf0]  ;;  %v1981_v16 = vor.u32 %v2334_v13, %v1980_v12  ;;  %v1968_v18 = vld [vmem:[#allocation2 + $0x60] sm:$0xf]  ;;  %v2331_v19 = vld [vmem:[#allocation2 + $0x68] sm:$0xf0] }
  0x2c   : > { %v1985_v17 = vor.u32 %v2333_v14, %v1982_v15  ;;  %v2330_v20 = vld [vmem:[#allocation2 + $0x64] sm:$0xf]  ;;  %v1970_v21 = vld [vmem:[#allocation2 + $0x6c] sm:$0xf0]  ;;  %v1969_v22 = vor.u32 %v2331_v19, %v1968_v18  ;;  %v1956_v23 = vld [vmem:[#allocation2 + $0x48] sm:$0xf] }
  0x2d   : > { %v2328_v24 = vld [vmem:[#allocation2 + $0x50] sm:$0xf0]  ;;  %p372_p13 = scmp.lt.s32.totalorder %s2799_s9, 1  ;;  %v1973_v25 = vor.u32 %v2330_v20, %v1970_v21  ;;  %v2012_v26 = vld [vmem:[#allocation2 + $0xb0] sm:$0xf]  ;;  %v2883_v13 = vld [vmem:[%s3115_s3 + $0x8] sm:$0xff] }
  0x2e   : > { %559 = vmatpush.bf16.msra.mxu0 %v1993_v10  ;;  %v2341_v27 = vld [vmem:[#allocation2 + $0xb8] sm:$0xf0]  ;;  %v2000_v28 = vld [vmem:[#allocation2 + $0x98] sm:$0xf]  ;;  %v2327_v29 = vld [vmem:[#allocation2 + $0x4c] sm:$0xf]  ;;  %v1957_v33 = vor.u32 %v2328_v24, %v1956_v23 }
  0x2f   : > { %573 = vmatpush.bf16.msra.mxu1 %v1997_v11  ;;  %v1958_v30 = vld [vmem:[#allocation2 + $0x54] sm:$0xf0]  ;;  %v2013_v31 = vor.u32 %v2341_v27, %v2012_v26  ;;  %v2338_v32 = vld [vmem:[#allocation2 + $0xa0] sm:$0xf0]  ;;  %v1944_v34 = vld [vmem:[#allocation2 + $0x30] sm:$0xf] }
  0x30   : > { %v2001_v35 = vor.u32 %v2338_v32, %v2000_v28  ;;  %v1961_v36 = vor.u32 %v2327_v29, %v1958_v30  ;;  %v2325_v37 = vld [vmem:[#allocation2 + $0x38] sm:$0xf0]  ;;  %v1988_v38 = vld [vmem:[#allocation2 + $0x80] sm:$0xf]  ;;  %v2335_v39 = vld [vmem:[#allocation2 + $0x88] sm:$0xf0] }
  0x31   : > { %586 = vmatpush.bf16.msra.mxu2 %v2013_v31  ;;  %v2324_v40 = vld [vmem:[#allocation2 + $0x34] sm:$0xf]  ;;  %v1946_v41 = vld [vmem:[#allocation2 + $0x3c] sm:$0xf0]  ;;  %s373_s2 = scalar_select %p372_p13, %s2799_s9, 1  ;;  %v1945_v42 = vor.u32 %v2325_v37, %v1944_v34  ;;  %v1989_v44 = vor.u32 %v2335_v39, %v1988_v38  ;;  %v428_v14 = vperm.slane %v2883_v13, 0 }
  0x32   : > { %560 = vmatpush.bf16.msra.mxu0 %v1981_v16  ;;  %v1932_v43 = vld [vmem:[#allocation2 + $0x18] sm:$0xf]  ;;  %v1949_v45 = vor.u32 %v2324_v40, %v1946_v41  ;;  %v2322_v46 = vld [vmem:[#allocation2 + $0x20] sm:$0xf0]  ;;  %v1976_v47 = vld [vmem:[#allocation2 + $0x68] sm:$0xf] }
  0x33   : > { %574 = vmatpush.bf16.msra.mxu1 %v1985_v17  ;;  %v2332_v48 = vld [vmem:[#allocation2 + $0x70] sm:$0xf0]  ;;  %v2321_v49 = vld [vmem:[#allocation2 + $0x1c] sm:$0xf]  ;;  %v1934_v50 = vld [vmem:[#allocation2 + $0x24] sm:$0xf0]  ;;  %v1933_v51 = vor.u32 %v2322_v46, %v1932_v43 }
  0x34   : > { %s2868_s5 = sshll.u32 %s373_s2, 4  ;;  %v1920_v52 = vld [vmem:[#allocation2] sm:$0xf]  ;;  %v1977_v53 = vor.u32 %v2332_v48, %v1976_v47  ;;  %v1937_v54 = vor.u32 %v2321_v49, %v1934_v50  ;;  %v2319_v55 = vld [vmem:[#allocation2 + $0x8] sm:$0xf0]  ;;  %vm603_vm0 = vcmask 261120  }
  0x35   : > { %587 = vmatpush.bf16.msra.mxu2 %v2001_v35  ;;  %s376_s14 = scalar_lea.vmem %s3112_s0, %s2868_s5  ;;  %v1964_v56 = vld [vmem:[#allocation2 + $0x50] sm:$0xf]  ;;  %v2329_v57 = vld [vmem:[#allocation2 + $0x58] sm:$0xf0]  ;;  %v2318_v58 = vld [vmem:[#allocation2 + $0x4] sm:$0xf]  ;;  %v1921_v60 = vor.u32 %v2319_v55, %v1920_v52  ;;  %s381_s11 = scalar_lea.vmem %s3113_s1, %s2868_s5 }
  0x36   : > { %561 = vmatpush.bf16.msra.mxu0 %v1969_v22  ;;  %v1922_v59 = vld [vmem:[#allocation2 + $0xc] sm:$0xf0]  ;;  %v2874_v61 = vld [vmem:[%s376_s14] sm:$0xff]  ;;  %v2876_v62 = vld [vmem:[%s376_s14 + $0x8] sm:$0xff]  ;;  %v1965_v63 = vor.u32 %v2329_v57, %v1964_v56  ;;  %s2727_s26 = smov 96   ;;  %s2728_s13 = smov 64  }
  0x37   : > { %575 = vmatpush.bf16.msra.mxu1 %v1973_v25  ;;  %v1925_v0 = vor.u32 %v2318_v58, %v1922_v59  ;;  %v1952_v1 = vld [vmem:[#allocation2 + $0x38] sm:$0xf]  ;;  %v2326_v2 = vld [vmem:[#allocation2 + $0x40] sm:$0xf0]  ;;  %v394_v3 = vpack.c.bf16 %v2876_v62, %v2874_v61  ;;  %v1940_v5 = vld [vmem:[#allocation2 + $0x20] sm:$0xf] }
  0x38   : > { %v1953_v4 = vor.u32 %v2326_v2, %v1952_v1  ;;  %v2323_v6 = vld [vmem:[#allocation2 + $0x28] sm:$0xf0]  ;;  %v1928_v8 = vld [vmem:[#allocation2 + $0x8] sm:$0xf]  ;;  %v2320_v9 = vld [vmem:[#allocation2 + $0x10] sm:$0xf0] }
  0x39   : > { %588 = vmatpush.bf16.msra.mxu2 %v1989_v44  ;;  %v1941_v7 = vor.u32 %v2323_v6, %v1940_v5  ;;  %v1929_v10 = vor.u32 %v2320_v9, %v1928_v8  ;;  %v2889_v15 = vld [vmem:[%s3115_s3] sm:$0xff]  ;;  %v2897_v25 = vld [vmem:[%s3115_s3 + $0x10] sm:$0xff]  ;;  %s2729_s18 = smov 32   ;;  %vm624_vm1 = vcmask 130048   ;;  %vm906_vm2 = vcmask 523264   ;;  %s362_s25 = sand.u32 1, %s2708_s28  }
  0x3a   : > { %562 = vmatpush.bf16.msra.mxu0 %v1957_v33  ;;  %v427_v19 = vperm.slane %v2889_v15, 0  ;;  %v429_v28 = vperm.slane %v2897_v25, 0  ;;  %vm909_vm3 = vcmask 785408   ;;  %s1911_s14 = sshll.u32 %s362_s25, 4  ;;  %s2414_s17 = sshll.u32 %s2799_s9, 4 }
  0x3b   : > { %576 = vmatpush.bf16.msra.mxu1 %v1961_v36  ;;  %s1764_s23 = scalar_lea.hbm %s3119_s7, %s2414_s17  ;;  %s364_s10 = scalar_lea.vmem [#allocation8], %s1911_s14 }
  0x3c   : > { %s1765_s9 = sshll.u32 %s364_s10, 4  ;;  %s1748_s19 = scalar_lea.sflag [#allocation4], %s362_s25  ;;  %s1766_s9 = int_to_ptr.vmem [resolvable:$true] %s1765_s9 }
  0x3d   : > { %589 = vmatpush.bf16.msra.mxu2 %v1977_v53  ;;  %s2666_s29 = scalar_lea.hbm %s3119_s7, 32 }
  0x3e   : > { %563 = vmatpush.bf16.msra.mxu0 %v1945_v42 }
  0x3f   : > { %577 = vmatpush.bf16.msra.mxu1 %v1949_v45 }
  0x41   : > { %590 = vmatpush.bf16.msra.mxu2 %v1965_v63 }
  0x42   : > { %564 = vmatpush.bf16.msra.mxu0 %v1933_v51 }
  0x43   : > { %578 = vmatpush.bf16.msra.mxu1 %v1937_v54 }
  0x45   : > { %591 = vmatpush.bf16.msra.mxu2 %v1953_v4 }
  0x46   : > { %565 = vmatpush.bf16.msra.mxu0 %v1921_v60 }
  0x47   : > { %579 = vmatpush.bf16.msra.mxu1 %v1925_v0 }
  0x49   : > { %566 = vmatmul.bf16.vlgmr.msra.gmra.mxu0 %v394_v3  ;;  %592 = vmatpush.bf16.msra.mxu2 %v1941_v7 }
  0x4a   : > { %580 = vmatmul.bf16.vlgmr.msra.gmra.mxu1 %v394_v3 }
  0x4d   : > { %593 = vmatpush.bf16.msra.mxu2 %v1929_v10 }
  0x50   : > { %594 = vmatmul.bf16.vlgmr.msra.gmra.mxu2 %v394_v3 }
  0xc6   : > { %v567_v12 = vpop.f32.mrf.mxu0 }
  0xc7   : > { %v581_v11 = vpop.f32.mrf.mxu1  ;;  %v568_v23 = vadd.f32 %v567_v12, %v427_v19 }
  0xc8   : > { %v582_v17 = vadd.f32 %v581_v11, %v428_v14 }
  0xce   : > { %v569_v21 = vpop.f32.mrf.mxu0 }
  0xcf   : > { %v583_v16 = vpop.f32.mrf.mxu1  ;;  %v570_v24 = vadd.f32 %v569_v21, %v427_v19 }
  0xd0   : > { %v584_v18 = vadd.f32 %v583_v16, %v428_v14 }
  0xd1   : > { %v600_v27 = vpack.c.bf16 %v570_v24, %v568_v23 }
  0xd2   : > { %v601_v20 = vpack.c.bf16 %v584_v18, %v582_v17 }
  0xd3   : > { %v595_v26 = vpop.f32.mrf.mxu2 }
  0xd4   : > { %671 = vrot.lane.b32.xlu2 %v601_v20, %s2727_s26  ;;  %v608_v22 = vsel %vm603_vm0, %v601_v20, 0  ;;  %v596_v29 = vadd.f32 %v595_v26, %v429_v28 }
  0xd5   : > { %617 = vmatpush.bf16.xpose.msra.mxu3 %v608_v22 }
  0xdb   : > { %v597_v30 = vpop.f32.mrf.mxu2 }
  0xdc   : > { %668 = vrot.lane.b32.xlu2 %v600_v27, %s2727_s26  ;;  %2014 = vmatmul.msk.bf16.vlgmr.msra.gmra.mxu3 %vm603_vm0, %v600_v27  ;;  %v598_v31 = vadd.f32 %v597_v30, %v429_v28 }
  0xde   : > { %v2902_v32 = vpack.c.bf16 %v598_v31, %v596_v29 }
  0xe0   : > { %658 = vmatpush.bf16.msrb.mxu3 %v2902_v32 }
  0xe4   : > { %739 = vrot.lane.b32.xlu2 %v600_v27, %s2728_s13 }
  0xec   : > { %808 = vrot.lane.b32.xlu2 %v600_v27, %s2729_s18 }
 0x12e   : > { %v672_v33 = vpop.permute.xlu2 %671 }
 0x12f   : > { %v677_v34 = vsel %vm603_vm0, %v672_v33, 0 }
 0x130   : > { %686 = vmatpush.bf16.xpose.msra.mxu3 %v677_v34 }
 0x136   : > { %v669_v49 = vpop.permute.xlu2 %668 }
 0x13e   : > { %v740_v52 = vpop.permute.xlu2 %739 }
 0x146   : > { %v809_v2 = vpop.permute.xlu2 %808 }
 0x15f   : > { %v619_v35 = vpop.f32.mrf.mxu3 }
 0x160   : > { %v625_v36 = vsel %vm624_vm1, %v619_v35, -inf }
 0x161   : > { %626 = vmax.xlane.f32.xlu0 %v625_v36 }
 0x167   : > { %v621_v37 = vpop.f32.mrf.mxu3 }
 0x168   : > { %v628_v38 = vsel %vm624_vm1, %v621_v37, -inf }
 0x169   : > { %629 = vmax.xlane.f32.xlu0 %v628_v38 }
 0x17d   : > { %741 = vrot.lane.b32.xlu0 %v601_v20, %s2728_s13 }
 0x1d4   : > { %v627_v39 = vpop.xlane.xlu0 %626 }
 0x1d5   : > { %v631_v40 = vsub.f32 %v619_v35, %v627_v39 }
 0x1d7   : > { %v633_v41 = vmul.f32 1.442695, %v631_v40 }
 0x1d9   : > { %2497 = vpow2.f32 %v633_v41 }
 0x1dc   : > { %v630_v42 = vpop.xlane.xlu0 %629 }
 0x1dd   : > { %v632_v43 = vsub.f32 %v621_v37, %v630_v42 }
 0x1df   : > { %v2498_v44 = vpop.eup %2497  ;;  %v635_v45 = vmul.f32 1.442695, %v632_v43 }
 0x1e0   : > { %v637_v46 = vsel %vm624_vm1, %v2498_v44, 0.0 }
 0x1e1   : > { %2499 = vpow2.f32 %v635_v45  ;;  %638 = vadd.xlane.f32.xlu1 %v637_v46 }
 0x1e7   : > { %v2500_v47 = vpop.eup %2499 }
 0x1e8   : > { %v640_v48 = vsel %vm624_vm1, %v2500_v47, 0.0 }
 0x1e9   : > { %641 = vadd.xlane.f32.xlu1 %v640_v48 }
 0x1ef   : > { %v742_v50 = vpop.permute.xlu0 %741 }
 0x1f0   : > { %v747_v51 = vsel %vm603_vm0, %v742_v50, 0 }
 0x1f1   : > { %756 = vmatpush.bf16.xpose.msrb.mxu2 %v747_v51 }
 0x1f8   : > { %2018 = vmatmul.msk.bf16.vlgmr.msrb.gmra.mxu2 %vm603_vm0, %v740_v52 }
 0x202   : > { %810 = vrot.lane.b32.xlu1 %v601_v20, %s2729_s18 }
 0x254   : > { %v639_v53 = vpop.xlane.xlu1 %638 }
 0x255   : > { %2501 = vrcp.f32 %v639_v53 }
 0x25b   : > { %v2502_v55 = vpop.eup %2501 }
 0x25c   : > { %v642_v54 = vpop.xlane.xlu1 %641  ;;  %v645_v57 = vmul.f32 %v2502_v55, %v2498_v44 }
 0x25d   : > { %2503 = vrcp.f32 %v642_v54 }
 0x263   : > { %v2504_v56 = vpop.eup %2503 }
 0x264   : > { %v646_v58 = vmul.f32 %v2504_v56, %v2500_v47 }
 0x266   : > { %v647_v59 = vpack.c.bf16 %v646_v58, %v645_v57 }
 0x268   : > { %2015 = vmatmul.msk.bf16.vlgmr.msrb.gmra.mxu3 %vm624_vm1, %v647_v59 }
 0x274   : > { %v811_v60 = vpop.permute.xlu1 %810 }
 0x275   : > { %v816_v63 = vsel %vm603_vm0, %v811_v60, 0 }
 0x276   : > { %825 = vmatpush.bf16.xpose.msrb.mxu3 %v816_v63 }
 0x278   : > { %2016 = vmatmul.msk.bf16.vlgmr.msra.gmra.mxu3 %vm603_vm0, %v669_v49 }
 0x27b   : > { %v758_v0 = vpop.f32.mrf.mxu2 }
 0x27c   : > { %v763_v1 = vsel %vm624_vm1, %v758_v0, -inf }
 0x27d   : > { %764 = vmax.xlane.f32.xlu1 %v763_v1 }
 0x283   : > { %v760_v19 = vpop.f32.mrf.mxu2 }
 0x284   : > { %v766_v22 = vsel %vm624_vm1, %v760_v19, -inf }
 0x288   : > { %2020 = vmatmul.msk.bf16.vlgmr.msrb.gmra.mxu3 %vm603_vm0, %v809_v2 }
 0x2eb   : > { %v660_v3 = vpop.f32.mrf.mxu3 }
 0x2ec   : > { %v665_v6 = vpack.c.bf16 %v660_v3, %v660_v3 }
 0x2ee   : > { %v2921_v10 = vunpack.c.l.b16 %v665_v6 }
 0x2f0   : > { %v765_v4 = vpop.xlane.xlu1 %764 }
 0x2f1   : > { %v769_v5 = vsub.f32 %v758_v0, %v765_v4 }
 0x2f3   : > { %v771_v7 = vmul.f32 1.442695, %v769_v5  ;;  %v662_v8 = vpop.f32.mrf.mxu3 }
 0x2f4   : > { %v666_v9 = vpack.c.bf16 %v662_v8, %v662_v8 }
 0x2f5   : > { %2505 = vpow2.f32 %v771_v7 }
 0x2f6   : > { %v2923_v11 = vunpack.c.l.b16 %v666_v9 }
 0x2f8   : > { %v881_v12 = vpack.c.b16 %v2923_v11, %v2921_v10  ;;  %v2730_v10 = vmov 128.0  }
 0x2fb   : > { %v2927_v14 = vpop.eup %2505  ;;  %v688_v16 = vpop.f32.mrf.mxu3 }
 0x2fc   : > { %v693_v17 = vsel %vm624_vm1, %v688_v16, -inf  ;;  %v775_v18 = vsel %vm624_vm1, %v2927_v14, 0.0 }
 0x2fd   : > { %694 = vmax.xlane.f32.xlu2 %v693_v17  ;;  %776 = vadd.xlane.f32.xlu1 %v775_v18 }
 0x303   : > { %v690_v20 = vpop.f32.mrf.mxu3 }
 0x304   : > { %v696_v21 = vsel %vm624_vm1, %v690_v20, -inf }
 0x305   : > { %697 = vmax.xlane.f32.xlu0 %v696_v21  ;;  %767 = vmax.xlane.f32.xlu2 %v766_v22  ;;  %v2349_v22 = vld [vmem:[%s3116_s4 + $0x38] sm:$0xff] }
 0x306   : > { %978 = vmatpush.bf16.msrb.mxu1 %v2349_v22  ;;  %v2176_v22 = vld [vmem:[#allocation5 + $0xe8] sm:$0xf] }
 0x30b   : > { %v827_v23 = vpop.f32.mrf.mxu3 }
 0x30c   : > { %v832_v24 = vsel %vm624_vm1, %v827_v23, -inf }
 0x30d   : > { %833 = vmax.xlane.f32.xlu0 %v832_v24 }
 0x313   : > { %v829_v26 = vpop.f32.mrf.mxu3 }
 0x314   : > { %v835_v27 = vsel %vm624_vm1, %v829_v26, -inf }
 0x315   : > { %836 = vmax.xlane.f32.xlu2 %v835_v27 }
 0x32d   : > { %717 = vrot.lane.b32.xlu2 %v2902_v32, %s2727_s26 }
 0x370   : > { %v695_v28 = vpop.xlane.xlu2 %694  ;;  %v777_v55 = vpop.xlane.xlu1 %776 }
 0x371   : > { %v699_v29 = vsub.f32 %v688_v16, %v695_v28 }
 0x373   : > { %v701_v30 = vmul.f32 1.442695, %v699_v29 }
 0x375   : > { %2507 = vpow2.f32 %v701_v30 }
 0x378   : > { %v768_v31 = vpop.xlane.xlu2 %767  ;;  %v698_v33 = vpop.xlane.xlu0 %697 }
 0x379   : > { %v770_v34 = vsub.f32 %v760_v19, %v768_v31  ;;  %v700_v37 = vsub.f32 %v690_v20, %v698_v33  ;;  %v2346_v31 = vld [vmem:[%s3116_s4 + $0x20] sm:$0xff] }
 0x37b   : > { %v2508_v35 = vpop.eup %2507  ;;  %v773_v36 = vmul.f32 1.442695, %v770_v34  ;;  %v703_v39 = vmul.f32 1.442695, %v700_v37 }
 0x37c   : > { %v705_v38 = vsel %vm624_vm1, %v2508_v35, 0.0 }
 0x37d   : > { %2509 = vpow2.f32 %v773_v36  ;;  %706 = vadd.xlane.f32.xlu1 %v705_v38 }
 0x37e   : > { %2511 = vpow2.f32 %v703_v39 }
 0x380   : > { %v834_v40 = vpop.xlane.xlu0 %833 }
 0x381   : > { %v838_v41 = vsub.f32 %v827_v23, %v834_v40 }
 0x383   : > { %v2510_v42 = vpop.eup %2509  ;;  %v840_v43 = vmul.f32 1.442695, %v838_v41 }
 0x384   : > { %v778_v44 = vsel %vm624_vm1, %v2510_v42, 0.0  ;;  %v2512_v46 = vpop.eup %2511 }
 0x385   : > { %2513 = vpow2.f32 %v840_v43  ;;  %779 = vadd.xlane.f32.xlu0 %v778_v44  ;;  %v708_v50 = vsel %vm624_vm1, %v2512_v46, 0.0 }
 0x388   : > { %v837_v45 = vpop.xlane.xlu2 %836 }
 0x389   : > { %v839_v47 = vsub.f32 %v829_v26, %v837_v45  ;;  %v2347_v26 = vld [vmem:[%s3116_s4 + $0x28] sm:$0xff] }
 0x38b   : > { %v2514_v48 = vpop.eup %2513  ;;  %v842_v49 = vmul.f32 1.442695, %v839_v47  ;;  %v2345_v47 = vld [vmem:[%s3116_s4 + $0x18] sm:$0xff] }
 0x38c   : > { %v844_v51 = vsel %vm624_vm1, %v2514_v48, 0.0 }
 0x38d   : > { %2515 = vpow2.f32 %v842_v49  ;;  %709 = vadd.xlane.f32.xlu0 %v708_v50  ;;  %845 = vadd.xlane.f32.xlu1 %v844_v51  ;;  %v2343_v49 = vld [vmem:[%s3116_s4 + $0x8] sm:$0xff]  ;;  %v2342_v50 = vld [vmem:[%s3116_s4] sm:$0xff] }
 0x390   : > { %v718_v52 = vpop.permute.xlu2 %717 }
 0x391   : > { %730 = vmatpush.bf16.msrb.mxu0 %v718_v52 }
 0x393   : > { %v2516_v53 = vpop.eup %2515 }
 0x394   : > { %v847_v54 = vsel %vm624_vm1, %v2516_v53, 0.0 }
 0x395   : > { %848 = vadd.xlane.f32.xlu0 %v847_v54 }
 0x3a6   : > { %786 = vrot.lane.b32.xlu1 %v2902_v32, %s2728_s13 }
 0x3a9   : > { %855 = vrot.lane.b32.xlu0 %v2902_v32, %s2729_s18 }
 0x3f0   : > { %v707_v57 = vpop.xlane.xlu1 %706 }
 0x3f1   : > { %2517 = vrcp.f32 %v707_v57  ;;  %v929_v57 = vperm.slane %v2889_v15, 1 }
 0x3f7   : > { %v2518_v59 = vpop.eup %2517 }
 0x3f8   : > { %v780_v56 = vpop.xlane.xlu0 %779  ;;  %v713_v63 = vmul.f32 %v2518_v59, %v2508_v35 }
 0x400   : > { %v710_v58 = vpop.xlane.xlu0 %709  ;;  %v846_v3 = vpop.xlane.xlu1 %845 }
 0x401   : > { %2519 = vrcp.f32 %v710_v58 }
 0x402   : > { %2521 = vrcp.f32 %v780_v56 }
 0x403   : > { %2523 = vrcp.f32 %v777_v55 }
 0x407   : > { %v2520_v60 = vpop.eup %2519 }
 0x408   : > { %v714_v0 = vmul.f32 %v2520_v60, %v2512_v46  ;;  %v849_v2 = vpop.xlane.xlu0 %848  ;;  %v2522_v32 = vpop.eup %2521 }
 0x409   : > { %2525 = vrcp.f32 %v849_v2  ;;  %v2524_v4 = vpop.eup %2523  ;;  %v784_v6 = vmul.f32 %v2522_v32, %v2510_v42 }
 0x40a   : > { %v715_v1 = vpack.c.bf16 %v714_v0, %v713_v63  ;;  %2527 = vrcp.f32 %v846_v3  ;;  %v783_v8 = vmul.f32 %v2524_v4, %v2927_v14  ;;  %v2348_v14 = vld [vmem:[%s3116_s4 + $0x30] sm:$0xff] }
 0x40b   : > { %979 = vmatpush.bf16.msrb.mxu1 %v2348_v14  ;;  %2529 = vrcp.f32 %v2730_v10  ;;  %v2130_v10 = vld [vmem:[#allocation5 + $0x98] sm:$0xf0] }
 0x40c   : > { %2017 = vmatmul.msk.bf16.vlgmr.msrb.gmra.mxu0 %vm624_vm1, %v715_v1  ;;  %v785_v17 = vpack.c.bf16 %v784_v6, %v783_v8 }
 0x40f   : > { %v2526_v5 = vpop.eup %2525  ;;  %980 = vmatpush.bf16.msrb.mxu1 %v2347_v26  ;;  %v2379_v26 = vld [vmem:[#allocation5 + $0xec] sm:$0xf] }
 0x410   : > { %v2528_v7 = vpop.eup %2527  ;;  %v853_v16 = vmul.f32 %v2526_v5, %v2516_v53 }
 0x411   : > { %v852_v18 = vmul.f32 %v2528_v7, %v2514_v48  ;;  %v2344_v48 = vld [vmem:[%s3116_s4 + $0x10] sm:$0xff]  ;;  %v2530_v11 = vpop.eup %2529 }
 0x412   : > { %vm1003_vm4 = vweird.f32 %v2530_v11 }
 0x413   : > { %v854_v20 = vpack.c.bf16 %v853_v16, %v852_v18  ;;  %981 = vmatpush.bf16.msrb.mxu1 %v2346_v31  ;;  %v2380_v18 = vld [vmem:[#allocation5 + $0xec] sm:$0xf0]  ;;  %v2374_v31 = vld [vmem:[#allocation5 + $0xc4] sm:$0xf] }
 0x417   : > { %982 = vmatpush.bf16.msrb.mxu1 %v2345_v47  ;;  %v2144_v47 = vld [vmem:[#allocation5 + $0xa8] sm:$0xf] }
 0x418   : > { %v787_v9 = vpop.permute.xlu1 %786 }
 0x419   : > { %799 = vmatpush.bf16.msra.mxu2 %v787_v9 }
 0x41b   : > { %v856_v19 = vpop.permute.xlu0 %855  ;;  %983 = vmatpush.bf16.msrb.mxu1 %v2344_v48  ;;  %v2373_v48 = vld [vmem:[#allocation5 + $0xb4] sm:$0xf0] }
 0x41c   : > { %2019 = vmatmul.msk.bf16.vlgmr.msra.gmra.mxu2 %vm624_vm1, %v785_v17  ;;  %868 = vmatpush.bf16.msra.mxu0 %v856_v19  ;;  %v2168_v17 = vld [vmem:[#allocation5 + $0xe0] sm:$0xf]  ;;  %v2378_v19 = vld [vmem:[#allocation5 + $0xe4] sm:$0xf] }
 0x41f   : > { %2021 = vmatmul.msk.bf16.vlgmr.msra.gmra.mxu0 %vm624_vm1, %v854_v20  ;;  %984 = vmatpush.bf16.msrb.mxu1 %v2343_v49  ;;  %v2169_v20 = vor.u32 %v2380_v18, %v2168_v17  ;;  %v2114_v17 = vld [vmem:[#allocation5 + $0x78] sm:$0xf0] }
 0x421   : > { %1244 = vmatpush.bf16.msrb.mxu2 %v2169_v20  ;;  %v2360_v20 = vld [vmem:[#allocation5 + $0x4c] sm:$0xf0] }
 0x423   : > { %985 = vmatpush.bf16.msrb.mxu1 %v2342_v50  ;;  %v2145_v50 = vor.u32 %v2373_v48, %v2144_v47  ;;  %v2352_v47 = vld [vmem:[#allocation5 + $0xc] sm:$0xf0]  ;;  %v2350_v48 = vld [vmem:[#allocation5 + $0x4] sm:$0xf] }
 0x489   : > { %v732_v21 = vpop.f32.mrf.mxu0 }
 0x48a   : > { %v737_v37 = vpack.c.bf16 %v732_v21, %v732_v21  ;;  %v2170_v21 = vld [vmem:[#allocation5 + $0xf0] sm:$0xf0] }
 0x48c   : > { %v884_v40 = vunpack.c.l.b16 %v737_v37 }
 0x491   : > { %v734_v23 = vpop.f32.mrf.mxu0 }
 0x492   : > { %v738_v35 = vpack.c.bf16 %v734_v23, %v734_v23  ;;  %v2381_v23 = vld [vmem:[#allocation5 + $0xf4] sm:$0xf0] }
 0x493   : > { %v2177_v14 = vor.u32 %v2381_v23, %v2176_v22  ;;  %v2090_v23 = vld [vmem:[#allocation5 + $0x50] sm:$0xf0] }
 0x494   : > { %v885_v38 = vunpack.c.l.b16 %v738_v35  ;;  %v2160_v35 = vld [vmem:[#allocation5 + $0xc8] sm:$0xf] }
 0x495   : > { %1272 = vmatpush.bf16.msrb.mxu0 %v2177_v14  ;;  %v2361_v14 = vld [vmem:[#allocation5 + $0x54] sm:$0xf0] }
 0x496   : > { %v886_v41 = vpack.c.b16 %v885_v38, %v884_v40  ;;  %v2162_v40 = vld [vmem:[#allocation5 + $0xd8] sm:$0xf0] }
 0x49c   : > { %v870_v28 = vpop.f32.mrf.mxu0 }
 0x49d   : > { %v875_v43 = vpack.c.bf16 %v870_v28, %v870_v28 }
 0x49f   : > { %v801_v24 = vpop.f32.mrf.mxu2  ;;  %v898_v45 = vunpack.c.l.b16 %v875_v43  ;;  %v2372_v43 = vld [vmem:[#allocation5 + $0xac] sm:$0xf0] }
 0x4a0   : > { %v806_v27 = vpack.c.bf16 %v801_v24, %v801_v24  ;;  %v2173_v24 = vor.u32 %v2378_v19, %v2170_v21  ;;  %v2088_v19 = vld [vmem:[#allocation5 + $0x40] sm:$0xf]  ;;  %v2358_v21 = vld [vmem:[#allocation5 + $0x44] sm:$0xf] }
 0x4a1   : > { %v2089_v22 = vor.u32 %v2360_v20, %v2088_v19 }
 0x4a2   : > { %v891_v33 = vunpack.c.l.b16 %v806_v27  ;;  %v2178_v27 = vld [vmem:[#allocation5 + $0xf8] sm:$0xf0]  ;;  %1258 = vmatpush.bf16.msra.mxu3 %v2173_v24  ;;  %v2096_v24 = vld [vmem:[#allocation5 + $0x48] sm:$0xf] }
 0x4a3   : > { %v2181_v28 = vor.u32 %v2379_v26, %v2178_v27  ;;  %v2093_v26 = vor.u32 %v2358_v21, %v2090_v23  ;;  %v2097_v27 = vor.u32 %v2361_v14, %v2096_v24  ;;  %v1044_v21 = vperm.slane %v2889_v15, 3 }
 0x4a4   : > { %v872_v39 = vpop.f32.mrf.mxu0 }
 0x4a5   : > { %v876_v42 = vpack.c.bf16 %v872_v39, %v872_v39  ;;  %1286 = vmatpush.bf16.msra.mxu1 %v2181_v28  ;;  %v2375_v39 = vld [vmem:[#allocation5 + $0xcc] sm:$0xf] }
 0x4a6   : > { %v2359_v28 = vld [vmem:[#allocation5 + $0x4c] sm:$0xf] }
 0x4a7   : > { %v803_v29 = vpop.f32.mrf.mxu2  ;;  %v899_v44 = vunpack.c.l.b16 %v876_v42  ;;  %v2136_v42 = vld [vmem:[#allocation5 + $0xa0] sm:$0xf] }
 0x4a8   : > { %v807_v30 = vpack.c.bf16 %v803_v29, %v803_v29  ;;  %v2152_v29 = vld [vmem:[#allocation5 + $0xc0] sm:$0xf] }
 0x4a9   : > { %v900_v46 = vpack.c.b16 %v899_v44, %v898_v45  ;;  %v2370_v44 = vld [vmem:[#allocation5 + $0xa4] sm:$0xf]  ;;  %v2137_v45 = vor.u32 %v2372_v43, %v2136_v42  ;;  %v2355_v42 = vld [vmem:[#allocation5 + $0x2c] sm:$0xf]  ;;  %v2082_v43 = vld [vmem:[#allocation5 + $0x38] sm:$0xf0] }
 0x4aa   : > { %v892_v34 = vunpack.c.l.b16 %v807_v30  ;;  %v2376_v30 = vld [vmem:[#allocation5 + $0xcc] sm:$0xf0] }
 0x4ac   : > { %v893_v36 = vpack.c.b16 %v892_v34, %v891_v33  ;;  %v2153_v33 = vor.u32 %v2376_v30, %v2152_v29  ;;  %v2154_v34 = vld [vmem:[#allocation5 + $0xd0] sm:$0xf0]  ;;  %v2098_v29 = vld [vmem:[#allocation5 + $0x58] sm:$0xf0] }
 0x4ad   : > { %v2157_v37 = vor.u32 %v2374_v31, %v2154_v34  ;;  %v2101_v30 = vor.u32 %v2359_v28, %v2098_v29  ;;  %v2072_v31 = vld [vmem:[#allocation5 + $0x20] sm:$0xf]  ;;  %v2354_v34 = vld [vmem:[#allocation5 + $0x24] sm:$0xf]  ;;  %v2389_v28 = vld [vmem:[#allocation7 + $0x38] sm:$0xff] }
 0x4ae   : > { %894 = vrot.lane.b32.xlu2 %v893_v36, %s2728_s13  ;;  %v2377_v36 = vld [vmem:[#allocation5 + $0xd4] sm:$0xf0]  ;;  %1245 = vmatpush.bf16.msrb.mxu2 %v2153_v33  ;;  %v2356_v33 = vld [vmem:[#allocation5 + $0x2c] sm:$0xf0] }
 0x4af   : > { %v2161_v38 = vor.u32 %v2377_v36, %v2160_v35  ;;  %1259 = vmatpush.bf16.msra.mxu3 %v2157_v37  ;;  %v2073_v35 = vor.u32 %v2356_v33, %v2072_v31  ;;  %v2074_v36 = vld [vmem:[#allocation5 + $0x30] sm:$0xf0]  ;;  %v2080_v37 = vld [vmem:[#allocation5 + $0x28] sm:$0xf]  ;;  %v2397_v29 = vld [vmem:[#allocation7 + $0x78] sm:$0xff] }
 0x4b0   : > { %v2411_v31 = vld [vmem:[#allocation7 + $0xe8] sm:$0xff]  ;;  %v2388_v33 = vld [vmem:[#allocation7 + $0x30] sm:$0xff] }
 0x4b1   : > { %1273 = vmatpush.bf16.msrb.mxu0 %v2161_v38  ;;  %v2357_v38 = vld [vmem:[#allocation5 + $0x34] sm:$0xf0] }
 0x4b2   : > { %1246 = vmatpush.bf16.msrb.mxu2 %v2137_v45 }
 0x4b5   : > { %1274 = vmatpush.bf16.msrb.mxu0 %v2145_v50 }
 0x4b6   : > { %887 = vrot.lane.b32.xlu2 %v886_v41, %s2729_s18  ;;  %v2165_v41 = vor.u32 %v2375_v39, %v2162_v40  ;;  %v2077_v40 = vor.u32 %v2354_v34, %v2074_v36  ;;  %v2396_v34 = vld [vmem:[#allocation7 + $0x70] sm:$0xff]  ;;  %v2410_v36 = vld [vmem:[#allocation7 + $0xe0] sm:$0xff]  ;;  %s3079_s18 = scalar_lea.vmem %s3120_s8, %s2868_s5 }
 0x4b8   : > { %1287 = vmatpush.bf16.msra.mxu1 %v2165_v41  ;;  %v2081_v41 = vor.u32 %v2357_v38, %v2080_v37  ;;  %v2387_v37 = vld [vmem:[#allocation7 + $0x28] sm:$0xff] }
 0x4b9   : > { %v2395_v38 = vld [vmem:[#allocation7 + $0x68] sm:$0xff] }
 0x4be   : > { %901 = vrot.lane.b32.xlu2 %v900_v46, %s2727_s26  ;;  %v2138_v46 = vld [vmem:[#allocation5 + $0xb0] sm:$0xf0]  ;;  %s1767_s26 = sshll.u32 %s1764_s23, 4  ;;  %s1768_s26 = int_to_ptr.hbm [resolvable:$true] %s1767_s26 }
 0x4bf   : > { %v2141_v49 = vor.u32 %v2370_v44, %v2138_v46  ;;  %v2056_v44 = vld [vmem:[#allocation5] sm:$0xf]  ;;  %v2085_v46 = vor.u32 %v2355_v42, %v2082_v43  ;;  %v2400_v43 = vld [vmem:[#allocation7 + $0x90] sm:$0xff]  ;;  %s2660_s21 = sshra.s32 %s1768_s26, 4  ;;  %s2661_s21 = int_to_ptr.hbm [resolvable:$true] %s2660_s21 }
 0x4c0   : > { %v2057_v50 = vor.u32 %v2352_v47, %v2056_v44  ;;  %v2394_v42 = vld [vmem:[#allocation7 + $0x60] sm:$0xff]  ;;  %v2408_v44 = vld [vmem:[#allocation7 + $0xd0] sm:$0xff]  ;;  %v2393_v47 = vld [vmem:[#allocation7 + $0x58] sm:$0xff]  ;;  %s2662_s5 = scalar_lea.hbm %s2661_s21, 16  ;;  %p2667_p3 = scmp.lt.s32.totalorder %s2661_s21, %s3119_s7 }
 0x4c1   : > { %1260 = vmatpush.bf16.msra.mxu3 %v2141_v49  ;;  %v2058_v49 = vld [vmem:[#allocation5 + $0x10] sm:$0xf0]  ;;  %p2663_p0 = scmp.ne.s32.totalorder %s2661_s21, %s2662_s5  ;;  %p2668_p4 = scmp.lt.s32.totalorder %s2666_s29, %s2662_s5 }
 0x4c3   : > { %p2664_p1 = pnand %p2663_p0, %p2816_p5  ;;  %p2669_p7 = por %p2668_p4, %p2667_p3 }
 0x4c5   : > { %p2665_p2 = pneg %p2664_p1 }
 0x4c7   : > { %p2670_p8 = pnand %p2669_p7, %p2665_p2 }
 0x508   : > { %v895_v51 = vpop.permute.xlu2 %894 }
 0x510   : > { %v888_v52 = vpop.permute.xlu2 %887 }
 0x511   : > { %v905_v53 = vsel %vm603_vm0, %v881_v12, %v888_v52  ;;  %v999_v12 = vmul.f32 128.0, %v2530_v11  ;;  %v2146_v52 = vld [vmem:[#allocation5 + $0xb8] sm:$0xf0] }
 0x512   : > { %v908_v55 = vsel %vm906_vm2, %v905_v53, %v895_v51  ;;  %v2371_v51 = vld [vmem:[#allocation5 + $0xac] sm:$0xf] }
 0x513   : > { %v1000_v2 = vsub.f32 1.0, %v999_v12  ;;  %v2149_v53 = vor.u32 %v2371_v51, %v2146_v52  ;;  %v2104_v12 = vld [vmem:[#allocation5 + $0x60] sm:$0xf]  ;;  %v2061_v51 = vor.u32 %v2350_v48, %v2058_v49  ;;  %v2064_v52 = vld [vmem:[#allocation5 + $0x8] sm:$0xf] }
 0x514   : > { %v2399_v48 = vld [vmem:[#allocation7 + $0x88] sm:$0xff] }
 0x515   : > { %v1001_v3 = vmul.f32 %v2530_v11, %v1000_v2  ;;  %1288 = vmatpush.bf16.msra.mxu1 %v2149_v53  ;;  %v2364_v2 = vld [vmem:[#allocation5 + $0x6c] sm:$0xf0]  ;;  %v2353_v53 = vld [vmem:[#allocation5 + $0x14] sm:$0xf0]  ;;  %v2407_v49 = vld [vmem:[#allocation7 + $0xc8] sm:$0xff] }
 0x517   : > { %v1002_v32 = vadd.f32 %v2530_v11, %v1001_v3  ;;  %v2362_v3 = vld [vmem:[#allocation5 + $0x64] sm:$0xf] }
 0x518   : > { %v902_v54 = vpop.permute.xlu2 %901 }
 0x519   : > { %v911_v56 = vsel %vm909_vm3, %v908_v55, %v902_v54  ;;  %v2985_v4 = vsel %vm1003_vm4, %v2530_v11, %v1002_v32  ;;  %v2120_v54 = vld [vmem:[#allocation5 + $0x80] sm:$0xf]  ;;  %v2368_v55 = vld [vmem:[#allocation5 + $0x8c] sm:$0xf0]  ;;  %v2105_v32 = vor.u32 %v2364_v2, %v2104_v12 }
 0x51a   : > { %986 = vmatmul.bf16.vlgmr.msrb.gmra.mxu1 %v911_v56  ;;  %v2366_v56 = vld [vmem:[#allocation5 + $0x84] sm:$0xf] }
 0x597   : > { %v987_v58 = vpop.f32.mrf.mxu1 }
 0x598   : > { %v988_v59 = vadd.f32 %v987_v58, %v929_v57  ;;  %v2122_v58 = vld [vmem:[#allocation5 + $0x90] sm:$0xf0] }
 0x59a   : > { %v992_v60 = vadd.f32 %v988_v59, %v2874_v61  ;;  %v2128_v59 = vld [vmem:[#allocation5 + $0x88] sm:$0xf] }
 0x59c   : > { %994 = vadd.xlane.f32.xlu0 %v992_v60 }
 0x59f   : > { %v989_v63 = vpop.f32.mrf.mxu1 }
 0x5a0   : > { %v990_v0 = vadd.f32 %v989_v63, %v929_v57  ;;  %v2121_v57 = vor.u32 %v2368_v55, %v2120_v54  ;;  %v2125_v63 = vor.u32 %v2366_v56, %v2122_v58  ;;  %v2351_v54 = vld [vmem:[#allocation5 + $0xc] sm:$0xf]  ;;  %v2065_v56 = vor.u32 %v2353_v53, %v2064_v52  ;;  %v2384_v52 = vld [vmem:[#allocation7 + $0x10] sm:$0xff] }
 0x5a1   : > { %v2392_v53 = vld [vmem:[#allocation7 + $0x50] sm:$0xff] }
 0x5a2   : > { %v993_v1 = vadd.f32 %v990_v0, %v2876_v62  ;;  %1247 = vmatpush.bf16.msrb.mxu2 %v2121_v57  ;;  %1261 = vmatpush.bf16.msra.mxu3 %v2125_v63  ;;  %v2066_v57 = vld [vmem:[#allocation5 + $0x18] sm:$0xf0] }
 0x5a3   : > { %v2069_v58 = vor.u32 %v2351_v54, %v2066_v57  ;;  %v2406_v57 = vld [vmem:[#allocation7 + $0xc0] sm:$0xff] }
 0x5a4   : > { %996 = vadd.xlane.f32.xlu1 %v993_v1 }
 0x5a6   : > { %1248 = vmatpush.bf16.msrb.mxu2 %v2105_v32 }
 0x5aa   : > { %1249 = vmatpush.bf16.msrb.mxu2 %v2089_v22 }
 0x5ae   : > { %1250 = vmatpush.bf16.msrb.mxu2 %v2073_v35  ;;  %v2402_v35 = vld [vmem:[#allocation7 + $0xa0] sm:$0xff] }
 0x5b2   : > { %1251 = vmatpush.bf16.msrb.mxu2 %v2057_v50  ;;  %v1082_v50 = vperm.slane %v2897_v25, 4  ;;  %v2383_v25 = vld [vmem:[#allocation7 + $0x8] sm:$0xff] }
 0x5b6   : > { %1633 = vmatpush.bf16.msra.mxu2 %v2389_v28 }
 0x5ba   : > { %1634 = vmatpush.bf16.msra.mxu2 %v2388_v33 }
 0x5be   : > { %1635 = vmatpush.bf16.msra.mxu2 %v2387_v37 }
 0x60f   : > { %v995_v5 = vpop.xlane.xlu0 %994 }
 0x610   : > { %v1005_v6 = vmul.f32 %v2985_v4, %v995_v5  ;;  %v2106_v5 = vld [vmem:[#allocation5 + $0x70] sm:$0xf0] }
 0x612   : > { %v2988_v61 = vsub.f32 %v992_v60, %v1005_v6  ;;  %v2369_v60 = vld [vmem:[#allocation5 + $0x94] sm:$0xf0]  ;;  %v2112_v6 = vld [vmem:[#allocation5 + $0x68] sm:$0xf] }
 0x613   : > { %v2129_v0 = vor.u32 %v2369_v60, %v2128_v59 }
 0x614   : > { %v1009_v7 = vmul.f32 %v2988_v61, %v2988_v61 }
 0x615   : > { %1275 = vmatpush.bf16.msrb.mxu0 %v2129_v0 }
 0x616   : > { %1011 = vadd.xlane.f32.xlu2 %v1009_v7  ;;  %v2365_v7 = vld [vmem:[#allocation5 + $0x74] sm:$0xf0] }
 0x617   : > { %v997_v62 = vpop.xlane.xlu1 %996 }
 0x618   : > { %v1006_v8 = vmul.f32 %v2985_v4, %v997_v62  ;;  %v2109_v62 = vor.u32 %v2362_v3, %v2106_v5 }
 0x61a   : > { %v2993_v9 = vsub.f32 %v993_v1, %v1006_v8  ;;  %v2367_v1 = vld [vmem:[#allocation5 + $0x8c] sm:$0xf]  ;;  %v2113_v8 = vor.u32 %v2365_v7, %v2112_v6  ;;  %1262 = vmatpush.bf16.msra.mxu3 %v2109_v62 }
 0x61b   : > { %v2133_v11 = vor.u32 %v2367_v1, %v2130_v10 }
 0x61c   : > { %v1010_v16 = vmul.f32 %v2993_v9, %v2993_v9  ;;  %1276 = vmatpush.bf16.msrb.mxu0 %v2113_v8 }
 0x61d   : > { %1289 = vmatpush.bf16.msra.mxu1 %v2133_v11 }
 0x61e   : > { %1013 = vadd.xlane.f32.xlu0 %v1010_v16  ;;  %v2363_v16 = vld [vmem:[#allocation5 + $0x6c] sm:$0xf]  ;;  %1263 = vmatpush.bf16.msra.mxu3 %v2093_v26  ;;  %v2413_v26 = vld [vmem:[#allocation7 + $0xf8] sm:$0xff] }
 0x61f   : > { %v2117_v18 = vor.u32 %v2363_v16, %v2114_v17  ;;  %v1041_v16 = vperm.slane %v2889_v15, 2 }
 0x620   : > { %1277 = vmatpush.bf16.msrb.mxu0 %v2097_v27  ;;  %v2412_v27 = vld [vmem:[#allocation7 + $0xf0] sm:$0xff] }
 0x621   : > { %1290 = vmatpush.bf16.msra.mxu1 %v2117_v18 }
 0x622   : > { %1264 = vmatpush.bf16.msra.mxu3 %v2077_v40  ;;  %v2409_v40 = vld [vmem:[#allocation7 + $0xd8] sm:$0xff] }
 0x624   : > { %1278 = vmatpush.bf16.msrb.mxu0 %v2081_v41  ;;  %v2386_v41 = vld [vmem:[#allocation7 + $0x20] sm:$0xff] }
 0x625   : > { %1291 = vmatpush.bf16.msra.mxu1 %v2101_v30  ;;  %v2403_v30 = vld [vmem:[#allocation7 + $0xa8] sm:$0xff]  ;;  %1636 = vmatpush.bf16.msra.mxu2 %v2386_v41 }
 0x626   : > { %1265 = vmatpush.bf16.msra.mxu3 %v2061_v51 }
 0x628   : > { %1279 = vmatpush.bf16.msrb.mxu0 %v2065_v56  ;;  %v2398_v56 = vld [vmem:[#allocation7 + $0x80] sm:$0xff] }
 0x629   : > { %1292 = vmatpush.bf16.msra.mxu1 %v2085_v46  ;;  %v2385_v46 = vld [vmem:[#allocation7 + $0x18] sm:$0xff] }
 0x62a   : > { %1647 = vmatpush.bf16.msrb.mxu3 %v2397_v29  ;;  %1637 = vmatpush.bf16.msra.mxu2 %v2385_v46 }
 0x62d   : > { %1293 = vmatpush.bf16.msra.mxu1 %v2069_v58 }
 0x62e   : > { %1648 = vmatpush.bf16.msrb.mxu3 %v2396_v34  ;;  %1638 = vmatpush.bf16.msra.mxu2 %v2384_v52 }
 0x631   : > { %1675 = vmatpush.bf16.msrb.mxu1 %v2413_v26 }
 0x632   : > { %1649 = vmatpush.bf16.msrb.mxu3 %v2395_v38  ;;  %1639 = vmatpush.bf16.msra.mxu2 %v2383_v25 }
 0x635   : > { %1676 = vmatpush.bf16.msrb.mxu1 %v2412_v27 }
 0x636   : > { %1650 = vmatpush.bf16.msrb.mxu3 %v2394_v42 }
 0x639   : > { %1677 = vmatpush.bf16.msrb.mxu1 %v2411_v31 }
 0x63a   : > { %1651 = vmatpush.bf16.msrb.mxu3 %v2393_v47 }
 0x63d   : > { %1678 = vmatpush.bf16.msrb.mxu1 %v2410_v36 }
 0x63e   : > { %1652 = vmatpush.bf16.msrb.mxu3 %v2392_v53 }
 0x641   : > { %1679 = vmatpush.bf16.msrb.mxu1 %v2409_v40 }
 0x645   : > { %1680 = vmatpush.bf16.msrb.mxu1 %v2408_v44 }
 0x649   : > { %1681 = vmatpush.bf16.msrb.mxu1 %v2407_v49 }
 0x64d   : > { %1682 = vmatpush.bf16.msrb.mxu1 %v2406_v57 }
 0x689   : > { %v1012_v39 = vpop.xlane.xlu2 %1011 }
 0x68a   : > { %v1015_v45 = vmul.f32 %v1012_v39, %v2985_v4  ;;  %v2401_v39 = vld [vmem:[#allocation7 + $0x98] sm:$0xff] }
 0x68c   : > { %v1017_v55 = vadd.f32 1e-12, %v1015_v45  ;;  %v393_v45 = vld [vmem:[%s3115_s3 + $0x18] sm:$0xff] }
 0x68d   : > { %v1083_v51 = vperm.slane %v393_v45, 4 }
 0x68e   : > { %2531 = vrsqrt.f32 %v1017_v55  ;;  %vm1025_vm6 = vweird.f32 %v1017_v55 }
 0x691   : > { %v1014_v59 = vpop.xlane.xlu0 %1013 }
 0x692   : > { %v1016_v60 = vmul.f32 %v1014_v59, %v2985_v4 }
 0x694   : > { %v2532_v63 = vpop.eup %2531  ;;  %v1018_v0 = vadd.f32 1e-12, %v1016_v60  ;;  %v1080_v60 = vperm.slane %v2889_v15, 4 }
 0x695   : > { %v1020_v1 = vmul.f32 %v2532_v63, %v1017_v55  ;;  %vm1026_vm5 = vweird.f32 %v2532_v63 }
 0x696   : > { %2533 = vrsqrt.f32 %v1018_v0  ;;  %vm1027_vm7 = vmor %vm1025_vm6, %vm1026_vm5  ;;  %vm1035_vm9 = vweird.f32 %v1018_v0 }
 0x697   : > { %v1021_v10 = vmul.f32 %v2532_v63, %v1020_v1 }
 0x699   : > { %v1022_v11 = vmul.f32 0.5, %v1021_v10 }
 0x69b   : > { %v1023_v12 = vsub.f32 1.5, %v1022_v11 }
 0x69c   : > { %v2534_v2 = vpop.eup %2533 }
 0x69d   : > { %v1024_v3 = vmul.f32 %v2532_v63, %v1023_v12  ;;  %v1030_v32 = vmul.f32 %v2534_v2, %v1018_v0  ;;  %vm1036_vm8 = vweird.f32 %v2534_v2  ;;  %v2391_v0 = vld [vmem:[#allocation7 + $0x48] sm:$0xff] }
 0x69e   : > { %vm1037_vm10 = vmor %vm1035_vm9, %vm1036_vm8  ;;  %1653 = vmatpush.bf16.msrb.mxu3 %v2391_v0 }
 0x69f   : > { %v1031_v5 = vmul.f32 %v2534_v2, %v1030_v32  ;;  %v1028_v6 = vsel %vm1027_vm7, %v2532_v63, %v1024_v3  ;;  %v1081_v63 = vperm.slane %v2883_v13, 4  ;;  %v2382_v32 = vld [vmem:[#allocation7] sm:$0xff] }
 0x6a0   : > { %v1039_v8 = vmul.f32 %v1028_v6, %v2988_v61  ;;  %v2405_v61 = vld [vmem:[#allocation7 + $0xb8] sm:$0xff]  ;;  %1640 = vmatpush.bf16.msra.mxu2 %v2382_v32 }
 0x6a1   : > { %v1032_v7 = vmul.f32 0.5, %v1031_v5  ;;  %1661 = vmatpush.bf16.msra.mxu0 %v2405_v61  ;;  %v2390_v5 = vld [vmem:[#allocation7 + $0x40] sm:$0xff] }
 0x6a2   : > { %v1042_v20 = vmul.f32 %v1041_v16, %v1039_v8  ;;  %1654 = vmatpush.bf16.msrb.mxu3 %v2390_v5 }
 0x6a3   : > { %v1033_v62 = vsub.f32 1.5, %v1032_v7 }
 0x6a4   : > { %v3003_v23 = vadd.f32 %v1044_v21, %v1042_v20 }
 0x6a5   : > { %v1034_v17 = vmul.f32 %v2534_v2, %v1033_v62 }
 0x6a7   : > { %v1038_v18 = vsel %vm1037_vm10, %v2534_v2, %v1034_v17 }
 0x6a8   : > { %v1040_v19 = vmul.f32 %v1038_v18, %v2993_v9  ;;  %v2404_v9 = vld [vmem:[#allocation7 + $0xb0] sm:$0xff] }
 0x6a9   : > { %1662 = vmatpush.bf16.msra.mxu0 %v2404_v9 }
 0x6aa   : > { %v1043_v22 = vmul.f32 %v1041_v16, %v1040_v19 }
 0x6ac   : > { %v3005_v24 = vadd.f32 %v1044_v21, %v1043_v22 }
 0x6ad   : > { %1663 = vmatpush.bf16.msra.mxu0 %v2403_v30 }
 0x6ae   : > { %v1047_v14 = vpack.c.bf16 %v3005_v24, %v3003_v23 }
 0x6b0   : > { %1252 = vmatmul.bf16.vlgmr.msrb.gmra.mxu2 %v1047_v14  ;;  %1266 = vmatmul.bf16.vlgmr.msra.gmra.mxu3 %v1047_v14 }
 0x6b1   : > { %1280 = vmatmul.bf16.vlgmr.msrb.gmra.mxu0 %v1047_v14  ;;  %1294 = vmatmul.bf16.vlgmr.msra.gmra.mxu1 %v1047_v14 }
 0x6b2   : > { %1664 = vmatpush.bf16.msra.mxu0 %v2402_v35 }
 0x6b6   : > { %1665 = vmatpush.bf16.msra.mxu0 %v2401_v39 }
 0x6ba   : > { %1666 = vmatpush.bf16.msra.mxu0 %v2400_v43 }
 0x6be   : > { %1667 = vmatpush.bf16.msra.mxu0 %v2399_v48 }
 0x6c2   : > { %1668 = vmatpush.bf16.msra.mxu0 %v2398_v56 }
 0x72e   : > { %v1281_v54 = vpop.f32.mrf.mxu0  ;;  %v1295_v55 = vpop.f32.mrf.mxu1 }
 0x72f   : > { %v3013_v58 = vadd.f32 %v1281_v54, %v1082_v50  ;;  %v3015_v59 = vadd.f32 %v1295_v55, %v1083_v51 }
 0x731   : > { %v1302_v1 = vmul.f32 %v3013_v58, %v3013_v58  ;;  %v1303_v10 = vmul.f32 %v3015_v59, %v3015_v59 }
 0x733   : > { %v1310_v11 = vmul.f32 %v1302_v1, %v3013_v58  ;;  %v1311_v12 = vmul.f32 %v1303_v10, %v3015_v59  ;;  %v1253_v2 = vpop.f32.mrf.mxu2  ;;  %v1267_v15 = vpop.f32.mrf.mxu3 }
 0x734   : > { %v3025_v3 = vadd.f32 %v1253_v2, %v1080_v60  ;;  %v3027_v13 = vadd.f32 %v1267_v15, %v1081_v63 }
 0x735   : > { %v1318_v6 = vmul.f32 0.044715, %v1310_v11  ;;  %v1319_v7 = vmul.f32 0.044715, %v1311_v12 }
 0x736   : > { %v1300_v62 = vmul.f32 %v3025_v3, %v3025_v3  ;;  %v1301_v8 = vmul.f32 %v3027_v13, %v3027_v13  ;;  %v1283_v16 = vpop.f32.mrf.mxu0  ;;  %v1297_v17 = vpop.f32.mrf.mxu1 }
 0x737   : > { %v1326_v18 = vadd.f32 %v1318_v6, %v3013_v58  ;;  %v1327_v19 = vadd.f32 %v1319_v7, %v3015_v59  ;;  %v1284_v20 = vadd.f32 %v1283_v16, %v1082_v50  ;;  %v3035_v21 = vadd.f32 %v1297_v17, %v1083_v51 }
 0x738   : > { %v1308_v22 = vmul.f32 %v1300_v62, %v3025_v3  ;;  %v1309_v14 = vmul.f32 %v1301_v8, %v3027_v13 }
 0x739   : > { %v1334_v61 = vmul.f32 0.7978846, %v1326_v18  ;;  %v1306_v26 = vmul.f32 %v1284_v20, %v1284_v20  ;;  %v1307_v9 = vmul.f32 %v3035_v21, %v3035_v21  ;;  %v1335_v27 = vmul.f32 0.7978846, %v1327_v19 }
 0x73a   : > { %v1316_v28 = vmul.f32 0.044715, %v1308_v22  ;;  %v1317_v29 = vmul.f32 0.044715, %v1309_v14 }
 0x73b   : > { %v1314_v30 = vmul.f32 %v1306_v26, %v1284_v20  ;;  %v1315_v31 = vmul.f32 %v1307_v9, %v3035_v21  ;;  %v1255_v33 = vpop.f32.mrf.mxu2  ;;  %v1269_v34 = vpop.f32.mrf.mxu3  ;;  %2535 = vtanh.f32 %v1334_v61 }
 0x73c   : > { %v1324_v35 = vadd.f32 %v1316_v28, %v3025_v3  ;;  %v1325_v36 = vadd.f32 %v1317_v29, %v3027_v13  ;;  %v1256_v37 = vadd.f32 %v1255_v33, %v1080_v60  ;;  %v1270_v40 = vadd.f32 %v1269_v34, %v1081_v63 }
 0x73d   : > { %v1322_v38 = vmul.f32 0.044715, %v1314_v30  ;;  %v1323_v39 = vmul.f32 0.044715, %v1315_v31  ;;  %2537 = vtanh.f32 %v1335_v27 }
 0x73e   : > { %v1332_v41 = vmul.f32 0.7978846, %v1324_v35  ;;  %v1333_v42 = vmul.f32 0.7978846, %v1325_v36  ;;  %v1304_v43 = vmul.f32 %v1256_v37, %v1256_v37  ;;  %v1305_v46 = vmul.f32 %v1270_v40, %v1270_v40 }
 0x73f   : > { %v1330_v44 = vadd.f32 %v1322_v38, %v1284_v20  ;;  %v1331_v45 = vadd.f32 %v1323_v39, %v3035_v21 }
 0x740   : > { %v1312_v47 = vmul.f32 %v1304_v43, %v1256_v37  ;;  %2539 = vtanh.f32 %v1332_v41  ;;  %v1313_v50 = vmul.f32 %v1305_v46, %v1270_v40 }
 0x741   : > { %v1338_v48 = vmul.f32 0.7978846, %v1330_v44  ;;  %v1339_v49 = vmul.f32 0.7978846, %v1331_v45  ;;  %2541 = vtanh.f32 %v1333_v42  ;;  %v2536_v52 = vpop.eup %2535 }
 0x742   : > { %v1320_v51 = vmul.f32 0.044715, %v1312_v47  ;;  %v1321_v53 = vmul.f32 0.044715, %v1313_v50  ;;  %v1350_v57 = vadd.f32 1.0, %v2536_v52 }
 0x743   : > { %2543 = vtanh.f32 %v1338_v48  ;;  %v2538_v54 = vpop.eup %2537 }
 0x744   : > { %2545 = vtanh.f32 %v1339_v49  ;;  %v1328_v55 = vadd.f32 %v1320_v51, %v1256_v37  ;;  %v1329_v56 = vadd.f32 %v1321_v53, %v1270_v40  ;;  %v1351_v25 = vadd.f32 1.0, %v2538_v54 }
 0x745   : > { %v1358_v12 = vmul.f32 0.5, %v1350_v57 }
 0x746   : > { %v1336_v60 = vmul.f32 0.7978846, %v1328_v55  ;;  %v2540_v63 = vpop.eup %2539  ;;  %v1337_v0 = vmul.f32 0.7978846, %v1329_v56  ;;  %v1359_v15 = vmul.f32 0.5, %v1351_v25 }
 0x747   : > { %v2542_v1 = vpop.eup %2541  ;;  %v1348_v32 = vadd.f32 1.0, %v2540_v63  ;;  %v1366_v16 = vmul.f32 %v1358_v12, %v3013_v58 }
 0x748   : > { %2547 = vtanh.f32 %v1336_v60  ;;  %v1349_v6 = vadd.f32 1.0, %v2542_v1  ;;  %v1367_v19 = vmul.f32 %v1359_v15, %v3015_v59 }
 0x749   : > { %v2544_v10 = vpop.eup %2543  ;;  %2549 = vtanh.f32 %v1337_v0  ;;  %v1356_v22 = vmul.f32 0.5, %v1348_v32 }
 0x74a   : > { %v2546_v11 = vpop.eup %2545  ;;  %v1354_v2 = vadd.f32 1.0, %v2544_v10  ;;  %v1357_v26 = vmul.f32 0.5, %v1349_v6 }
 0x74b   : > { %v1355_v5 = vadd.f32 1.0, %v2546_v11  ;;  %v1364_v31 = vmul.f32 %v1356_v22, %v3025_v3  ;;  %v1739_v22 = vld [vmem:[%s381_s11] sm:$0xff] }
 0x74c   : > { %v1362_v7 = vmul.f32 0.5, %v1354_v2  ;;  %v1365_v58 = vmul.f32 %v1357_v26, %v3027_v13 }
 0x74d   : > { %v1363_v62 = vmul.f32 0.5, %v1355_v5 }
 0x74e   : > { %v2548_v8 = vpop.eup %2547  ;;  %v1370_v17 = vmul.f32 %v1362_v7, %v1284_v20 }
 0x74f   : > { %v2550_v18 = vpop.eup %2549  ;;  %v1371_v14 = vmul.f32 %v1363_v62, %v3035_v21  ;;  %v1352_v61 = vadd.f32 1.0, %v2548_v8  ;;  %v3053_v21 = vld [vmem:[%s3115_s3] sm:$0xff] }
 0x750   : > { %v1353_v9 = vadd.f32 1.0, %v2550_v18  ;;  %v1374_v27 = vpack.c.bf16 %v1370_v17, %v1366_v16  ;;  %v1440_v35 = vperm.slane %v3053_v21, 5  ;;  %v1731_v62 = vperm.slane %v3053_v21, 6 }
 0x751   : > { %v1360_v28 = vmul.f32 0.5, %v1352_v61  ;;  %v1375_v29 = vpack.c.bf16 %v1371_v14, %v1367_v19  ;;  %v1734_v16 = vperm.slane %v3053_v21, 7 }
 0x752   : > { %v1361_v30 = vmul.f32 0.5, %v1353_v9  ;;  %1669 = vmatmul.bf16.vlgmr.msra.gmra.mxu0 %v1374_v27  ;;  %v1740_v27 = vld [vmem:[%s381_s11 + $0x8] sm:$0xff] }
 0x753   : > { %v1368_v33 = vmul.f32 %v1360_v28, %v1256_v37  ;;  %1683 = vmatmul.bf16.vlgmr.msrb.gmra.mxu1 %v1375_v29 }
 0x754   : > { %v1369_v20 = vmul.f32 %v1361_v30, %v1270_v40 }
 0x755   : > { %v1372_v34 = vpack.c.bf16 %v1368_v33, %v1364_v31 }
 0x756   : > { %v1373_v59 = vpack.c.bf16 %v1369_v20, %v1365_v58 }
 0x757   : > { %1641 = vmatmul.bf16.vlgmr.msra.gmra.mxu2 %v1372_v34 }
 0x758   : > { %1655 = vmatmul.bf16.vlgmr.msrb.gmra.mxu3 %v1373_v59 }
 0x7cf   : > { %v1670_v3 = vpop.f32.mrf.mxu0 }
 0x7d0   : > { %v1684_v41 = vpop.f32.mrf.mxu1 }
 0x7d7   : > { %v1672_v47 = vpop.f32.mrf.mxu0 }
 0x7d8   : > { %v1686_v49 = vpop.f32.mrf.mxu1 }
 0x7da   : > { %v1642_v36 = vpop.f32.mrf.mxu2 }
 0x7db   : > { %v1643_v38 = vadd.f32 %v1642_v36, %v1440_v35  ;;  %v1656_v39 = vpop.f32.mrf.mxu3 }
 0x7dd   : > { %v1657_v37 = vadd.f32 %v1656_v39, %v1643_v38 }
 0x7df   : > { %v1671_v42 = vadd.f32 %v1670_v3, %v1657_v37 }
 0x7e1   : > { %v1685_v13 = vadd.f32 %v1684_v41, %v1671_v42 }
 0x7e2   : > { %v1644_v40 = vpop.f32.mrf.mxu2 }
 0x7e3   : > { %v1645_v43 = vadd.f32 %v1644_v40, %v1440_v35  ;;  %v1689_v44 = vadd.f32 %v1685_v13, %v3003_v23  ;;  %v1658_v45 = vpop.f32.mrf.mxu3 }
 0x7e5   : > { %v1659_v46 = vadd.f32 %v1658_v45, %v1645_v43  ;;  %1691 = vadd.xlane.f32.xlu1 %v1689_v44 }
 0x7e7   : > { %v1673_v48 = vadd.f32 %v1672_v47, %v1659_v46 }
 0x7e9   : > { %v1687_v50 = vadd.f32 %v1686_v49, %v1673_v48 }
 0x7eb   : > { %v1690_v51 = vadd.f32 %v1687_v50, %v3005_v24 }
 0x7ed   : > { %1693 = vadd.xlane.f32.xlu2 %v1690_v51 }
 0x858   : > { %v1692_v52 = vpop.xlane.xlu1 %1691 }
 0x859   : > { %v1695_v53 = vmul.f32 %v1692_v52, %v2985_v4 }
 0x85b   : > { %v1697_v54 = vsub.f32 %v1689_v44, %v1695_v53 }
 0x85d   : > { %v1699_v55 = vmul.f32 %v1697_v54, %v1697_v54 }
 0x85f   : > { %1701 = vadd.xlane.f32.xlu0 %v1699_v55 }
 0x860   : > { %v1694_v56 = vpop.xlane.xlu2 %1693 }
 0x861   : > { %v1696_v57 = vmul.f32 %v1694_v56, %v2985_v4 }
 0x863   : > { %v1698_v23 = vsub.f32 %v1690_v51, %v1696_v57 }
 0x865   : > { %v1700_v60 = vmul.f32 %v1698_v23, %v1698_v23 }
 0x867   : > { %1703 = vadd.xlane.f32.xlu1 %v1700_v60 }
 0x8d2   : > { %v1702_v63 = vpop.xlane.xlu0 %1701 }
 0x8d3   : > { %v1705_v25 = vmul.f32 %v1702_v63, %v2985_v4 }
 0x8d5   : > { %v1707_v0 = vadd.f32 1e-12, %v1705_v25 }
 0x8d7   : > { %2551 = vrsqrt.f32 %v1707_v0  ;;  %vm1715_vm12 = vweird.f32 %v1707_v0 }
 0x8da   : > { %v1704_v24 = vpop.xlane.xlu1 %1703 }
 0x8db   : > { %v1706_v1 = vmul.f32 %v1704_v24, %v2985_v4 }
 0x8dd   : > { %v2552_v10 = vpop.eup %2551  ;;  %v1708_v11 = vadd.f32 1e-12, %v1706_v1 }
 0x8de   : > { %v1710_v12 = vmul.f32 %v2552_v10, %v1707_v0  ;;  %vm1716_vm11 = vweird.f32 %v2552_v10 }
 0x8df   : > { %2553 = vrsqrt.f32 %v1708_v11  ;;  %vm1717_vm13 = vmor %vm1715_vm12, %vm1716_vm11  ;;  %vm1725_vm15 = vweird.f32 %v1708_v11 }
 0x8e0   : > { %v1711_v2 = vmul.f32 %v2552_v10, %v1710_v12 }
 0x8e2   : > { %v1712_v15 = vmul.f32 0.5, %v1711_v2 }
 0x8e4   : > { %v1713_v32 = vsub.f32 1.5, %v1712_v15 }
 0x8e5   : > { %v2554_v5 = vpop.eup %2553 }
 0x8e6   : > { %v1714_v6 = vmul.f32 %v2552_v10, %v1713_v32  ;;  %v1720_v7 = vmul.f32 %v2554_v5, %v1708_v11  ;;  %vm1726_vm14 = vweird.f32 %v2554_v5 }
 0x8e7   : > { %vm1727_vm0 = vmor %vm1725_vm15, %vm1726_vm14 }
 0x8e8   : > { %v1718_v4 = vsel %vm1717_vm13, %v2552_v10, %v1714_v6  ;;  %v1721_v8 = vmul.f32 %v2554_v5, %v1720_v7 }
 0x8e9   : > { %v1729_v17 = vmul.f32 %v1718_v4, %v1697_v54 }
 0x8ea   : > { %v1722_v18 = vmul.f32 0.5, %v1721_v8 }
 0x8eb   : > { %v1732_v19 = vmul.f32 %v1731_v62, %v1729_v17 }
 0x8ec   : > { %v1723_v14 = vsub.f32 1.5, %v1722_v18 }
 0x8ed   : > { %v1735_v61 = vadd.f32 %v1734_v16, %v1732_v19 }
 0x8ee   : > { %v1724_v26 = vmul.f32 %v2554_v5, %v1723_v14 }
 0x8ef   : > { %v1741_v9 = vadd.f32 %v1739_v22, %v1735_v61  ;;  %1737 = vst [vmem:[%s364_s10] sm:$0xff] %v1735_v61 }
 0x8f0   : > { %v1728_v28 = vsel %vm1727_vm0, %v2554_v5, %v1724_v26 }
 0x8f1   : > { %v1743_v29 = vmul.f32 0.33333334, %v1741_v9  ;;  %v1730_v30 = vmul.f32 %v1728_v28, %v1698_v23 }
 0x8f3   : > { %1745 = vst [vmem:[%s3079_s18] sm:$0xff] %v1743_v29  ;;  %v1733_v31 = vmul.f32 %v1731_v62, %v1730_v30 }
 0x8f5   : > { %v1736_v33 = vadd.f32 %v1734_v16, %v1733_v31 }
 0x8f7   : > { %v1742_v58 = vadd.f32 %v1740_v27, %v1736_v33  ;;  %1738 = vst [vmem:[%s364_s10 + $0x8] sm:$0xff] %v1736_v33 }
 0x8f8   : > { %2673 = shalt.err (!%p2670_p8)
}
 0x8f9   : > { %s2731_s25 = smov 128   ;;  %s2732_s17 = smov 8   ;;  %v1744_v20 = vmul.f32 0.33333334, %v1742_v58 }
 0x8fa   : > { %2427 = dma.vmem_to_hbm [thread:$0]  (%p2816_p5), %s1766_s9, 256, %s1768_s26, %s1748_s19, %s2731_s25, %s2731_s25, %s2732_s17  }
 0x8fb   : > { %1746 = vst [vmem:[%s3079_s18 + $0x8] sm:$0xff] %v1744_v20 }
 0x8fc PF: > { %p2449_p9 = scmp.ge.s32.totalorder %s2716_s30, 2  ;;  %s1785_s20 = sand.u32 1, %s2704_s27  }
 0x8fd   : > { %s1786_s22 = scalar_lea.sflag [#allocation4], %s1785_s20 }
 0x8fe   : > { %p2440_p10 = pnand %p2449_p9, %p2820_p6 }
 0x900   : > { %p2441_p11 = pneg %p2440_p10 }
 0x902   : > { %2699 = dma.done.wait (%p2441_p11), %s1786_s22, 256  }
 0x903   : > { %2701 = vsyncadd (%p2441_p11), %s1786_s22, 4294967040  ;;  %s3135_s30 = sld [smem:[#allocation13_spill]]  ;;  %s3138_s27 = smov %s2708_s28 }
 0x904   : > { %s3136_s23 = sld [smem:[#allocation12_spill]] }
 0x905   : > { %s3137_s29 = sld [smem:[#allocation14_spill]] }
 0x909   : > { %p21_p5 = scmp.ge.s32.totalorder %s3135_s30, 4  }
 0x90a   : > { %s3139_s28 = smov %s3136_s23 }
 0x90b   :  { %23 = sbr.rel (!%p21_p5) target bundleno = 8 (0x8), region = 111 }
 0x910   :  { %1800 = vsyncpa [#allocation3], 1 }
 0x911   :  { %1802 = vsyncpa [#allocation3 + $0x1], 1 }
 0x912   :  { %1803 = vsyncpa [#allocation6], 1 }
 0x913   :  { %1804 = vsyncpa [#allocation4], 1 }
 0x914   :  { %1806 = vsyncpa [#allocation4 + $0x1], 1 }

// kernel: compressor_forward.2
= control target key start
LH: loop header
LB: loop body
LE: loop exit
PB: predicated region body
PF: predicated region fallthrough
CT: control target
= control target key end

     0   :  { %14 = vsyncpa [#allocation3], 0  ;;  %s3033_s0 = inlined_call_operand.vmem [shape: f32[2,16,128], index: 0, kind: input, shape index: {}]   ;;  %s3034_s1 = inlined_call_operand.vmem [shape: f32[2,16,128], index: 1, kind: input, shape index: {}, may-alias: {1,8}]   ;;  %s3035_s2 = inlined_call_operand.hbm [shape: bf16[128,384], index: 2, kind: input, shape index: {}]   ;;  %s3036_s3 = inlined_call_operand.vmem [shape: f32[8,512], index: 3, kind: input, shape index: {}]   ;;  %s3037_s4 = inlined_call_operand.vmem [shape: bf16[128,128], index: 4, kind: input, shape index: {}]   ;;  %s3038_s5 = inlined_call_operand.vmem [shape: bf16[128,512], index: 5, kind: input, shape index: {}]   ;;  %s3039_s6 = inlined_call_operand.hbm [shape: bf16[512,128], index: 6, kind: input, shape index: {}]   ;;  %s3040_s7 = inlined_call_operand.vmem [shape: f32[2,16,128], index: 7, kind: output, shape index: {0}]   ;;  %s3041_s8 = inlined_call_operand.vmem [shape: f32[2,16,128], index: 8, kind: output, shape index: {1}, may-alias: {1,8}]  }
   0x1   :  { %15 = vsyncpa [#allocation5], 0  ;;  %s2591_s27 = smov 0  }
   0x2 LB: > { %s246_s30 = sshll.u32 %s3035_s2, 4  ;;  %s2600_s9 = sadd.s32 4294967295, %s2534_s27   ;;  %s2534_s27 = sphi %s2591_s27, %s21_s27   ;;  %s247_s30 = int_to_ptr.hbm [resolvable:$true] %s246_s30 }
   0x3   : > { %p1855_p0 = scmp.ge.s32.totalorder %s2534_s27, 1  ;;  %p235_p1 = scmp.lt.s32.totalorder %s2534_s27, 3 }
   0x4   : > { %p2379_p2 = scmp.eq.s32.totalorder %s2600_s9, 0  ;;  %s2536_s11 = smov [#allocation2]  }
   0x5   : > { %p2605_p3 = pnand %p1855_p0, %p235_p1  ;;  %s248_s12 = sshll.u32 %s2536_s11, 4  ;;  %s249_s12 = int_to_ptr.vmem [resolvable:$true] %s248_s12 }
   0x6   : > { %s269_s15 = sshll.u32 %s3039_s6, 4  ;;  %s2537_s16 = smov [#allocation4]   ;;  %s270_s15 = int_to_ptr.hbm [resolvable:$true] %s269_s15 }
   0x7   : > { %p2372_p4 = pneg %p2605_p3  ;;  %s271_s17 = sshll.u32 %s2537_s16, 4  ;;  %s272_s17 = int_to_ptr.vmem [resolvable:$true] %s271_s17 }
   0x8   : > { %s2538_s18 = smov 192   ;;  %s2539_s19 = smov 12  }
   0x9   : > { %p2373_p5 = pnand %p2379_p2, %p2372_p4  ;;  %s2540_s20 = smov 64  }
   0xa   : > { %s2541_s21 = smov 4   ;;  %303 = sbr.rel (%p2605_p3) target bundleno = 2277 (0x8e5), region = 48 }
   0xb   : > { %2375 = dma.hbm_to_vmem [thread:$0]  (!%p2373_p5), %s247_s30, 3072, %s249_s12, [#allocation3], %s2538_s18, %s2538_s18, %s2539_s19  }
   0xc   : > { %2378 = dma.hbm_to_vmem [thread:$0]  (!%p2373_p5), %s270_s15, 4096, %s272_s17, [#allocation5], %s2540_s20, %s2540_s20, %s2541_s21  }
   0xf   : > { %2525 = dma.done.wait (%p2379_p2), [#allocation3], 3072  }
  0x10   : > { %2527 = vsyncadd (%p2379_p2), [#allocation3], 4294964224 }
  0x11   : > { %2529 = dma.done.wait (%p2379_p2), [#allocation5], 4096  }
  0x12   : > { %2531 = vsyncadd (%p2379_p2), [#allocation5], 4294963200  ;;  %v1956_v0 = vld [vmem:[#allocation2 + $0xa8] sm:$0xf]  ;;  %v2290_v1 = vld [vmem:[#allocation2 + $0xb0] sm:$0xf0] }
  0x13   : > { %v2289_v2 = vld [vmem:[#allocation2 + $0xac] sm:$0xf]  ;;  %v1957_v3 = vor.u32 %v2290_v1, %v1956_v0  ;;  %v1958_v4 = vld [vmem:[#allocation2 + $0xb4] sm:$0xf0]  ;;  %v1944_v5 = vld [vmem:[#allocation2 + $0x90] sm:$0xf] }
  0x14   : > { %v2287_v6 = vld [vmem:[#allocation2 + $0x98] sm:$0xf0]  ;;  %v1961_v7 = vor.u32 %v2289_v2, %v1958_v4  ;;  %v2286_v8 = vld [vmem:[#allocation2 + $0x94] sm:$0xf]  ;;  %v1946_v9 = vld [vmem:[#allocation2 + $0x9c] sm:$0xf0] }
  0x15   : > { %544 = vmatpush.bf16.msra.mxu0 %v1957_v3  ;;  %v1945_v10 = vor.u32 %v2287_v6, %v1944_v5  ;;  %v1949_v11 = vor.u32 %v2286_v8, %v1946_v9  ;;  %v1932_v12 = vld [vmem:[#allocation2 + $0x78] sm:$0xf]  ;;  %v2284_v13 = vld [vmem:[#allocation2 + $0x80] sm:$0xf0]  ;;  %v2283_v14 = vld [vmem:[#allocation2 + $0x7c] sm:$0xf] }
  0x16   : > { %558 = vmatpush.bf16.msra.mxu1 %v1961_v7  ;;  %v1934_v15 = vld [vmem:[#allocation2 + $0x84] sm:$0xf0]  ;;  %v1933_v16 = vor.u32 %v2284_v13, %v1932_v12  ;;  %v1920_v18 = vld [vmem:[#allocation2 + $0x60] sm:$0xf]  ;;  %v2281_v19 = vld [vmem:[#allocation2 + $0x68] sm:$0xf0] }
  0x17   : > { %v1937_v17 = vor.u32 %v2283_v14, %v1934_v15  ;;  %v2280_v20 = vld [vmem:[#allocation2 + $0x64] sm:$0xf]  ;;  %v1922_v21 = vld [vmem:[#allocation2 + $0x6c] sm:$0xf0]  ;;  %v1921_v22 = vor.u32 %v2281_v19, %v1920_v18  ;;  %v1908_v23 = vld [vmem:[#allocation2 + $0x48] sm:$0xf] }
  0x18   : > { %v2278_v24 = vld [vmem:[#allocation2 + $0x50] sm:$0xf0]  ;;  %p353_p6 = scmp.lt.s32.totalorder %s2600_s9, 1  ;;  %v1925_v25 = vor.u32 %v2280_v20, %v1922_v21  ;;  %v1964_v26 = vld [vmem:[#allocation2 + $0xb0] sm:$0xf]  ;;  %v2645_v13 = vld [vmem:[%s3036_s3 + $0x8] sm:$0xff] }
  0x19   : > { %545 = vmatpush.bf16.msra.mxu0 %v1945_v10  ;;  %v2291_v27 = vld [vmem:[#allocation2 + $0xb8] sm:$0xf0]  ;;  %v1952_v28 = vld [vmem:[#allocation2 + $0x98] sm:$0xf]  ;;  %v2277_v29 = vld [vmem:[#allocation2 + $0x4c] sm:$0xf]  ;;  %v1909_v33 = vor.u32 %v2278_v24, %v1908_v23 }
  0x1a   : > { %559 = vmatpush.bf16.msra.mxu1 %v1949_v11  ;;  %v1910_v30 = vld [vmem:[#allocation2 + $0x54] sm:$0xf0]  ;;  %v1965_v31 = vor.u32 %v2291_v27, %v1964_v26  ;;  %v2288_v32 = vld [vmem:[#allocation2 + $0xa0] sm:$0xf0]  ;;  %v1896_v34 = vld [vmem:[#allocation2 + $0x30] sm:$0xf] }
  0x1b   : > { %v1953_v35 = vor.u32 %v2288_v32, %v1952_v28  ;;  %v1913_v36 = vor.u32 %v2277_v29, %v1910_v30  ;;  %v2275_v37 = vld [vmem:[#allocation2 + $0x38] sm:$0xf0]  ;;  %v1940_v38 = vld [vmem:[#allocation2 + $0x80] sm:$0xf]  ;;  %v2285_v39 = vld [vmem:[#allocation2 + $0x88] sm:$0xf0] }
  0x1c   : > { %572 = vmatpush.bf16.msra.mxu2 %v1965_v31  ;;  %v2274_v40 = vld [vmem:[#allocation2 + $0x34] sm:$0xf]  ;;  %v1898_v41 = vld [vmem:[#allocation2 + $0x3c] sm:$0xf0]  ;;  %s3044_s9 = smov (!%p353_p6, %s2600_s9), 1  ;;  %v1897_v42 = vor.u32 %v2275_v37, %v1896_v34  ;;  %v1941_v44 = vor.u32 %v2285_v39, %v1940_v38  ;;  %v414_v14 = vperm.slane %v2645_v13, 0 }
  0x1d   : > { %546 = vmatpush.bf16.msra.mxu0 %v1933_v16  ;;  %v1884_v43 = vld [vmem:[#allocation2 + $0x18] sm:$0xf]  ;;  %v1901_v45 = vor.u32 %v2274_v40, %v1898_v41  ;;  %v2272_v46 = vld [vmem:[#allocation2 + $0x20] sm:$0xf0]  ;;  %v1928_v47 = vld [vmem:[#allocation2 + $0x68] sm:$0xf] }
  0x1e   : > { %560 = vmatpush.bf16.msra.mxu1 %v1937_v17  ;;  %v2282_v48 = vld [vmem:[#allocation2 + $0x70] sm:$0xf0]  ;;  %v2271_v49 = vld [vmem:[#allocation2 + $0x1c] sm:$0xf]  ;;  %v1886_v50 = vld [vmem:[#allocation2 + $0x24] sm:$0xf0]  ;;  %v1885_v51 = vor.u32 %v2272_v46, %v1884_v43 }
  0x1f   : > { %s2630_s22 = sshll.u32 %s3044_s9, 4  ;;  %v1872_v52 = vld [vmem:[#allocation2] sm:$0xf]  ;;  %v1929_v53 = vor.u32 %v2282_v48, %v1928_v47  ;;  %v1889_v54 = vor.u32 %v2271_v49, %v1886_v50  ;;  %v2269_v55 = vld [vmem:[#allocation2 + $0x8] sm:$0xf0]  ;;  %vm589_vm0 = vcmask 261120  }
  0x20   : > { %573 = vmatpush.bf16.msra.mxu2 %v1953_v35  ;;  %s357_s25 = scalar_lea.vmem %s3033_s0, %s2630_s22  ;;  %v1916_v56 = vld [vmem:[#allocation2 + $0x50] sm:$0xf]  ;;  %v2279_v57 = vld [vmem:[#allocation2 + $0x58] sm:$0xf0]  ;;  %v2268_v58 = vld [vmem:[#allocation2 + $0x4] sm:$0xf]  ;;  %v1873_v60 = vor.u32 %v2269_v55, %v1872_v52  ;;  %s367_s29 = scalar_lea.vmem %s3040_s7, %s2630_s22 }
  0x21   : > { %547 = vmatpush.bf16.msra.mxu0 %v1921_v22  ;;  %v1874_v59 = vld [vmem:[#allocation2 + $0xc] sm:$0xf0]  ;;  %v2636_v61 = vld [vmem:[%s357_s25] sm:$0xff]  ;;  %v2638_v62 = vld [vmem:[%s357_s25 + $0x8] sm:$0xff]  ;;  %v1917_v63 = vor.u32 %v2279_v57, %v1916_v56  ;;  %s2542_s9 = smov 96   ;;  %s2543_s12 = smov 64  }
  0x22   : > { %561 = vmatpush.bf16.msra.mxu1 %v1925_v25  ;;  %v1877_v0 = vor.u32 %v2268_v58, %v1874_v59  ;;  %v1904_v1 = vld [vmem:[#allocation2 + $0x38] sm:$0xf]  ;;  %v2276_v2 = vld [vmem:[#allocation2 + $0x40] sm:$0xf0]  ;;  %v380_v3 = vpack.c.bf16 %v2638_v62, %v2636_v61  ;;  %v1892_v5 = vld [vmem:[#allocation2 + $0x20] sm:$0xf]  ;;  %s362_s25 = scalar_lea.vmem %s3034_s1, %s2630_s22 }
  0x23   : > { %v1905_v4 = vor.u32 %v2276_v2, %v1904_v1  ;;  %v2273_v6 = vld [vmem:[#allocation2 + $0x28] sm:$0xf0]  ;;  %v1880_v8 = vld [vmem:[#allocation2 + $0x8] sm:$0xf]  ;;  %v2270_v9 = vld [vmem:[#allocation2 + $0x10] sm:$0xf0] }
  0x24   : > { %574 = vmatpush.bf16.msra.mxu2 %v1941_v44  ;;  %v1893_v7 = vor.u32 %v2273_v6, %v1892_v5  ;;  %v1881_v10 = vor.u32 %v2270_v9, %v1880_v8  ;;  %v2651_v15 = vld [vmem:[%s3036_s3] sm:$0xff]  ;;  %v2659_v25 = vld [vmem:[%s3036_s3 + $0x10] sm:$0xff]  ;;  %s2544_s13 = smov 32   ;;  %vm610_vm1 = vcmask 130048   ;;  %vm892_vm2 = vcmask 523264  }
  0x25   : > { %548 = vmatpush.bf16.msra.mxu0 %v1909_v33  ;;  %v413_v19 = vperm.slane %v2651_v15, 0  ;;  %v415_v28 = vperm.slane %v2659_v25, 0  ;;  %vm895_vm3 = vcmask 785408  }
  0x26   : > { %562 = vmatpush.bf16.msra.mxu1 %v1913_v36 }
  0x28   : > { %575 = vmatpush.bf16.msra.mxu2 %v1929_v53 }
  0x29   : > { %549 = vmatpush.bf16.msra.mxu0 %v1897_v42 }
  0x2a   : > { %563 = vmatpush.bf16.msra.mxu1 %v1901_v45 }
  0x2c   : > { %576 = vmatpush.bf16.msra.mxu2 %v1917_v63 }
  0x2d   : > { %550 = vmatpush.bf16.msra.mxu0 %v1885_v51 }
  0x2e   : > { %564 = vmatpush.bf16.msra.mxu1 %v1889_v54 }
  0x30   : > { %577 = vmatpush.bf16.msra.mxu2 %v1905_v4 }
  0x31   : > { %551 = vmatpush.bf16.msra.mxu0 %v1873_v60 }
  0x32   : > { %565 = vmatpush.bf16.msra.mxu1 %v1877_v0 }
  0x34   : > { %552 = vmatmul.bf16.vlgmr.msra.gmra.mxu0 %v380_v3  ;;  %578 = vmatpush.bf16.msra.mxu2 %v1893_v7 }
  0x35   : > { %566 = vmatmul.bf16.vlgmr.msra.gmra.mxu1 %v380_v3 }
  0x38   : > { %579 = vmatpush.bf16.msra.mxu2 %v1881_v10 }
  0x3b   : > { %580 = vmatmul.bf16.vlgmr.msra.gmra.mxu2 %v380_v3 }
  0xb1   : > { %v553_v12 = vpop.f32.mrf.mxu0 }
  0xb2   : > { %v567_v11 = vpop.f32.mrf.mxu1  ;;  %v554_v23 = vadd.f32 %v553_v12, %v413_v19 }
  0xb3   : > { %v568_v17 = vadd.f32 %v567_v11, %v414_v14 }
  0xb9   : > { %v555_v21 = vpop.f32.mrf.mxu0 }
  0xba   : > { %v569_v16 = vpop.f32.mrf.mxu1  ;;  %v556_v24 = vadd.f32 %v555_v21, %v413_v19 }
  0xbb   : > { %v570_v18 = vadd.f32 %v569_v16, %v414_v14 }
  0xbc   : > { %v586_v27 = vpack.c.bf16 %v556_v24, %v554_v23 }
  0xbd   : > { %v587_v20 = vpack.c.bf16 %v570_v18, %v568_v17 }
  0xbe   : > { %v581_v26 = vpop.f32.mrf.mxu2 }
  0xbf   : > { %657 = vrot.lane.b32.xlu2 %v587_v20, %s2542_s9  ;;  %v594_v22 = vsel %vm589_vm0, %v587_v20, 0  ;;  %v582_v29 = vadd.f32 %v581_v26, %v415_v28 }
  0xc0   : > { %603 = vmatpush.bf16.xpose.msra.mxu3 %v594_v22 }
  0xc6   : > { %v583_v30 = vpop.f32.mrf.mxu2 }
  0xc7   : > { %654 = vrot.lane.b32.xlu2 %v586_v27, %s2542_s9  ;;  %1966 = vmatmul.msk.bf16.vlgmr.msra.gmra.mxu3 %vm589_vm0, %v586_v27  ;;  %v584_v31 = vadd.f32 %v583_v30, %v415_v28 }
  0xc9   : > { %v2664_v32 = vpack.c.bf16 %v584_v31, %v582_v29 }
  0xcb   : > { %644 = vmatpush.bf16.msrb.mxu3 %v2664_v32 }
  0xcf   : > { %725 = vrot.lane.b32.xlu2 %v586_v27, %s2543_s12 }
  0xd7   : > { %794 = vrot.lane.b32.xlu2 %v586_v27, %s2544_s13 }
 0x119   : > { %v658_v33 = vpop.permute.xlu2 %657 }
 0x11a   : > { %v663_v34 = vsel %vm589_vm0, %v658_v33, 0 }
 0x11b   : > { %672 = vmatpush.bf16.xpose.msra.mxu3 %v663_v34 }
 0x121   : > { %v655_v49 = vpop.permute.xlu2 %654 }
 0x129   : > { %v726_v52 = vpop.permute.xlu2 %725 }
 0x131   : > { %v795_v2 = vpop.permute.xlu2 %794 }
 0x14a   : > { %v605_v35 = vpop.f32.mrf.mxu3 }
 0x14b   : > { %v611_v36 = vsel %vm610_vm1, %v605_v35, -inf }
 0x14c   : > { %612 = vmax.xlane.f32.xlu0 %v611_v36 }
 0x152   : > { %v607_v37 = vpop.f32.mrf.mxu3 }
 0x153   : > { %v614_v38 = vsel %vm610_vm1, %v607_v37, -inf }
 0x154   : > { %615 = vmax.xlane.f32.xlu0 %v614_v38 }
 0x168   : > { %727 = vrot.lane.b32.xlu0 %v587_v20, %s2543_s12 }
 0x1bf   : > { %v613_v39 = vpop.xlane.xlu0 %612 }
 0x1c0   : > { %v617_v40 = vsub.f32 %v605_v35, %v613_v39 }
 0x1c2   : > { %v619_v41 = vmul.f32 1.442695, %v617_v40 }
 0x1c4   : > { %2401 = vpow2.f32 %v619_v41 }
 0x1c7   : > { %v616_v42 = vpop.xlane.xlu0 %615 }
 0x1c8   : > { %v618_v43 = vsub.f32 %v607_v37, %v616_v42 }
 0x1ca   : > { %v2402_v44 = vpop.eup %2401  ;;  %v621_v45 = vmul.f32 1.442695, %v618_v43 }
 0x1cb   : > { %v623_v46 = vsel %vm610_vm1, %v2402_v44, 0.0 }
 0x1cc   : > { %2403 = vpow2.f32 %v621_v45  ;;  %624 = vadd.xlane.f32.xlu1 %v623_v46 }
 0x1d2   : > { %v2404_v47 = vpop.eup %2403 }
 0x1d3   : > { %v626_v48 = vsel %vm610_vm1, %v2404_v47, 0.0 }
 0x1d4   : > { %627 = vadd.xlane.f32.xlu1 %v626_v48 }
 0x1da   : > { %v728_v50 = vpop.permute.xlu0 %727 }
 0x1db   : > { %v733_v51 = vsel %vm589_vm0, %v728_v50, 0 }
 0x1dc   : > { %742 = vmatpush.bf16.xpose.msrb.mxu2 %v733_v51 }
 0x1e3   : > { %1970 = vmatmul.msk.bf16.vlgmr.msrb.gmra.mxu2 %vm589_vm0, %v726_v52 }
 0x1ed   : > { %796 = vrot.lane.b32.xlu1 %v587_v20, %s2544_s13 }
 0x23f   : > { %v625_v53 = vpop.xlane.xlu1 %624 }
 0x240   : > { %2405 = vrcp.f32 %v625_v53 }
 0x246   : > { %v2406_v55 = vpop.eup %2405 }
 0x247   : > { %v628_v54 = vpop.xlane.xlu1 %627  ;;  %v631_v57 = vmul.f32 %v2406_v55, %v2402_v44 }
 0x248   : > { %2407 = vrcp.f32 %v628_v54 }
 0x24e   : > { %v2408_v56 = vpop.eup %2407 }
 0x24f   : > { %v632_v58 = vmul.f32 %v2408_v56, %v2404_v47 }
 0x251   : > { %v633_v59 = vpack.c.bf16 %v632_v58, %v631_v57 }
 0x253   : > { %1967 = vmatmul.msk.bf16.vlgmr.msrb.gmra.mxu3 %vm610_vm1, %v633_v59 }
 0x25f   : > { %v797_v60 = vpop.permute.xlu1 %796 }
 0x260   : > { %v802_v63 = vsel %vm589_vm0, %v797_v60, 0 }
 0x261   : > { %811 = vmatpush.bf16.xpose.msrb.mxu3 %v802_v63 }
 0x263   : > { %1968 = vmatmul.msk.bf16.vlgmr.msra.gmra.mxu3 %vm589_vm0, %v655_v49 }
 0x266   : > { %v744_v0 = vpop.f32.mrf.mxu2 }
 0x267   : > { %v749_v1 = vsel %vm610_vm1, %v744_v0, -inf }
 0x268   : > { %750 = vmax.xlane.f32.xlu1 %v749_v1 }
 0x26e   : > { %v746_v19 = vpop.f32.mrf.mxu2 }
 0x26f   : > { %v752_v22 = vsel %vm610_vm1, %v746_v19, -inf }
 0x273   : > { %1972 = vmatmul.msk.bf16.vlgmr.msrb.gmra.mxu3 %vm589_vm0, %v795_v2 }
 0x2d6   : > { %v646_v3 = vpop.f32.mrf.mxu3 }
 0x2d7   : > { %v651_v6 = vpack.c.bf16 %v646_v3, %v646_v3 }
 0x2d9   : > { %v2683_v10 = vunpack.c.l.b16 %v651_v6 }
 0x2db   : > { %v751_v4 = vpop.xlane.xlu1 %750 }
 0x2dc   : > { %v755_v5 = vsub.f32 %v744_v0, %v751_v4 }
 0x2de   : > { %v757_v7 = vmul.f32 1.442695, %v755_v5  ;;  %v648_v8 = vpop.f32.mrf.mxu3 }
 0x2df   : > { %v652_v9 = vpack.c.bf16 %v648_v8, %v648_v8 }
 0x2e0   : > { %2409 = vpow2.f32 %v757_v7 }
 0x2e1   : > { %v2685_v11 = vunpack.c.l.b16 %v652_v9 }
 0x2e3   : > { %v867_v12 = vpack.c.b16 %v2685_v11, %v2683_v10  ;;  %v2545_v10 = vmov 128.0  }
 0x2e6   : > { %v2689_v14 = vpop.eup %2409  ;;  %v674_v16 = vpop.f32.mrf.mxu3 }
 0x2e7   : > { %v679_v17 = vsel %vm610_vm1, %v674_v16, -inf  ;;  %v761_v18 = vsel %vm610_vm1, %v2689_v14, 0.0 }
 0x2e8   : > { %680 = vmax.xlane.f32.xlu2 %v679_v17  ;;  %762 = vadd.xlane.f32.xlu1 %v761_v18 }
 0x2ee   : > { %v676_v20 = vpop.f32.mrf.mxu3 }
 0x2ef   : > { %v682_v21 = vsel %vm610_vm1, %v676_v20, -inf }
 0x2f0   : > { %683 = vmax.xlane.f32.xlu0 %v682_v21  ;;  %753 = vmax.xlane.f32.xlu2 %v752_v22  ;;  %v2299_v22 = vld [vmem:[%s3037_s4 + $0x38] sm:$0xff] }
 0x2f1   : > { %964 = vmatpush.bf16.msrb.mxu1 %v2299_v22  ;;  %v2128_v22 = vld [vmem:[%s3038_s5 + $0xe8] sm:$0xf] }
 0x2f6   : > { %v813_v23 = vpop.f32.mrf.mxu3 }
 0x2f7   : > { %v818_v24 = vsel %vm610_vm1, %v813_v23, -inf }
 0x2f8   : > { %819 = vmax.xlane.f32.xlu0 %v818_v24 }
 0x2fe   : > { %v815_v26 = vpop.f32.mrf.mxu3 }
 0x2ff   : > { %v821_v27 = vsel %vm610_vm1, %v815_v26, -inf }
 0x300   : > { %822 = vmax.xlane.f32.xlu2 %v821_v27 }
 0x318   : > { %703 = vrot.lane.b32.xlu2 %v2664_v32, %s2542_s9 }
 0x35b   : > { %v681_v28 = vpop.xlane.xlu2 %680  ;;  %v763_v55 = vpop.xlane.xlu1 %762 }
 0x35c   : > { %v685_v29 = vsub.f32 %v674_v16, %v681_v28 }
 0x35e   : > { %v687_v30 = vmul.f32 1.442695, %v685_v29 }
 0x360   : > { %2411 = vpow2.f32 %v687_v30 }
 0x363   : > { %v754_v31 = vpop.xlane.xlu2 %753  ;;  %v684_v33 = vpop.xlane.xlu0 %683 }
 0x364   : > { %v756_v34 = vsub.f32 %v746_v19, %v754_v31  ;;  %v686_v37 = vsub.f32 %v676_v20, %v684_v33  ;;  %v2296_v31 = vld [vmem:[%s3037_s4 + $0x20] sm:$0xff] }
 0x366   : > { %v2412_v35 = vpop.eup %2411  ;;  %v759_v36 = vmul.f32 1.442695, %v756_v34  ;;  %v689_v39 = vmul.f32 1.442695, %v686_v37 }
 0x367   : > { %v691_v38 = vsel %vm610_vm1, %v2412_v35, 0.0 }
 0x368   : > { %2413 = vpow2.f32 %v759_v36  ;;  %692 = vadd.xlane.f32.xlu1 %v691_v38 }
 0x369   : > { %2415 = vpow2.f32 %v689_v39 }
 0x36b   : > { %v820_v40 = vpop.xlane.xlu0 %819 }
 0x36c   : > { %v824_v41 = vsub.f32 %v813_v23, %v820_v40 }
 0x36e   : > { %v2414_v42 = vpop.eup %2413  ;;  %v826_v43 = vmul.f32 1.442695, %v824_v41 }
 0x36f   : > { %v764_v44 = vsel %vm610_vm1, %v2414_v42, 0.0  ;;  %v2416_v46 = vpop.eup %2415 }
 0x370   : > { %2417 = vpow2.f32 %v826_v43  ;;  %765 = vadd.xlane.f32.xlu0 %v764_v44  ;;  %v694_v50 = vsel %vm610_vm1, %v2416_v46, 0.0 }
 0x373   : > { %v823_v45 = vpop.xlane.xlu2 %822 }
 0x374   : > { %v825_v47 = vsub.f32 %v815_v26, %v823_v45  ;;  %v2297_v26 = vld [vmem:[%s3037_s4 + $0x28] sm:$0xff] }
 0x376   : > { %v2418_v48 = vpop.eup %2417  ;;  %v828_v49 = vmul.f32 1.442695, %v825_v47  ;;  %v2295_v47 = vld [vmem:[%s3037_s4 + $0x18] sm:$0xff] }
 0x377   : > { %v830_v51 = vsel %vm610_vm1, %v2418_v48, 0.0 }
 0x378   : > { %2419 = vpow2.f32 %v828_v49  ;;  %695 = vadd.xlane.f32.xlu0 %v694_v50  ;;  %831 = vadd.xlane.f32.xlu1 %v830_v51  ;;  %v2293_v49 = vld [vmem:[%s3037_s4 + $0x8] sm:$0xff]  ;;  %v2292_v50 = vld [vmem:[%s3037_s4] sm:$0xff] }
 0x37b   : > { %v704_v52 = vpop.permute.xlu2 %703 }
 0x37c   : > { %716 = vmatpush.bf16.msrb.mxu0 %v704_v52 }
 0x37e   : > { %v2420_v53 = vpop.eup %2419 }
 0x37f   : > { %v833_v54 = vsel %vm610_vm1, %v2420_v53, 0.0 }
 0x380   : > { %834 = vadd.xlane.f32.xlu0 %v833_v54 }
 0x391   : > { %772 = vrot.lane.b32.xlu1 %v2664_v32, %s2543_s12 }
 0x394   : > { %841 = vrot.lane.b32.xlu0 %v2664_v32, %s2544_s13 }
 0x3db   : > { %v693_v57 = vpop.xlane.xlu1 %692 }
 0x3dc   : > { %2421 = vrcp.f32 %v693_v57  ;;  %v915_v57 = vperm.slane %v2651_v15, 1 }
 0x3e2   : > { %v2422_v59 = vpop.eup %2421 }
 0x3e3   : > { %v766_v56 = vpop.xlane.xlu0 %765  ;;  %v699_v63 = vmul.f32 %v2422_v59, %v2412_v35 }
 0x3eb   : > { %v696_v58 = vpop.xlane.xlu0 %695  ;;  %v832_v3 = vpop.xlane.xlu1 %831 }
 0x3ec   : > { %2423 = vrcp.f32 %v696_v58 }
 0x3ed   : > { %2425 = vrcp.f32 %v766_v56 }
 0x3ee   : > { %2427 = vrcp.f32 %v763_v55 }
 0x3f2   : > { %v2424_v60 = vpop.eup %2423 }
 0x3f3   : > { %v700_v0 = vmul.f32 %v2424_v60, %v2416_v46  ;;  %v835_v2 = vpop.xlane.xlu0 %834  ;;  %v2426_v32 = vpop.eup %2425 }
 0x3f4   : > { %2429 = vrcp.f32 %v835_v2  ;;  %v2428_v4 = vpop.eup %2427  ;;  %v770_v6 = vmul.f32 %v2426_v32, %v2414_v42 }
 0x3f5   : > { %v701_v1 = vpack.c.bf16 %v700_v0, %v699_v63  ;;  %2431 = vrcp.f32 %v832_v3  ;;  %v769_v8 = vmul.f32 %v2428_v4, %v2689_v14  ;;  %v2298_v14 = vld [vmem:[%s3037_s4 + $0x30] sm:$0xff] }
 0x3f6   : > { %965 = vmatpush.bf16.msrb.mxu1 %v2298_v14  ;;  %2433 = vrcp.f32 %v2545_v10  ;;  %v2082_v10 = vld [vmem:[%s3038_s5 + $0x98] sm:$0xf0] }
 0x3f7   : > { %1969 = vmatmul.msk.bf16.vlgmr.msrb.gmra.mxu0 %vm610_vm1, %v701_v1  ;;  %v771_v17 = vpack.c.bf16 %v770_v6, %v769_v8 }
 0x3fa   : > { %v2430_v5 = vpop.eup %2429  ;;  %966 = vmatpush.bf16.msrb.mxu1 %v2297_v26  ;;  %v2329_v26 = vld [vmem:[%s3038_s5 + $0xec] sm:$0xf] }
 0x3fb   : > { %v2432_v7 = vpop.eup %2431  ;;  %v839_v16 = vmul.f32 %v2430_v5, %v2420_v53 }
 0x3fc   : > { %v838_v18 = vmul.f32 %v2432_v7, %v2418_v48  ;;  %v2294_v48 = vld [vmem:[%s3037_s4 + $0x10] sm:$0xff]  ;;  %v2434_v11 = vpop.eup %2433 }
 0x3fd   : > { %vm989_vm4 = vweird.f32 %v2434_v11 }
 0x3fe   : > { %v840_v20 = vpack.c.bf16 %v839_v16, %v838_v18  ;;  %967 = vmatpush.bf16.msrb.mxu1 %v2296_v31  ;;  %v2330_v18 = vld [vmem:[%s3038_s5 + $0xec] sm:$0xf0]  ;;  %v2324_v31 = vld [vmem:[%s3038_s5 + $0xc4] sm:$0xf] }
 0x402   : > { %968 = vmatpush.bf16.msrb.mxu1 %v2295_v47  ;;  %v2096_v47 = vld [vmem:[%s3038_s5 + $0xa8] sm:$0xf] }
 0x403   : > { %v773_v9 = vpop.permute.xlu1 %772 }
 0x404   : > { %785 = vmatpush.bf16.msra.mxu2 %v773_v9 }
 0x406   : > { %v842_v19 = vpop.permute.xlu0 %841  ;;  %969 = vmatpush.bf16.msrb.mxu1 %v2294_v48  ;;  %v2323_v48 = vld [vmem:[%s3038_s5 + $0xb4] sm:$0xf0] }
 0x407   : > { %1971 = vmatmul.msk.bf16.vlgmr.msra.gmra.mxu2 %vm610_vm1, %v771_v17  ;;  %854 = vmatpush.bf16.msra.mxu0 %v842_v19  ;;  %v2120_v17 = vld [vmem:[%s3038_s5 + $0xe0] sm:$0xf]  ;;  %v2328_v19 = vld [vmem:[%s3038_s5 + $0xe4] sm:$0xf] }
 0x40a   : > { %1973 = vmatmul.msk.bf16.vlgmr.msra.gmra.mxu0 %vm610_vm1, %v840_v20  ;;  %970 = vmatpush.bf16.msrb.mxu1 %v2293_v49  ;;  %v2121_v20 = vor.u32 %v2330_v18, %v2120_v17  ;;  %v2066_v17 = vld [vmem:[%s3038_s5 + $0x78] sm:$0xf0] }
 0x40c   : > { %1230 = vmatpush.bf16.msrb.mxu2 %v2121_v20  ;;  %v2310_v20 = vld [vmem:[%s3038_s5 + $0x4c] sm:$0xf0] }
 0x40e   : > { %971 = vmatpush.bf16.msrb.mxu1 %v2292_v50  ;;  %v2097_v50 = vor.u32 %v2323_v48, %v2096_v47  ;;  %v2302_v47 = vld [vmem:[%s3038_s5 + $0xc] sm:$0xf0]  ;;  %v2300_v48 = vld [vmem:[%s3038_s5 + $0x4] sm:$0xf] }
 0x474   : > { %v718_v21 = vpop.f32.mrf.mxu0 }
 0x475   : > { %v723_v37 = vpack.c.bf16 %v718_v21, %v718_v21  ;;  %v2122_v21 = vld [vmem:[%s3038_s5 + $0xf0] sm:$0xf0] }
 0x477   : > { %v870_v40 = vunpack.c.l.b16 %v723_v37 }
 0x47c   : > { %v720_v23 = vpop.f32.mrf.mxu0 }
 0x47d   : > { %v724_v35 = vpack.c.bf16 %v720_v23, %v720_v23  ;;  %v2331_v23 = vld [vmem:[%s3038_s5 + $0xf4] sm:$0xf0] }
 0x47e   : > { %v2129_v14 = vor.u32 %v2331_v23, %v2128_v22  ;;  %v2042_v23 = vld [vmem:[%s3038_s5 + $0x50] sm:$0xf0] }
 0x47f   : > { %v871_v38 = vunpack.c.l.b16 %v724_v35  ;;  %v2112_v35 = vld [vmem:[%s3038_s5 + $0xc8] sm:$0xf] }
 0x480   : > { %1258 = vmatpush.bf16.msrb.mxu0 %v2129_v14  ;;  %v2311_v14 = vld [vmem:[%s3038_s5 + $0x54] sm:$0xf0] }
 0x481   : > { %v872_v41 = vpack.c.b16 %v871_v38, %v870_v40  ;;  %v2114_v40 = vld [vmem:[%s3038_s5 + $0xd8] sm:$0xf0] }
 0x487   : > { %v856_v28 = vpop.f32.mrf.mxu0 }
 0x488   : > { %v861_v43 = vpack.c.bf16 %v856_v28, %v856_v28 }
 0x48a   : > { %v787_v24 = vpop.f32.mrf.mxu2  ;;  %v884_v45 = vunpack.c.l.b16 %v861_v43  ;;  %v2322_v43 = vld [vmem:[%s3038_s5 + $0xac] sm:$0xf0] }
 0x48b   : > { %v792_v27 = vpack.c.bf16 %v787_v24, %v787_v24  ;;  %v2125_v24 = vor.u32 %v2328_v19, %v2122_v21  ;;  %v2040_v19 = vld [vmem:[%s3038_s5 + $0x40] sm:$0xf]  ;;  %v2308_v21 = vld [vmem:[%s3038_s5 + $0x44] sm:$0xf] }
 0x48c   : > { %v2041_v22 = vor.u32 %v2310_v20, %v2040_v19 }
 0x48d   : > { %v877_v33 = vunpack.c.l.b16 %v792_v27  ;;  %v2130_v27 = vld [vmem:[%s3038_s5 + $0xf8] sm:$0xf0]  ;;  %1244 = vmatpush.bf16.msra.mxu3 %v2125_v24  ;;  %v2048_v24 = vld [vmem:[%s3038_s5 + $0x48] sm:$0xf] }
 0x48e   : > { %v2133_v28 = vor.u32 %v2329_v26, %v2130_v27  ;;  %v2045_v26 = vor.u32 %v2308_v21, %v2042_v23  ;;  %v2049_v27 = vor.u32 %v2311_v14, %v2048_v24  ;;  %v1030_v21 = vperm.slane %v2651_v15, 3 }
 0x48f   : > { %v858_v39 = vpop.f32.mrf.mxu0 }
 0x490   : > { %v862_v42 = vpack.c.bf16 %v858_v39, %v858_v39  ;;  %1272 = vmatpush.bf16.msra.mxu1 %v2133_v28  ;;  %v2325_v39 = vld [vmem:[%s3038_s5 + $0xcc] sm:$0xf] }
 0x491   : > { %v2309_v28 = vld [vmem:[%s3038_s5 + $0x4c] sm:$0xf] }
 0x492   : > { %v789_v29 = vpop.f32.mrf.mxu2  ;;  %v885_v44 = vunpack.c.l.b16 %v862_v42  ;;  %v2088_v42 = vld [vmem:[%s3038_s5 + $0xa0] sm:$0xf] }
 0x493   : > { %v793_v30 = vpack.c.bf16 %v789_v29, %v789_v29  ;;  %v2104_v29 = vld [vmem:[%s3038_s5 + $0xc0] sm:$0xf] }
 0x494   : > { %v886_v46 = vpack.c.b16 %v885_v44, %v884_v45  ;;  %v2320_v44 = vld [vmem:[%s3038_s5 + $0xa4] sm:$0xf]  ;;  %v2089_v45 = vor.u32 %v2322_v43, %v2088_v42  ;;  %v2305_v42 = vld [vmem:[%s3038_s5 + $0x2c] sm:$0xf]  ;;  %v2034_v43 = vld [vmem:[%s3038_s5 + $0x38] sm:$0xf0] }
 0x495   : > { %v878_v34 = vunpack.c.l.b16 %v793_v30  ;;  %v2326_v30 = vld [vmem:[%s3038_s5 + $0xcc] sm:$0xf0] }
 0x497   : > { %v879_v36 = vpack.c.b16 %v878_v34, %v877_v33  ;;  %v2105_v33 = vor.u32 %v2326_v30, %v2104_v29  ;;  %v2106_v34 = vld [vmem:[%s3038_s5 + $0xd0] sm:$0xf0]  ;;  %v2050_v29 = vld [vmem:[%s3038_s5 + $0x58] sm:$0xf0] }
 0x498   : > { %v2109_v37 = vor.u32 %v2324_v31, %v2106_v34  ;;  %v2053_v30 = vor.u32 %v2309_v28, %v2050_v29  ;;  %v2024_v31 = vld [vmem:[%s3038_s5 + $0x20] sm:$0xf]  ;;  %v2304_v34 = vld [vmem:[%s3038_s5 + $0x24] sm:$0xf]  ;;  %v2339_v28 = vld [vmem:[#allocation4 + $0x38] sm:$0xff] }
 0x499   : > { %880 = vrot.lane.b32.xlu2 %v879_v36, %s2543_s12  ;;  %v2327_v36 = vld [vmem:[%s3038_s5 + $0xd4] sm:$0xf0]  ;;  %1231 = vmatpush.bf16.msrb.mxu2 %v2105_v33  ;;  %v2306_v33 = vld [vmem:[%s3038_s5 + $0x2c] sm:$0xf0] }
 0x49a   : > { %v2113_v38 = vor.u32 %v2327_v36, %v2112_v35  ;;  %1245 = vmatpush.bf16.msra.mxu3 %v2109_v37  ;;  %v2025_v35 = vor.u32 %v2306_v33, %v2024_v31  ;;  %v2026_v36 = vld [vmem:[%s3038_s5 + $0x30] sm:$0xf0]  ;;  %v2032_v37 = vld [vmem:[%s3038_s5 + $0x28] sm:$0xf]  ;;  %v2347_v29 = vld [vmem:[#allocation4 + $0x78] sm:$0xff] }
 0x49b   : > { %v2361_v31 = vld [vmem:[#allocation4 + $0xe8] sm:$0xff]  ;;  %v2338_v33 = vld [vmem:[#allocation4 + $0x30] sm:$0xff] }
 0x49c   : > { %1259 = vmatpush.bf16.msrb.mxu0 %v2113_v38  ;;  %v2307_v38 = vld [vmem:[%s3038_s5 + $0x34] sm:$0xf0] }
 0x49d   : > { %1232 = vmatpush.bf16.msrb.mxu2 %v2089_v45 }
 0x4a0   : > { %1260 = vmatpush.bf16.msrb.mxu0 %v2097_v50 }
 0x4a1   : > { %873 = vrot.lane.b32.xlu2 %v872_v41, %s2544_s13  ;;  %v2117_v41 = vor.u32 %v2325_v39, %v2114_v40  ;;  %v2029_v40 = vor.u32 %v2304_v34, %v2026_v36  ;;  %v2346_v34 = vld [vmem:[#allocation4 + $0x70] sm:$0xff]  ;;  %v2360_v36 = vld [vmem:[#allocation4 + $0xe0] sm:$0xff] }
 0x4a3   : > { %1273 = vmatpush.bf16.msra.mxu1 %v2117_v41  ;;  %v2033_v41 = vor.u32 %v2307_v38, %v2032_v37  ;;  %v2337_v37 = vld [vmem:[#allocation4 + $0x28] sm:$0xff] }
 0x4a4   : > { %v2345_v38 = vld [vmem:[#allocation4 + $0x68] sm:$0xff] }
 0x4a9   : > { %887 = vrot.lane.b32.xlu2 %v886_v46, %s2542_s9  ;;  %v2090_v46 = vld [vmem:[%s3038_s5 + $0xb0] sm:$0xf0]  ;;  %s372_s9 = scalar_lea.vmem %s3041_s8, %s2630_s22 }
 0x4aa   : > { %v2093_v49 = vor.u32 %v2320_v44, %v2090_v46  ;;  %v2008_v44 = vld [vmem:[%s3038_s5] sm:$0xf]  ;;  %v2037_v46 = vor.u32 %v2305_v42, %v2034_v43  ;;  %v2350_v43 = vld [vmem:[#allocation4 + $0x90] sm:$0xff] }
 0x4ab   : > { %v2009_v50 = vor.u32 %v2302_v47, %v2008_v44  ;;  %v2344_v42 = vld [vmem:[#allocation4 + $0x60] sm:$0xff]  ;;  %v2358_v44 = vld [vmem:[#allocation4 + $0xd0] sm:$0xff]  ;;  %v2343_v47 = vld [vmem:[#allocation4 + $0x58] sm:$0xff] }
 0x4ac   : > { %1246 = vmatpush.bf16.msra.mxu3 %v2093_v49  ;;  %v2010_v49 = vld [vmem:[%s3038_s5 + $0x10] sm:$0xf0] }
 0x4f3   : > { %v881_v51 = vpop.permute.xlu2 %880 }
 0x4fb   : > { %v874_v52 = vpop.permute.xlu2 %873 }
 0x4fc   : > { %v891_v53 = vsel %vm589_vm0, %v867_v12, %v874_v52  ;;  %v985_v12 = vmul.f32 128.0, %v2434_v11  ;;  %v2098_v52 = vld [vmem:[%s3038_s5 + $0xb8] sm:$0xf0] }
 0x4fd   : > { %v894_v55 = vsel %vm892_vm2, %v891_v53, %v881_v51  ;;  %v2321_v51 = vld [vmem:[%s3038_s5 + $0xac] sm:$0xf] }
 0x4fe   : > { %v986_v2 = vsub.f32 1.0, %v985_v12  ;;  %v2101_v53 = vor.u32 %v2321_v51, %v2098_v52  ;;  %v2056_v12 = vld [vmem:[%s3038_s5 + $0x60] sm:$0xf]  ;;  %v2013_v51 = vor.u32 %v2300_v48, %v2010_v49  ;;  %v2016_v52 = vld [vmem:[%s3038_s5 + $0x8] sm:$0xf] }
 0x4ff   : > { %v2349_v48 = vld [vmem:[#allocation4 + $0x88] sm:$0xff] }
 0x500   : > { %v987_v3 = vmul.f32 %v2434_v11, %v986_v2  ;;  %1274 = vmatpush.bf16.msra.mxu1 %v2101_v53  ;;  %v2314_v2 = vld [vmem:[%s3038_s5 + $0x6c] sm:$0xf0]  ;;  %v2303_v53 = vld [vmem:[%s3038_s5 + $0x14] sm:$0xf0]  ;;  %v2357_v49 = vld [vmem:[#allocation4 + $0xc8] sm:$0xff] }
 0x502   : > { %v988_v32 = vadd.f32 %v2434_v11, %v987_v3  ;;  %v2312_v3 = vld [vmem:[%s3038_s5 + $0x64] sm:$0xf] }
 0x503   : > { %v888_v54 = vpop.permute.xlu2 %887 }
 0x504   : > { %v897_v56 = vsel %vm895_vm3, %v894_v55, %v888_v54  ;;  %v2747_v4 = vsel %vm989_vm4, %v2434_v11, %v988_v32  ;;  %v2072_v54 = vld [vmem:[%s3038_s5 + $0x80] sm:$0xf]  ;;  %v2318_v55 = vld [vmem:[%s3038_s5 + $0x8c] sm:$0xf0]  ;;  %v2057_v32 = vor.u32 %v2314_v2, %v2056_v12 }
 0x505   : > { %972 = vmatmul.bf16.vlgmr.msrb.gmra.mxu1 %v897_v56  ;;  %v2316_v56 = vld [vmem:[%s3038_s5 + $0x84] sm:$0xf] }
 0x582   : > { %v973_v58 = vpop.f32.mrf.mxu1 }
 0x583   : > { %v974_v59 = vadd.f32 %v973_v58, %v915_v57  ;;  %v2074_v58 = vld [vmem:[%s3038_s5 + $0x90] sm:$0xf0] }
 0x585   : > { %v978_v60 = vadd.f32 %v974_v59, %v2636_v61  ;;  %v2080_v59 = vld [vmem:[%s3038_s5 + $0x88] sm:$0xf] }
 0x587   : > { %980 = vadd.xlane.f32.xlu0 %v978_v60 }
 0x58a   : > { %v975_v63 = vpop.f32.mrf.mxu1 }
 0x58b   : > { %v976_v0 = vadd.f32 %v975_v63, %v915_v57  ;;  %v2073_v57 = vor.u32 %v2318_v55, %v2072_v54  ;;  %v2077_v63 = vor.u32 %v2316_v56, %v2074_v58  ;;  %v2301_v54 = vld [vmem:[%s3038_s5 + $0xc] sm:$0xf]  ;;  %v2017_v56 = vor.u32 %v2303_v53, %v2016_v52  ;;  %v2334_v52 = vld [vmem:[#allocation4 + $0x10] sm:$0xff] }
 0x58c   : > { %v2342_v53 = vld [vmem:[#allocation4 + $0x50] sm:$0xff] }
 0x58d   : > { %v979_v1 = vadd.f32 %v976_v0, %v2638_v62  ;;  %1233 = vmatpush.bf16.msrb.mxu2 %v2073_v57  ;;  %1247 = vmatpush.bf16.msra.mxu3 %v2077_v63  ;;  %v2018_v57 = vld [vmem:[%s3038_s5 + $0x18] sm:$0xf0] }
 0x58e   : > { %v2021_v58 = vor.u32 %v2301_v54, %v2018_v57  ;;  %v2356_v57 = vld [vmem:[#allocation4 + $0xc0] sm:$0xff] }
 0x58f   : > { %982 = vadd.xlane.f32.xlu1 %v979_v1 }
 0x591   : > { %1234 = vmatpush.bf16.msrb.mxu2 %v2057_v32 }
 0x595   : > { %1235 = vmatpush.bf16.msrb.mxu2 %v2041_v22 }
 0x599   : > { %1236 = vmatpush.bf16.msrb.mxu2 %v2025_v35  ;;  %v2352_v35 = vld [vmem:[#allocation4 + $0xa0] sm:$0xff] }
 0x59d   : > { %1237 = vmatpush.bf16.msrb.mxu2 %v2009_v50  ;;  %v1068_v50 = vperm.slane %v2659_v25, 4  ;;  %v2333_v25 = vld [vmem:[#allocation4 + $0x8] sm:$0xff] }
 0x5a1   : > { %1619 = vmatpush.bf16.msra.mxu2 %v2339_v28 }
 0x5a5   : > { %1620 = vmatpush.bf16.msra.mxu2 %v2338_v33 }
 0x5a9   : > { %1621 = vmatpush.bf16.msra.mxu2 %v2337_v37 }
 0x5fa   : > { %v981_v5 = vpop.xlane.xlu0 %980 }
 0x5fb   : > { %v991_v6 = vmul.f32 %v2747_v4, %v981_v5  ;;  %v2058_v5 = vld [vmem:[%s3038_s5 + $0x70] sm:$0xf0] }
 0x5fd   : > { %v2750_v61 = vsub.f32 %v978_v60, %v991_v6  ;;  %v2319_v60 = vld [vmem:[%s3038_s5 + $0x94] sm:$0xf0]  ;;  %v2064_v6 = vld [vmem:[%s3038_s5 + $0x68] sm:$0xf] }
 0x5fe   : > { %v2081_v0 = vor.u32 %v2319_v60, %v2080_v59 }
 0x5ff   : > { %v995_v7 = vmul.f32 %v2750_v61, %v2750_v61 }
 0x600   : > { %1261 = vmatpush.bf16.msrb.mxu0 %v2081_v0 }
 0x601   : > { %997 = vadd.xlane.f32.xlu2 %v995_v7  ;;  %v2315_v7 = vld [vmem:[%s3038_s5 + $0x74] sm:$0xf0] }
 0x602   : > { %v983_v62 = vpop.xlane.xlu1 %982 }
 0x603   : > { %v992_v8 = vmul.f32 %v2747_v4, %v983_v62  ;;  %v2061_v62 = vor.u32 %v2312_v3, %v2058_v5 }
 0x605   : > { %v2755_v9 = vsub.f32 %v979_v1, %v992_v8  ;;  %v2317_v1 = vld [vmem:[%s3038_s5 + $0x8c] sm:$0xf]  ;;  %v2065_v8 = vor.u32 %v2315_v7, %v2064_v6  ;;  %1248 = vmatpush.bf16.msra.mxu3 %v2061_v62 }
 0x606   : > { %v2085_v11 = vor.u32 %v2317_v1, %v2082_v10 }
 0x607   : > { %v996_v16 = vmul.f32 %v2755_v9, %v2755_v9  ;;  %1262 = vmatpush.bf16.msrb.mxu0 %v2065_v8 }
 0x608   : > { %1275 = vmatpush.bf16.msra.mxu1 %v2085_v11 }
 0x609   : > { %999 = vadd.xlane.f32.xlu0 %v996_v16  ;;  %v2313_v16 = vld [vmem:[%s3038_s5 + $0x6c] sm:$0xf]  ;;  %1249 = vmatpush.bf16.msra.mxu3 %v2045_v26  ;;  %v2363_v26 = vld [vmem:[#allocation4 + $0xf8] sm:$0xff] }
 0x60a   : > { %v2069_v18 = vor.u32 %v2313_v16, %v2066_v17  ;;  %v1027_v16 = vperm.slane %v2651_v15, 2 }
 0x60b   : > { %1263 = vmatpush.bf16.msrb.mxu0 %v2049_v27  ;;  %v2362_v27 = vld [vmem:[#allocation4 + $0xf0] sm:$0xff] }
 0x60c   : > { %1276 = vmatpush.bf16.msra.mxu1 %v2069_v18 }
 0x60d   : > { %1250 = vmatpush.bf16.msra.mxu3 %v2029_v40  ;;  %v2359_v40 = vld [vmem:[#allocation4 + $0xd8] sm:$0xff] }
 0x60f   : > { %1264 = vmatpush.bf16.msrb.mxu0 %v2033_v41  ;;  %v2336_v41 = vld [vmem:[#allocation4 + $0x20] sm:$0xff] }
 0x610   : > { %1277 = vmatpush.bf16.msra.mxu1 %v2053_v30  ;;  %v2353_v30 = vld [vmem:[#allocation4 + $0xa8] sm:$0xff]  ;;  %1622 = vmatpush.bf16.msra.mxu2 %v2336_v41 }
 0x611   : > { %1251 = vmatpush.bf16.msra.mxu3 %v2013_v51 }
 0x613   : > { %1265 = vmatpush.bf16.msrb.mxu0 %v2017_v56  ;;  %v2348_v56 = vld [vmem:[#allocation4 + $0x80] sm:$0xff] }
 0x614   : > { %1278 = vmatpush.bf16.msra.mxu1 %v2037_v46  ;;  %v2335_v46 = vld [vmem:[#allocation4 + $0x18] sm:$0xff] }
 0x615   : > { %1633 = vmatpush.bf16.msrb.mxu3 %v2347_v29  ;;  %1623 = vmatpush.bf16.msra.mxu2 %v2335_v46 }
 0x618   : > { %1279 = vmatpush.bf16.msra.mxu1 %v2021_v58 }
 0x619   : > { %1634 = vmatpush.bf16.msrb.mxu3 %v2346_v34  ;;  %1624 = vmatpush.bf16.msra.mxu2 %v2334_v52 }
 0x61c   : > { %1661 = vmatpush.bf16.msrb.mxu1 %v2363_v26 }
 0x61d   : > { %1635 = vmatpush.bf16.msrb.mxu3 %v2345_v38  ;;  %1625 = vmatpush.bf16.msra.mxu2 %v2333_v25 }
 0x620   : > { %1662 = vmatpush.bf16.msrb.mxu1 %v2362_v27 }
 0x621   : > { %1636 = vmatpush.bf16.msrb.mxu3 %v2344_v42 }
 0x624   : > { %1663 = vmatpush.bf16.msrb.mxu1 %v2361_v31 }
 0x625   : > { %1637 = vmatpush.bf16.msrb.mxu3 %v2343_v47 }
 0x628   : > { %1664 = vmatpush.bf16.msrb.mxu1 %v2360_v36 }
 0x629   : > { %1638 = vmatpush.bf16.msrb.mxu3 %v2342_v53 }
 0x62c   : > { %1665 = vmatpush.bf16.msrb.mxu1 %v2359_v40 }
 0x630   : > { %1666 = vmatpush.bf16.msrb.mxu1 %v2358_v44 }
 0x634   : > { %1667 = vmatpush.bf16.msrb.mxu1 %v2357_v49 }
 0x638   : > { %1668 = vmatpush.bf16.msrb.mxu1 %v2356_v57 }
 0x674   : > { %v998_v39 = vpop.xlane.xlu2 %997 }
 0x675   : > { %v1001_v45 = vmul.f32 %v998_v39, %v2747_v4  ;;  %v2351_v39 = vld [vmem:[#allocation4 + $0x98] sm:$0xff] }
 0x677   : > { %v1003_v55 = vadd.f32 1e-12, %v1001_v45  ;;  %v379_v45 = vld [vmem:[%s3036_s3 + $0x18] sm:$0xff] }
 0x678   : > { %v1069_v51 = vperm.slane %v379_v45, 4 }
 0x679   : > { %2435 = vrsqrt.f32 %v1003_v55  ;;  %vm1011_vm6 = vweird.f32 %v1003_v55 }
 0x67c   : > { %v1000_v59 = vpop.xlane.xlu0 %999 }
 0x67d   : > { %v1002_v60 = vmul.f32 %v1000_v59, %v2747_v4 }
 0x67f   : > { %v2436_v63 = vpop.eup %2435  ;;  %v1004_v0 = vadd.f32 1e-12, %v1002_v60  ;;  %v1066_v60 = vperm.slane %v2651_v15, 4 }
 0x680   : > { %v1006_v1 = vmul.f32 %v2436_v63, %v1003_v55  ;;  %vm1012_vm5 = vweird.f32 %v2436_v63 }
 0x681   : > { %2437 = vrsqrt.f32 %v1004_v0  ;;  %vm1013_vm7 = vmor %vm1011_vm6, %vm1012_vm5  ;;  %vm1021_vm9 = vweird.f32 %v1004_v0 }
 0x682   : > { %v1007_v10 = vmul.f32 %v2436_v63, %v1006_v1 }
 0x684   : > { %v1008_v11 = vmul.f32 0.5, %v1007_v10 }
 0x686   : > { %v1009_v12 = vsub.f32 1.5, %v1008_v11 }
 0x687   : > { %v2438_v2 = vpop.eup %2437 }
 0x688   : > { %v1010_v3 = vmul.f32 %v2436_v63, %v1009_v12  ;;  %v1016_v32 = vmul.f32 %v2438_v2, %v1004_v0  ;;  %vm1022_vm8 = vweird.f32 %v2438_v2  ;;  %v2341_v0 = vld [vmem:[#allocation4 + $0x48] sm:$0xff] }
 0x689   : > { %vm1023_vm10 = vmor %vm1021_vm9, %vm1022_vm8  ;;  %1639 = vmatpush.bf16.msrb.mxu3 %v2341_v0 }
 0x68a   : > { %v1017_v5 = vmul.f32 %v2438_v2, %v1016_v32  ;;  %v1014_v6 = vsel %vm1013_vm7, %v2436_v63, %v1010_v3  ;;  %v1067_v63 = vperm.slane %v2645_v13, 4  ;;  %v2332_v32 = vld [vmem:[#allocation4] sm:$0xff] }
 0x68b   : > { %v1025_v8 = vmul.f32 %v1014_v6, %v2750_v61  ;;  %v2355_v61 = vld [vmem:[#allocation4 + $0xb8] sm:$0xff]  ;;  %1626 = vmatpush.bf16.msra.mxu2 %v2332_v32 }
 0x68c   : > { %v1018_v7 = vmul.f32 0.5, %v1017_v5  ;;  %1647 = vmatpush.bf16.msra.mxu0 %v2355_v61  ;;  %v2340_v5 = vld [vmem:[#allocation4 + $0x40] sm:$0xff] }
 0x68d   : > { %v1028_v20 = vmul.f32 %v1027_v16, %v1025_v8  ;;  %1640 = vmatpush.bf16.msrb.mxu3 %v2340_v5 }
 0x68e   : > { %v1019_v62 = vsub.f32 1.5, %v1018_v7 }
 0x68f   : > { %v2957_v23 = vadd.f32 %v1030_v21, %v1028_v20 }
 0x690   : > { %v1020_v17 = vmul.f32 %v2438_v2, %v1019_v62 }
 0x692   : > { %v1024_v18 = vsel %vm1023_vm10, %v2438_v2, %v1020_v17 }
 0x693   : > { %v1026_v19 = vmul.f32 %v1024_v18, %v2755_v9  ;;  %v2354_v9 = vld [vmem:[#allocation4 + $0xb0] sm:$0xff] }
 0x694   : > { %1648 = vmatpush.bf16.msra.mxu0 %v2354_v9 }
 0x695   : > { %v1029_v22 = vmul.f32 %v1027_v16, %v1026_v19 }
 0x697   : > { %v2959_v24 = vadd.f32 %v1030_v21, %v1029_v22 }
 0x698   : > { %1649 = vmatpush.bf16.msra.mxu0 %v2353_v30 }
 0x699   : > { %v1033_v14 = vpack.c.bf16 %v2959_v24, %v2957_v23 }
 0x69b   : > { %1238 = vmatmul.bf16.vlgmr.msrb.gmra.mxu2 %v1033_v14  ;;  %1252 = vmatmul.bf16.vlgmr.msra.gmra.mxu3 %v1033_v14 }
 0x69c   : > { %1266 = vmatmul.bf16.vlgmr.msrb.gmra.mxu0 %v1033_v14  ;;  %1280 = vmatmul.bf16.vlgmr.msra.gmra.mxu1 %v1033_v14 }
 0x69d   : > { %1650 = vmatpush.bf16.msra.mxu0 %v2352_v35 }
 0x6a1   : > { %1651 = vmatpush.bf16.msra.mxu0 %v2351_v39 }
 0x6a5   : > { %1652 = vmatpush.bf16.msra.mxu0 %v2350_v43 }
 0x6a9   : > { %1653 = vmatpush.bf16.msra.mxu0 %v2349_v48 }
 0x6ad   : > { %1654 = vmatpush.bf16.msra.mxu0 %v2348_v56 }
 0x719   : > { %v1267_v54 = vpop.f32.mrf.mxu0  ;;  %v1281_v55 = vpop.f32.mrf.mxu1 }
 0x71a   : > { %v2967_v58 = vadd.f32 %v1267_v54, %v1068_v50  ;;  %v2969_v59 = vadd.f32 %v1281_v55, %v1069_v51 }
 0x71c   : > { %v1288_v1 = vmul.f32 %v2967_v58, %v2967_v58  ;;  %v1289_v10 = vmul.f32 %v2969_v59, %v2969_v59 }
 0x71e   : > { %v1296_v11 = vmul.f32 %v1288_v1, %v2967_v58  ;;  %v1297_v12 = vmul.f32 %v1289_v10, %v2969_v59  ;;  %v1239_v2 = vpop.f32.mrf.mxu2  ;;  %v1253_v15 = vpop.f32.mrf.mxu3 }
 0x71f   : > { %v2979_v3 = vadd.f32 %v1239_v2, %v1066_v60  ;;  %v2981_v13 = vadd.f32 %v1253_v15, %v1067_v63 }
 0x720   : > { %v1304_v6 = vmul.f32 0.044715, %v1296_v11  ;;  %v1305_v7 = vmul.f32 0.044715, %v1297_v12 }
 0x721   : > { %v1286_v62 = vmul.f32 %v2979_v3, %v2979_v3  ;;  %v1287_v8 = vmul.f32 %v2981_v13, %v2981_v13  ;;  %v1269_v16 = vpop.f32.mrf.mxu0  ;;  %v1283_v17 = vpop.f32.mrf.mxu1 }
 0x722   : > { %v1312_v18 = vadd.f32 %v1304_v6, %v2967_v58  ;;  %v1313_v19 = vadd.f32 %v1305_v7, %v2969_v59  ;;  %v1270_v20 = vadd.f32 %v1269_v16, %v1068_v50  ;;  %v2989_v21 = vadd.f32 %v1283_v17, %v1069_v51 }
 0x723   : > { %v1294_v22 = vmul.f32 %v1286_v62, %v2979_v3  ;;  %v1295_v14 = vmul.f32 %v1287_v8, %v2981_v13 }
 0x724   : > { %v1320_v61 = vmul.f32 0.7978846, %v1312_v18  ;;  %v1292_v26 = vmul.f32 %v1270_v20, %v1270_v20  ;;  %v1293_v9 = vmul.f32 %v2989_v21, %v2989_v21  ;;  %v1321_v27 = vmul.f32 0.7978846, %v1313_v19 }
 0x725   : > { %v1302_v28 = vmul.f32 0.044715, %v1294_v22  ;;  %v1303_v29 = vmul.f32 0.044715, %v1295_v14 }
 0x726   : > { %v1300_v30 = vmul.f32 %v1292_v26, %v1270_v20  ;;  %v1301_v31 = vmul.f32 %v1293_v9, %v2989_v21  ;;  %v1241_v33 = vpop.f32.mrf.mxu2  ;;  %v1255_v34 = vpop.f32.mrf.mxu3  ;;  %2439 = vtanh.f32 %v1320_v61 }
 0x727   : > { %v1310_v35 = vadd.f32 %v1302_v28, %v2979_v3  ;;  %v1311_v36 = vadd.f32 %v1303_v29, %v2981_v13  ;;  %v1242_v37 = vadd.f32 %v1241_v33, %v1066_v60  ;;  %v1256_v40 = vadd.f32 %v1255_v34, %v1067_v63 }
 0x728   : > { %v1308_v38 = vmul.f32 0.044715, %v1300_v30  ;;  %v1309_v39 = vmul.f32 0.044715, %v1301_v31  ;;  %2441 = vtanh.f32 %v1321_v27 }
 0x729   : > { %v1318_v41 = vmul.f32 0.7978846, %v1310_v35  ;;  %v1319_v42 = vmul.f32 0.7978846, %v1311_v36  ;;  %v1290_v43 = vmul.f32 %v1242_v37, %v1242_v37  ;;  %v1291_v46 = vmul.f32 %v1256_v40, %v1256_v40 }
 0x72a   : > { %v1316_v44 = vadd.f32 %v1308_v38, %v1270_v20  ;;  %v1317_v45 = vadd.f32 %v1309_v39, %v2989_v21 }
 0x72b   : > { %v1298_v47 = vmul.f32 %v1290_v43, %v1242_v37  ;;  %2443 = vtanh.f32 %v1318_v41  ;;  %v1299_v50 = vmul.f32 %v1291_v46, %v1256_v40 }
 0x72c   : > { %v1324_v48 = vmul.f32 0.7978846, %v1316_v44  ;;  %v1325_v49 = vmul.f32 0.7978846, %v1317_v45  ;;  %2445 = vtanh.f32 %v1319_v42  ;;  %v2440_v52 = vpop.eup %2439 }
 0x72d   : > { %v1306_v51 = vmul.f32 0.044715, %v1298_v47  ;;  %v1307_v53 = vmul.f32 0.044715, %v1299_v50  ;;  %v1336_v57 = vadd.f32 1.0, %v2440_v52 }
 0x72e   : > { %2447 = vtanh.f32 %v1324_v48  ;;  %v2442_v54 = vpop.eup %2441 }
 0x72f   : > { %2449 = vtanh.f32 %v1325_v49  ;;  %v1314_v55 = vadd.f32 %v1306_v51, %v1242_v37  ;;  %v1315_v56 = vadd.f32 %v1307_v53, %v1256_v40  ;;  %v1337_v25 = vadd.f32 1.0, %v2442_v54 }
 0x730   : > { %v1344_v12 = vmul.f32 0.5, %v1336_v57 }
 0x731   : > { %v1322_v60 = vmul.f32 0.7978846, %v1314_v55  ;;  %v2444_v63 = vpop.eup %2443  ;;  %v1323_v0 = vmul.f32 0.7978846, %v1315_v56  ;;  %v1345_v15 = vmul.f32 0.5, %v1337_v25 }
 0x732   : > { %v2446_v1 = vpop.eup %2445  ;;  %v1334_v32 = vadd.f32 1.0, %v2444_v63  ;;  %v1352_v16 = vmul.f32 %v1344_v12, %v2967_v58 }
 0x733   : > { %2451 = vtanh.f32 %v1322_v60  ;;  %v1335_v6 = vadd.f32 1.0, %v2446_v1  ;;  %v1353_v19 = vmul.f32 %v1345_v15, %v2969_v59 }
 0x734   : > { %v2448_v10 = vpop.eup %2447  ;;  %2453 = vtanh.f32 %v1323_v0  ;;  %v1342_v22 = vmul.f32 0.5, %v1334_v32 }
 0x735   : > { %v2450_v11 = vpop.eup %2449  ;;  %v1340_v2 = vadd.f32 1.0, %v2448_v10  ;;  %v1343_v26 = vmul.f32 0.5, %v1335_v6 }
 0x736   : > { %v1341_v5 = vadd.f32 1.0, %v2450_v11  ;;  %v1350_v31 = vmul.f32 %v1342_v22, %v2979_v3  ;;  %v1725_v22 = vld [vmem:[%s362_s25] sm:$0xff] }
 0x737   : > { %v1348_v7 = vmul.f32 0.5, %v1340_v2  ;;  %v1351_v58 = vmul.f32 %v1343_v26, %v2981_v13  ;;  %v1726_v26 = vld [vmem:[%s362_s25 + $0x8] sm:$0xff] }
 0x738   : > { %v1349_v62 = vmul.f32 0.5, %v1341_v5 }
 0x739   : > { %v2452_v8 = vpop.eup %2451  ;;  %v1356_v17 = vmul.f32 %v1348_v7, %v1270_v20 }
 0x73a   : > { %v2454_v18 = vpop.eup %2453  ;;  %v1357_v14 = vmul.f32 %v1349_v62, %v2989_v21  ;;  %v1338_v61 = vadd.f32 1.0, %v2452_v8  ;;  %v3007_v21 = vld [vmem:[%s3036_s3] sm:$0xff] }
 0x73b   : > { %v1339_v9 = vadd.f32 1.0, %v2454_v18  ;;  %v1360_v27 = vpack.c.bf16 %v1356_v17, %v1352_v16  ;;  %v1426_v35 = vperm.slane %v3007_v21, 5  ;;  %v1717_v62 = vperm.slane %v3007_v21, 6 }
 0x73c   : > { %v1346_v28 = vmul.f32 0.5, %v1338_v61  ;;  %v1361_v29 = vpack.c.bf16 %v1357_v14, %v1353_v19  ;;  %v1720_v16 = vperm.slane %v3007_v21, 7 }
 0x73d   : > { %v1347_v30 = vmul.f32 0.5, %v1339_v9  ;;  %1655 = vmatmul.bf16.vlgmr.msra.gmra.mxu0 %v1360_v27 }
 0x73e   : > { %v1354_v33 = vmul.f32 %v1346_v28, %v1242_v37  ;;  %1669 = vmatmul.bf16.vlgmr.msrb.gmra.mxu1 %v1361_v29 }
 0x73f   : > { %v1355_v20 = vmul.f32 %v1347_v30, %v1256_v40 }
 0x740   : > { %v1358_v34 = vpack.c.bf16 %v1354_v33, %v1350_v31 }
 0x741   : > { %v1359_v59 = vpack.c.bf16 %v1355_v20, %v1351_v58 }
 0x742   : > { %1627 = vmatmul.bf16.vlgmr.msra.gmra.mxu2 %v1358_v34 }
 0x743   : > { %1641 = vmatmul.bf16.vlgmr.msrb.gmra.mxu3 %v1359_v59 }
 0x7ba   : > { %v1656_v3 = vpop.f32.mrf.mxu0 }
 0x7bb   : > { %v1670_v41 = vpop.f32.mrf.mxu1 }
 0x7c2   : > { %v1658_v47 = vpop.f32.mrf.mxu0 }
 0x7c3   : > { %v1672_v49 = vpop.f32.mrf.mxu1 }
 0x7c5   : > { %v1628_v36 = vpop.f32.mrf.mxu2 }
 0x7c6   : > { %v1629_v38 = vadd.f32 %v1628_v36, %v1426_v35  ;;  %v1642_v39 = vpop.f32.mrf.mxu3 }
 0x7c8   : > { %v1643_v37 = vadd.f32 %v1642_v39, %v1629_v38 }
 0x7ca   : > { %v1657_v42 = vadd.f32 %v1656_v3, %v1643_v37 }
 0x7cc   : > { %v1671_v13 = vadd.f32 %v1670_v41, %v1657_v42 }
 0x7cd   : > { %v1630_v40 = vpop.f32.mrf.mxu2 }
 0x7ce   : > { %v1631_v43 = vadd.f32 %v1630_v40, %v1426_v35  ;;  %v1675_v44 = vadd.f32 %v1671_v13, %v2957_v23  ;;  %v1644_v45 = vpop.f32.mrf.mxu3 }
 0x7d0   : > { %v1645_v46 = vadd.f32 %v1644_v45, %v1631_v43  ;;  %1677 = vadd.xlane.f32.xlu1 %v1675_v44 }
 0x7d2   : > { %v1659_v48 = vadd.f32 %v1658_v47, %v1645_v46 }
 0x7d4   : > { %v1673_v50 = vadd.f32 %v1672_v49, %v1659_v48 }
 0x7d6   : > { %v1676_v51 = vadd.f32 %v1673_v50, %v2959_v24 }
 0x7d8   : > { %1679 = vadd.xlane.f32.xlu2 %v1676_v51 }
 0x843   : > { %v1678_v52 = vpop.xlane.xlu1 %1677 }
 0x844   : > { %v1681_v53 = vmul.f32 %v1678_v52, %v2747_v4 }
 0x846   : > { %v1683_v54 = vsub.f32 %v1675_v44, %v1681_v53 }
 0x848   : > { %v1685_v55 = vmul.f32 %v1683_v54, %v1683_v54 }
 0x84a   : > { %1687 = vadd.xlane.f32.xlu0 %v1685_v55 }
 0x84b   : > { %v1680_v56 = vpop.xlane.xlu2 %1679 }
 0x84c   : > { %v1682_v57 = vmul.f32 %v1680_v56, %v2747_v4 }
 0x84e   : > { %v1684_v23 = vsub.f32 %v1676_v51, %v1682_v57 }
 0x850   : > { %v1686_v60 = vmul.f32 %v1684_v23, %v1684_v23 }
 0x852   : > { %1689 = vadd.xlane.f32.xlu1 %v1686_v60 }
 0x8bd   : > { %v1688_v63 = vpop.xlane.xlu0 %1687 }
 0x8be   : > { %v1691_v25 = vmul.f32 %v1688_v63, %v2747_v4 }
 0x8c0   : > { %v1693_v0 = vadd.f32 1e-12, %v1691_v25 }
 0x8c2   : > { %2455 = vrsqrt.f32 %v1693_v0  ;;  %vm1701_vm12 = vweird.f32 %v1693_v0 }
 0x8c5   : > { %v1690_v1 = vpop.xlane.xlu1 %1689 }
 0x8c6   : > { %v1692_v24 = vmul.f32 %v1690_v1, %v2747_v4 }
 0x8c8   : > { %v2456_v10 = vpop.eup %2455  ;;  %v1694_v11 = vadd.f32 1e-12, %v1692_v24 }
 0x8c9   : > { %v1696_v12 = vmul.f32 %v2456_v10, %v1693_v0  ;;  %vm1702_vm11 = vweird.f32 %v2456_v10 }
 0x8ca   : > { %2457 = vrsqrt.f32 %v1694_v11  ;;  %vm1703_vm13 = vmor %vm1701_vm12, %vm1702_vm11  ;;  %vm1711_vm15 = vweird.f32 %v1694_v11 }
 0x8cb   : > { %v1697_v2 = vmul.f32 %v2456_v10, %v1696_v12 }
 0x8cd   : > { %v1698_v15 = vmul.f32 0.5, %v1697_v2 }
 0x8cf   : > { %v1699_v32 = vsub.f32 1.5, %v1698_v15 }
 0x8d0   : > { %v2458_v5 = vpop.eup %2457 }
 0x8d1   : > { %v1700_v6 = vmul.f32 %v2456_v10, %v1699_v32  ;;  %v1706_v7 = vmul.f32 %v2458_v5, %v1694_v11  ;;  %vm1712_vm14 = vweird.f32 %v2458_v5 }
 0x8d2   : > { %vm1713_vm0 = vmor %vm1711_vm15, %vm1712_vm14 }
 0x8d3   : > { %v1704_v8 = vsel %vm1703_vm13, %v2456_v10, %v1700_v6  ;;  %v1707_v4 = vmul.f32 %v2458_v5, %v1706_v7 }
 0x8d4   : > { %v1715_v17 = vmul.f32 %v1704_v8, %v1683_v54 }
 0x8d5   : > { %v1708_v18 = vmul.f32 0.5, %v1707_v4 }
 0x8d6   : > { %v1718_v19 = vmul.f32 %v1717_v62, %v1715_v17 }
 0x8d7   : > { %v1709_v14 = vsub.f32 1.5, %v1708_v18 }
 0x8d8   : > { %v1721_v61 = vadd.f32 %v1720_v16, %v1718_v19 }
 0x8d9   : > { %v1710_v9 = vmul.f32 %v2458_v5, %v1709_v14 }
 0x8da   : > { %1723 = vst [vmem:[%s367_s29] sm:$0xff] %v1721_v61  ;;  %v1727_v27 = vadd.f32 %v1725_v22, %v1721_v61 }
 0x8db   : > { %v1714_v28 = vsel %vm1713_vm0, %v2458_v5, %v1710_v9 }
 0x8dc   : > { %1729 = vst [vmem:[%s372_s9] sm:$0xff] %v1727_v27  ;;  %v1716_v29 = vmul.f32 %v1714_v28, %v1684_v23 }
 0x8de   : > { %v1719_v30 = vmul.f32 %v1717_v62, %v1716_v29 }
 0x8e0   : > { %v1722_v31 = vadd.f32 %v1720_v16, %v1719_v30 }
 0x8e2   : > { %1724 = vst [vmem:[%s367_s29 + $0x8] sm:$0xff] %v1722_v31  ;;  %v1728_v33 = vadd.f32 %v1726_v26, %v1722_v31 }
 0x8e4   : > { %1730 = vst [vmem:[%s372_s9 + $0x8] sm:$0xff] %v1728_v33 }
 0x8e5 PF: > { %s21_s27 = sadd.s32 1, %s2534_s27  }
 0x8e6   : > { %p18_p7 = scmp.ge.s32.totalorder %s21_s27, 4  }
 0x8e8   :  { %20 = sbr.rel (!%p18_p7) target bundleno = 2 (0x2), region = 102 }
 0x8ed   :  { %1768 = vsyncpa [#allocation3], 1 }
 0x8ee   :  { %1770 = vsyncpa [#allocation3 + $0x1], 1 }
 0x8ef   :  { %1771 = vsyncpa [#allocation5], 1 }

// kernel: compressor_forward.2
= control target key start
LH: loop header
LB: loop body
LE: loop exit
PB: predicated region body
PF: predicated region fallthrough
CT: control target
= control target key end

     0   :  { %14 = vsyncpa [#allocation3], 0  ;;  %s3033_s0 = inlined_call_operand.vmem [shape: f32[2,16,128], index: 0, kind: input, shape index: {}]   ;;  %s3034_s1 = inlined_call_operand.vmem [shape: f32[2,16,128], index: 1, kind: input, shape index: {}, may-alias: {1,8}]   ;;  %s3035_s2 = inlined_call_operand.hbm [shape: bf16[128,384], index: 2, kind: input, shape index: {}]   ;;  %s3036_s3 = inlined_call_operand.vmem [shape: f32[8,512], index: 3, kind: input, shape index: {}]   ;;  %s3037_s4 = inlined_call_operand.vmem [shape: bf16[128,128], index: 4, kind: input, shape index: {}]   ;;  %s3038_s5 = inlined_call_operand.vmem [shape: bf16[128,512], index: 5, kind: input, shape index: {}]   ;;  %s3039_s6 = inlined_call_operand.hbm [shape: bf16[512,128], index: 6, kind: input, shape index: {}]   ;;  %s3040_s7 = inlined_call_operand.vmem [shape: f32[2,16,128], index: 7, kind: output, shape index: {0}]   ;;  %s3041_s8 = inlined_call_operand.vmem [shape: f32[2,16,128], index: 8, kind: output, shape index: {1}, may-alias: {1,8}]  }
   0x1   :  { %15 = vsyncpa [#allocation5], 0  ;;  %s2591_s27 = smov 0  }
   0x2 LB: > { %s246_s30 = sshll.u32 %s3035_s2, 4  ;;  %s2600_s9 = sadd.s32 4294967295, %s2534_s27   ;;  %s2534_s27 = sphi %s2591_s27, %s21_s27   ;;  %s247_s30 = int_to_ptr.hbm [resolvable:$true] %s246_s30 }
   0x3   : > { %p1855_p0 = scmp.ge.s32.totalorder %s2534_s27, 1  ;;  %p235_p1 = scmp.lt.s32.totalorder %s2534_s27, 3 }
   0x4   : > { %p2379_p2 = scmp.eq.s32.totalorder %s2600_s9, 0  ;;  %s2536_s11 = smov [#allocation2]  }
   0x5   : > { %p2605_p3 = pnand %p1855_p0, %p235_p1  ;;  %s248_s12 = sshll.u32 %s2536_s11, 4  ;;  %s249_s12 = int_to_ptr.vmem [resolvable:$true] %s248_s12 }
   0x6   : > { %s269_s15 = sshll.u32 %s3039_s6, 4  ;;  %s2537_s16 = smov [#allocation4]   ;;  %s270_s15 = int_to_ptr.hbm [resolvable:$true] %s269_s15 }
   0x7   : > { %p2372_p4 = pneg %p2605_p3  ;;  %s271_s17 = sshll.u32 %s2537_s16, 4  ;;  %s272_s17 = int_to_ptr.vmem [resolvable:$true] %s271_s17 }
   0x8   : > { %s2538_s18 = smov 192   ;;  %s2539_s19 = smov 12  }
   0x9   : > { %p2373_p5 = pnand %p2379_p2, %p2372_p4  ;;  %s2540_s20 = smov 64  }
   0xa   : > { %s2541_s21 = smov 4   ;;  %303 = sbr.rel (%p2605_p3) target bundleno = 2277 (0x8e5), region = 48 }
   0xb   : > { %2375 = dma.hbm_to_vmem [thread:$0]  (!%p2373_p5), %s247_s30, 3072, %s249_s12, [#allocation3], %s2538_s18, %s2538_s18, %s2539_s19  }
   0xc   : > { %2378 = dma.hbm_to_vmem [thread:$0]  (!%p2373_p5), %s270_s15, 4096, %s272_s17, [#allocation5], %s2540_s20, %s2540_s20, %s2541_s21  }
   0xf   : > { %2525 = dma.done.wait (%p2379_p2), [#allocation3], 3072  }
  0x10   : > { %2527 = vsyncadd (%p2379_p2), [#allocation3], 4294964224 }
  0x11   : > { %2529 = dma.done.wait (%p2379_p2), [#allocation5], 4096  }
  0x12   : > { %2531 = vsyncadd (%p2379_p2), [#allocation5], 4294963200  ;;  %v1956_v0 = vld [vmem:[#allocation2 + $0xa8] sm:$0xf]  ;;  %v2290_v1 = vld [vmem:[#allocation2 + $0xb0] sm:$0xf0] }
  0x13   : > { %v2289_v2 = vld [vmem:[#allocation2 + $0xac] sm:$0xf]  ;;  %v1957_v3 = vor.u32 %v2290_v1, %v1956_v0  ;;  %v1958_v4 = vld [vmem:[#allocation2 + $0xb4] sm:$0xf0]  ;;  %v1944_v5 = vld [vmem:[#allocation2 + $0x90] sm:$0xf] }
  0x14   : > { %v2287_v6 = vld [vmem:[#allocation2 + $0x98] sm:$0xf0]  ;;  %v1961_v7 = vor.u32 %v2289_v2, %v1958_v4  ;;  %v2286_v8 = vld [vmem:[#allocation2 + $0x94] sm:$0xf]  ;;  %v1946_v9 = vld [vmem:[#allocation2 + $0x9c] sm:$0xf0] }
  0x15   : > { %544 = vmatpush.bf16.msra.mxu0 %v1957_v3  ;;  %v1945_v10 = vor.u32 %v2287_v6, %v1944_v5  ;;  %v1949_v11 = vor.u32 %v2286_v8, %v1946_v9  ;;  %v1932_v12 = vld [vmem:[#allocation2 + $0x78] sm:$0xf]  ;;  %v2284_v13 = vld [vmem:[#allocation2 + $0x80] sm:$0xf0]  ;;  %v2283_v14 = vld [vmem:[#allocation2 + $0x7c] sm:$0xf] }
  0x16   : > { %558 = vmatpush.bf16.msra.mxu1 %v1961_v7  ;;  %v1934_v15 = vld [vmem:[#allocation2 + $0x84] sm:$0xf0]  ;;  %v1933_v16 = vor.u32 %v2284_v13, %v1932_v12  ;;  %v1920_v18 = vld [vmem:[#allocation2 + $0x60] sm:$0xf]  ;;  %v2281_v19 = vld [vmem:[#allocation2 + $0x68] sm:$0xf0] }
  0x17   : > { %v1937_v17 = vor.u32 %v2283_v14, %v1934_v15  ;;  %v2280_v20 = vld [vmem:[#allocation2 + $0x64] sm:$0xf]  ;;  %v1922_v21 = vld [vmem:[#allocation2 + $0x6c] sm:$0xf0]  ;;  %v1921_v22 = vor.u32 %v2281_v19, %v1920_v18  ;;  %v1908_v23 = vld [vmem:[#allocation2 + $0x48] sm:$0xf] }
  0x18   : > { %v2278_v24 = vld [vmem:[#allocation2 + $0x50] sm:$0xf0]  ;;  %p353_p6 = scmp.lt.s32.totalorder %s2600_s9, 1  ;;  %v1925_v25 = vor.u32 %v2280_v20, %v1922_v21  ;;  %v1964_v26 = vld [vmem:[#allocation2 + $0xb0] sm:$0xf]  ;;  %v2645_v13 = vld [vmem:[%s3036_s3 + $0x8] sm:$0xff] }
  0x19   : > { %545 = vmatpush.bf16.msra.mxu0 %v1945_v10  ;;  %v2291_v27 = vld [vmem:[#allocation2 + $0xb8] sm:$0xf0]  ;;  %v1952_v28 = vld [vmem:[#allocation2 + $0x98] sm:$0xf]  ;;  %v2277_v29 = vld [vmem:[#allocation2 + $0x4c] sm:$0xf]  ;;  %v1909_v33 = vor.u32 %v2278_v24, %v1908_v23 }
  0x1a   : > { %559 = vmatpush.bf16.msra.mxu1 %v1949_v11  ;;  %v1910_v30 = vld [vmem:[#allocation2 + $0x54] sm:$0xf0]  ;;  %v1965_v31 = vor.u32 %v2291_v27, %v1964_v26  ;;  %v2288_v32 = vld [vmem:[#allocation2 + $0xa0] sm:$0xf0]  ;;  %v1896_v34 = vld [vmem:[#allocation2 + $0x30] sm:$0xf] }
  0x1b   : > { %v1953_v35 = vor.u32 %v2288_v32, %v1952_v28  ;;  %v1913_v36 = vor.u32 %v2277_v29, %v1910_v30  ;;  %v2275_v37 = vld [vmem:[#allocation2 + $0x38] sm:$0xf0]  ;;  %v1940_v38 = vld [vmem:[#allocation2 + $0x80] sm:$0xf]  ;;  %v2285_v39 = vld [vmem:[#allocation2 + $0x88] sm:$0xf0] }
  0x1c   : > { %572 = vmatpush.bf16.msra.mxu2 %v1965_v31  ;;  %v2274_v40 = vld [vmem:[#allocation2 + $0x34] sm:$0xf]  ;;  %v1898_v41 = vld [vmem:[#allocation2 + $0x3c] sm:$0xf0]  ;;  %s3044_s9 = smov (!%p353_p6, %s2600_s9), 1  ;;  %v1897_v42 = vor.u32 %v2275_v37, %v1896_v34  ;;  %v1941_v44 = vor.u32 %v2285_v39, %v1940_v38  ;;  %v414_v14 = vperm.slane %v2645_v13, 0 }
  0x1d   : > { %546 = vmatpush.bf16.msra.mxu0 %v1933_v16  ;;  %v1884_v43 = vld [vmem:[#allocation2 + $0x18] sm:$0xf]  ;;  %v1901_v45 = vor.u32 %v2274_v40, %v1898_v41  ;;  %v2272_v46 = vld [vmem:[#allocation2 + $0x20] sm:$0xf0]  ;;  %v1928_v47 = vld [vmem:[#allocation2 + $0x68] sm:$0xf] }
  0x1e   : > { %560 = vmatpush.bf16.msra.mxu1 %v1937_v17  ;;  %v2282_v48 = vld [vmem:[#allocation2 + $0x70] sm:$0xf0]  ;;  %v2271_v49 = vld [vmem:[#allocation2 + $0x1c] sm:$0xf]  ;;  %v1886_v50 = vld [vmem:[#allocation2 + $0x24] sm:$0xf0]  ;;  %v1885_v51 = vor.u32 %v2272_v46, %v1884_v43 }
  0x1f   : > { %s2630_s22 = sshll.u32 %s3044_s9, 4  ;;  %v1872_v52 = vld [vmem:[#allocation2] sm:$0xf]  ;;  %v1929_v53 = vor.u32 %v2282_v48, %v1928_v47  ;;  %v1889_v54 = vor.u32 %v2271_v49, %v1886_v50  ;;  %v2269_v55 = vld [vmem:[#allocation2 + $0x8] sm:$0xf0]  ;;  %vm589_vm0 = vcmask 261120  }
  0x20   : > { %573 = vmatpush.bf16.msra.mxu2 %v1953_v35  ;;  %s357_s25 = scalar_lea.vmem %s3033_s0, %s2630_s22  ;;  %v1916_v56 = vld [vmem:[#allocation2 + $0x50] sm:$0xf]  ;;  %v2279_v57 = vld [vmem:[#allocation2 + $0x58] sm:$0xf0]  ;;  %v2268_v58 = vld [vmem:[#allocation2 + $0x4] sm:$0xf]  ;;  %v1873_v60 = vor.u32 %v2269_v55, %v1872_v52  ;;  %s367_s29 = scalar_lea.vmem %s3040_s7, %s2630_s22 }
  0x21   : > { %547 = vmatpush.bf16.msra.mxu0 %v1921_v22  ;;  %v1874_v59 = vld [vmem:[#allocation2 + $0xc] sm:$0xf0]  ;;  %v2636_v61 = vld [vmem:[%s357_s25] sm:$0xff]  ;;  %v2638_v62 = vld [vmem:[%s357_s25 + $0x8] sm:$0xff]  ;;  %v1917_v63 = vor.u32 %v2279_v57, %v1916_v56  ;;  %s2542_s9 = smov 96   ;;  %s2543_s12 = smov 64  }
  0x22   : > { %561 = vmatpush.bf16.msra.mxu1 %v1925_v25  ;;  %v1877_v0 = vor.u32 %v2268_v58, %v1874_v59  ;;  %v1904_v1 = vld [vmem:[#allocation2 + $0x38] sm:$0xf]  ;;  %v2276_v2 = vld [vmem:[#allocation2 + $0x40] sm:$0xf0]  ;;  %v380_v3 = vpack.c.bf16 %v2638_v62, %v2636_v61  ;;  %v1892_v5 = vld [vmem:[#allocation2 + $0x20] sm:$0xf]  ;;  %s362_s25 = scalar_lea.vmem %s3034_s1, %s2630_s22 }
  0x23   : > { %v1905_v4 = vor.u32 %v2276_v2, %v1904_v1  ;;  %v2273_v6 = vld [vmem:[#allocation2 + $0x28] sm:$0xf0]  ;;  %v1880_v8 = vld [vmem:[#allocation2 + $0x8] sm:$0xf]  ;;  %v2270_v9 = vld [vmem:[#allocation2 + $0x10] sm:$0xf0] }
  0x24   : > { %574 = vmatpush.bf16.msra.mxu2 %v1941_v44  ;;  %v1893_v7 = vor.u32 %v2273_v6, %v1892_v5  ;;  %v1881_v10 = vor.u32 %v2270_v9, %v1880_v8  ;;  %v2651_v15 = vld [vmem:[%s3036_s3] sm:$0xff]  ;;  %v2659_v25 = vld [vmem:[%s3036_s3 + $0x10] sm:$0xff]  ;;  %s2544_s13 = smov 32   ;;  %vm610_vm1 = vcmask 130048   ;;  %vm892_vm2 = vcmask 523264  }
  0x25   : > { %548 = vmatpush.bf16.msra.mxu0 %v1909_v33  ;;  %v413_v19 = vperm.slane %v2651_v15, 0  ;;  %v415_v28 = vperm.slane %v2659_v25, 0  ;;  %vm895_vm3 = vcmask 785408  }
  0x26   : > { %562 = vmatpush.bf16.msra.mxu1 %v1913_v36 }
  0x28   : > { %575 = vmatpush.bf16.msra.mxu2 %v1929_v53 }
  0x29   : > { %549 = vmatpush.bf16.msra.mxu0 %v1897_v42 }
  0x2a   : > { %563 = vmatpush.bf16.msra.mxu1 %v1901_v45 }
  0x2c   : > { %576 = vmatpush.bf16.msra.mxu2 %v1917_v63 }
  0x2d   : > { %550 = vmatpush.bf16.msra.mxu0 %v1885_v51 }
  0x2e   : > { %564 = vmatpush.bf16.msra.mxu1 %v1889_v54 }
  0x30   : > { %577 = vmatpush.bf16.msra.mxu2 %v1905_v4 }
  0x31   : > { %551 = vmatpush.bf16.msra.mxu0 %v1873_v60 }
  0x32   : > { %565 = vmatpush.bf16.msra.mxu1 %v1877_v0 }
  0x34   : > { %552 = vmatmul.bf16.vlgmr.msra.gmra.mxu0 %v380_v3  ;;  %578 = vmatpush.bf16.msra.mxu2 %v1893_v7 }
  0x35   : > { %566 = vmatmul.bf16.vlgmr.msra.gmra.mxu1 %v380_v3 }
  0x38   : > { %579 = vmatpush.bf16.msra.mxu2 %v1881_v10 }
  0x3b   : > { %580 = vmatmul.bf16.vlgmr.msra.gmra.mxu2 %v380_v3 }
  0xb1   : > { %v553_v12 = vpop.f32.mrf.mxu0 }
  0xb2   : > { %v567_v11 = vpop.f32.mrf.mxu1  ;;  %v554_v23 = vadd.f32 %v553_v12, %v413_v19 }
  0xb3   : > { %v568_v17 = vadd.f32 %v567_v11, %v414_v14 }
  0xb9   : > { %v555_v21 = vpop.f32.mrf.mxu0 }
  0xba   : > { %v569_v16 = vpop.f32.mrf.mxu1  ;;  %v556_v24 = vadd.f32 %v555_v21, %v413_v19 }
  0xbb   : > { %v570_v18 = vadd.f32 %v569_v16, %v414_v14 }
  0xbc   : > { %v586_v27 = vpack.c.bf16 %v556_v24, %v554_v23 }
  0xbd   : > { %v587_v20 = vpack.c.bf16 %v570_v18, %v568_v17 }
  0xbe   : > { %v581_v26 = vpop.f32.mrf.mxu2 }
  0xbf   : > { %657 = vrot.lane.b32.xlu2 %v587_v20, %s2542_s9  ;;  %v594_v22 = vsel %vm589_vm0, %v587_v20, 0  ;;  %v582_v29 = vadd.f32 %v581_v26, %v415_v28 }
  0xc0   : > { %603 = vmatpush.bf16.xpose.msra.mxu3 %v594_v22 }
  0xc6   : > { %v583_v30 = vpop.f32.mrf.mxu2 }
  0xc7   : > { %654 = vrot.lane.b32.xlu2 %v586_v27, %s2542_s9  ;;  %1966 = vmatmul.msk.bf16.vlgmr.msra.gmra.mxu3 %vm589_vm0, %v586_v27  ;;  %v584_v31 = vadd.f32 %v583_v30, %v415_v28 }
  0xc9   : > { %v2664_v32 = vpack.c.bf16 %v584_v31, %v582_v29 }
  0xcb   : > { %644 = vmatpush.bf16.msrb.mxu3 %v2664_v32 }
  0xcf   : > { %725 = vrot.lane.b32.xlu2 %v586_v27, %s2543_s12 }
  0xd7   : > { %794 = vrot.lane.b32.xlu2 %v586_v27, %s2544_s13 }
 0x119   : > { %v658_v33 = vpop.permute.xlu2 %657 }
 0x11a   : > { %v663_v34 = vsel %vm589_vm0, %v658_v33, 0 }
 0x11b   : > { %672 = vmatpush.bf16.xpose.msra.mxu3 %v663_v34 }
 0x121   : > { %v655_v49 = vpop.permute.xlu2 %654 }
 0x129   : > { %v726_v52 = vpop.permute.xlu2 %725 }
 0x131   : > { %v795_v2 = vpop.permute.xlu2 %794 }
 0x14a   : > { %v605_v35 = vpop.f32.mrf.mxu3 }
 0x14b   : > { %v611_v36 = vsel %vm610_vm1, %v605_v35, -inf }
 0x14c   : > { %612 = vmax.xlane.f32.xlu0 %v611_v36 }
 0x152   : > { %v607_v37 = vpop.f32.mrf.mxu3 }
 0x153   : > { %v614_v38 = vsel %vm610_vm1, %v607_v37, -inf }
 0x154   : > { %615 = vmax.xlane.f32.xlu0 %v614_v38 }
 0x168   : > { %727 = vrot.lane.b32.xlu0 %v587_v20, %s2543_s12 }
 0x1bf   : > { %v613_v39 = vpop.xlane.xlu0 %612 }
 0x1c0   : > { %v617_v40 = vsub.f32 %v605_v35, %v613_v39 }
 0x1c2   : > { %v619_v41 = vmul.f32 1.442695, %v617_v40 }
 0x1c4   : > { %2401 = vpow2.f32 %v619_v41 }
 0x1c7   : > { %v616_v42 = vpop.xlane.xlu0 %615 }
 0x1c8   : > { %v618_v43 = vsub.f32 %v607_v37, %v616_v42 }
 0x1ca   : > { %v2402_v44 = vpop.eup %2401  ;;  %v621_v45 = vmul.f32 1.442695, %v618_v43 }
 0x1cb   : > { %v623_v46 = vsel %vm610_vm1, %v2402_v44, 0.0 }
 0x1cc   : > { %2403 = vpow2.f32 %v621_v45  ;;  %624 = vadd.xlane.f32.xlu1 %v623_v46 }
 0x1d2   : > { %v2404_v47 = vpop.eup %2403 }
 0x1d3   : > { %v626_v48 = vsel %vm610_vm1, %v2404_v47, 0.0 }
 0x1d4   : > { %627 = vadd.xlane.f32.xlu1 %v626_v48 }
 0x1da   : > { %v728_v50 = vpop.permute.xlu0 %727 }
 0x1db   : > { %v733_v51 = vsel %vm589_vm0, %v728_v50, 0 }
 0x1dc   : > { %742 = vmatpush.bf16.xpose.msrb.mxu2 %v733_v51 }
 0x1e3   : > { %1970 = vmatmul.msk.bf16.vlgmr.msrb.gmra.mxu2 %vm589_vm0, %v726_v52 }
 0x1ed   : > { %796 = vrot.lane.b32.xlu1 %v587_v20, %s2544_s13 }
 0x23f   : > { %v625_v53 = vpop.xlane.xlu1 %624 }
 0x240   : > { %2405 = vrcp.f32 %v625_v53 }
 0x246   : > { %v2406_v55 = vpop.eup %2405 }
 0x247   : > { %v628_v54 = vpop.xlane.xlu1 %627  ;;  %v631_v57 = vmul.f32 %v2406_v55, %v2402_v44 }
 0x248   : > { %2407 = vrcp.f32 %v628_v54 }
 0x24e   : > { %v2408_v56 = vpop.eup %2407 }
 0x24f   : > { %v632_v58 = vmul.f32 %v2408_v56, %v2404_v47 }
 0x251   : > { %v633_v59 = vpack.c.bf16 %v632_v58, %v631_v57 }
 0x253   : > { %1967 = vmatmul.msk.bf16.vlgmr.msrb.gmra.mxu3 %vm610_vm1, %v633_v59 }
 0x25f   : > { %v797_v60 = vpop.permute.xlu1 %796 }
 0x260   : > { %v802_v63 = vsel %vm589_vm0, %v797_v60, 0 }
 0x261   : > { %811 = vmatpush.bf16.xpose.msrb.mxu3 %v802_v63 }
 0x263   : > { %1968 = vmatmul.msk.bf16.vlgmr.msra.gmra.mxu3 %vm589_vm0, %v655_v49 }
 0x266   : > { %v744_v0 = vpop.f32.mrf.mxu2 }
 0x267   : > { %v749_v1 = vsel %vm610_vm1, %v744_v0, -inf }
 0x268   : > { %750 = vmax.xlane.f32.xlu1 %v749_v1 }
 0x26e   : > { %v746_v19 = vpop.f32.mrf.mxu2 }
 0x26f   : > { %v752_v22 = vsel %vm610_vm1, %v746_v19, -inf }
 0x273   : > { %1972 = vmatmul.msk.bf16.vlgmr.msrb.gmra.mxu3 %vm589_vm0, %v795_v2 }
 0x2d6   : > { %v646_v3 = vpop.f32.mrf.mxu3 }
 0x2d7   : > { %v651_v6 = vpack.c.bf16 %v646_v3, %v646_v3 }
 0x2d9   : > { %v2683_v10 = vunpack.c.l.b16 %v651_v6 }
 0x2db   : > { %v751_v4 = vpop.xlane.xlu1 %750 }
 0x2dc   : > { %v755_v5 = vsub.f32 %v744_v0, %v751_v4 }
 0x2de   : > { %v757_v7 = vmul.f32 1.442695, %v755_v5  ;;  %v648_v8 = vpop.f32.mrf.mxu3 }
 0x2df   : > { %v652_v9 = vpack.c.bf16 %v648_v8, %v648_v8 }
 0x2e0   : > { %2409 = vpow2.f32 %v757_v7 }
 0x2e1   : > { %v2685_v11 = vunpack.c.l.b16 %v652_v9 }
 0x2e3   : > { %v867_v12 = vpack.c.b16 %v2685_v11, %v2683_v10  ;;  %v2545_v10 = vmov 128.0  }
 0x2e6   : > { %v2689_v14 = vpop.eup %2409  ;;  %v674_v16 = vpop.f32.mrf.mxu3 }
 0x2e7   : > { %v679_v17 = vsel %vm610_vm1, %v674_v16, -inf  ;;  %v761_v18 = vsel %vm610_vm1, %v2689_v14, 0.0 }
 0x2e8   : > { %680 = vmax.xlane.f32.xlu2 %v679_v17  ;;  %762 = vadd.xlane.f32.xlu1 %v761_v18 }
 0x2ee   : > { %v676_v20 = vpop.f32.mrf.mxu3 }
 0x2ef   : > { %v682_v21 = vsel %vm610_vm1, %v676_v20, -inf }
 0x2f0   : > { %683 = vmax.xlane.f32.xlu0 %v682_v21  ;;  %753 = vmax.xlane.f32.xlu2 %v752_v22  ;;  %v2299_v22 = vld [vmem:[%s3037_s4 + $0x38] sm:$0xff] }
 0x2f1   : > { %964 = vmatpush.bf16.msrb.mxu1 %v2299_v22  ;;  %v2128_v22 = vld [vmem:[%s3038_s5 + $0xe8] sm:$0xf] }
 0x2f6   : > { %v813_v23 = vpop.f32.mrf.mxu3 }
 0x2f7   : > { %v818_v24 = vsel %vm610_vm1, %v813_v23, -inf }
 0x2f8   : > { %819 = vmax.xlane.f32.xlu0 %v818_v24 }
 0x2fe   : > { %v815_v26 = vpop.f32.mrf.mxu3 }
 0x2ff   : > { %v821_v27 = vsel %vm610_vm1, %v815_v26, -inf }
 0x300   : > { %822 = vmax.xlane.f32.xlu2 %v821_v27 }
 0x318   : > { %703 = vrot.lane.b32.xlu2 %v2664_v32, %s2542_s9 }
 0x35b   : > { %v681_v28 = vpop.xlane.xlu2 %680  ;;  %v763_v55 = vpop.xlane.xlu1 %762 }
 0x35c   : > { %v685_v29 = vsub.f32 %v674_v16, %v681_v28 }
 0x35e   : > { %v687_v30 = vmul.f32 1.442695, %v685_v29 }
 0x360   : > { %2411 = vpow2.f32 %v687_v30 }
 0x363   : > { %v754_v31 = vpop.xlane.xlu2 %753  ;;  %v684_v33 = vpop.xlane.xlu0 %683 }
 0x364   : > { %v756_v34 = vsub.f32 %v746_v19, %v754_v31  ;;  %v686_v37 = vsub.f32 %v676_v20, %v684_v33  ;;  %v2296_v31 = vld [vmem:[%s3037_s4 + $0x20] sm:$0xff] }
 0x366   : > { %v2412_v35 = vpop.eup %2411  ;;  %v759_v36 = vmul.f32 1.442695, %v756_v34  ;;  %v689_v39 = vmul.f32 1.442695, %v686_v37 }
 0x367   : > { %v691_v38 = vsel %vm610_vm1, %v2412_v35, 0.0 }
 0x368   : > { %2413 = vpow2.f32 %v759_v36  ;;  %692 = vadd.xlane.f32.xlu1 %v691_v38 }
 0x369   : > { %2415 = vpow2.f32 %v689_v39 }
 0x36b   : > { %v820_v40 = vpop.xlane.xlu0 %819 }
 0x36c   : > { %v824_v41 = vsub.f32 %v813_v23, %v820_v40 }
 0x36e   : > { %v2414_v42 = vpop.eup %2413  ;;  %v826_v43 = vmul.f32 1.442695, %v824_v41 }
 0x36f   : > { %v764_v44 = vsel %vm610_vm1, %v2414_v42, 0.0  ;;  %v2416_v46 = vpop.eup %2415 }
 0x370   : > { %2417 = vpow2.f32 %v826_v43  ;;  %765 = vadd.xlane.f32.xlu0 %v764_v44  ;;  %v694_v50 = vsel %vm610_vm1, %v2416_v46, 0.0 }
 0x373   : > { %v823_v45 = vpop.xlane.xlu2 %822 }
 0x374   : > { %v825_v47 = vsub.f32 %v815_v26, %v823_v45  ;;  %v2297_v26 = vld [vmem:[%s3037_s4 + $0x28] sm:$0xff] }
 0x376   : > { %v2418_v48 = vpop.eup %2417  ;;  %v828_v49 = vmul.f32 1.442695, %v825_v47  ;;  %v2295_v47 = vld [vmem:[%s3037_s4 + $0x18] sm:$0xff] }
 0x377   : > { %v830_v51 = vsel %vm610_vm1, %v2418_v48, 0.0 }
 0x378   : > { %2419 = vpow2.f32 %v828_v49  ;;  %695 = vadd.xlane.f32.xlu0 %v694_v50  ;;  %831 = vadd.xlane.f32.xlu1 %v830_v51  ;;  %v2293_v49 = vld [vmem:[%s3037_s4 + $0x8] sm:$0xff]  ;;  %v2292_v50 = vld [vmem:[%s3037_s4] sm:$0xff] }
 0x37b   : > { %v704_v52 = vpop.permute.xlu2 %703 }
 0x37c   : > { %716 = vmatpush.bf16.msrb.mxu0 %v704_v52 }
 0x37e   : > { %v2420_v53 = vpop.eup %2419 }
 0x37f   : > { %v833_v54 = vsel %vm610_vm1, %v2420_v53, 0.0 }
 0x380   : > { %834 = vadd.xlane.f32.xlu0 %v833_v54 }
 0x391   : > { %772 = vrot.lane.b32.xlu1 %v2664_v32, %s2543_s12 }
 0x394   : > { %841 = vrot.lane.b32.xlu0 %v2664_v32, %s2544_s13 }
 0x3db   : > { %v693_v57 = vpop.xlane.xlu1 %692 }
 0x3dc   : > { %2421 = vrcp.f32 %v693_v57  ;;  %v915_v57 = vperm.slane %v2651_v15, 1 }
 0x3e2   : > { %v2422_v59 = vpop.eup %2421 }
 0x3e3   : > { %v766_v56 = vpop.xlane.xlu0 %765  ;;  %v699_v63 = vmul.f32 %v2422_v59, %v2412_v35 }
 0x3eb   : > { %v696_v58 = vpop.xlane.xlu0 %695  ;;  %v832_v3 = vpop.xlane.xlu1 %831 }
 0x3ec   : > { %2423 = vrcp.f32 %v696_v58 }
 0x3ed   : > { %2425 = vrcp.f32 %v766_v56 }
 0x3ee   : > { %2427 = vrcp.f32 %v763_v55 }
 0x3f2   : > { %v2424_v60 = vpop.eup %2423 }
 0x3f3   : > { %v700_v0 = vmul.f32 %v2424_v60, %v2416_v46  ;;  %v835_v2 = vpop.xlane.xlu0 %834  ;;  %v2426_v32 = vpop.eup %2425 }
 0x3f4   : > { %2429 = vrcp.f32 %v835_v2  ;;  %v2428_v4 = vpop.eup %2427  ;;  %v770_v6 = vmul.f32 %v2426_v32, %v2414_v42 }
 0x3f5   : > { %v701_v1 = vpack.c.bf16 %v700_v0, %v699_v63  ;;  %2431 = vrcp.f32 %v832_v3  ;;  %v769_v8 = vmul.f32 %v2428_v4, %v2689_v14  ;;  %v2298_v14 = vld [vmem:[%s3037_s4 + $0x30] sm:$0xff] }
 0x3f6   : > { %965 = vmatpush.bf16.msrb.mxu1 %v2298_v14  ;;  %2433 = vrcp.f32 %v2545_v10  ;;  %v2082_v10 = vld [vmem:[%s3038_s5 + $0x98] sm:$0xf0] }
 0x3f7   : > { %1969 = vmatmul.msk.bf16.vlgmr.msrb.gmra.mxu0 %vm610_vm1, %v701_v1  ;;  %v771_v17 = vpack.c.bf16 %v770_v6, %v769_v8 }
 0x3fa   : > { %v2430_v5 = vpop.eup %2429  ;;  %966 = vmatpush.bf16.msrb.mxu1 %v2297_v26  ;;  %v2329_v26 = vld [vmem:[%s3038_s5 + $0xec] sm:$0xf] }
 0x3fb   : > { %v2432_v7 = vpop.eup %2431  ;;  %v839_v16 = vmul.f32 %v2430_v5, %v2420_v53 }
 0x3fc   : > { %v838_v18 = vmul.f32 %v2432_v7, %v2418_v48  ;;  %v2294_v48 = vld [vmem:[%s3037_s4 + $0x10] sm:$0xff]  ;;  %v2434_v11 = vpop.eup %2433 }
 0x3fd   : > { %vm989_vm4 = vweird.f32 %v2434_v11 }
 0x3fe   : > { %v840_v20 = vpack.c.bf16 %v839_v16, %v838_v18  ;;  %967 = vmatpush.bf16.msrb.mxu1 %v2296_v31  ;;  %v2330_v18 = vld [vmem:[%s3038_s5 + $0xec] sm:$0xf0]  ;;  %v2324_v31 = vld [vmem:[%s3038_s5 + $0xc4] sm:$0xf] }
 0x402   : > { %968 = vmatpush.bf16.msrb.mxu1 %v2295_v47  ;;  %v2096_v47 = vld [vmem:[%s3038_s5 + $0xa8] sm:$0xf] }
 0x403   : > { %v773_v9 = vpop.permute.xlu1 %772 }
 0x404   : > { %785 = vmatpush.bf16.msra.mxu2 %v773_v9 }
 0x406   : > { %v842_v19 = vpop.permute.xlu0 %841  ;;  %969 = vmatpush.bf16.msrb.mxu1 %v2294_v48  ;;  %v2323_v48 = vld [vmem:[%s3038_s5 + $0xb4] sm:$0xf0] }
 0x407   : > { %1971 = vmatmul.msk.bf16.vlgmr.msra.gmra.mxu2 %vm610_vm1, %v771_v17  ;;  %854 = vmatpush.bf16.msra.mxu0 %v842_v19  ;;  %v2120_v17 = vld [vmem:[%s3038_s5 + $0xe0] sm:$0xf]  ;;  %v2328_v19 = vld [vmem:[%s3038_s5 + $0xe4] sm:$0xf] }
 0x40a   : > { %1973 = vmatmul.msk.bf16.vlgmr.msra.gmra.mxu0 %vm610_vm1, %v840_v20  ;;  %970 = vmatpush.bf16.msrb.mxu1 %v2293_v49  ;;  %v2121_v20 = vor.u32 %v2330_v18, %v2120_v17  ;;  %v2066_v17 = vld [vmem:[%s3038_s5 + $0x78] sm:$0xf0] }
 0x40c   : > { %1230 = vmatpush.bf16.msrb.mxu2 %v2121_v20  ;;  %v2310_v20 = vld [vmem:[%s3038_s5 + $0x4c] sm:$0xf0] }
 0x40e   : > { %971 = vmatpush.bf16.msrb.mxu1 %v2292_v50  ;;  %v2097_v50 = vor.u32 %v2323_v48, %v2096_v47  ;;  %v2302_v47 = vld [vmem:[%s3038_s5 + $0xc] sm:$0xf0]  ;;  %v2300_v48 = vld [vmem:[%s3038_s5 + $0x4] sm:$0xf] }
 0x474   : > { %v718_v21 = vpop.f32.mrf.mxu0 }
 0x475   : > { %v723_v37 = vpack.c.bf16 %v718_v21, %v718_v21  ;;  %v2122_v21 = vld [vmem:[%s3038_s5 + $0xf0] sm:$0xf0] }
 0x477   : > { %v870_v40 = vunpack.c.l.b16 %v723_v37 }
 0x47c   : > { %v720_v23 = vpop.f32.mrf.mxu0 }
 0x47d   : > { %v724_v35 = vpack.c.bf16 %v720_v23, %v720_v23  ;;  %v2331_v23 = vld [vmem:[%s3038_s5 + $0xf4] sm:$0xf0] }
 0x47e   : > { %v2129_v14 = vor.u32 %v2331_v23, %v2128_v22  ;;  %v2042_v23 = vld [vmem:[%s3038_s5 + $0x50] sm:$0xf0] }
 0x47f   : > { %v871_v38 = vunpack.c.l.b16 %v724_v35  ;;  %v2112_v35 = vld [vmem:[%s3038_s5 + $0xc8] sm:$0xf] }
 0x480   : > { %1258 = vmatpush.bf16.msrb.mxu0 %v2129_v14  ;;  %v2311_v14 = vld [vmem:[%s3038_s5 + $0x54] sm:$0xf0] }
 0x481   : > { %v872_v41 = vpack.c.b16 %v871_v38, %v870_v40  ;;  %v2114_v40 = vld [vmem:[%s3038_s5 + $0xd8] sm:$0xf0] }
 0x487   : > { %v856_v28 = vpop.f32.mrf.mxu0 }
 0x488   : > { %v861_v43 = vpack.c.bf16 %v856_v28, %v856_v28 }
 0x48a   : > { %v787_v24 = vpop.f32.mrf.mxu2  ;;  %v884_v45 = vunpack.c.l.b16 %v861_v43  ;;  %v2322_v43 = vld [vmem:[%s3038_s5 + $0xac] sm:$0xf0] }
 0x48b   : > { %v792_v27 = vpack.c.bf16 %v787_v24, %v787_v24  ;;  %v2125_v24 = vor.u32 %v2328_v19, %v2122_v21  ;;  %v2040_v19 = vld [vmem:[%s3038_s5 + $0x40] sm:$0xf]  ;;  %v2308_v21 = vld [vmem:[%s3038_s5 + $0x44] sm:$0xf] }
 0x48c   : > { %v2041_v22 = vor.u32 %v2310_v20, %v2040_v19 }
 0x48d   : > { %v877_v33 = vunpack.c.l.b16 %v792_v27  ;;  %v2130_v27 = vld [vmem:[%s3038_s5 + $0xf8] sm:$0xf0]  ;;  %1244 = vmatpush.bf16.msra.mxu3 %v2125_v24  ;;  %v2048_v24 = vld [vmem:[%s3038_s5 + $0x48] sm:$0xf] }
 0x48e   : > { %v2133_v28 = vor.u32 %v2329_v26, %v2130_v27  ;;  %v2045_v26 = vor.u32 %v2308_v21, %v2042_v23  ;;  %v2049_v27 = vor.u32 %v2311_v14, %v2048_v24  ;;  %v1030_v21 = vperm.slane %v2651_v15, 3 }
 0x48f   : > { %v858_v39 = vpop.f32.mrf.mxu0 }
 0x490   : > { %v862_v42 = vpack.c.bf16 %v858_v39, %v858_v39  ;;  %1272 = vmatpush.bf16.msra.mxu1 %v2133_v28  ;;  %v2325_v39 = vld [vmem:[%s3038_s5 + $0xcc] sm:$0xf] }
 0x491   : > { %v2309_v28 = vld [vmem:[%s3038_s5 + $0x4c] sm:$0xf] }
 0x492   : > { %v789_v29 = vpop.f32.mrf.mxu2  ;;  %v885_v44 = vunpack.c.l.b16 %v862_v42  ;;  %v2088_v42 = vld [vmem:[%s3038_s5 + $0xa0] sm:$0xf] }
 0x493   : > { %v793_v30 = vpack.c.bf16 %v789_v29, %v789_v29  ;;  %v2104_v29 = vld [vmem:[%s3038_s5 + $0xc0] sm:$0xf] }
 0x494   : > { %v886_v46 = vpack.c.b16 %v885_v44, %v884_v45  ;;  %v2320_v44 = vld [vmem:[%s3038_s5 + $0xa4] sm:$0xf]  ;;  %v2089_v45 = vor.u32 %v2322_v43, %v2088_v42  ;;  %v2305_v42 = vld [vmem:[%s3038_s5 + $0x2c] sm:$0xf]  ;;  %v2034_v43 = vld [vmem:[%s3038_s5 + $0x38] sm:$0xf0] }
 0x495   : > { %v878_v34 = vunpack.c.l.b16 %v793_v30  ;;  %v2326_v30 = vld [vmem:[%s3038_s5 + $0xcc] sm:$0xf0] }
 0x497   : > { %v879_v36 = vpack.c.b16 %v878_v34, %v877_v33  ;;  %v2105_v33 = vor.u32 %v2326_v30, %v2104_v29  ;;  %v2106_v34 = vld [vmem:[%s3038_s5 + $0xd0] sm:$0xf0]  ;;  %v2050_v29 = vld [vmem:[%s3038_s5 + $0x58] sm:$0xf0] }
 0x498   : > { %v2109_v37 = vor.u32 %v2324_v31, %v2106_v34  ;;  %v2053_v30 = vor.u32 %v2309_v28, %v2050_v29  ;;  %v2024_v31 = vld [vmem:[%s3038_s5 + $0x20] sm:$0xf]  ;;  %v2304_v34 = vld [vmem:[%s3038_s5 + $0x24] sm:$0xf]  ;;  %v2339_v28 = vld [vmem:[#allocation4 + $0x38] sm:$0xff] }
 0x499   : > { %880 = vrot.lane.b32.xlu2 %v879_v36, %s2543_s12  ;;  %v2327_v36 = vld [vmem:[%s3038_s5 + $0xd4] sm:$0xf0]  ;;  %1231 = vmatpush.bf16.msrb.mxu2 %v2105_v33  ;;  %v2306_v33 = vld [vmem:[%s3038_s5 + $0x2c] sm:$0xf0] }
 0x49a   : > { %v2113_v38 = vor.u32 %v2327_v36, %v2112_v35  ;;  %1245 = vmatpush.bf16.msra.mxu3 %v2109_v37  ;;  %v2025_v35 = vor.u32 %v2306_v33, %v2024_v31  ;;  %v2026_v36 = vld [vmem:[%s3038_s5 + $0x30] sm:$0xf0]  ;;  %v2032_v37 = vld [vmem:[%s3038_s5 + $0x28] sm:$0xf]  ;;  %v2347_v29 = vld [vmem:[#allocation4 + $0x78] sm:$0xff] }
 0x49b   : > { %v2361_v31 = vld [vmem:[#allocation4 + $0xe8] sm:$0xff]  ;;  %v2338_v33 = vld [vmem:[#allocation4 + $0x30] sm:$0xff] }
 0x49c   : > { %1259 = vmatpush.bf16.msrb.mxu0 %v2113_v38  ;;  %v2307_v38 = vld [vmem:[%s3038_s5 + $0x34] sm:$0xf0] }
 0x49d   : > { %1232 = vmatpush.bf16.msrb.mxu2 %v2089_v45 }
 0x4a0   : > { %1260 = vmatpush.bf16.msrb.mxu0 %v2097_v50 }
 0x4a1   : > { %873 = vrot.lane.b32.xlu2 %v872_v41, %s2544_s13  ;;  %v2117_v41 = vor.u32 %v2325_v39, %v2114_v40  ;;  %v2029_v40 = vor.u32 %v2304_v34, %v2026_v36  ;;  %v2346_v34 = vld [vmem:[#allocation4 + $0x70] sm:$0xff]  ;;  %v2360_v36 = vld [vmem:[#allocation4 + $0xe0] sm:$0xff] }
 0x4a3   : > { %1273 = vmatpush.bf16.msra.mxu1 %v2117_v41  ;;  %v2033_v41 = vor.u32 %v2307_v38, %v2032_v37  ;;  %v2337_v37 = vld [vmem:[#allocation4 + $0x28] sm:$0xff] }
 0x4a4   : > { %v2345_v38 = vld [vmem:[#allocation4 + $0x68] sm:$0xff] }
 0x4a9   : > { %887 = vrot.lane.b32.xlu2 %v886_v46, %s2542_s9  ;;  %v2090_v46 = vld [vmem:[%s3038_s5 + $0xb0] sm:$0xf0]  ;;  %s372_s9 = scalar_lea.vmem %s3041_s8, %s2630_s22 }
 0x4aa   : > { %v2093_v49 = vor.u32 %v2320_v44, %v2090_v46  ;;  %v2008_v44 = vld [vmem:[%s3038_s5] sm:$0xf]  ;;  %v2037_v46 = vor.u32 %v2305_v42, %v2034_v43  ;;  %v2350_v43 = vld [vmem:[#allocation4 + $0x90] sm:$0xff] }
 0x4ab   : > { %v2009_v50 = vor.u32 %v2302_v47, %v2008_v44  ;;  %v2344_v42 = vld [vmem:[#allocation4 + $0x60] sm:$0xff]  ;;  %v2358_v44 = vld [vmem:[#allocation4 + $0xd0] sm:$0xff]  ;;  %v2343_v47 = vld [vmem:[#allocation4 + $0x58] sm:$0xff] }
 0x4ac   : > { %1246 = vmatpush.bf16.msra.mxu3 %v2093_v49  ;;  %v2010_v49 = vld [vmem:[%s3038_s5 + $0x10] sm:$0xf0] }
 0x4f3   : > { %v881_v51 = vpop.permute.xlu2 %880 }
 0x4fb   : > { %v874_v52 = vpop.permute.xlu2 %873 }
 0x4fc   : > { %v891_v53 = vsel %vm589_vm0, %v867_v12, %v874_v52  ;;  %v985_v12 = vmul.f32 128.0, %v2434_v11  ;;  %v2098_v52 = vld [vmem:[%s3038_s5 + $0xb8] sm:$0xf0] }
 0x4fd   : > { %v894_v55 = vsel %vm892_vm2, %v891_v53, %v881_v51  ;;  %v2321_v51 = vld [vmem:[%s3038_s5 + $0xac] sm:$0xf] }
 0x4fe   : > { %v986_v2 = vsub.f32 1.0, %v985_v12  ;;  %v2101_v53 = vor.u32 %v2321_v51, %v2098_v52  ;;  %v2056_v12 = vld [vmem:[%s3038_s5 + $0x60] sm:$0xf]  ;;  %v2013_v51 = vor.u32 %v2300_v48, %v2010_v49  ;;  %v2016_v52 = vld [vmem:[%s3038_s5 + $0x8] sm:$0xf] }
 0x4ff   : > { %v2349_v48 = vld [vmem:[#allocation4 + $0x88] sm:$0xff] }
 0x500   : > { %v987_v3 = vmul.f32 %v2434_v11, %v986_v2  ;;  %1274 = vmatpush.bf16.msra.mxu1 %v2101_v53  ;;  %v2314_v2 = vld [vmem:[%s3038_s5 + $0x6c] sm:$0xf0]  ;;  %v2303_v53 = vld [vmem:[%s3038_s5 + $0x14] sm:$0xf0]  ;;  %v2357_v49 = vld [vmem:[#allocation4 + $0xc8] sm:$0xff] }
 0x502   : > { %v988_v32 = vadd.f32 %v2434_v11, %v987_v3  ;;  %v2312_v3 = vld [vmem:[%s3038_s5 + $0x64] sm:$0xf] }
 0x503   : > { %v888_v54 = vpop.permute.xlu2 %887 }
 0x504   : > { %v897_v56 = vsel %vm895_vm3, %v894_v55, %v888_v54  ;;  %v2747_v4 = vsel %vm989_vm4, %v2434_v11, %v988_v32  ;;  %v2072_v54 = vld [vmem:[%s3038_s5 + $0x80] sm:$0xf]  ;;  %v2318_v55 = vld [vmem:[%s3038_s5 + $0x8c] sm:$0xf0]  ;;  %v2057_v32 = vor.u32 %v2314_v2, %v2056_v12 }
 0x505   : > { %972 = vmatmul.bf16.vlgmr.msrb.gmra.mxu1 %v897_v56  ;;  %v2316_v56 = vld [vmem:[%s3038_s5 + $0x84] sm:$0xf] }
 0x582   : > { %v973_v58 = vpop.f32.mrf.mxu1 }
 0x583   : > { %v974_v59 = vadd.f32 %v973_v58, %v915_v57  ;;  %v2074_v58 = vld [vmem:[%s3038_s5 + $0x90] sm:$0xf0] }
 0x585   : > { %v978_v60 = vadd.f32 %v974_v59, %v2636_v61  ;;  %v2080_v59 = vld [vmem:[%s3038_s5 + $0x88] sm:$0xf] }
 0x587   : > { %980 = vadd.xlane.f32.xlu0 %v978_v60 }
 0x58a   : > { %v975_v63 = vpop.f32.mrf.mxu1 }
 0x58b   : > { %v976_v0 = vadd.f32 %v975_v63, %v915_v57  ;;  %v2073_v57 = vor.u32 %v2318_v55, %v2072_v54  ;;  %v2077_v63 = vor.u32 %v2316_v56, %v2074_v58  ;;  %v2301_v54 = vld [vmem:[%s3038_s5 + $0xc] sm:$0xf]  ;;  %v2017_v56 = vor.u32 %v2303_v53, %v2016_v52  ;;  %v2334_v52 = vld [vmem:[#allocation4 + $0x10] sm:$0xff] }
 0x58c   : > { %v2342_v53 = vld [vmem:[#allocation4 + $0x50] sm:$0xff] }
 0x58d   : > { %v979_v1 = vadd.f32 %v976_v0, %v2638_v62  ;;  %1233 = vmatpush.bf16.msrb.mxu2 %v2073_v57  ;;  %1247 = vmatpush.bf16.msra.mxu3 %v2077_v63  ;;  %v2018_v57 = vld [vmem:[%s3038_s5 + $0x18] sm:$0xf0] }
 0x58e   : > { %v2021_v58 = vor.u32 %v2301_v54, %v2018_v57  ;;  %v2356_v57 = vld [vmem:[#allocation4 + $0xc0] sm:$0xff] }
 0x58f   : > { %982 = vadd.xlane.f32.xlu1 %v979_v1 }
 0x591   : > { %1234 = vmatpush.bf16.msrb.mxu2 %v2057_v32 }
 0x595   : > { %1235 = vmatpush.bf16.msrb.mxu2 %v2041_v22 }
 0x599   : > { %1236 = vmatpush.bf16.msrb.mxu2 %v2025_v35  ;;  %v2352_v35 = vld [vmem:[#allocation4 + $0xa0] sm:$0xff] }
 0x59d   : > { %1237 = vmatpush.bf16.msrb.mxu2 %v2009_v50  ;;  %v1068_v50 = vperm.slane %v2659_v25, 4  ;;  %v2333_v25 = vld [vmem:[#allocation4 + $0x8] sm:$0xff] }
 0x5a1   : > { %1619 = vmatpush.bf16.msra.mxu2 %v2339_v28 }
 0x5a5   : > { %1620 = vmatpush.bf16.msra.mxu2 %v2338_v33 }
 0x5a9   : > { %1621 = vmatpush.bf16.msra.mxu2 %v2337_v37 }
 0x5fa   : > { %v981_v5 = vpop.xlane.xlu0 %980 }
 0x5fb   : > { %v991_v6 = vmul.f32 %v2747_v4, %v981_v5  ;;  %v2058_v5 = vld [vmem:[%s3038_s5 + $0x70] sm:$0xf0] }
 0x5fd   : > { %v2750_v61 = vsub.f32 %v978_v60, %v991_v6  ;;  %v2319_v60 = vld [vmem:[%s3038_s5 + $0x94] sm:$0xf0]  ;;  %v2064_v6 = vld [vmem:[%s3038_s5 + $0x68] sm:$0xf] }
 0x5fe   : > { %v2081_v0 = vor.u32 %v2319_v60, %v2080_v59 }
 0x5ff   : > { %v995_v7 = vmul.f32 %v2750_v61, %v2750_v61 }
 0x600   : > { %1261 = vmatpush.bf16.msrb.mxu0 %v2081_v0 }
 0x601   : > { %997 = vadd.xlane.f32.xlu2 %v995_v7  ;;  %v2315_v7 = vld [vmem:[%s3038_s5 + $0x74] sm:$0xf0] }
 0x602   : > { %v983_v62 = vpop.xlane.xlu1 %982 }
 0x603   : > { %v992_v8 = vmul.f32 %v2747_v4, %v983_v62  ;;  %v2061_v62 = vor.u32 %v2312_v3, %v2058_v5 }
 0x605   : > { %v2755_v9 = vsub.f32 %v979_v1, %v992_v8  ;;  %v2317_v1 = vld [vmem:[%s3038_s5 + $0x8c] sm:$0xf]  ;;  %v2065_v8 = vor.u32 %v2315_v7, %v2064_v6  ;;  %1248 = vmatpush.bf16.msra.mxu3 %v2061_v62 }
 0x606   : > { %v2085_v11 = vor.u32 %v2317_v1, %v2082_v10 }
 0x607   : > { %v996_v16 = vmul.f32 %v2755_v9, %v2755_v9  ;;  %1262 = vmatpush.bf16.msrb.mxu0 %v2065_v8 }
 0x608   : > { %1275 = vmatpush.bf16.msra.mxu1 %v2085_v11 }
 0x609   : > { %999 = vadd.xlane.f32.xlu0 %v996_v16  ;;  %v2313_v16 = vld [vmem:[%s3038_s5 + $0x6c] sm:$0xf]  ;;  %1249 = vmatpush.bf16.msra.mxu3 %v2045_v26  ;;  %v2363_v26 = vld [vmem:[#allocation4 + $0xf8] sm:$0xff] }
 0x60a   : > { %v2069_v18 = vor.u32 %v2313_v16, %v2066_v17  ;;  %v1027_v16 = vperm.slane %v2651_v15, 2 }
 0x60b   : > { %1263 = vmatpush.bf16.msrb.mxu0 %v2049_v27  ;;  %v2362_v27 = vld [vmem:[#allocation4 + $0xf0] sm:$0xff] }
 0x60c   : > { %1276 = vmatpush.bf16.msra.mxu1 %v2069_v18 }
 0x60d   : > { %1250 = vmatpush.bf16.msra.mxu3 %v2029_v40  ;;  %v2359_v40 = vld [vmem:[#allocation4 + $0xd8] sm:$0xff] }
 0x60f   : > { %1264 = vmatpush.bf16.msrb.mxu0 %v2033_v41  ;;  %v2336_v41 = vld [vmem:[#allocation4 + $0x20] sm:$0xff] }
 0x610   : > { %1277 = vmatpush.bf16.msra.mxu1 %v2053_v30  ;;  %v2353_v30 = vld [vmem:[#allocation4 + $0xa8] sm:$0xff]  ;;  %1622 = vmatpush.bf16.msra.mxu2 %v2336_v41 }
 0x611   : > { %1251 = vmatpush.bf16.msra.mxu3 %v2013_v51 }
 0x613   : > { %1265 = vmatpush.bf16.msrb.mxu0 %v2017_v56  ;;  %v2348_v56 = vld [vmem:[#allocation4 + $0x80] sm:$0xff] }
 0x614   : > { %1278 = vmatpush.bf16.msra.mxu1 %v2037_v46  ;;  %v2335_v46 = vld [vmem:[#allocation4 + $0x18] sm:$0xff] }
 0x615   : > { %1633 = vmatpush.bf16.msrb.mxu3 %v2347_v29  ;;  %1623 = vmatpush.bf16.msra.mxu2 %v2335_v46 }
 0x618   : > { %1279 = vmatpush.bf16.msra.mxu1 %v2021_v58 }
 0x619   : > { %1634 = vmatpush.bf16.msrb.mxu3 %v2346_v34  ;;  %1624 = vmatpush.bf16.msra.mxu2 %v2334_v52 }
 0x61c   : > { %1661 = vmatpush.bf16.msrb.mxu1 %v2363_v26 }
 0x61d   : > { %1635 = vmatpush.bf16.msrb.mxu3 %v2345_v38  ;;  %1625 = vmatpush.bf16.msra.mxu2 %v2333_v25 }
 0x620   : > { %1662 = vmatpush.bf16.msrb.mxu1 %v2362_v27 }
 0x621   : > { %1636 = vmatpush.bf16.msrb.mxu3 %v2344_v42 }
 0x624   : > { %1663 = vmatpush.bf16.msrb.mxu1 %v2361_v31 }
 0x625   : > { %1637 = vmatpush.bf16.msrb.mxu3 %v2343_v47 }
 0x628   : > { %1664 = vmatpush.bf16.msrb.mxu1 %v2360_v36 }
 0x629   : > { %1638 = vmatpush.bf16.msrb.mxu3 %v2342_v53 }
 0x62c   : > { %1665 = vmatpush.bf16.msrb.mxu1 %v2359_v40 }
 0x630   : > { %1666 = vmatpush.bf16.msrb.mxu1 %v2358_v44 }
 0x634   : > { %1667 = vmatpush.bf16.msrb.mxu1 %v2357_v49 }
 0x638   : > { %1668 = vmatpush.bf16.msrb.mxu1 %v2356_v57 }
 0x674   : > { %v998_v39 = vpop.xlane.xlu2 %997 }
 0x675   : > { %v1001_v45 = vmul.f32 %v998_v39, %v2747_v4  ;;  %v2351_v39 = vld [vmem:[#allocation4 + $0x98] sm:$0xff] }
 0x677   : > { %v1003_v55 = vadd.f32 1e-12, %v1001_v45  ;;  %v379_v45 = vld [vmem:[%s3036_s3 + $0x18] sm:$0xff] }
 0x678   : > { %v1069_v51 = vperm.slane %v379_v45, 4 }
 0x679   : > { %2435 = vrsqrt.f32 %v1003_v55  ;;  %vm1011_vm6 = vweird.f32 %v1003_v55 }
 0x67c   : > { %v1000_v59 = vpop.xlane.xlu0 %999 }
 0x67d   : > { %v1002_v60 = vmul.f32 %v1000_v59, %v2747_v4 }
 0x67f   : > { %v2436_v63 = vpop.eup %2435  ;;  %v1004_v0 = vadd.f32 1e-12, %v1002_v60  ;;  %v1066_v60 = vperm.slane %v2651_v15, 4 }
 0x680   : > { %v1006_v1 = vmul.f32 %v2436_v63, %v1003_v55  ;;  %vm1012_vm5 = vweird.f32 %v2436_v63 }
 0x681   : > { %2437 = vrsqrt.f32 %v1004_v0  ;;  %vm1013_vm7 = vmor %vm1011_vm6, %vm1012_vm5  ;;  %vm1021_vm9 = vweird.f32 %v1004_v0 }
 0x682   : > { %v1007_v10 = vmul.f32 %v2436_v63, %v1006_v1 }
 0x684   : > { %v1008_v11 = vmul.f32 0.5, %v1007_v10 }
 0x686   : > { %v1009_v12 = vsub.f32 1.5, %v1008_v11 }
 0x687   : > { %v2438_v2 = vpop.eup %2437 }
 0x688   : > { %v1010_v3 = vmul.f32 %v2436_v63, %v1009_v12  ;;  %v1016_v32 = vmul.f32 %v2438_v2, %v1004_v0  ;;  %vm1022_vm8 = vweird.f32 %v2438_v2  ;;  %v2341_v0 = vld [vmem:[#allocation4 + $0x48] sm:$0xff] }
 0x689   : > { %vm1023_vm10 = vmor %vm1021_vm9, %vm1022_vm8  ;;  %1639 = vmatpush.bf16.msrb.mxu3 %v2341_v0 }
 0x68a   : > { %v1017_v5 = vmul.f32 %v2438_v2, %v1016_v32  ;;  %v1014_v6 = vsel %vm1013_vm7, %v2436_v63, %v1010_v3  ;;  %v1067_v63 = vperm.slane %v2645_v13, 4  ;;  %v2332_v32 = vld [vmem:[#allocation4] sm:$0xff] }
 0x68b   : > { %v1025_v8 = vmul.f32 %v1014_v6, %v2750_v61  ;;  %v2355_v61 = vld [vmem:[#allocation4 + $0xb8] sm:$0xff]  ;;  %1626 = vmatpush.bf16.msra.mxu2 %v2332_v32 }
 0x68c   : > { %v1018_v7 = vmul.f32 0.5, %v1017_v5  ;;  %1647 = vmatpush.bf16.msra.mxu0 %v2355_v61  ;;  %v2340_v5 = vld [vmem:[#allocation4 + $0x40] sm:$0xff] }
 0x68d   : > { %v1028_v20 = vmul.f32 %v1027_v16, %v1025_v8  ;;  %1640 = vmatpush.bf16.msrb.mxu3 %v2340_v5 }
 0x68e   : > { %v1019_v62 = vsub.f32 1.5, %v1018_v7 }
 0x68f   : > { %v2957_v23 = vadd.f32 %v1030_v21, %v1028_v20 }
 0x690   : > { %v1020_v17 = vmul.f32 %v2438_v2, %v1019_v62 }
 0x692   : > { %v1024_v18 = vsel %vm1023_vm10, %v2438_v2, %v1020_v17 }
 0x693   : > { %v1026_v19 = vmul.f32 %v1024_v18, %v2755_v9  ;;  %v2354_v9 = vld [vmem:[#allocation4 + $0xb0] sm:$0xff] }
 0x694   : > { %1648 = vmatpush.bf16.msra.mxu0 %v2354_v9 }
 0x695   : > { %v1029_v22 = vmul.f32 %v1027_v16, %v1026_v19 }
 0x697   : > { %v2959_v24 = vadd.f32 %v1030_v21, %v1029_v22 }
 0x698   : > { %1649 = vmatpush.bf16.msra.mxu0 %v2353_v30 }
 0x699   : > { %v1033_v14 = vpack.c.bf16 %v2959_v24, %v2957_v23 }
 0x69b   : > { %1238 = vmatmul.bf16.vlgmr.msrb.gmra.mxu2 %v1033_v14  ;;  %1252 = vmatmul.bf16.vlgmr.msra.gmra.mxu3 %v1033_v14 }
 0x69c   : > { %1266 = vmatmul.bf16.vlgmr.msrb.gmra.mxu0 %v1033_v14  ;;  %1280 = vmatmul.bf16.vlgmr.msra.gmra.mxu1 %v1033_v14 }
 0x69d   : > { %1650 = vmatpush.bf16.msra.mxu0 %v2352_v35 }
 0x6a1   : > { %1651 = vmatpush.bf16.msra.mxu0 %v2351_v39 }
 0x6a5   : > { %1652 = vmatpush.bf16.msra.mxu0 %v2350_v43 }
 0x6a9   : > { %1653 = vmatpush.bf16.msra.mxu0 %v2349_v48 }
 0x6ad   : > { %1654 = vmatpush.bf16.msra.mxu0 %v2348_v56 }
 0x719   : > { %v1267_v54 = vpop.f32.mrf.mxu0  ;;  %v1281_v55 = vpop.f32.mrf.mxu1 }
 0x71a   : > { %v2967_v58 = vadd.f32 %v1267_v54, %v1068_v50  ;;  %v2969_v59 = vadd.f32 %v1281_v55, %v1069_v51 }
 0x71c   : > { %v1288_v1 = vmul.f32 %v2967_v58, %v2967_v58  ;;  %v1289_v10 = vmul.f32 %v2969_v59, %v2969_v59 }
 0x71e   : > { %v1296_v11 = vmul.f32 %v1288_v1, %v2967_v58  ;;  %v1297_v12 = vmul.f32 %v1289_v10, %v2969_v59  ;;  %v1239_v2 = vpop.f32.mrf.mxu2  ;;  %v1253_v15 = vpop.f32.mrf.mxu3 }
 0x71f   : > { %v2979_v3 = vadd.f32 %v1239_v2, %v1066_v60  ;;  %v2981_v13 = vadd.f32 %v1253_v15, %v1067_v63 }
 0x720   : > { %v1304_v6 = vmul.f32 0.044715, %v1296_v11  ;;  %v1305_v7 = vmul.f32 0.044715, %v1297_v12 }
 0x721   : > { %v1286_v62 = vmul.f32 %v2979_v3, %v2979_v3  ;;  %v1287_v8 = vmul.f32 %v2981_v13, %v2981_v13  ;;  %v1269_v16 = vpop.f32.mrf.mxu0  ;;  %v1283_v17 = vpop.f32.mrf.mxu1 }
 0x722   : > { %v1312_v18 = vadd.f32 %v1304_v6, %v2967_v58  ;;  %v1313_v19 = vadd.f32 %v1305_v7, %v2969_v59  ;;  %v1270_v20 = vadd.f32 %v1269_v16, %v1068_v50  ;;  %v2989_v21 = vadd.f32 %v1283_v17, %v1069_v51 }
 0x723   : > { %v1294_v22 = vmul.f32 %v1286_v62, %v2979_v3  ;;  %v1295_v14 = vmul.f32 %v1287_v8, %v2981_v13 }
 0x724   : > { %v1320_v61 = vmul.f32 0.7978846, %v1312_v18  ;;  %v1292_v26 = vmul.f32 %v1270_v20, %v1270_v20  ;;  %v1293_v9 = vmul.f32 %v2989_v21, %v2989_v21  ;;  %v1321_v27 = vmul.f32 0.7978846, %v1313_v19 }
 0x725   : > { %v1302_v28 = vmul.f32 0.044715, %v1294_v22  ;;  %v1303_v29 = vmul.f32 0.044715, %v1295_v14 }
 0x726   : > { %v1300_v30 = vmul.f32 %v1292_v26, %v1270_v20  ;;  %v1301_v31 = vmul.f32 %v1293_v9, %v2989_v21  ;;  %v1241_v33 = vpop.f32.mrf.mxu2  ;;  %v1255_v34 = vpop.f32.mrf.mxu3  ;;  %2439 = vtanh.f32 %v1320_v61 }
 0x727   : > { %v1310_v35 = vadd.f32 %v1302_v28, %v2979_v3  ;;  %v1311_v36 = vadd.f32 %v1303_v29, %v2981_v13  ;;  %v1242_v37 = vadd.f32 %v1241_v33, %v1066_v60  ;;  %v1256_v40 = vadd.f32 %v1255_v34, %v1067_v63 }
 0x728   : > { %v1308_v38 = vmul.f32 0.044715, %v1300_v30  ;;  %v1309_v39 = vmul.f32 0.044715, %v1301_v31  ;;  %2441 = vtanh.f32 %v1321_v27 }
 0x729   : > { %v1318_v41 = vmul.f32 0.7978846, %v1310_v35  ;;  %v1319_v42 = vmul.f32 0.7978846, %v1311_v36  ;;  %v1290_v43 = vmul.f32 %v1242_v37, %v1242_v37  ;;  %v1291_v46 = vmul.f32 %v1256_v40, %v1256_v40 }
 0x72a   : > { %v1316_v44 = vadd.f32 %v1308_v38, %v1270_v20  ;;  %v1317_v45 = vadd.f32 %v1309_v39, %v2989_v21 }
 0x72b   : > { %v1298_v47 = vmul.f32 %v1290_v43, %v1242_v37  ;;  %2443 = vtanh.f32 %v1318_v41  ;;  %v1299_v50 = vmul.f32 %v1291_v46, %v1256_v40 }
 0x72c   : > { %v1324_v48 = vmul.f32 0.7978846, %v1316_v44  ;;  %v1325_v49 = vmul.f32 0.7978846, %v1317_v45  ;;  %2445 = vtanh.f32 %v1319_v42  ;;  %v2440_v52 = vpop.eup %2439 }
 0x72d   : > { %v1306_v51 = vmul.f32 0.044715, %v1298_v47  ;;  %v1307_v53 = vmul.f32 0.044715, %v1299_v50  ;;  %v1336_v57 = vadd.f32 1.0, %v2440_v52 }
 0x72e   : > { %2447 = vtanh.f32 %v1324_v48  ;;  %v2442_v54 = vpop.eup %2441 }
 0x72f   : > { %2449 = vtanh.f32 %v1325_v49  ;;  %v1314_v55 = vadd.f32 %v1306_v51, %v1242_v37  ;;  %v1315_v56 = vadd.f32 %v1307_v53, %v1256_v40  ;;  %v1337_v25 = vadd.f32 1.0, %v2442_v54 }
 0x730   : > { %v1344_v12 = vmul.f32 0.5, %v1336_v57 }
 0x731   : > { %v1322_v60 = vmul.f32 0.7978846, %v1314_v55  ;;  %v2444_v63 = vpop.eup %2443  ;;  %v1323_v0 = vmul.f32 0.7978846, %v1315_v56  ;;  %v1345_v15 = vmul.f32 0.5, %v1337_v25 }
 0x732   : > { %v2446_v1 = vpop.eup %2445  ;;  %v1334_v32 = vadd.f32 1.0, %v2444_v63  ;;  %v1352_v16 = vmul.f32 %v1344_v12, %v2967_v58 }
 0x733   : > { %2451 = vtanh.f32 %v1322_v60  ;;  %v1335_v6 = vadd.f32 1.0, %v2446_v1  ;;  %v1353_v19 = vmul.f32 %v1345_v15, %v2969_v59 }
 0x734   : > { %v2448_v10 = vpop.eup %2447  ;;  %2453 = vtanh.f32 %v1323_v0  ;;  %v1342_v22 = vmul.f32 0.5, %v1334_v32 }
 0x735   : > { %v2450_v11 = vpop.eup %2449  ;;  %v1340_v2 = vadd.f32 1.0, %v2448_v10  ;;  %v1343_v26 = vmul.f32 0.5, %v1335_v6 }
 0x736   : > { %v1341_v5 = vadd.f32 1.0, %v2450_v11  ;;  %v1350_v31 = vmul.f32 %v1342_v22, %v2979_v3  ;;  %v1725_v22 = vld [vmem:[%s362_s25] sm:$0xff] }
 0x737   : > { %v1348_v7 = vmul.f32 0.5, %v1340_v2  ;;  %v1351_v58 = vmul.f32 %v1343_v26, %v2981_v13  ;;  %v1726_v26 = vld [vmem:[%s362_s25 + $0x8] sm:$0xff] }
 0x738   : > { %v1349_v62 = vmul.f32 0.5, %v1341_v5 }
 0x739   : > { %v2452_v8 = vpop.eup %2451  ;;  %v1356_v17 = vmul.f32 %v1348_v7, %v1270_v20 }
 0x73a   : > { %v2454_v18 = vpop.eup %2453  ;;  %v1357_v14 = vmul.f32 %v1349_v62, %v2989_v21  ;;  %v1338_v61 = vadd.f32 1.0, %v2452_v8  ;;  %v3007_v21 = vld [vmem:[%s3036_s3] sm:$0xff] }
 0x73b   : > { %v1339_v9 = vadd.f32 1.0, %v2454_v18  ;;  %v1360_v27 = vpack.c.bf16 %v1356_v17, %v1352_v16  ;;  %v1426_v35 = vperm.slane %v3007_v21, 5  ;;  %v1717_v62 = vperm.slane %v3007_v21, 6 }
 0x73c   : > { %v1346_v28 = vmul.f32 0.5, %v1338_v61  ;;  %v1361_v29 = vpack.c.bf16 %v1357_v14, %v1353_v19  ;;  %v1720_v16 = vperm.slane %v3007_v21, 7 }
 0x73d   : > { %v1347_v30 = vmul.f32 0.5, %v1339_v9  ;;  %1655 = vmatmul.bf16.vlgmr.msra.gmra.mxu0 %v1360_v27 }
 0x73e   : > { %v1354_v33 = vmul.f32 %v1346_v28, %v1242_v37  ;;  %1669 = vmatmul.bf16.vlgmr.msrb.gmra.mxu1 %v1361_v29 }
 0x73f   : > { %v1355_v20 = vmul.f32 %v1347_v30, %v1256_v40 }
 0x740   : > { %v1358_v34 = vpack.c.bf16 %v1354_v33, %v1350_v31 }
 0x741   : > { %v1359_v59 = vpack.c.bf16 %v1355_v20, %v1351_v58 }
 0x742   : > { %1627 = vmatmul.bf16.vlgmr.msra.gmra.mxu2 %v1358_v34 }
 0x743   : > { %1641 = vmatmul.bf16.vlgmr.msrb.gmra.mxu3 %v1359_v59 }
 0x7ba   : > { %v1656_v3 = vpop.f32.mrf.mxu0 }
 0x7bb   : > { %v1670_v41 = vpop.f32.mrf.mxu1 }
 0x7c2   : > { %v1658_v47 = vpop.f32.mrf.mxu0 }
 0x7c3   : > { %v1672_v49 = vpop.f32.mrf.mxu1 }
 0x7c5   : > { %v1628_v36 = vpop.f32.mrf.mxu2 }
 0x7c6   : > { %v1629_v38 = vadd.f32 %v1628_v36, %v1426_v35  ;;  %v1642_v39 = vpop.f32.mrf.mxu3 }
 0x7c8   : > { %v1643_v37 = vadd.f32 %v1642_v39, %v1629_v38 }
 0x7ca   : > { %v1657_v42 = vadd.f32 %v1656_v3, %v1643_v37 }
 0x7cc   : > { %v1671_v13 = vadd.f32 %v1670_v41, %v1657_v42 }
 0x7cd   : > { %v1630_v40 = vpop.f32.mrf.mxu2 }
 0x7ce   : > { %v1631_v43 = vadd.f32 %v1630_v40, %v1426_v35  ;;  %v1675_v44 = vadd.f32 %v1671_v13, %v2957_v23  ;;  %v1644_v45 = vpop.f32.mrf.mxu3 }
 0x7d0   : > { %v1645_v46 = vadd.f32 %v1644_v45, %v1631_v43  ;;  %1677 = vadd.xlane.f32.xlu1 %v1675_v44 }
 0x7d2   : > { %v1659_v48 = vadd.f32 %v1658_v47, %v1645_v46 }
 0x7d4   : > { %v1673_v50 = vadd.f32 %v1672_v49, %v1659_v48 }
 0x7d6   : > { %v1676_v51 = vadd.f32 %v1673_v50, %v2959_v24 }
 0x7d8   : > { %1679 = vadd.xlane.f32.xlu2 %v1676_v51 }
 0x843   : > { %v1678_v52 = vpop.xlane.xlu1 %1677 }
 0x844   : > { %v1681_v53 = vmul.f32 %v1678_v52, %v2747_v4 }
 0x846   : > { %v1683_v54 = vsub.f32 %v1675_v44, %v1681_v53 }
 0x848   : > { %v1685_v55 = vmul.f32 %v1683_v54, %v1683_v54 }
 0x84a   : > { %1687 = vadd.xlane.f32.xlu0 %v1685_v55 }
 0x84b   : > { %v1680_v56 = vpop.xlane.xlu2 %1679 }
 0x84c   : > { %v1682_v57 = vmul.f32 %v1680_v56, %v2747_v4 }
 0x84e   : > { %v1684_v23 = vsub.f32 %v1676_v51, %v1682_v57 }
 0x850   : > { %v1686_v60 = vmul.f32 %v1684_v23, %v1684_v23 }
 0x852   : > { %1689 = vadd.xlane.f32.xlu1 %v1686_v60 }
 0x8bd   : > { %v1688_v63 = vpop.xlane.xlu0 %1687 }
 0x8be   : > { %v1691_v25 = vmul.f32 %v1688_v63, %v2747_v4 }
 0x8c0   : > { %v1693_v0 = vadd.f32 1e-12, %v1691_v25 }
 0x8c2   : > { %2455 = vrsqrt.f32 %v1693_v0  ;;  %vm1701_vm12 = vweird.f32 %v1693_v0 }
 0x8c5   : > { %v1690_v1 = vpop.xlane.xlu1 %1689 }
 0x8c6   : > { %v1692_v24 = vmul.f32 %v1690_v1, %v2747_v4 }
 0x8c8   : > { %v2456_v10 = vpop.eup %2455  ;;  %v1694_v11 = vadd.f32 1e-12, %v1692_v24 }
 0x8c9   : > { %v1696_v12 = vmul.f32 %v2456_v10, %v1693_v0  ;;  %vm1702_vm11 = vweird.f32 %v2456_v10 }
 0x8ca   : > { %2457 = vrsqrt.f32 %v1694_v11  ;;  %vm1703_vm13 = vmor %vm1701_vm12, %vm1702_vm11  ;;  %vm1711_vm15 = vweird.f32 %v1694_v11 }
 0x8cb   : > { %v1697_v2 = vmul.f32 %v2456_v10, %v1696_v12 }
 0x8cd   : > { %v1698_v15 = vmul.f32 0.5, %v1697_v2 }
 0x8cf   : > { %v1699_v32 = vsub.f32 1.5, %v1698_v15 }
 0x8d0   : > { %v2458_v5 = vpop.eup %2457 }
 0x8d1   : > { %v1700_v6 = vmul.f32 %v2456_v10, %v1699_v32  ;;  %v1706_v7 = vmul.f32 %v2458_v5, %v1694_v11  ;;  %vm1712_vm14 = vweird.f32 %v2458_v5 }
 0x8d2   : > { %vm1713_vm0 = vmor %vm1711_vm15, %vm1712_vm14 }
 0x8d3   : > { %v1704_v8 = vsel %vm1703_vm13, %v2456_v10, %v1700_v6  ;;  %v1707_v4 = vmul.f32 %v2458_v5, %v1706_v7 }
 0x8d4   : > { %v1715_v17 = vmul.f32 %v1704_v8, %v1683_v54 }
 0x8d5   : > { %v1708_v18 = vmul.f32 0.5, %v1707_v4 }
 0x8d6   : > { %v1718_v19 = vmul.f32 %v1717_v62, %v1715_v17 }
 0x8d7   : > { %v1709_v14 = vsub.f32 1.5, %v1708_v18 }
 0x8d8   : > { %v1721_v61 = vadd.f32 %v1720_v16, %v1718_v19 }
 0x8d9   : > { %v1710_v9 = vmul.f32 %v2458_v5, %v1709_v14 }
 0x8da   : > { %1723 = vst [vmem:[%s367_s29] sm:$0xff] %v1721_v61  ;;  %v1727_v27 = vadd.f32 %v1725_v22, %v1721_v61 }
 0x8db   : > { %v1714_v28 = vsel %vm1713_vm0, %v2458_v5, %v1710_v9 }
 0x8dc   : > { %1729 = vst [vmem:[%s372_s9] sm:$0xff] %v1727_v27  ;;  %v1716_v29 = vmul.f32 %v1714_v28, %v1684_v23 }
 0x8de   : > { %v1719_v30 = vmul.f32 %v1717_v62, %v1716_v29 }
 0x8e0   : > { %v1722_v31 = vadd.f32 %v1720_v16, %v1719_v30 }
 0x8e2   : > { %1724 = vst [vmem:[%s367_s29 + $0x8] sm:$0xff] %v1722_v31  ;;  %v1728_v33 = vadd.f32 %v1726_v26, %v1722_v31 }
 0x8e4   : > { %1730 = vst [vmem:[%s372_s9 + $0x8] sm:$0xff] %v1728_v33 }
 0x8e5 PF: > { %s21_s27 = sadd.s32 1, %s2534_s27  }
 0x8e6   : > { %p18_p7 = scmp.ge.s32.totalorder %s21_s27, 4  }
 0x8e8   :  { %20 = sbr.rel (!%p18_p7) target bundleno = 2 (0x2), region = 102 }
 0x8ed   :  { %1768 = vsyncpa [#allocation3], 1 }
 0x8ee   :  { %1770 = vsyncpa [#allocation3 + $0x1], 1 }
 0x8ef   :  { %1771 = vsyncpa [#allocation5], 1 }

// kernel: compressor_forward.3
= control target key start
LH: loop header
LB: loop body
LE: loop exit
PB: predicated region body
PF: predicated region fallthrough
CT: control target
= control target key end

     0   :  { %s3112_s0 = inlined_call_operand.vmem [shape: f32[2,16,128], index: 0, kind: input, shape index: {}]   ;;  %s3113_s1 = inlined_call_operand.vmem [shape: f32[2,16,128], index: 1, kind: input, shape index: {}, may-alias: {1,8}]   ;;  %s3114_s2 = inlined_call_operand.hbm [shape: bf16[128,384], index: 2, kind: input, shape index: {}]   ;;  %s3115_s3 = inlined_call_operand.vmem [shape: f32[8,512], index: 3, kind: input, shape index: {}]   ;;  %s3116_s4 = inlined_call_operand.vmem [shape: bf16[128,128], index: 4, kind: input, shape index: {}]   ;;  %s3117_s5 = inlined_call_operand.hbm [shape: bf16[128,512], index: 5, kind: input, shape index: {}]   ;;  %s3118_s6 = inlined_call_operand.hbm [shape: bf16[512,128], index: 6, kind: input, shape index: {}]   ;;  %s3119_s7 = inlined_call_operand.hbm [shape: f32[2,16,128], index: 7, kind: output, shape index: {0}]   ;;  %s3120_s8 = inlined_call_operand.vmem [shape: f32[2,16,128], index: 8, kind: output, shape index: {1}, may-alias: {1,8}]  }
   0x1   :  { %3124 = sst [smem:[#allocation15_spill]] %s3114_s2 }
   0x2   :  { %3125 = sst [smem:[#allocation16_spill]] %s3117_s5 }
   0x3   :  { %14 = vsyncpa [#allocation3], 0 }
   0x4   :  { %15 = vsyncpa [#allocation6], 0 }
   0x5   :  { %16 = vsyncpa [#allocation4], 0 }
   0x6   :  { %18 = vsyncpa [#allocation4 + $0x1], 0  ;;  %s2778_s27 = smov 0   ;;  %s2780_s28 = smov 0  }
   0x7   :  { %s2782_s29 = smov 0   ;;  %s2784_s30 = smov 0  }
   0x8 LB: > { %3126 = sst [smem:[#allocation12_spill]] %s2712_s29  ;;  %s2799_s9 = sadd.s32 4294967295, %s2716_s30   ;;  %s2716_s30 = sphi %s2784_s30, %s3135_s30   ;;  %s2712_s29 = sphi %s2782_s29, %s3137_s29   ;;  %s2708_s28 = sphi %s2780_s28, %s3139_s28   ;;  %s2704_s27 = sphi %s2778_s27, %s3138_s27  }
   0x9   : > { %s1901_s10 = sadd.s32 4294967294, %s2716_s30   ;;  %s2803_s11 = sadd.s32 1, %s2716_s30  }
   0xa   : > { %3127 = sst [smem:[#allocation13_spill]] %s2803_s11  ;;  %s188_s12 = sadd.s32 1, %s2712_s29 }
   0xb   : > { %s185_s13 = ssub.s32 %s2716_s30, %s2803_s11  ;;  %p198_p0 = scmp.ne.s32.totalorder %s2712_s29, %s2708_s28 }
   0xc   : > { %p186_p1 = scmp.eq.s32.totalorder %s185_s13, 0  ;;  %p199_p2 = scmp.eq.s32.totalorder %s2799_s9, 1 }
   0xd   : > { %p204_p3 = scmp.ne.s32.totalorder %s2708_s28, %s2704_s27  ;;  %p205_p4 = scmp.eq.s32.totalorder %s1901_s10, 1 }
   0xe   : > { %s2814_s14 = scalar_select %p186_p1, %s2712_s29, %s188_s12  }
   0xf   : > { %p2816_p5 = por %p199_p2, %p198_p0  ;;  %p2820_p6 = por %p205_p4, %p204_p3 }
  0x10   : > { %3128 = sst [smem:[#allocation14_spill]] %s2814_s14  ;;  %p1902_p7 = scmp.ge.s32.totalorder %s2716_s30, 1 }
  0x11   : > { %p238_p8 = scmp.lt.s32.totalorder %s2716_s30, 3  ;;  %p2443_p9 = scmp.eq.s32.totalorder %s2799_s9, 0 }
  0x12   : > { %s3132_s5 = sld [smem:[#allocation16_spill]]  ;;  %s2718_s21 = smov [#allocation5]  }
  0x13   : > { %p2827_p10 = pnand %p1902_p7, %p238_p8  ;;  %s271_s22 = sshll.u32 %s2718_s21, 4  ;;  %s272_s22 = int_to_ptr.vmem [resolvable:$true] %s271_s22 }
  0x14   : > { %s3134_s2 = sld [smem:[#allocation15_spill]]  ;;  %s2719_s10 = smov 256  }
  0x15   : > { %p2429_p11 = pneg %p2827_p10  ;;  %s2720_s12 = smov 16  }
  0x16   : > { %s2721_s13 = smov [#allocation2]   ;;  %s2722_s19 = smov 192  }
  0x17   : > { %p2838_p12 = pnand %p2443_p9, %p2429_p11  ;;  %s251_s18 = sshll.u32 %s2721_s13, 4  ;;  %s252_s18 = int_to_ptr.vmem [resolvable:$true] %s251_s18 }
  0x18   : > { %s269_s20 = sshll.u32 %s3132_s5, 4  ;;  %s2723_s21 = smov 12   ;;  %s270_s20 = int_to_ptr.hbm [resolvable:$true] %s269_s20 }
  0x19   : > { %2435 = dma.hbm_to_vmem [thread:$0]  (!%p2838_p12), %s270_s20, 4096, %s272_s22, [#allocation6], %s2719_s10, %s2719_s10, %s2720_s12  }
  0x1a   : > { %s249_s26 = sshll.u32 %s3134_s2, 4  ;;  %s283_s24 = sshll.u32 %s3118_s6, 4  ;;  %s250_s26 = int_to_ptr.hbm [resolvable:$true] %s249_s26  ;;  %s284_s24 = int_to_ptr.hbm [resolvable:$true] %s283_s24 }
  0x1b   : > { %2432 = dma.hbm_to_vmem [thread:$0]  (!%p2838_p12), %s250_s26, 3072, %s252_s18, [#allocation3], %s2722_s19, %s2722_s19, %s2723_s21  }
  0x1c   : > { %s2724_s25 = smov [#allocation7]   ;;  %s2725_s29 = smov 64  }
  0x1d   : > { %s285_s2 = sshll.u32 %s2724_s25, 4  ;;  %s2726_s11 = smov 4   ;;  %s286_s2 = int_to_ptr.vmem [resolvable:$true] %s285_s2 }
  0x1e   : > { %2438 = dma.hbm_to_vmem [thread:$0]  (!%p2838_p12), %s284_s24, 4096, %s286_s2, [#allocation6], %s2725_s29, %s2725_s29, %s2726_s11  }
  0x1f   : > { %317 = sbr.rel (%p2827_p10) target bundleno = 2300 (0x8fc), region = 48 }
  0x24   : > { %2691 = dma.done.wait (%p2443_p9), [#allocation3], 3072  }
  0x25   : > { %2693 = vsyncadd (%p2443_p9), [#allocation3], 4294964224 }
  0x26   : > { %2695 = dma.done.wait (%p2443_p9), [#allocation6], 8192  }
  0x27   : > { %2697 = vsyncadd (%p2443_p9), [#allocation6], 4294959104  ;;  %v2004_v0 = vld [vmem:[#allocation2 + $0xa8] sm:$0xf]  ;;  %v2340_v1 = vld [vmem:[#allocation2 + $0xb0] sm:$0xf0] }
  0x28   : > { %v2339_v2 = vld [vmem:[#allocation2 + $0xac] sm:$0xf]  ;;  %v2005_v3 = vor.u32 %v2340_v1, %v2004_v0  ;;  %v2006_v4 = vld [vmem:[#allocation2 + $0xb4] sm:$0xf0]  ;;  %v1992_v5 = vld [vmem:[#allocation2 + $0x90] sm:$0xf] }
  0x29   : > { %v2337_v6 = vld [vmem:[#allocation2 + $0x98] sm:$0xf0]  ;;  %v2009_v7 = vor.u32 %v2339_v2, %v2006_v4  ;;  %v2336_v8 = vld [vmem:[#allocation2 + $0x94] sm:$0xf]  ;;  %v1994_v9 = vld [vmem:[#allocation2 + $0x9c] sm:$0xf0] }
  0x2a   : > { %558 = vmatpush.bf16.msra.mxu0 %v2005_v3  ;;  %v1993_v10 = vor.u32 %v2337_v6, %v1992_v5  ;;  %v1997_v11 = vor.u32 %v2336_v8, %v1994_v9  ;;  %v1980_v12 = vld [vmem:[#allocation2 + $0x78] sm:$0xf]  ;;  %v2334_v13 = vld [vmem:[#allocation2 + $0x80] sm:$0xf0]  ;;  %v2333_v14 = vld [vmem:[#allocation2 + $0x7c] sm:$0xf] }
  0x2b   : > { %572 = vmatpush.bf16.msra.mxu1 %v2009_v7  ;;  %v1982_v15 = vld [vmem:[#allocation2 + $0x84] sm:$0xf0]  ;;  %v1981_v16 = vor.u32 %v2334_v13, %v1980_v12  ;;  %v1968_v18 = vld [vmem:[#allocation2 + $0x60] sm:$0xf]  ;;  %v2331_v19 = vld [vmem:[#allocation2 + $0x68] sm:$0xf0] }
  0x2c   : > { %v1985_v17 = vor.u32 %v2333_v14, %v1982_v15  ;;  %v2330_v20 = vld [vmem:[#allocation2 + $0x64] sm:$0xf]  ;;  %v1970_v21 = vld [vmem:[#allocation2 + $0x6c] sm:$0xf0]  ;;  %v1969_v22 = vor.u32 %v2331_v19, %v1968_v18  ;;  %v1956_v23 = vld [vmem:[#allocation2 + $0x48] sm:$0xf] }
  0x2d   : > { %v2328_v24 = vld [vmem:[#allocation2 + $0x50] sm:$0xf0]  ;;  %p372_p13 = scmp.lt.s32.totalorder %s2799_s9, 1  ;;  %v1973_v25 = vor.u32 %v2330_v20, %v1970_v21  ;;  %v2012_v26 = vld [vmem:[#allocation2 + $0xb0] sm:$0xf]  ;;  %v2883_v13 = vld [vmem:[%s3115_s3 + $0x8] sm:$0xff] }
  0x2e   : > { %559 = vmatpush.bf16.msra.mxu0 %v1993_v10  ;;  %v2341_v27 = vld [vmem:[#allocation2 + $0xb8] sm:$0xf0]  ;;  %v2000_v28 = vld [vmem:[#allocation2 + $0x98] sm:$0xf]  ;;  %v2327_v29 = vld [vmem:[#allocation2 + $0x4c] sm:$0xf]  ;;  %v1957_v33 = vor.u32 %v2328_v24, %v1956_v23 }
  0x2f   : > { %573 = vmatpush.bf16.msra.mxu1 %v1997_v11  ;;  %v1958_v30 = vld [vmem:[#allocation2 + $0x54] sm:$0xf0]  ;;  %v2013_v31 = vor.u32 %v2341_v27, %v2012_v26  ;;  %v2338_v32 = vld [vmem:[#allocation2 + $0xa0] sm:$0xf0]  ;;  %v1944_v34 = vld [vmem:[#allocation2 + $0x30] sm:$0xf] }
  0x30   : > { %v2001_v35 = vor.u32 %v2338_v32, %v2000_v28  ;;  %v1961_v36 = vor.u32 %v2327_v29, %v1958_v30  ;;  %v2325_v37 = vld [vmem:[#allocation2 + $0x38] sm:$0xf0]  ;;  %v1988_v38 = vld [vmem:[#allocation2 + $0x80] sm:$0xf]  ;;  %v2335_v39 = vld [vmem:[#allocation2 + $0x88] sm:$0xf0] }
  0x31   : > { %586 = vmatpush.bf16.msra.mxu2 %v2013_v31  ;;  %v2324_v40 = vld [vmem:[#allocation2 + $0x34] sm:$0xf]  ;;  %v1946_v41 = vld [vmem:[#allocation2 + $0x3c] sm:$0xf0]  ;;  %s373_s2 = scalar_select %p372_p13, %s2799_s9, 1  ;;  %v1945_v42 = vor.u32 %v2325_v37, %v1944_v34  ;;  %v1989_v44 = vor.u32 %v2335_v39, %v1988_v38  ;;  %v428_v14 = vperm.slane %v2883_v13, 0 }
  0x32   : > { %560 = vmatpush.bf16.msra.mxu0 %v1981_v16  ;;  %v1932_v43 = vld [vmem:[#allocation2 + $0x18] sm:$0xf]  ;;  %v1949_v45 = vor.u32 %v2324_v40, %v1946_v41  ;;  %v2322_v46 = vld [vmem:[#allocation2 + $0x20] sm:$0xf0]  ;;  %v1976_v47 = vld [vmem:[#allocation2 + $0x68] sm:$0xf] }
  0x33   : > { %574 = vmatpush.bf16.msra.mxu1 %v1985_v17  ;;  %v2332_v48 = vld [vmem:[#allocation2 + $0x70] sm:$0xf0]  ;;  %v2321_v49 = vld [vmem:[#allocation2 + $0x1c] sm:$0xf]  ;;  %v1934_v50 = vld [vmem:[#allocation2 + $0x24] sm:$0xf0]  ;;  %v1933_v51 = vor.u32 %v2322_v46, %v1932_v43 }
  0x34   : > { %s2868_s5 = sshll.u32 %s373_s2, 4  ;;  %v1920_v52 = vld [vmem:[#allocation2] sm:$0xf]  ;;  %v1977_v53 = vor.u32 %v2332_v48, %v1976_v47  ;;  %v1937_v54 = vor.u32 %v2321_v49, %v1934_v50  ;;  %v2319_v55 = vld [vmem:[#allocation2 + $0x8] sm:$0xf0]  ;;  %vm603_vm0 = vcmask 261120  }
  0x35   : > { %587 = vmatpush.bf16.msra.mxu2 %v2001_v35  ;;  %s376_s14 = scalar_lea.vmem %s3112_s0, %s2868_s5  ;;  %v1964_v56 = vld [vmem:[#allocation2 + $0x50] sm:$0xf]  ;;  %v2329_v57 = vld [vmem:[#allocation2 + $0x58] sm:$0xf0]  ;;  %v2318_v58 = vld [vmem:[#allocation2 + $0x4] sm:$0xf]  ;;  %v1921_v60 = vor.u32 %v2319_v55, %v1920_v52  ;;  %s381_s11 = scalar_lea.vmem %s3113_s1, %s2868_s5 }
  0x36   : > { %561 = vmatpush.bf16.msra.mxu0 %v1969_v22  ;;  %v1922_v59 = vld [vmem:[#allocation2 + $0xc] sm:$0xf0]  ;;  %v2874_v61 = vld [vmem:[%s376_s14] sm:$0xff]  ;;  %v2876_v62 = vld [vmem:[%s376_s14 + $0x8] sm:$0xff]  ;;  %v1965_v63 = vor.u32 %v2329_v57, %v1964_v56  ;;  %s2727_s26 = smov 96   ;;  %s2728_s13 = smov 64  }
  0x37   : > { %575 = vmatpush.bf16.msra.mxu1 %v1973_v25  ;;  %v1925_v0 = vor.u32 %v2318_v58, %v1922_v59  ;;  %v1952_v1 = vld [vmem:[#allocation2 + $0x38] sm:$0xf]  ;;  %v2326_v2 = vld [vmem:[#allocation2 + $0x40] sm:$0xf0]  ;;  %v394_v3 = vpack.c.bf16 %v2876_v62, %v2874_v61  ;;  %v1940_v5 = vld [vmem:[#allocation2 + $0x20] sm:$0xf] }
  0x38   : > { %v1953_v4 = vor.u32 %v2326_v2, %v1952_v1  ;;  %v2323_v6 = vld [vmem:[#allocation2 + $0x28] sm:$0xf0]  ;;  %v1928_v8 = vld [vmem:[#allocation2 + $0x8] sm:$0xf]  ;;  %v2320_v9 = vld [vmem:[#allocation2 + $0x10] sm:$0xf0] }
  0x39   : > { %588 = vmatpush.bf16.msra.mxu2 %v1989_v44  ;;  %v1941_v7 = vor.u32 %v2323_v6, %v1940_v5  ;;  %v1929_v10 = vor.u32 %v2320_v9, %v1928_v8  ;;  %v2889_v15 = vld [vmem:[%s3115_s3] sm:$0xff]  ;;  %v2897_v25 = vld [vmem:[%s3115_s3 + $0x10] sm:$0xff]  ;;  %s2729_s18 = smov 32   ;;  %vm624_vm1 = vcmask 130048   ;;  %vm906_vm2 = vcmask 523264   ;;  %s362_s25 = sand.u32 1, %s2708_s28  }
  0x3a   : > { %562 = vmatpush.bf16.msra.mxu0 %v1957_v33  ;;  %v427_v19 = vperm.slane %v2889_v15, 0  ;;  %v429_v28 = vperm.slane %v2897_v25, 0  ;;  %vm909_vm3 = vcmask 785408   ;;  %s1911_s14 = sshll.u32 %s362_s25, 4  ;;  %s2414_s17 = sshll.u32 %s2799_s9, 4 }
  0x3b   : > { %576 = vmatpush.bf16.msra.mxu1 %v1961_v36  ;;  %s1764_s23 = scalar_lea.hbm %s3119_s7, %s2414_s17  ;;  %s364_s10 = scalar_lea.vmem [#allocation8], %s1911_s14 }
  0x3c   : > { %s1765_s9 = sshll.u32 %s364_s10, 4  ;;  %s1748_s19 = scalar_lea.sflag [#allocation4], %s362_s25  ;;  %s1766_s9 = int_to_ptr.vmem [resolvable:$true] %s1765_s9 }
  0x3d   : > { %589 = vmatpush.bf16.msra.mxu2 %v1977_v53  ;;  %s2666_s29 = scalar_lea.hbm %s3119_s7, 32 }
  0x3e   : > { %563 = vmatpush.bf16.msra.mxu0 %v1945_v42 }
  0x3f   : > { %577 = vmatpush.bf16.msra.mxu1 %v1949_v45 }
  0x41   : > { %590 = vmatpush.bf16.msra.mxu2 %v1965_v63 }
  0x42   : > { %564 = vmatpush.bf16.msra.mxu0 %v1933_v51 }
  0x43   : > { %578 = vmatpush.bf16.msra.mxu1 %v1937_v54 }
  0x45   : > { %591 = vmatpush.bf16.msra.mxu2 %v1953_v4 }
  0x46   : > { %565 = vmatpush.bf16.msra.mxu0 %v1921_v60 }
  0x47   : > { %579 = vmatpush.bf16.msra.mxu1 %v1925_v0 }
  0x49   : > { %566 = vmatmul.bf16.vlgmr.msra.gmra.mxu0 %v394_v3  ;;  %592 = vmatpush.bf16.msra.mxu2 %v1941_v7 }
  0x4a   : > { %580 = vmatmul.bf16.vlgmr.msra.gmra.mxu1 %v394_v3 }
  0x4d   : > { %593 = vmatpush.bf16.msra.mxu2 %v1929_v10 }
  0x50   : > { %594 = vmatmul.bf16.vlgmr.msra.gmra.mxu2 %v394_v3 }
  0xc6   : > { %v567_v12 = vpop.f32.mrf.mxu0 }
  0xc7   : > { %v581_v11 = vpop.f32.mrf.mxu1  ;;  %v568_v23 = vadd.f32 %v567_v12, %v427_v19 }
  0xc8   : > { %v582_v17 = vadd.f32 %v581_v11, %v428_v14 }
  0xce   : > { %v569_v21 = vpop.f32.mrf.mxu0 }
  0xcf   : > { %v583_v16 = vpop.f32.mrf.mxu1  ;;  %v570_v24 = vadd.f32 %v569_v21, %v427_v19 }
  0xd0   : > { %v584_v18 = vadd.f32 %v583_v16, %v428_v14 }
  0xd1   : > { %v600_v27 = vpack.c.bf16 %v570_v24, %v568_v23 }
  0xd2   : > { %v601_v20 = vpack.c.bf16 %v584_v18, %v582_v17 }
  0xd3   : > { %v595_v26 = vpop.f32.mrf.mxu2 }
  0xd4   : > { %671 = vrot.lane.b32.xlu2 %v601_v20, %s2727_s26  ;;  %v608_v22 = vsel %vm603_vm0, %v601_v20, 0  ;;  %v596_v29 = vadd.f32 %v595_v26, %v429_v28 }
  0xd5   : > { %617 = vmatpush.bf16.xpose.msra.mxu3 %v608_v22 }
  0xdb   : > { %v597_v30 = vpop.f32.mrf.mxu2 }
  0xdc   : > { %668 = vrot.lane.b32.xlu2 %v600_v27, %s2727_s26  ;;  %2014 = vmatmul.msk.bf16.vlgmr.msra.gmra.mxu3 %vm603_vm0, %v600_v27  ;;  %v598_v31 = vadd.f32 %v597_v30, %v429_v28 }
  0xde   : > { %v2902_v32 = vpack.c.bf16 %v598_v31, %v596_v29 }
  0xe0   : > { %658 = vmatpush.bf16.msrb.mxu3 %v2902_v32 }
  0xe4   : > { %739 = vrot.lane.b32.xlu2 %v600_v27, %s2728_s13 }
  0xec   : > { %808 = vrot.lane.b32.xlu2 %v600_v27, %s2729_s18 }
 0x12e   : > { %v672_v33 = vpop.permute.xlu2 %671 }
 0x12f   : > { %v677_v34 = vsel %vm603_vm0, %v672_v33, 0 }
 0x130   : > { %686 = vmatpush.bf16.xpose.msra.mxu3 %v677_v34 }
 0x136   : > { %v669_v49 = vpop.permute.xlu2 %668 }
 0x13e   : > { %v740_v52 = vpop.permute.xlu2 %739 }
 0x146   : > { %v809_v2 = vpop.permute.xlu2 %808 }
 0x15f   : > { %v619_v35 = vpop.f32.mrf.mxu3 }
 0x160   : > { %v625_v36 = vsel %vm624_vm1, %v619_v35, -inf }
 0x161   : > { %626 = vmax.xlane.f32.xlu0 %v625_v36 }
 0x167   : > { %v621_v37 = vpop.f32.mrf.mxu3 }
 0x168   : > { %v628_v38 = vsel %vm624_vm1, %v621_v37, -inf }
 0x169   : > { %629 = vmax.xlane.f32.xlu0 %v628_v38 }
 0x17d   : > { %741 = vrot.lane.b32.xlu0 %v601_v20, %s2728_s13 }
 0x1d4   : > { %v627_v39 = vpop.xlane.xlu0 %626 }
 0x1d5   : > { %v631_v40 = vsub.f32 %v619_v35, %v627_v39 }
 0x1d7   : > { %v633_v41 = vmul.f32 1.442695, %v631_v40 }
 0x1d9   : > { %2497 = vpow2.f32 %v633_v41 }
 0x1dc   : > { %v630_v42 = vpop.xlane.xlu0 %629 }
 0x1dd   : > { %v632_v43 = vsub.f32 %v621_v37, %v630_v42 }
 0x1df   : > { %v2498_v44 = vpop.eup %2497  ;;  %v635_v45 = vmul.f32 1.442695, %v632_v43 }
 0x1e0   : > { %v637_v46 = vsel %vm624_vm1, %v2498_v44, 0.0 }
 0x1e1   : > { %2499 = vpow2.f32 %v635_v45  ;;  %638 = vadd.xlane.f32.xlu1 %v637_v46 }
 0x1e7   : > { %v2500_v47 = vpop.eup %2499 }
 0x1e8   : > { %v640_v48 = vsel %vm624_vm1, %v2500_v47, 0.0 }
 0x1e9   : > { %641 = vadd.xlane.f32.xlu1 %v640_v48 }
 0x1ef   : > { %v742_v50 = vpop.permute.xlu0 %741 }
 0x1f0   : > { %v747_v51 = vsel %vm603_vm0, %v742_v50, 0 }
 0x1f1   : > { %756 = vmatpush.bf16.xpose.msrb.mxu2 %v747_v51 }
 0x1f8   : > { %2018 = vmatmul.msk.bf16.vlgmr.msrb.gmra.mxu2 %vm603_vm0, %v740_v52 }
 0x202   : > { %810 = vrot.lane.b32.xlu1 %v601_v20, %s2729_s18 }
 0x254   : > { %v639_v53 = vpop.xlane.xlu1 %638 }
 0x255   : > { %2501 = vrcp.f32 %v639_v53 }
 0x25b   : > { %v2502_v55 = vpop.eup %2501 }
 0x25c   : > { %v642_v54 = vpop.xlane.xlu1 %641  ;;  %v645_v57 = vmul.f32 %v2502_v55, %v2498_v44 }
 0x25d   : > { %2503 = vrcp.f32 %v642_v54 }
 0x263   : > { %v2504_v56 = vpop.eup %2503 }
 0x264   : > { %v646_v58 = vmul.f32 %v2504_v56, %v2500_v47 }
 0x266   : > { %v647_v59 = vpack.c.bf16 %v646_v58, %v645_v57 }
 0x268   : > { %2015 = vmatmul.msk.bf16.vlgmr.msrb.gmra.mxu3 %vm624_vm1, %v647_v59 }
 0x274   : > { %v811_v60 = vpop.permute.xlu1 %810 }
 0x275   : > { %v816_v63 = vsel %vm603_vm0, %v811_v60, 0 }
 0x276   : > { %825 = vmatpush.bf16.xpose.msrb.mxu3 %v816_v63 }
 0x278   : > { %2016 = vmatmul.msk.bf16.vlgmr.msra.gmra.mxu3 %vm603_vm0, %v669_v49 }
 0x27b   : > { %v758_v0 = vpop.f32.mrf.mxu2 }
 0x27c   : > { %v763_v1 = vsel %vm624_vm1, %v758_v0, -inf }
 0x27d   : > { %764 = vmax.xlane.f32.xlu1 %v763_v1 }
 0x283   : > { %v760_v19 = vpop.f32.mrf.mxu2 }
 0x284   : > { %v766_v22 = vsel %vm624_vm1, %v760_v19, -inf }
 0x288   : > { %2020 = vmatmul.msk.bf16.vlgmr.msrb.gmra.mxu3 %vm603_vm0, %v809_v2 }
 0x2eb   : > { %v660_v3 = vpop.f32.mrf.mxu3 }
 0x2ec   : > { %v665_v6 = vpack.c.bf16 %v660_v3, %v660_v3 }
 0x2ee   : > { %v2921_v10 = vunpack.c.l.b16 %v665_v6 }
 0x2f0   : > { %v765_v4 = vpop.xlane.xlu1 %764 }
 0x2f1   : > { %v769_v5 = vsub.f32 %v758_v0, %v765_v4 }
 0x2f3   : > { %v771_v7 = vmul.f32 1.442695, %v769_v5  ;;  %v662_v8 = vpop.f32.mrf.mxu3 }
 0x2f4   : > { %v666_v9 = vpack.c.bf16 %v662_v8, %v662_v8 }
 0x2f5   : > { %2505 = vpow2.f32 %v771_v7 }
 0x2f6   : > { %v2923_v11 = vunpack.c.l.b16 %v666_v9 }
 0x2f8   : > { %v881_v12 = vpack.c.b16 %v2923_v11, %v2921_v10  ;;  %v2730_v10 = vmov 128.0  }
 0x2fb   : > { %v2927_v14 = vpop.eup %2505  ;;  %v688_v16 = vpop.f32.mrf.mxu3 }
 0x2fc   : > { %v693_v17 = vsel %vm624_vm1, %v688_v16, -inf  ;;  %v775_v18 = vsel %vm624_vm1, %v2927_v14, 0.0 }
 0x2fd   : > { %694 = vmax.xlane.f32.xlu2 %v693_v17  ;;  %776 = vadd.xlane.f32.xlu1 %v775_v18 }
 0x303   : > { %v690_v20 = vpop.f32.mrf.mxu3 }
 0x304   : > { %v696_v21 = vsel %vm624_vm1, %v690_v20, -inf }
 0x305   : > { %697 = vmax.xlane.f32.xlu0 %v696_v21  ;;  %767 = vmax.xlane.f32.xlu2 %v766_v22  ;;  %v2349_v22 = vld [vmem:[%s3116_s4 + $0x38] sm:$0xff] }
 0x306   : > { %978 = vmatpush.bf16.msrb.mxu1 %v2349_v22  ;;  %v2176_v22 = vld [vmem:[#allocation5 + $0xe8] sm:$0xf] }
 0x30b   : > { %v827_v23 = vpop.f32.mrf.mxu3 }
 0x30c   : > { %v832_v24 = vsel %vm624_vm1, %v827_v23, -inf }
 0x30d   : > { %833 = vmax.xlane.f32.xlu0 %v832_v24 }
 0x313   : > { %v829_v26 = vpop.f32.mrf.mxu3 }
 0x314   : > { %v835_v27 = vsel %vm624_vm1, %v829_v26, -inf }
 0x315   : > { %836 = vmax.xlane.f32.xlu2 %v835_v27 }
 0x32d   : > { %717 = vrot.lane.b32.xlu2 %v2902_v32, %s2727_s26 }
 0x370   : > { %v695_v28 = vpop.xlane.xlu2 %694  ;;  %v777_v55 = vpop.xlane.xlu1 %776 }
 0x371   : > { %v699_v29 = vsub.f32 %v688_v16, %v695_v28 }
 0x373   : > { %v701_v30 = vmul.f32 1.442695, %v699_v29 }
 0x375   : > { %2507 = vpow2.f32 %v701_v30 }
 0x378   : > { %v768_v31 = vpop.xlane.xlu2 %767  ;;  %v698_v33 = vpop.xlane.xlu0 %697 }
 0x379   : > { %v770_v34 = vsub.f32 %v760_v19, %v768_v31  ;;  %v700_v37 = vsub.f32 %v690_v20, %v698_v33  ;;  %v2346_v31 = vld [vmem:[%s3116_s4 + $0x20] sm:$0xff] }
 0x37b   : > { %v2508_v35 = vpop.eup %2507  ;;  %v773_v36 = vmul.f32 1.442695, %v770_v34  ;;  %v703_v39 = vmul.f32 1.442695, %v700_v37 }
 0x37c   : > { %v705_v38 = vsel %vm624_vm1, %v2508_v35, 0.0 }
 0x37d   : > { %2509 = vpow2.f32 %v773_v36  ;;  %706 = vadd.xlane.f32.xlu1 %v705_v38 }
 0x37e   : > { %2511 = vpow2.f32 %v703_v39 }
 0x380   : > { %v834_v40 = vpop.xlane.xlu0 %833 }
 0x381   : > { %v838_v41 = vsub.f32 %v827_v23, %v834_v40 }
 0x383   : > { %v2510_v42 = vpop.eup %2509  ;;  %v840_v43 = vmul.f32 1.442695, %v838_v41 }
 0x384   : > { %v778_v44 = vsel %vm624_vm1, %v2510_v42, 0.0  ;;  %v2512_v46 = vpop.eup %2511 }
 0x385   : > { %2513 = vpow2.f32 %v840_v43  ;;  %779 = vadd.xlane.f32.xlu0 %v778_v44  ;;  %v708_v50 = vsel %vm624_vm1, %v2512_v46, 0.0 }
 0x388   : > { %v837_v45 = vpop.xlane.xlu2 %836 }
 0x389   : > { %v839_v47 = vsub.f32 %v829_v26, %v837_v45  ;;  %v2347_v26 = vld [vmem:[%s3116_s4 + $0x28] sm:$0xff] }
 0x38b   : > { %v2514_v48 = vpop.eup %2513  ;;  %v842_v49 = vmul.f32 1.442695, %v839_v47  ;;  %v2345_v47 = vld [vmem:[%s3116_s4 + $0x18] sm:$0xff] }
 0x38c   : > { %v844_v51 = vsel %vm624_vm1, %v2514_v48, 0.0 }
 0x38d   : > { %2515 = vpow2.f32 %v842_v49  ;;  %709 = vadd.xlane.f32.xlu0 %v708_v50  ;;  %845 = vadd.xlane.f32.xlu1 %v844_v51  ;;  %v2343_v49 = vld [vmem:[%s3116_s4 + $0x8] sm:$0xff]  ;;  %v2342_v50 = vld [vmem:[%s3116_s4] sm:$0xff] }
 0x390   : > { %v718_v52 = vpop.permute.xlu2 %717 }
 0x391   : > { %730 = vmatpush.bf16.msrb.mxu0 %v718_v52 }
 0x393   : > { %v2516_v53 = vpop.eup %2515 }
 0x394   : > { %v847_v54 = vsel %vm624_vm1, %v2516_v53, 0.0 }
 0x395   : > { %848 = vadd.xlane.f32.xlu0 %v847_v54 }
 0x3a6   : > { %786 = vrot.lane.b32.xlu1 %v2902_v32, %s2728_s13 }
 0x3a9   : > { %855 = vrot.lane.b32.xlu0 %v2902_v32, %s2729_s18 }
 0x3f0   : > { %v707_v57 = vpop.xlane.xlu1 %706 }
 0x3f1   : > { %2517 = vrcp.f32 %v707_v57  ;;  %v929_v57 = vperm.slane %v2889_v15, 1 }
 0x3f7   : > { %v2518_v59 = vpop.eup %2517 }
 0x3f8   : > { %v780_v56 = vpop.xlane.xlu0 %779  ;;  %v713_v63 = vmul.f32 %v2518_v59, %v2508_v35 }
 0x400   : > { %v710_v58 = vpop.xlane.xlu0 %709  ;;  %v846_v3 = vpop.xlane.xlu1 %845 }
 0x401   : > { %2519 = vrcp.f32 %v710_v58 }
 0x402   : > { %2521 = vrcp.f32 %v780_v56 }
 0x403   : > { %2523 = vrcp.f32 %v777_v55 }
 0x407   : > { %v2520_v60 = vpop.eup %2519 }
 0x408   : > { %v714_v0 = vmul.f32 %v2520_v60, %v2512_v46  ;;  %v849_v2 = vpop.xlane.xlu0 %848  ;;  %v2522_v32 = vpop.eup %2521 }
 0x409   : > { %2525 = vrcp.f32 %v849_v2  ;;  %v2524_v4 = vpop.eup %2523  ;;  %v784_v6 = vmul.f32 %v2522_v32, %v2510_v42 }
 0x40a   : > { %v715_v1 = vpack.c.bf16 %v714_v0, %v713_v63  ;;  %2527 = vrcp.f32 %v846_v3  ;;  %v783_v8 = vmul.f32 %v2524_v4, %v2927_v14  ;;  %v2348_v14 = vld [vmem:[%s3116_s4 + $0x30] sm:$0xff] }
 0x40b   : > { %979 = vmatpush.bf16.msrb.mxu1 %v2348_v14  ;;  %2529 = vrcp.f32 %v2730_v10  ;;  %v2130_v10 = vld [vmem:[#allocation5 + $0x98] sm:$0xf0] }
 0x40c   : > { %2017 = vmatmul.msk.bf16.vlgmr.msrb.gmra.mxu0 %vm624_vm1, %v715_v1  ;;  %v785_v17 = vpack.c.bf16 %v784_v6, %v783_v8 }
 0x40f   : > { %v2526_v5 = vpop.eup %2525  ;;  %980 = vmatpush.bf16.msrb.mxu1 %v2347_v26  ;;  %v2379_v26 = vld [vmem:[#allocation5 + $0xec] sm:$0xf] }
 0x410   : > { %v2528_v7 = vpop.eup %2527  ;;  %v853_v16 = vmul.f32 %v2526_v5, %v2516_v53 }
 0x411   : > { %v852_v18 = vmul.f32 %v2528_v7, %v2514_v48  ;;  %v2344_v48 = vld [vmem:[%s3116_s4 + $0x10] sm:$0xff]  ;;  %v2530_v11 = vpop.eup %2529 }
 0x412   : > { %vm1003_vm4 = vweird.f32 %v2530_v11 }
 0x413   : > { %v854_v20 = vpack.c.bf16 %v853_v16, %v852_v18  ;;  %981 = vmatpush.bf16.msrb.mxu1 %v2346_v31  ;;  %v2380_v18 = vld [vmem:[#allocation5 + $0xec] sm:$0xf0]  ;;  %v2374_v31 = vld [vmem:[#allocation5 + $0xc4] sm:$0xf] }
 0x417   : > { %982 = vmatpush.bf16.msrb.mxu1 %v2345_v47  ;;  %v2144_v47 = vld [vmem:[#allocation5 + $0xa8] sm:$0xf] }
 0x418   : > { %v787_v9 = vpop.permute.xlu1 %786 }
 0x419   : > { %799 = vmatpush.bf16.msra.mxu2 %v787_v9 }
 0x41b   : > { %v856_v19 = vpop.permute.xlu0 %855  ;;  %983 = vmatpush.bf16.msrb.mxu1 %v2344_v48  ;;  %v2373_v48 = vld [vmem:[#allocation5 + $0xb4] sm:$0xf0] }
 0x41c   : > { %2019 = vmatmul.msk.bf16.vlgmr.msra.gmra.mxu2 %vm624_vm1, %v785_v17  ;;  %868 = vmatpush.bf16.msra.mxu0 %v856_v19  ;;  %v2168_v17 = vld [vmem:[#allocation5 + $0xe0] sm:$0xf]  ;;  %v2378_v19 = vld [vmem:[#allocation5 + $0xe4] sm:$0xf] }
 0x41f   : > { %2021 = vmatmul.msk.bf16.vlgmr.msra.gmra.mxu0 %vm624_vm1, %v854_v20  ;;  %984 = vmatpush.bf16.msrb.mxu1 %v2343_v49  ;;  %v2169_v20 = vor.u32 %v2380_v18, %v2168_v17  ;;  %v2114_v17 = vld [vmem:[#allocation5 + $0x78] sm:$0xf0] }
 0x421   : > { %1244 = vmatpush.bf16.msrb.mxu2 %v2169_v20  ;;  %v2360_v20 = vld [vmem:[#allocation5 + $0x4c] sm:$0xf0] }
 0x423   : > { %985 = vmatpush.bf16.msrb.mxu1 %v2342_v50  ;;  %v2145_v50 = vor.u32 %v2373_v48, %v2144_v47  ;;  %v2352_v47 = vld [vmem:[#allocation5 + $0xc] sm:$0xf0]  ;;  %v2350_v48 = vld [vmem:[#allocation5 + $0x4] sm:$0xf] }
 0x489   : > { %v732_v21 = vpop.f32.mrf.mxu0 }
 0x48a   : > { %v737_v37 = vpack.c.bf16 %v732_v21, %v732_v21  ;;  %v2170_v21 = vld [vmem:[#allocation5 + $0xf0] sm:$0xf0] }
 0x48c   : > { %v884_v40 = vunpack.c.l.b16 %v737_v37 }
 0x491   : > { %v734_v23 = vpop.f32.mrf.mxu0 }
 0x492   : > { %v738_v35 = vpack.c.bf16 %v734_v23, %v734_v23  ;;  %v2381_v23 = vld [vmem:[#allocation5 + $0xf4] sm:$0xf0] }
 0x493   : > { %v2177_v14 = vor.u32 %v2381_v23, %v2176_v22  ;;  %v2090_v23 = vld [vmem:[#allocation5 + $0x50] sm:$0xf0] }
 0x494   : > { %v885_v38 = vunpack.c.l.b16 %v738_v35  ;;  %v2160_v35 = vld [vmem:[#allocation5 + $0xc8] sm:$0xf] }
 0x495   : > { %1272 = vmatpush.bf16.msrb.mxu0 %v2177_v14  ;;  %v2361_v14 = vld [vmem:[#allocation5 + $0x54] sm:$0xf0] }
 0x496   : > { %v886_v41 = vpack.c.b16 %v885_v38, %v884_v40  ;;  %v2162_v40 = vld [vmem:[#allocation5 + $0xd8] sm:$0xf0] }
 0x49c   : > { %v870_v28 = vpop.f32.mrf.mxu0 }
 0x49d   : > { %v875_v43 = vpack.c.bf16 %v870_v28, %v870_v28 }
 0x49f   : > { %v801_v24 = vpop.f32.mrf.mxu2  ;;  %v898_v45 = vunpack.c.l.b16 %v875_v43  ;;  %v2372_v43 = vld [vmem:[#allocation5 + $0xac] sm:$0xf0] }
 0x4a0   : > { %v806_v27 = vpack.c.bf16 %v801_v24, %v801_v24  ;;  %v2173_v24 = vor.u32 %v2378_v19, %v2170_v21  ;;  %v2088_v19 = vld [vmem:[#allocation5 + $0x40] sm:$0xf]  ;;  %v2358_v21 = vld [vmem:[#allocation5 + $0x44] sm:$0xf] }
 0x4a1   : > { %v2089_v22 = vor.u32 %v2360_v20, %v2088_v19 }
 0x4a2   : > { %v891_v33 = vunpack.c.l.b16 %v806_v27  ;;  %v2178_v27 = vld [vmem:[#allocation5 + $0xf8] sm:$0xf0]  ;;  %1258 = vmatpush.bf16.msra.mxu3 %v2173_v24  ;;  %v2096_v24 = vld [vmem:[#allocation5 + $0x48] sm:$0xf] }
 0x4a3   : > { %v2181_v28 = vor.u32 %v2379_v26, %v2178_v27  ;;  %v2093_v26 = vor.u32 %v2358_v21, %v2090_v23  ;;  %v2097_v27 = vor.u32 %v2361_v14, %v2096_v24  ;;  %v1044_v21 = vperm.slane %v2889_v15, 3 }
 0x4a4   : > { %v872_v39 = vpop.f32.mrf.mxu0 }
 0x4a5   : > { %v876_v42 = vpack.c.bf16 %v872_v39, %v872_v39  ;;  %1286 = vmatpush.bf16.msra.mxu1 %v2181_v28  ;;  %v2375_v39 = vld [vmem:[#allocation5 + $0xcc] sm:$0xf] }
 0x4a6   : > { %v2359_v28 = vld [vmem:[#allocation5 + $0x4c] sm:$0xf] }
 0x4a7   : > { %v803_v29 = vpop.f32.mrf.mxu2  ;;  %v899_v44 = vunpack.c.l.b16 %v876_v42  ;;  %v2136_v42 = vld [vmem:[#allocation5 + $0xa0] sm:$0xf] }
 0x4a8   : > { %v807_v30 = vpack.c.bf16 %v803_v29, %v803_v29  ;;  %v2152_v29 = vld [vmem:[#allocation5 + $0xc0] sm:$0xf] }
 0x4a9   : > { %v900_v46 = vpack.c.b16 %v899_v44, %v898_v45  ;;  %v2370_v44 = vld [vmem:[#allocation5 + $0xa4] sm:$0xf]  ;;  %v2137_v45 = vor.u32 %v2372_v43, %v2136_v42  ;;  %v2355_v42 = vld [vmem:[#allocation5 + $0x2c] sm:$0xf]  ;;  %v2082_v43 = vld [vmem:[#allocation5 + $0x38] sm:$0xf0] }
 0x4aa   : > { %v892_v34 = vunpack.c.l.b16 %v807_v30  ;;  %v2376_v30 = vld [vmem:[#allocation5 + $0xcc] sm:$0xf0] }
 0x4ac   : > { %v893_v36 = vpack.c.b16 %v892_v34, %v891_v33  ;;  %v2153_v33 = vor.u32 %v2376_v30, %v2152_v29  ;;  %v2154_v34 = vld [vmem:[#allocation5 + $0xd0] sm:$0xf0]  ;;  %v2098_v29 = vld [vmem:[#allocation5 + $0x58] sm:$0xf0] }
 0x4ad   : > { %v2157_v37 = vor.u32 %v2374_v31, %v2154_v34  ;;  %v2101_v30 = vor.u32 %v2359_v28, %v2098_v29  ;;  %v2072_v31 = vld [vmem:[#allocation5 + $0x20] sm:$0xf]  ;;  %v2354_v34 = vld [vmem:[#allocation5 + $0x24] sm:$0xf]  ;;  %v2389_v28 = vld [vmem:[#allocation7 + $0x38] sm:$0xff] }
 0x4ae   : > { %894 = vrot.lane.b32.xlu2 %v893_v36, %s2728_s13  ;;  %v2377_v36 = vld [vmem:[#allocation5 + $0xd4] sm:$0xf0]  ;;  %1245 = vmatpush.bf16.msrb.mxu2 %v2153_v33  ;;  %v2356_v33 = vld [vmem:[#allocation5 + $0x2c] sm:$0xf0] }
 0x4af   : > { %v2161_v38 = vor.u32 %v2377_v36, %v2160_v35  ;;  %1259 = vmatpush.bf16.msra.mxu3 %v2157_v37  ;;  %v2073_v35 = vor.u32 %v2356_v33, %v2072_v31  ;;  %v2074_v36 = vld [vmem:[#allocation5 + $0x30] sm:$0xf0]  ;;  %v2080_v37 = vld [vmem:[#allocation5 + $0x28] sm:$0xf]  ;;  %v2397_v29 = vld [vmem:[#allocation7 + $0x78] sm:$0xff] }
 0x4b0   : > { %v2411_v31 = vld [vmem:[#allocation7 + $0xe8] sm:$0xff]  ;;  %v2388_v33 = vld [vmem:[#allocation7 + $0x30] sm:$0xff] }
 0x4b1   : > { %1273 = vmatpush.bf16.msrb.mxu0 %v2161_v38  ;;  %v2357_v38 = vld [vmem:[#allocation5 + $0x34] sm:$0xf0] }
 0x4b2   : > { %1246 = vmatpush.bf16.msrb.mxu2 %v2137_v45 }
 0x4b5   : > { %1274 = vmatpush.bf16.msrb.mxu0 %v2145_v50 }
 0x4b6   : > { %887 = vrot.lane.b32.xlu2 %v886_v41, %s2729_s18  ;;  %v2165_v41 = vor.u32 %v2375_v39, %v2162_v40  ;;  %v2077_v40 = vor.u32 %v2354_v34, %v2074_v36  ;;  %v2396_v34 = vld [vmem:[#allocation7 + $0x70] sm:$0xff]  ;;  %v2410_v36 = vld [vmem:[#allocation7 + $0xe0] sm:$0xff]  ;;  %s3079_s18 = scalar_lea.vmem %s3120_s8, %s2868_s5 }
 0x4b8   : > { %1287 = vmatpush.bf16.msra.mxu1 %v2165_v41  ;;  %v2081_v41 = vor.u32 %v2357_v38, %v2080_v37  ;;  %v2387_v37 = vld [vmem:[#allocation7 + $0x28] sm:$0xff] }
 0x4b9   : > { %v2395_v38 = vld [vmem:[#allocation7 + $0x68] sm:$0xff] }
 0x4be   : > { %901 = vrot.lane.b32.xlu2 %v900_v46, %s2727_s26  ;;  %v2138_v46 = vld [vmem:[#allocation5 + $0xb0] sm:$0xf0]  ;;  %s1767_s26 = sshll.u32 %s1764_s23, 4  ;;  %s1768_s26 = int_to_ptr.hbm [resolvable:$true] %s1767_s26 }
 0x4bf   : > { %v2141_v49 = vor.u32 %v2370_v44, %v2138_v46  ;;  %v2056_v44 = vld [vmem:[#allocation5] sm:$0xf]  ;;  %v2085_v46 = vor.u32 %v2355_v42, %v2082_v43  ;;  %v2400_v43 = vld [vmem:[#allocation7 + $0x90] sm:$0xff]  ;;  %s2660_s21 = sshra.s32 %s1768_s26, 4  ;;  %s2661_s21 = int_to_ptr.hbm [resolvable:$true] %s2660_s21 }
 0x4c0   : > { %v2057_v50 = vor.u32 %v2352_v47, %v2056_v44  ;;  %v2394_v42 = vld [vmem:[#allocation7 + $0x60] sm:$0xff]  ;;  %v2408_v44 = vld [vmem:[#allocation7 + $0xd0] sm:$0xff]  ;;  %v2393_v47 = vld [vmem:[#allocation7 + $0x58] sm:$0xff]  ;;  %s2662_s5 = scalar_lea.hbm %s2661_s21, 16  ;;  %p2667_p3 = scmp.lt.s32.totalorder %s2661_s21, %s3119_s7 }
 0x4c1   : > { %1260 = vmatpush.bf16.msra.mxu3 %v2141_v49  ;;  %v2058_v49 = vld [vmem:[#allocation5 + $0x10] sm:$0xf0]  ;;  %p2663_p0 = scmp.ne.s32.totalorder %s2661_s21, %s2662_s5  ;;  %p2668_p4 = scmp.lt.s32.totalorder %s2666_s29, %s2662_s5 }
 0x4c3   : > { %p2664_p1 = pnand %p2663_p0, %p2816_p5  ;;  %p2669_p7 = por %p2668_p4, %p2667_p3 }
 0x4c5   : > { %p2665_p2 = pneg %p2664_p1 }
 0x4c7   : > { %p2670_p8 = pnand %p2669_p7, %p2665_p2 }
 0x508   : > { %v895_v51 = vpop.permute.xlu2 %894 }
 0x510   : > { %v888_v52 = vpop.permute.xlu2 %887 }
 0x511   : > { %v905_v53 = vsel %vm603_vm0, %v881_v12, %v888_v52  ;;  %v999_v12 = vmul.f32 128.0, %v2530_v11  ;;  %v2146_v52 = vld [vmem:[#allocation5 + $0xb8] sm:$0xf0] }
 0x512   : > { %v908_v55 = vsel %vm906_vm2, %v905_v53, %v895_v51  ;;  %v2371_v51 = vld [vmem:[#allocation5 + $0xac] sm:$0xf] }
 0x513   : > { %v1000_v2 = vsub.f32 1.0, %v999_v12  ;;  %v2149_v53 = vor.u32 %v2371_v51, %v2146_v52  ;;  %v2104_v12 = vld [vmem:[#allocation5 + $0x60] sm:$0xf]  ;;  %v2061_v51 = vor.u32 %v2350_v48, %v2058_v49  ;;  %v2064_v52 = vld [vmem:[#allocation5 + $0x8] sm:$0xf] }
 0x514   : > { %v2399_v48 = vld [vmem:[#allocation7 + $0x88] sm:$0xff] }
 0x515   : > { %v1001_v3 = vmul.f32 %v2530_v11, %v1000_v2  ;;  %1288 = vmatpush.bf16.msra.mxu1 %v2149_v53  ;;  %v2364_v2 = vld [vmem:[#allocation5 + $0x6c] sm:$0xf0]  ;;  %v2353_v53 = vld [vmem:[#allocation5 + $0x14] sm:$0xf0]  ;;  %v2407_v49 = vld [vmem:[#allocation7 + $0xc8] sm:$0xff] }
 0x517   : > { %v1002_v32 = vadd.f32 %v2530_v11, %v1001_v3  ;;  %v2362_v3 = vld [vmem:[#allocation5 + $0x64] sm:$0xf] }
 0x518   : > { %v902_v54 = vpop.permute.xlu2 %901 }
 0x519   : > { %v911_v56 = vsel %vm909_vm3, %v908_v55, %v902_v54  ;;  %v2985_v4 = vsel %vm1003_vm4, %v2530_v11, %v1002_v32  ;;  %v2120_v54 = vld [vmem:[#allocation5 + $0x80] sm:$0xf]  ;;  %v2368_v55 = vld [vmem:[#allocation5 + $0x8c] sm:$0xf0]  ;;  %v2105_v32 = vor.u32 %v2364_v2, %v2104_v12 }
 0x51a   : > { %986 = vmatmul.bf16.vlgmr.msrb.gmra.mxu1 %v911_v56  ;;  %v2366_v56 = vld [vmem:[#allocation5 + $0x84] sm:$0xf] }
 0x597   : > { %v987_v58 = vpop.f32.mrf.mxu1 }
 0x598   : > { %v988_v59 = vadd.f32 %v987_v58, %v929_v57  ;;  %v2122_v58 = vld [vmem:[#allocation5 + $0x90] sm:$0xf0] }
 0x59a   : > { %v992_v60 = vadd.f32 %v988_v59, %v2874_v61  ;;  %v2128_v59 = vld [vmem:[#allocation5 + $0x88] sm:$0xf] }
 0x59c   : > { %994 = vadd.xlane.f32.xlu0 %v992_v60 }
 0x59f   : > { %v989_v63 = vpop.f32.mrf.mxu1 }
 0x5a0   : > { %v990_v0 = vadd.f32 %v989_v63, %v929_v57  ;;  %v2121_v57 = vor.u32 %v2368_v55, %v2120_v54  ;;  %v2125_v63 = vor.u32 %v2366_v56, %v2122_v58  ;;  %v2351_v54 = vld [vmem:[#allocation5 + $0xc] sm:$0xf]  ;;  %v2065_v56 = vor.u32 %v2353_v53, %v2064_v52  ;;  %v2384_v52 = vld [vmem:[#allocation7 + $0x10] sm:$0xff] }
 0x5a1   : > { %v2392_v53 = vld [vmem:[#allocation7 + $0x50] sm:$0xff] }
 0x5a2   : > { %v993_v1 = vadd.f32 %v990_v0, %v2876_v62  ;;  %1247 = vmatpush.bf16.msrb.mxu2 %v2121_v57  ;;  %1261 = vmatpush.bf16.msra.mxu3 %v2125_v63  ;;  %v2066_v57 = vld [vmem:[#allocation5 + $0x18] sm:$0xf0] }
 0x5a3   : > { %v2069_v58 = vor.u32 %v2351_v54, %v2066_v57  ;;  %v2406_v57 = vld [vmem:[#allocation7 + $0xc0] sm:$0xff] }
 0x5a4   : > { %996 = vadd.xlane.f32.xlu1 %v993_v1 }
 0x5a6   : > { %1248 = vmatpush.bf16.msrb.mxu2 %v2105_v32 }
 0x5aa   : > { %1249 = vmatpush.bf16.msrb.mxu2 %v2089_v22 }
 0x5ae   : > { %1250 = vmatpush.bf16.msrb.mxu2 %v2073_v35  ;;  %v2402_v35 = vld [vmem:[#allocation7 + $0xa0] sm:$0xff] }
 0x5b2   : > { %1251 = vmatpush.bf16.msrb.mxu2 %v2057_v50  ;;  %v1082_v50 = vperm.slane %v2897_v25, 4  ;;  %v2383_v25 = vld [vmem:[#allocation7 + $0x8] sm:$0xff] }
 0x5b6   : > { %1633 = vmatpush.bf16.msra.mxu2 %v2389_v28 }
 0x5ba   : > { %1634 = vmatpush.bf16.msra.mxu2 %v2388_v33 }
 0x5be   : > { %1635 = vmatpush.bf16.msra.mxu2 %v2387_v37 }
 0x60f   : > { %v995_v5 = vpop.xlane.xlu0 %994 }
 0x610   : > { %v1005_v6 = vmul.f32 %v2985_v4, %v995_v5  ;;  %v2106_v5 = vld [vmem:[#allocation5 + $0x70] sm:$0xf0] }
 0x612   : > { %v2988_v61 = vsub.f32 %v992_v60, %v1005_v6  ;;  %v2369_v60 = vld [vmem:[#allocation5 + $0x94] sm:$0xf0]  ;;  %v2112_v6 = vld [vmem:[#allocation5 + $0x68] sm:$0xf] }
 0x613   : > { %v2129_v0 = vor.u32 %v2369_v60, %v2128_v59 }
 0x614   : > { %v1009_v7 = vmul.f32 %v2988_v61, %v2988_v61 }
 0x615   : > { %1275 = vmatpush.bf16.msrb.mxu0 %v2129_v0 }
 0x616   : > { %1011 = vadd.xlane.f32.xlu2 %v1009_v7  ;;  %v2365_v7 = vld [vmem:[#allocation5 + $0x74] sm:$0xf0] }
 0x617   : > { %v997_v62 = vpop.xlane.xlu1 %996 }
 0x618   : > { %v1006_v8 = vmul.f32 %v2985_v4, %v997_v62  ;;  %v2109_v62 = vor.u32 %v2362_v3, %v2106_v5 }
 0x61a   : > { %v2993_v9 = vsub.f32 %v993_v1, %v1006_v8  ;;  %v2367_v1 = vld [vmem:[#allocation5 + $0x8c] sm:$0xf]  ;;  %v2113_v8 = vor.u32 %v2365_v7, %v2112_v6  ;;  %1262 = vmatpush.bf16.msra.mxu3 %v2109_v62 }
 0x61b   : > { %v2133_v11 = vor.u32 %v2367_v1, %v2130_v10 }
 0x61c   : > { %v1010_v16 = vmul.f32 %v2993_v9, %v2993_v9  ;;  %1276 = vmatpush.bf16.msrb.mxu0 %v2113_v8 }
 0x61d   : > { %1289 = vmatpush.bf16.msra.mxu1 %v2133_v11 }
 0x61e   : > { %1013 = vadd.xlane.f32.xlu0 %v1010_v16  ;;  %v2363_v16 = vld [vmem:[#allocation5 + $0x6c] sm:$0xf]  ;;  %1263 = vmatpush.bf16.msra.mxu3 %v2093_v26  ;;  %v2413_v26 = vld [vmem:[#allocation7 + $0xf8] sm:$0xff] }
 0x61f   : > { %v2117_v18 = vor.u32 %v2363_v16, %v2114_v17  ;;  %v1041_v16 = vperm.slane %v2889_v15, 2 }
 0x620   : > { %1277 = vmatpush.bf16.msrb.mxu0 %v2097_v27  ;;  %v2412_v27 = vld [vmem:[#allocation7 + $0xf0] sm:$0xff] }
 0x621   : > { %1290 = vmatpush.bf16.msra.mxu1 %v2117_v18 }
 0x622   : > { %1264 = vmatpush.bf16.msra.mxu3 %v2077_v40  ;;  %v2409_v40 = vld [vmem:[#allocation7 + $0xd8] sm:$0xff] }
 0x624   : > { %1278 = vmatpush.bf16.msrb.mxu0 %v2081_v41  ;;  %v2386_v41 = vld [vmem:[#allocation7 + $0x20] sm:$0xff] }
 0x625   : > { %1291 = vmatpush.bf16.msra.mxu1 %v2101_v30  ;;  %v2403_v30 = vld [vmem:[#allocation7 + $0xa8] sm:$0xff]  ;;  %1636 = vmatpush.bf16.msra.mxu2 %v2386_v41 }
 0x626   : > { %1265 = vmatpush.bf16.msra.mxu3 %v2061_v51 }
 0x628   : > { %1279 = vmatpush.bf16.msrb.mxu0 %v2065_v56  ;;  %v2398_v56 = vld [vmem:[#allocation7 + $0x80] sm:$0xff] }
 0x629   : > { %1292 = vmatpush.bf16.msra.mxu1 %v2085_v46  ;;  %v2385_v46 = vld [vmem:[#allocation7 + $0x18] sm:$0xff] }
 0x62a   : > { %1647 = vmatpush.bf16.msrb.mxu3 %v2397_v29  ;;  %1637 = vmatpush.bf16.msra.mxu2 %v2385_v46 }
 0x62d   : > { %1293 = vmatpush.bf16.msra.mxu1 %v2069_v58 }
 0x62e   : > { %1648 = vmatpush.bf16.msrb.mxu3 %v2396_v34  ;;  %1638 = vmatpush.bf16.msra.mxu2 %v2384_v52 }
 0x631   : > { %1675 = vmatpush.bf16.msrb.mxu1 %v2413_v26 }
 0x632   : > { %1649 = vmatpush.bf16.msrb.mxu3 %v2395_v38  ;;  %1639 = vmatpush.bf16.msra.mxu2 %v2383_v25 }
 0x635   : > { %1676 = vmatpush.bf16.msrb.mxu1 %v2412_v27 }
 0x636   : > { %1650 = vmatpush.bf16.msrb.mxu3 %v2394_v42 }
 0x639   : > { %1677 = vmatpush.bf16.msrb.mxu1 %v2411_v31 }
 0x63a   : > { %1651 = vmatpush.bf16.msrb.mxu3 %v2393_v47 }
 0x63d   : > { %1678 = vmatpush.bf16.msrb.mxu1 %v2410_v36 }
 0x63e   : > { %1652 = vmatpush.bf16.msrb.mxu3 %v2392_v53 }
 0x641   : > { %1679 = vmatpush.bf16.msrb.mxu1 %v2409_v40 }
 0x645   : > { %1680 = vmatpush.bf16.msrb.mxu1 %v2408_v44 }
 0x649   : > { %1681 = vmatpush.bf16.msrb.mxu1 %v2407_v49 }
 0x64d   : > { %1682 = vmatpush.bf16.msrb.mxu1 %v2406_v57 }
 0x689   : > { %v1012_v39 = vpop.xlane.xlu2 %1011 }
 0x68a   : > { %v1015_v45 = vmul.f32 %v1012_v39, %v2985_v4  ;;  %v2401_v39 = vld [vmem:[#allocation7 + $0x98] sm:$0xff] }
 0x68c   : > { %v1017_v55 = vadd.f32 1e-12, %v1015_v45  ;;  %v393_v45 = vld [vmem:[%s3115_s3 + $0x18] sm:$0xff] }
 0x68d   : > { %v1083_v51 = vperm.slane %v393_v45, 4 }
 0x68e   : > { %2531 = vrsqrt.f32 %v1017_v55  ;;  %vm1025_vm6 = vweird.f32 %v1017_v55 }
 0x691   : > { %v1014_v59 = vpop.xlane.xlu0 %1013 }
 0x692   : > { %v1016_v60 = vmul.f32 %v1014_v59, %v2985_v4 }
 0x694   : > { %v2532_v63 = vpop.eup %2531  ;;  %v1018_v0 = vadd.f32 1e-12, %v1016_v60  ;;  %v1080_v60 = vperm.slane %v2889_v15, 4 }
 0x695   : > { %v1020_v1 = vmul.f32 %v2532_v63, %v1017_v55  ;;  %vm1026_vm5 = vweird.f32 %v2532_v63 }
 0x696   : > { %2533 = vrsqrt.f32 %v1018_v0  ;;  %vm1027_vm7 = vmor %vm1025_vm6, %vm1026_vm5  ;;  %vm1035_vm9 = vweird.f32 %v1018_v0 }
 0x697   : > { %v1021_v10 = vmul.f32 %v2532_v63, %v1020_v1 }
 0x699   : > { %v1022_v11 = vmul.f32 0.5, %v1021_v10 }
 0x69b   : > { %v1023_v12 = vsub.f32 1.5, %v1022_v11 }
 0x69c   : > { %v2534_v2 = vpop.eup %2533 }
 0x69d   : > { %v1024_v3 = vmul.f32 %v2532_v63, %v1023_v12  ;;  %v1030_v32 = vmul.f32 %v2534_v2, %v1018_v0  ;;  %vm1036_vm8 = vweird.f32 %v2534_v2  ;;  %v2391_v0 = vld [vmem:[#allocation7 + $0x48] sm:$0xff] }
 0x69e   : > { %vm1037_vm10 = vmor %vm1035_vm9, %vm1036_vm8  ;;  %1653 = vmatpush.bf16.msrb.mxu3 %v2391_v0 }
 0x69f   : > { %v1031_v5 = vmul.f32 %v2534_v2, %v1030_v32  ;;  %v1028_v6 = vsel %vm1027_vm7, %v2532_v63, %v1024_v3  ;;  %v1081_v63 = vperm.slane %v2883_v13, 4  ;;  %v2382_v32 = vld [vmem:[#allocation7] sm:$0xff] }
 0x6a0   : > { %v1039_v8 = vmul.f32 %v1028_v6, %v2988_v61  ;;  %v2405_v61 = vld [vmem:[#allocation7 + $0xb8] sm:$0xff]  ;;  %1640 = vmatpush.bf16.msra.mxu2 %v2382_v32 }
 0x6a1   : > { %v1032_v7 = vmul.f32 0.5, %v1031_v5  ;;  %1661 = vmatpush.bf16.msra.mxu0 %v2405_v61  ;;  %v2390_v5 = vld [vmem:[#allocation7 + $0x40] sm:$0xff] }
 0x6a2   : > { %v1042_v20 = vmul.f32 %v1041_v16, %v1039_v8  ;;  %1654 = vmatpush.bf16.msrb.mxu3 %v2390_v5 }
 0x6a3   : > { %v1033_v62 = vsub.f32 1.5, %v1032_v7 }
 0x6a4   : > { %v3003_v23 = vadd.f32 %v1044_v21, %v1042_v20 }
 0x6a5   : > { %v1034_v17 = vmul.f32 %v2534_v2, %v1033_v62 }
 0x6a7   : > { %v1038_v18 = vsel %vm1037_vm10, %v2534_v2, %v1034_v17 }
 0x6a8   : > { %v1040_v19 = vmul.f32 %v1038_v18, %v2993_v9  ;;  %v2404_v9 = vld [vmem:[#allocation7 + $0xb0] sm:$0xff] }
 0x6a9   : > { %1662 = vmatpush.bf16.msra.mxu0 %v2404_v9 }
 0x6aa   : > { %v1043_v22 = vmul.f32 %v1041_v16, %v1040_v19 }
 0x6ac   : > { %v3005_v24 = vadd.f32 %v1044_v21, %v1043_v22 }
 0x6ad   : > { %1663 = vmatpush.bf16.msra.mxu0 %v2403_v30 }
 0x6ae   : > { %v1047_v14 = vpack.c.bf16 %v3005_v24, %v3003_v23 }
 0x6b0   : > { %1252 = vmatmul.bf16.vlgmr.msrb.gmra.mxu2 %v1047_v14  ;;  %1266 = vmatmul.bf16.vlgmr.msra.gmra.mxu3 %v1047_v14 }
 0x6b1   : > { %1280 = vmatmul.bf16.vlgmr.msrb.gmra.mxu0 %v1047_v14  ;;  %1294 = vmatmul.bf16.vlgmr.msra.gmra.mxu1 %v1047_v14 }
 0x6b2   : > { %1664 = vmatpush.bf16.msra.mxu0 %v2402_v35 }
 0x6b6   : > { %1665 = vmatpush.bf16.msra.mxu0 %v2401_v39 }
 0x6ba   : > { %1666 = vmatpush.bf16.msra.mxu0 %v2400_v43 }
 0x6be   : > { %1667 = vmatpush.bf16.msra.mxu0 %v2399_v48 }
 0x6c2   : > { %1668 = vmatpush.bf16.msra.mxu0 %v2398_v56 }
 0x72e   : > { %v1281_v54 = vpop.f32.mrf.mxu0  ;;  %v1295_v55 = vpop.f32.mrf.mxu1 }
 0x72f   : > { %v3013_v58 = vadd.f32 %v1281_v54, %v1082_v50  ;;  %v3015_v59 = vadd.f32 %v1295_v55, %v1083_v51 }
 0x731   : > { %v1302_v1 = vmul.f32 %v3013_v58, %v3013_v58  ;;  %v1303_v10 = vmul.f32 %v3015_v59, %v3015_v59 }
 0x733   : > { %v1310_v11 = vmul.f32 %v1302_v1, %v3013_v58  ;;  %v1311_v12 = vmul.f32 %v1303_v10, %v3015_v59  ;;  %v1253_v2 = vpop.f32.mrf.mxu2  ;;  %v1267_v15 = vpop.f32.mrf.mxu3 }
 0x734   : > { %v3025_v3 = vadd.f32 %v1253_v2, %v1080_v60  ;;  %v3027_v13 = vadd.f32 %v1267_v15, %v1081_v63 }
 0x735   : > { %v1318_v6 = vmul.f32 0.044715, %v1310_v11  ;;  %v1319_v7 = vmul.f32 0.044715, %v1311_v12 }
 0x736   : > { %v1300_v62 = vmul.f32 %v3025_v3, %v3025_v3  ;;  %v1301_v8 = vmul.f32 %v3027_v13, %v3027_v13  ;;  %v1283_v16 = vpop.f32.mrf.mxu0  ;;  %v1297_v17 = vpop.f32.mrf.mxu1 }
 0x737   : > { %v1326_v18 = vadd.f32 %v1318_v6, %v3013_v58  ;;  %v1327_v19 = vadd.f32 %v1319_v7, %v3015_v59  ;;  %v1284_v20 = vadd.f32 %v1283_v16, %v1082_v50  ;;  %v3035_v21 = vadd.f32 %v1297_v17, %v1083_v51 }
 0x738   : > { %v1308_v22 = vmul.f32 %v1300_v62, %v3025_v3  ;;  %v1309_v14 = vmul.f32 %v1301_v8, %v3027_v13 }
 0x739   : > { %v1334_v61 = vmul.f32 0.7978846, %v1326_v18  ;;  %v1306_v26 = vmul.f32 %v1284_v20, %v1284_v20  ;;  %v1307_v9 = vmul.f32 %v3035_v21, %v3035_v21  ;;  %v1335_v27 = vmul.f32 0.7978846, %v1327_v19 }
 0x73a   : > { %v1316_v28 = vmul.f32 0.044715, %v1308_v22  ;;  %v1317_v29 = vmul.f32 0.044715, %v1309_v14 }
 0x73b   : > { %v1314_v30 = vmul.f32 %v1306_v26, %v1284_v20  ;;  %v1315_v31 = vmul.f32 %v1307_v9, %v3035_v21  ;;  %v1255_v33 = vpop.f32.mrf.mxu2  ;;  %v1269_v34 = vpop.f32.mrf.mxu3  ;;  %2535 = vtanh.f32 %v1334_v61 }
 0x73c   : > { %v1324_v35 = vadd.f32 %v1316_v28, %v3025_v3  ;;  %v1325_v36 = vadd.f32 %v1317_v29, %v3027_v13  ;;  %v1256_v37 = vadd.f32 %v1255_v33, %v1080_v60  ;;  %v1270_v40 = vadd.f32 %v1269_v34, %v1081_v63 }
 0x73d   : > { %v1322_v38 = vmul.f32 0.044715, %v1314_v30  ;;  %v1323_v39 = vmul.f32 0.044715, %v1315_v31  ;;  %2537 = vtanh.f32 %v1335_v27 }
 0x73e   : > { %v1332_v41 = vmul.f32 0.7978846, %v1324_v35  ;;  %v1333_v42 = vmul.f32 0.7978846, %v1325_v36  ;;  %v1304_v43 = vmul.f32 %v1256_v37, %v1256_v37  ;;  %v1305_v46 = vmul.f32 %v1270_v40, %v1270_v40 }
 0x73f   : > { %v1330_v44 = vadd.f32 %v1322_v38, %v1284_v20  ;;  %v1331_v45 = vadd.f32 %v1323_v39, %v3035_v21 }
 0x740   : > { %v1312_v47 = vmul.f32 %v1304_v43, %v1256_v37  ;;  %2539 = vtanh.f32 %v1332_v41  ;;  %v1313_v50 = vmul.f32 %v1305_v46, %v1270_v40 }
 0x741   : > { %v1338_v48 = vmul.f32 0.7978846, %v1330_v44  ;;  %v1339_v49 = vmul.f32 0.7978846, %v1331_v45  ;;  %2541 = vtanh.f32 %v1333_v42  ;;  %v2536_v52 = vpop.eup %2535 }
 0x742   : > { %v1320_v51 = vmul.f32 0.044715, %v1312_v47  ;;  %v1321_v53 = vmul.f32 0.044715, %v1313_v50  ;;  %v1350_v57 = vadd.f32 1.0, %v2536_v52 }
 0x743   : > { %2543 = vtanh.f32 %v1338_v48  ;;  %v2538_v54 = vpop.eup %2537 }
 0x744   : > { %2545 = vtanh.f32 %v1339_v49  ;;  %v1328_v55 = vadd.f32 %v1320_v51, %v1256_v37  ;;  %v1329_v56 = vadd.f32 %v1321_v53, %v1270_v40  ;;  %v1351_v25 = vadd.f32 1.0, %v2538_v54 }
 0x745   : > { %v1358_v12 = vmul.f32 0.5, %v1350_v57 }
 0x746   : > { %v1336_v60 = vmul.f32 0.7978846, %v1328_v55  ;;  %v2540_v63 = vpop.eup %2539  ;;  %v1337_v0 = vmul.f32 0.7978846, %v1329_v56  ;;  %v1359_v15 = vmul.f32 0.5, %v1351_v25 }
 0x747   : > { %v2542_v1 = vpop.eup %2541  ;;  %v1348_v32 = vadd.f32 1.0, %v2540_v63  ;;  %v1366_v16 = vmul.f32 %v1358_v12, %v3013_v58 }
 0x748   : > { %2547 = vtanh.f32 %v1336_v60  ;;  %v1349_v6 = vadd.f32 1.0, %v2542_v1  ;;  %v1367_v19 = vmul.f32 %v1359_v15, %v3015_v59 }
 0x749   : > { %v2544_v10 = vpop.eup %2543  ;;  %2549 = vtanh.f32 %v1337_v0  ;;  %v1356_v22 = vmul.f32 0.5, %v1348_v32 }
 0x74a   : > { %v2546_v11 = vpop.eup %2545  ;;  %v1354_v2 = vadd.f32 1.0, %v2544_v10  ;;  %v1357_v26 = vmul.f32 0.5, %v1349_v6 }
 0x74b   : > { %v1355_v5 = vadd.f32 1.0, %v2546_v11  ;;  %v1364_v31 = vmul.f32 %v1356_v22, %v3025_v3  ;;  %v1739_v22 = vld [vmem:[%s381_s11] sm:$0xff] }
 0x74c   : > { %v1362_v7 = vmul.f32 0.5, %v1354_v2  ;;  %v1365_v58 = vmul.f32 %v1357_v26, %v3027_v13 }
 0x74d   : > { %v1363_v62 = vmul.f32 0.5, %v1355_v5 }
 0x74e   : > { %v2548_v8 = vpop.eup %2547  ;;  %v1370_v17 = vmul.f32 %v1362_v7, %v1284_v20 }
 0x74f   : > { %v2550_v18 = vpop.eup %2549  ;;  %v1371_v14 = vmul.f32 %v1363_v62, %v3035_v21  ;;  %v1352_v61 = vadd.f32 1.0, %v2548_v8  ;;  %v3053_v21 = vld [vmem:[%s3115_s3] sm:$0xff] }
 0x750   : > { %v1353_v9 = vadd.f32 1.0, %v2550_v18  ;;  %v1374_v27 = vpack.c.bf16 %v1370_v17, %v1366_v16  ;;  %v1440_v35 = vperm.slane %v3053_v21, 5  ;;  %v1731_v62 = vperm.slane %v3053_v21, 6 }
 0x751   : > { %v1360_v28 = vmul.f32 0.5, %v1352_v61  ;;  %v1375_v29 = vpack.c.bf16 %v1371_v14, %v1367_v19  ;;  %v1734_v16 = vperm.slane %v3053_v21, 7 }
 0x752   : > { %v1361_v30 = vmul.f32 0.5, %v1353_v9  ;;  %1669 = vmatmul.bf16.vlgmr.msra.gmra.mxu0 %v1374_v27  ;;  %v1740_v27 = vld [vmem:[%s381_s11 + $0x8] sm:$0xff] }
 0x753   : > { %v1368_v33 = vmul.f32 %v1360_v28, %v1256_v37  ;;  %1683 = vmatmul.bf16.vlgmr.msrb.gmra.mxu1 %v1375_v29 }
 0x754   : > { %v1369_v20 = vmul.f32 %v1361_v30, %v1270_v40 }
 0x755   : > { %v1372_v34 = vpack.c.bf16 %v1368_v33, %v1364_v31 }
 0x756   : > { %v1373_v59 = vpack.c.bf16 %v1369_v20, %v1365_v58 }
 0x757   : > { %1641 = vmatmul.bf16.vlgmr.msra.gmra.mxu2 %v1372_v34 }
 0x758   : > { %1655 = vmatmul.bf16.vlgmr.msrb.gmra.mxu3 %v1373_v59 }
 0x7cf   : > { %v1670_v3 = vpop.f32.mrf.mxu0 }
 0x7d0   : > { %v1684_v41 = vpop.f32.mrf.mxu1 }
 0x7d7   : > { %v1672_v47 = vpop.f32.mrf.mxu0 }
 0x7d8   : > { %v1686_v49 = vpop.f32.mrf.mxu1 }
 0x7da   : > { %v1642_v36 = vpop.f32.mrf.mxu2 }
 0x7db   : > { %v1643_v38 = vadd.f32 %v1642_v36, %v1440_v35  ;;  %v1656_v39 = vpop.f32.mrf.mxu3 }
 0x7dd   : > { %v1657_v37 = vadd.f32 %v1656_v39, %v1643_v38 }
 0x7df   : > { %v1671_v42 = vadd.f32 %v1670_v3, %v1657_v37 }
 0x7e1   : > { %v1685_v13 = vadd.f32 %v1684_v41, %v1671_v42 }
 0x7e2   : > { %v1644_v40 = vpop.f32.mrf.mxu2 }
 0x7e3   : > { %v1645_v43 = vadd.f32 %v1644_v40, %v1440_v35  ;;  %v1689_v44 = vadd.f32 %v1685_v13, %v3003_v23  ;;  %v1658_v45 = vpop.f32.mrf.mxu3 }
 0x7e5   : > { %v1659_v46 = vadd.f32 %v1658_v45, %v1645_v43  ;;  %1691 = vadd.xlane.f32.xlu1 %v1689_v44 }
 0x7e7   : > { %v1673_v48 = vadd.f32 %v1672_v47, %v1659_v46 }
 0x7e9   : > { %v1687_v50 = vadd.f32 %v1686_v49, %v1673_v48 }
 0x7eb   : > { %v1690_v51 = vadd.f32 %v1687_v50, %v3005_v24 }
 0x7ed   : > { %1693 = vadd.xlane.f32.xlu2 %v1690_v51 }
 0x858   : > { %v1692_v52 = vpop.xlane.xlu1 %1691 }
 0x859   : > { %v1695_v53 = vmul.f32 %v1692_v52, %v2985_v4 }
 0x85b   : > { %v1697_v54 = vsub.f32 %v1689_v44, %v1695_v53 }
 0x85d   : > { %v1699_v55 = vmul.f32 %v1697_v54, %v1697_v54 }
 0x85f   : > { %1701 = vadd.xlane.f32.xlu0 %v1699_v55 }
 0x860   : > { %v1694_v56 = vpop.xlane.xlu2 %1693 }
 0x861   : > { %v1696_v57 = vmul.f32 %v1694_v56, %v2985_v4 }
 0x863   : > { %v1698_v23 = vsub.f32 %v1690_v51, %v1696_v57 }
 0x865   : > { %v1700_v60 = vmul.f32 %v1698_v23, %v1698_v23 }
 0x867   : > { %1703 = vadd.xlane.f32.xlu1 %v1700_v60 }
 0x8d2   : > { %v1702_v63 = vpop.xlane.xlu0 %1701 }
 0x8d3   : > { %v1705_v25 = vmul.f32 %v1702_v63, %v2985_v4 }
 0x8d5   : > { %v1707_v0 = vadd.f32 1e-12, %v1705_v25 }
 0x8d7   : > { %2551 = vrsqrt.f32 %v1707_v0  ;;  %vm1715_vm12 = vweird.f32 %v1707_v0 }
 0x8da   : > { %v1704_v24 = vpop.xlane.xlu1 %1703 }
 0x8db   : > { %v1706_v1 = vmul.f32 %v1704_v24, %v2985_v4 }
 0x8dd   : > { %v2552_v10 = vpop.eup %2551  ;;  %v1708_v11 = vadd.f32 1e-12, %v1706_v1 }
 0x8de   : > { %v1710_v12 = vmul.f32 %v2552_v10, %v1707_v0  ;;  %vm1716_vm11 = vweird.f32 %v2552_v10 }
 0x8df   : > { %2553 = vrsqrt.f32 %v1708_v11  ;;  %vm1717_vm13 = vmor %vm1715_vm12, %vm1716_vm11  ;;  %vm1725_vm15 = vweird.f32 %v1708_v11 }
 0x8e0   : > { %v1711_v2 = vmul.f32 %v2552_v10, %v1710_v12 }
 0x8e2   : > { %v1712_v15 = vmul.f32 0.5, %v1711_v2 }
 0x8e4   : > { %v1713_v32 = vsub.f32 1.5, %v1712_v15 }
 0x8e5   : > { %v2554_v5 = vpop.eup %2553 }
 0x8e6   : > { %v1714_v6 = vmul.f32 %v2552_v10, %v1713_v32  ;;  %v1720_v7 = vmul.f32 %v2554_v5, %v1708_v11  ;;  %vm1726_vm14 = vweird.f32 %v2554_v5 }
 0x8e7   : > { %vm1727_vm0 = vmor %vm1725_vm15, %vm1726_vm14 }
 0x8e8   : > { %v1718_v4 = vsel %vm1717_vm13, %v2552_v10, %v1714_v6  ;;  %v1721_v8 = vmul.f32 %v2554_v5, %v1720_v7 }
 0x8e9   : > { %v1729_v17 = vmul.f32 %v1718_v4, %v1697_v54 }
 0x8ea   : > { %v1722_v18 = vmul.f32 0.5, %v1721_v8 }
 0x8eb   : > { %v1732_v19 = vmul.f32 %v1731_v62, %v1729_v17 }
 0x8ec   : > { %v1723_v14 = vsub.f32 1.5, %v1722_v18 }
 0x8ed   : > { %v1735_v61 = vadd.f32 %v1734_v16, %v1732_v19 }
 0x8ee   : > { %v1724_v26 = vmul.f32 %v2554_v5, %v1723_v14 }
 0x8ef   : > { %v1741_v9 = vadd.f32 %v1739_v22, %v1735_v61  ;;  %1737 = vst [vmem:[%s364_s10] sm:$0xff] %v1735_v61 }
 0x8f0   : > { %v1728_v28 = vsel %vm1727_vm0, %v2554_v5, %v1724_v26 }
 0x8f1   : > { %v1743_v29 = vmul.f32 0.33333334, %v1741_v9  ;;  %v1730_v30 = vmul.f32 %v1728_v28, %v1698_v23 }
 0x8f3   : > { %1745 = vst [vmem:[%s3079_s18] sm:$0xff] %v1743_v29  ;;  %v1733_v31 = vmul.f32 %v1731_v62, %v1730_v30 }
 0x8f5   : > { %v1736_v33 = vadd.f32 %v1734_v16, %v1733_v31 }
 0x8f7   : > { %v1742_v58 = vadd.f32 %v1740_v27, %v1736_v33  ;;  %1738 = vst [vmem:[%s364_s10 + $0x8] sm:$0xff] %v1736_v33 }
 0x8f8   : > { %2673 = shalt.err (!%p2670_p8)
}
 0x8f9   : > { %s2731_s25 = smov 128   ;;  %s2732_s17 = smov 8   ;;  %v1744_v20 = vmul.f32 0.33333334, %v1742_v58 }
 0x8fa   : > { %2427 = dma.vmem_to_hbm [thread:$0]  (%p2816_p5), %s1766_s9, 256, %s1768_s26, %s1748_s19, %s2731_s25, %s2731_s25, %s2732_s17  }
 0x8fb   : > { %1746 = vst [vmem:[%s3079_s18 + $0x8] sm:$0xff] %v1744_v20 }
 0x8fc PF: > { %p2449_p9 = scmp.ge.s32.totalorder %s2716_s30, 2  ;;  %s1785_s20 = sand.u32 1, %s2704_s27  }
 0x8fd   : > { %s1786_s22 = scalar_lea.sflag [#allocation4], %s1785_s20 }
 0x8fe   : > { %p2440_p10 = pnand %p2449_p9, %p2820_p6 }
 0x900   : > { %p2441_p11 = pneg %p2440_p10 }
 0x902   : > { %2699 = dma.done.wait (%p2441_p11), %s1786_s22, 256  }
 0x903   : > { %2701 = vsyncadd (%p2441_p11), %s1786_s22, 4294967040  ;;  %s3135_s30 = sld [smem:[#allocation13_spill]]  ;;  %s3138_s27 = smov %s2708_s28 }
 0x904   : > { %s3136_s23 = sld [smem:[#allocation12_spill]] }
 0x905   : > { %s3137_s29 = sld [smem:[#allocation14_spill]] }
 0x909   : > { %p21_p5 = scmp.ge.s32.totalorder %s3135_s30, 4  }
 0x90a   : > { %s3139_s28 = smov %s3136_s23 }
 0x90b   :  { %23 = sbr.rel (!%p21_p5) target bundleno = 8 (0x8), region = 111 }
 0x910   :  { %1800 = vsyncpa [#allocation3], 1 }
 0x911   :  { %1802 = vsyncpa [#allocation3 + $0x1], 1 }
 0x912   :  { %1803 = vsyncpa [#allocation6], 1 }
 0x913   :  { %1804 = vsyncpa [#allocation4], 1 }
 0x914   :  { %1806 = vsyncpa [#allocation4 + $0x1], 1 }

</bundles_post_ra>
